<compile_context>
chip_gen: v7x
topology: tpu7x:2x2x1
jax: 0.10.0
libtpu: 0.0.40
codegen_flags: <defaults>
</compile_context>

<pallas_src>
import functools
from math import sqrt

import jax
import jax.numpy as jnp
from jax.experimental import pallas as pl
from jax.experimental.pallas import tpu as pltpu

LEAKY_SLOPE = 0.2
H = W = 4          # step=0 resolution
HW = H * W


def _lrelu(y, slope):
    return jnp.where(y >= 0.0, y, slope * y)


def _detect_num_tensorcores():
    """2 for megacore chips (v7x, v4, v5p), else 1 (v5e, v6e)."""
    try:
        kind = jax.devices()[0].device_kind.lower()
    except Exception:
        return 1
    if "v7" in kind or "v4" in kind or "v5p" in kind:
        return 2
    return 1


# ---------------------------------------------------------------------------
# Kernel 1: from_rgb (1x1 conv, K=4) + bias + LeakyReLU + minibatch-stddev
#           channel, fused into one (B*HW, 513) bf16 output.
# ---------------------------------------------------------------------------
def _from_rgb_std_kernel(x_ref, w_ref, b_ref, o_ref, *, scale, slope, batch, hw):
    n = w_ref.shape[1]
    y = jnp.dot(x_ref[...], w_ref[...], preferred_element_type=jnp.float32)
    y = _lrelu(y * scale + b_ref[...], slope)                # (batch*hw, n) f32
    m = y.shape[0]

    # minibatch stddev: var over batch at each (h, w, c), sqrt, mean -> scalar.
    yb = y.reshape(batch, hw, n)
    mean = jnp.mean(yb, axis=0)
    var = jnp.mean((yb - mean) ** 2, axis=0)                 # unbiased=False
    std = jnp.sqrt(var + 1e-8)
    mstd = jnp.mean(std)

    o_ref[:, 0:n] = y.astype(o_ref.dtype)
    o_ref[:, n:n + 1] = jnp.broadcast_to(mstd, (m, 1)).astype(o_ref.dtype)


def from_rgb_with_std(xm, w, b, *, scale, batch, hw):
    M = xm.shape[0]
    N = w.shape[1]
    kernel = functools.partial(_from_rgb_std_kernel, scale=scale,
                               slope=LEAKY_SLOPE, batch=batch, hw=hw)
    return pl.pallas_call(
        kernel,
        out_shape=jax.ShapeDtypeStruct((M, N + 1), jnp.bfloat16),
    )(xm, w, b)


# ---------------------------------------------------------------------------
# Kernel 2: conv1 as single-K-block matmul + scale + bias + LeakyReLU.
#           grid=(n_split,), "parallel" so v7x streams half of w1 per TC.
# ---------------------------------------------------------------------------
def _conv1_kernel(x_ref, w_ref, b_ref, o_ref, *, scale, slope):
    y = jnp.dot(x_ref[...], w_ref[...], preferred_element_type=jnp.float32)
    o_ref[...] = _lrelu(y * scale + b_ref[...], slope).astype(o_ref.dtype)


def conv1_matmul(cols, w, b, *, scale, n_split):
    M, Kp = cols.shape
    _, N = w.shape
    tn = N // n_split
    kernel = functools.partial(_conv1_kernel, scale=scale, slope=LEAKY_SLOPE)
    flops = 2 * M * Kp * N
    bytes_accessed = (cols.size * cols.dtype.itemsize * n_split
                      + w.size * w.dtype.itemsize + N * 4 + M * N * 2)
    return pl.pallas_call(
        kernel,
        out_shape=jax.ShapeDtypeStruct((M, N), jnp.bfloat16),
        grid_spec=pltpu.PrefetchScalarGridSpec(
            num_scalar_prefetch=0,
            grid=(n_split,),
            in_specs=[
                pl.BlockSpec((M, Kp), lambda j: (0, 0)),
                pl.BlockSpec((Kp, tn), lambda j: (0, j)),
                pl.BlockSpec((1, tn), lambda j: (0, j)),
            ],
            out_specs=pl.BlockSpec((M, tn), lambda j: (0, j)),
        ),
        compiler_params=pltpu.CompilerParams(
            dimension_semantics=("parallel",),
            vmem_limit_bytes=32 * 1024 * 1024),
        cost_estimate=pl.CostEstimate(flops=flops, transcendentals=0,
                                      bytes_accessed=bytes_accessed),
    )(cols, w, b)


# ---------------------------------------------------------------------------
# Kernel 3: conv2 4x4 valid (as K-tiled matmul) + scale + bias + LeakyReLU,
#           parallel N-split (leading axis), f32 accumulation in the resident
#           output block.  Output is the lane-dense (Mp, 512) activation.
# ---------------------------------------------------------------------------
def _conv2_kernel(x_ref, w_ref, b_ref, o_ref, *, nk, scale, slope):
    k = pl.program_id(1)

    @pl.when(k == 0)
    def _():
        o_ref[...] = jnp.zeros_like(o_ref)

    o_ref[...] += jnp.dot(x_ref[...], w_ref[...],
                          preferred_element_type=jnp.float32)

    @pl.when(k == nk - 1)
    def _():
        o_ref[...] = _lrelu(o_ref[...] * scale + b_ref[...], slope)


def conv2_matmul(x, w, b, *, scale, n_split):
    Mp, Kp = x.shape
    _, N = w.shape
    tn = N // n_split
    tk = 4096 // n_split          # K=8192 divides exactly: nk = 2 (1 TC) / 4 (2 TC)
    nk = Kp // tk
    kernel = functools.partial(_conv2_kernel, nk=nk, scale=scale,
                               slope=LEAKY_SLOPE)
    flops = 2 * Mp * Kp * N
    bytes_accessed = (x.size * x.dtype.itemsize * n_split
                      + w.size * w.dtype.itemsize + N * 4 + Mp * N * 4)
    return pl.pallas_call(
        kernel,
        out_shape=jax.ShapeDtypeStruct((Mp, N), jnp.float32),
        grid_spec=pltpu.PrefetchScalarGridSpec(
            num_scalar_prefetch=0,
            grid=(n_split, nk),
            in_specs=[
                pl.BlockSpec((Mp, tk), lambda j, k: (0, k)),
                pl.BlockSpec((tk, tn), lambda j, k: (k, j)),
                pl.BlockSpec((1, tn), lambda j, k: (0, j)),
            ],
            out_specs=pl.BlockSpec((Mp, tn), lambda j, k: (0, j)),
        ),
        compiler_params=pltpu.CompilerParams(
            dimension_semantics=("parallel", "arbitrary"),
            vmem_limit_bytes=32 * 1024 * 1024),
        cost_estimate=pl.CostEstimate(flops=flops, transcendentals=0,
                                      bytes_accessed=bytes_accessed),
    )(x, w, b)


# ---------------------------------------------------------------------------
# Parameters: raw (PyTorch-layout) params + one-time prepared (K,N) weights.
# ---------------------------------------------------------------------------
def init_params(key):
    ks = jax.random.split(key, 4)
    return {
        # from_rgb[8]: EqualConv2d(3+1, 512, 1)
        'from_rgb8_w': jax.random.normal(ks[0], (512, 4, 1, 1), jnp.float32),
        'from_rgb8_b': jnp.zeros((512,), jnp.float32),
        # progression[8] = ConvBlock(513, 512, 3, 1, 4, 0)
        'prog8_conv1_w': jax.random.normal(ks[1], (512, 513, 3, 3), jnp.float32),
        'prog8_conv1_b': jnp.zeros((512,), jnp.float32),
        'prog8_conv2_w': jax.random.normal(ks[2], (512, 512, 4, 4), jnp.float32),
        'prog8_conv2_b': jnp.zeros((512,), jnp.float32),
        # EqualLinear(512, 1)
        'linear_w': jax.random.normal(ks[3], (1, 512), jnp.float32),
        'linear_b': jnp.zeros((1,), jnp.float32),
    }


def prepare_params(params):
    """One-time weight prep (NOT per forward): transpose to (K, N), pad K to a
    lane multiple (128), cast the big streamed weights to bf16.  Equal-LR scales
    are fixed Python floats folded into the kernel epilogues."""
    # from_rgb[8]: (512,4,1,1) -> (4, 512), tiny, keep f32
    w_rgb = params['from_rgb8_w'].reshape(512, 4).T.astype(jnp.float32)
    # conv1: (512,513,3,3) -> tap-major / channel-minor im2col layout -> (4617,512)
    w1 = params['prog8_conv1_w'].transpose(0, 2, 3, 1).reshape(512, 9 * 513).T
    k1 = w1.shape[0]
    k1p = pl.cdiv(k1, 128) * 128                                  # 4617 -> 4736
    w1 = jnp.pad(w1, ((0, k1p - k1), (0, 0))).astype(jnp.bfloat16)
    # conv2: (512,512,4,4) -> (h,w,c)-flatten matching NHWC activation -> (8192,512)
    w2 = params['prog8_conv2_w'].transpose(0, 2, 3, 1).reshape(512, 16 * 512).T
    w2 = w2.astype(jnp.bfloat16)
    # linear: (1,512) -> (512,1), tiny, keep f32
    wl = params['linear_w'].T.astype(jnp.float32)
    return {
        'w_rgb': w_rgb, 'b_rgb': params['from_rgb8_b'].reshape(1, 512),
        'w1': w1, 'b1': params['prog8_conv1_b'].reshape(1, 512),
        'w2': w2, 'b2': params['prog8_conv2_b'].reshape(1, 512),
        'wl': wl, 'bl': params['linear_b'].reshape(1, 1),
    }


# ---------------------------------------------------------------------------
# im2col glue (plain JAX, NHWC, channel-minor to match prepared conv1 weight)
# ---------------------------------------------------------------------------
def _im2col_3x3_pad1_nhwc(x):
    B, h, w, C = x.shape
    xp = jnp.pad(x, ((0, 0), (1, 1), (1, 1), (0, 0)))
    cols = jnp.stack([xp[:, dh:dh + h, dw:dw + w, :]
                      for dh in range(3) for dw in range(3)], axis=3)   # (B,h,w,9,C)
    return cols.reshape(B * h * w, 9 * C)


# ---------------------------------------------------------------------------
# Discriminator forward (step = 0 path, from_rgb_activate = True)
# ---------------------------------------------------------------------------
def discriminator_forward(prep, x, label, step=0, alpha=-1.0, *, n_split=1):
    # TODO(synk): step>0 progressive path (Blur / FusedDownsample / AvgPool2d /
    # alpha skip-blend) not implemented; only the default (step=0) call is.
    assert step == 0
    B = x.shape[0]
    lab = jnp.broadcast_to(label.reshape(B, 1, 1, 1).astype(x.dtype),
                           (B, 1, H, W))
    xin = jnp.concatenate([x, lab], axis=1)                 # (B,4,H,W) NCHW
    xm = xin.transpose(0, 2, 3, 1).reshape(B * HW, 4)       # rows = (b,h,w)

    # K1: from_rgb 1x1 conv + LeakyReLU, fused minibatch-stddev channel
    out = from_rgb_with_std(xm, prep['w_rgb'], prep['b_rgb'],
                            scale=sqrt(2.0 / 4), batch=B, hw=HW)
    out = out.reshape(B, H, W, 513)                         # bf16, (b,h,w,c)

    # K2: conv1 3x3 pad=1 via im2col matmul (bf16 stream, f32 accumulate)
    cols = _im2col_3x3_pad1_nhwc(out)                       # (B*HW, 4617) bf16
    k1p = prep['w1'].shape[0]
    cols = jnp.pad(cols, ((0, 0), (0, k1p - cols.shape[1])))
    out = conv1_matmul(cols, prep['w1'], prep['b1'],
                       scale=sqrt(2.0 / (513 * 9)), n_split=n_split)
    # (B*HW, 512) bf16, rows in (b,h,w) order == NHWC flatten

    # K3: conv2 4x4 valid + LeakyReLU -> lane-dense (Mp, 512) f32 activation
    xm2 = out.reshape(B, HW * 512)
    mp = ((B + 7) // 8) * 8                                 # pad batch to sublane multiple
    xm2 = jnp.pad(xm2, ((0, mp - B), (0, 0)))
    act = conv2_matmul(xm2, prep['w2'], prep['b2'],
                       scale=sqrt(2.0 / (512 * 16)), n_split=n_split)

    # EqualLinear(512 -> 1): trivial (B,512)x(512,1) dot, kept in plain JAX so the
    # big kernel keeps a lane-dense output and the N-split stays unfused.
    return act[:B] @ prep['wl'] * sqrt(2.0 / 512) + prep['bl']   # (B, 1)


# ---------------------------------------------------------------------------
# Pure-JAX f32 reference (same math, raw params) for the sanity check
# ---------------------------------------------------------------------------
def ref_forward(params, x, label):
    B = x.shape[0]
    lrelu = lambda v: jnp.where(v >= 0, v, LEAKY_SLOPE * v)
    lab = jnp.broadcast_to(label.reshape(B, 1, 1, 1), (B, 1, H, W))
    xin = jnp.concatenate([x, lab], 1)

    w = params['from_rgb8_w'].reshape(512, 4) * sqrt(2 / 4)
    out = jnp.einsum('oc,bchw->bohw', w, xin) \
        + params['from_rgb8_b'].reshape(1, -1, 1, 1)
    out = lrelu(out)

    mean_std = jnp.mean(jnp.sqrt(jnp.var(out, axis=0) + 1e-8))
    out = jnp.concatenate([out, jnp.broadcast_to(mean_std, (B, 1, H, W))], 1)

    w = params['prog8_conv1_w'].reshape(512, 513, 9) * sqrt(2 / (513 * 9))
    xp = jnp.pad(out, ((0, 0), (0, 0), (1, 1), (1, 1)))
    patches = jnp.stack([xp[:, :, dh:dh + H, dw:dw + W]
                         for dh in range(3) for dw in range(3)], 2)
    out = jnp.einsum('ock,bckhw->bohw', w, patches) \
        + params['prog8_conv1_b'].reshape(1, -1, 1, 1)
    out = lrelu(out)

    w = params['prog8_conv2_w'].reshape(512, -1) * sqrt(2 / (512 * 16))
    out = jnp.einsum('of,bf->bo', w, out.reshape(B, -1)) + params['prog8_conv2_b']
    out = lrelu(out)

    wl = params['linear_w'] * sqrt(2 / 512)
    return out @ wl.T + params['linear_b']


if __name__ == "__main__":
    key = jax.random.PRNGKey(0)
    kx, kl, kp = jax.random.split(key, 3)
    x = jax.random.normal(kx, (2, 3, 4, 4), jnp.float32)          # step=0 -> 4x4 input
    label = (jax.random.uniform(kl, (2,)) > 0.5).astype(jnp.float32)

    params = init_params(kp)
    prep = prepare_params(params)     # one-time weight prep (not in the forward)

    n_split = _detect_num_tensorcores()   # 2 on megacore (v7x/v4/v5p), else 1
    fwd = jax.jit(lambda p, xx, ll: discriminator_forward(p, xx, ll,
                                                          n_split=n_split))
    out = fwd(prep, x, label)
    out = jax.block_until_ready(out)
    assert out.shape == (2, 1)

    ref = ref_forward(params, x, label)
    # Tolerance covers bf16 weight/activation streaming (f32 accumulation).
    if not bool(jnp.allclose(out, ref, rtol=3e-2, atol=3e-2)):
        raise AssertionError(f"mismatch: pallas={out} ref={ref}")
    print("KERNEL_OK")
</pallas_src>

<mosaic_0001>
module attributes {stable_mosaic.version = 11 : i64} {
  func.func @_from_rgb_std_kernel(%arg0: memref<32x4xf32, #tpu.memory_space<vmem>>, %arg1: memref<4x512xf32, #tpu.memory_space<vmem>>, %arg2: memref<1x512xf32, #tpu.memory_space<vmem>>, %arg3: memref<32x513xbf16, #tpu.memory_space<vmem>>) attributes {dimension_semantics = [], scalar_prefetch = 0 : i64, scratch_operands = 0 : i64, tpu.core_type = #tpu.core_type<tc>} {
    %c0 = arith.constant 0 : index
    %c0_0 = arith.constant 0 : index
    %0 = vector.load %arg0[%c0, %c0_0] : memref<32x4xf32, #tpu.memory_space<vmem>>, vector<32x4xf32>
    %c0_1 = arith.constant 0 : index
    %c0_2 = arith.constant 0 : index
    %1 = vector.load %arg1[%c0_1, %c0_2] : memref<4x512xf32, #tpu.memory_space<vmem>>, vector<4x512xf32>
    %cst = arith.constant dense<0.000000e+00> : vector<32x512xf32>
    %2 = tpu.matmul %0, %1, %cst {dimension_numbers = #tpu.dot_dimension_numbers<[1], [0], [0], [1], [0, 0, 1, 1], [], []>} : vector<32x4xf32>, vector<4x512xf32>, vector<32x512xf32> -> vector<32x512xf32>
    %cst_3 = arith.constant 0.707106769 : f32
    %3 = vector.broadcast %cst_3 : f32 to vector<32x512xf32>
    %4 = arith.mulf %2, %3 : vector<32x512xf32>
    %c0_4 = arith.constant 0 : index
    %c0_5 = arith.constant 0 : index
    %5 = vector.load %arg2[%c0_4, %c0_5] : memref<1x512xf32, #tpu.memory_space<vmem>>, vector<1x512xf32>
    %6 = vector.broadcast %5 : vector<1x512xf32> to vector<32x512xf32>
    %7 = arith.addf %4, %6 : vector<32x512xf32>
    %cst_6 = arith.constant 0.000000e+00 : f32
    %8 = vector.broadcast %cst_6 : f32 to vector<32x512xf32>
    %9 = arith.cmpf oge, %7, %8 : vector<32x512xf32>
    %cst_7 = arith.constant 2.000000e-01 : f32
    %10 = vector.broadcast %cst_7 : f32 to vector<32x512xf32>
    %11 = arith.mulf %10, %7 : vector<32x512xf32>
    %12 = arith.select %9, %7, %11 : vector<32x512xi1>, vector<32x512xf32>
    %13 = vector.shape_cast %12 : vector<32x512xf32> to vector<2x16x512xf32>
    %cst_8 = arith.constant dense<0.000000e+00> : vector<16x512xf32>
    %14 = vector.multi_reduction <add>, %13, %cst_8 [0] : vector<2x16x512xf32> to vector<16x512xf32>
    %cst_9 = arith.constant 2.000000e+00 : f32
    %15 = vector.broadcast %cst_9 : f32 to vector<16x512xf32>
    %16 = arith.divf %14, %15 : vector<16x512xf32>
    %17 = vector.shape_cast %16 : vector<16x512xf32> to vector<1x16x512xf32>
    %18 = vector.broadcast %17 : vector<1x16x512xf32> to vector<2x16x512xf32>
    %19 = arith.subf %13, %18 : vector<2x16x512xf32>
    %20 = arith.mulf %19, %19 : vector<2x16x512xf32>
    %cst_10 = arith.constant dense<0.000000e+00> : vector<16x512xf32>
    %21 = vector.multi_reduction <add>, %20, %cst_10 [0] : vector<2x16x512xf32> to vector<16x512xf32>
    %cst_11 = arith.constant 2.000000e+00 : f32
    %22 = vector.broadcast %cst_11 : f32 to vector<16x512xf32>
    %23 = arith.divf %21, %22 : vector<16x512xf32>
    %cst_12 = arith.constant 9.99999993E-9 : f32
    %24 = vector.broadcast %cst_12 : f32 to vector<16x512xf32>
    %25 = arith.addf %23, %24 : vector<16x512xf32>
    %26 = math.sqrt %25 : vector<16x512xf32>
    %27 = vector.shape_cast %26 : vector<16x512xf32> to vector<1x16x512xf32>
    %cst_13 = arith.constant dense<0.000000e+00> : vector<1xf32>
    %28 = vector.multi_reduction <add>, %27, %cst_13 [1, 2] : vector<1x16x512xf32> to vector<1xf32>
    %29 = vector.shape_cast %28 : vector<1xf32> to vector<1x1x1xf32>
    %30 = vector.extract %29[0, 0, 0] : f32 from vector<1x1x1xf32>
    %cst_14 = arith.constant 8.192000e+03 : f32
    %31 = arith.divf %30, %cst_14 : f32
    %32 = arith.truncf %12 : vector<32x512xf32> to vector<32x512xbf16>
    %c0_15 = arith.constant 0 : index
    %c0_16 = arith.constant 0 : index
    %33 = vector.load %arg3[%c0_15, %c0_16] : memref<32x513xbf16, #tpu.memory_space<vmem>>, vector<32x512xbf16>
    tpu.vector_store %arg3[%c0_15, %c0_16], %32 {strides = array<i32>} : memref<32x513xbf16, #tpu.memory_space<vmem>>, vector<32x512xbf16>,
    %34 = vector.broadcast %31 : f32 to vector<32x1xf32>
    %35 = arith.truncf %34 : vector<32x1xf32> to vector<32x1xbf16>
    %c0_17 = arith.constant 0 : index
    %c512 = arith.constant 512 : index
    %36 = vector.load %arg3[%c0_17, %c512] : memref<32x513xbf16, #tpu.memory_space<vmem>>, vector<32x1xbf16>
    tpu.vector_store %arg3[%c0_17, %c512], %35 {strides = array<i32>} : memref<32x513xbf16, #tpu.memory_space<vmem>>, vector<32x1xbf16>,
    return
  }
}

module attributes {stable_mosaic.version = 11 : i64} {
  func.func @_conv1_kernel(%arg0: i32, %arg1: memref<32x4736xbf16, #tpu.memory_space<vmem>>, %arg2: memref<4736x512xbf16, #tpu.memory_space<vmem>>, %arg3: memref<1x512xf32, #tpu.memory_space<vmem>>, %arg4: memref<32x512xbf16, #tpu.memory_space<vmem>>) attributes {dimension_semantics = [#tpu.dimension_semantics<parallel>], iteration_bounds = array<i64: 1>, scalar_prefetch = 0 : i64, scratch_operands = 0 : i64, tpu.core_type = #tpu.core_type<tc>, window_params = [{pipeline_mode = #tpu.pipeline_mode<synchronous>, transform_indices = @transform_0, window_bounds = array<i64: 32, 4736>}, {transform_indices = @transform_1, window_bounds = array<i64: 4736, 512>}, {transform_indices = @transform_2, window_bounds = array<i64: 1, 512>}, {transform_indices = @transform_3, window_bounds = array<i64: 32, 512>}]} {
    %c0 = arith.constant 0 : index
    %c0_0 = arith.constant 0 : index
    %0 = vector.load %arg1[%c0, %c0_0] : memref<32x4736xbf16, #tpu.memory_space<vmem>>, vector<32x4736xbf16>
    %c0_1 = arith.constant 0 : index
    %c0_2 = arith.constant 0 : index
    %1 = vector.load %arg2[%c0_1, %c0_2] : memref<4736x512xbf16, #tpu.memory_space<vmem>>, vector<4736x512xbf16>
    %cst = arith.constant dense<0.000000e+00> : vector<32x512xf32>
    %2 = tpu.matmul %0, %1, %cst {dimension_numbers = #tpu.dot_dimension_numbers<[1], [0], [0], [1], [0, 0, 1, 1], [], []>} : vector<32x4736xbf16>, vector<4736x512xbf16>, vector<32x512xf32> -> vector<32x512xf32>
    %cst_3 = arith.constant 0.0208130181 : f32
    %3 = vector.broadcast %cst_3 : f32 to vector<32x512xf32>
    %4 = arith.mulf %2, %3 : vector<32x512xf32>
    %c0_4 = arith.constant 0 : index
    %c0_5 = arith.constant 0 : index
    %5 = vector.load %arg3[%c0_4, %c0_5] : memref<1x512xf32, #tpu.memory_space<vmem>>, vector<1x512xf32>
    %6 = vector.broadcast %5 : vector<1x512xf32> to vector<32x512xf32>
    %7 = arith.addf %4, %6 : vector<32x512xf32>
    %cst_6 = arith.constant 0.000000e+00 : f32
    %8 = vector.broadcast %cst_6 : f32 to vector<32x512xf32>
    %9 = arith.cmpf oge, %7, %8 : vector<32x512xf32>
    %cst_7 = arith.constant 2.000000e-01 : f32
    %10 = vector.broadcast %cst_7 : f32 to vector<32x512xf32>
    %11 = arith.mulf %10, %7 : vector<32x512xf32>
    %12 = arith.select %9, %7, %11 : vector<32x512xi1>, vector<32x512xf32>
    %13 = arith.truncf %12 : vector<32x512xf32> to vector<32x512xbf16>
    %c0_8 = arith.constant 0 : index
    %c0_9 = arith.constant 0 : index
    %14 = vector.load %arg4[%c0_8, %c0_9] : memref<32x512xbf16, #tpu.memory_space<vmem>>, vector<32x512xbf16>
    tpu.vector_store %arg4[%c0_8, %c0_9], %13 {strides = array<i32>} : memref<32x512xbf16, #tpu.memory_space<vmem>>, vector<32x512xbf16>,
    return
  }
  func.func @transform_0(%arg0: i32) -> (i32, i32) {
    %c0_i32 = arith.constant 0 : i32
    %c0_i32_0 = arith.constant 0 : i32
    %c0_i32_1 = arith.constant 0 : i32
    return %c0_i32, %c0_i32_0 : i32, i32
  }
  func.func @transform_1(%arg0: i32) -> (i32, i32) {
    %c0_i32 = arith.constant 0 : i32
    %c0_i32_0 = arith.constant 0 : i32
    return %c0_i32, %arg0 : i32, i32
  }
  func.func @transform_2(%arg0: i32) -> (i32, i32) {
    %c0_i32 = arith.constant 0 : i32
    %c0_i32_0 = arith.constant 0 : i32
    return %c0_i32, %arg0 : i32, i32
  }
  func.func @transform_3(%arg0: i32) -> (i32, i32) {
    %c0_i32 = arith.constant 0 : i32
    %c0_i32_0 = arith.constant 0 : i32
    return %c0_i32, %arg0 : i32, i32
  }
}

module attributes {stable_mosaic.version = 11 : i64} {
  func.func @_conv2_kernel(%arg0: i32, %arg1: i32, %arg2: memref<8x4096xbf16, #tpu.memory_space<vmem>>, %arg3: memref<4096x512xbf16, #tpu.memory_space<vmem>>, %arg4: memref<1x512xf32, #tpu.memory_space<vmem>>, %arg5: memref<8x512xf32, #tpu.memory_space<vmem>>) attributes {dimension_semantics = [#tpu.dimension_semantics<parallel>, #tpu.dimension_semantics<arbitrary>], iteration_bounds = array<i64: 1, 2>, scalar_prefetch = 0 : i64, scratch_operands = 0 : i64, tpu.core_type = #tpu.core_type<tc>, window_params = [{transform_indices = @transform_0, window_bounds = array<i64: 8, 4096>}, {transform_indices = @transform_1, window_bounds = array<i64: 4096, 512>}, {transform_indices = @transform_2, window_bounds = array<i64: 1, 512>}, {transform_indices = @transform_3, window_bounds = array<i64: 8, 512>}]} {
    %c0_i32 = arith.constant 0 : i32
    %0 = arith.cmpi eq, %arg1, %c0_i32 : i32
    %1 = arith.extui %0 : i1 to i32
    %c0_i32_0 = arith.constant 0 : i32
    %2 = arith.cmpi ne, %1, %c0_i32_0 : i32
    scf.if %2 {
      %cst_9 = arith.constant 0.000000e+00 : f32
      %12 = vector.broadcast %cst_9 : f32 to vector<8x512xf32>
      %c0_10 = arith.constant 0 : index
      %c0_11 = arith.constant 0 : index
      %13 = vector.load %arg5[%c0_10, %c0_11] : memref<8x512xf32, #tpu.memory_space<vmem>>, vector<8x512xf32>
      tpu.vector_store %arg5[%c0_10, %c0_11], %12 {strides = array<i32>} : memref<8x512xf32, #tpu.memory_space<vmem>>, vector<8x512xf32>,
    } else {
    }
    %c0 = arith.constant 0 : index
    %c0_1 = arith.constant 0 : index
    %3 = vector.load %arg5[%c0, %c0_1] : memref<8x512xf32, #tpu.memory_space<vmem>>, vector<8x512xf32>
    %c0_2 = arith.constant 0 : index
    %c0_3 = arith.constant 0 : index
    %4 = vector.load %arg2[%c0_2, %c0_3] : memref<8x4096xbf16, #tpu.memory_space<vmem>>, vector<8x4096xbf16>
    %c0_4 = arith.constant 0 : index
    %c0_5 = arith.constant 0 : index
    %5 = vector.load %arg3[%c0_4, %c0_5] : memref<4096x512xbf16, #tpu.memory_space<vmem>>, vector<4096x512xbf16>
    %cst = arith.constant dense<0.000000e+00> : vector<8x512xf32>
    %6 = tpu.matmul %4, %5, %cst {dimension_numbers = #tpu.dot_dimension_numbers<[1], [0], [0], [1], [0, 0, 1, 1], [], []>} : vector<8x4096xbf16>, vector<4096x512xbf16>, vector<8x512xf32> -> vector<8x512xf32>
    %7 = arith.addf %3, %6 : vector<8x512xf32>
    %c0_6 = arith.constant 0 : index
    %c0_7 = arith.constant 0 : index
    %8 = vector.load %arg5[%c0_6, %c0_7] : memref<8x512xf32, #tpu.memory_space<vmem>>, vector<8x512xf32>
    tpu.vector_store %arg5[%c0_6, %c0_7], %7 {strides = array<i32>} : memref<8x512xf32, #tpu.memory_space<vmem>>, vector<8x512xf32>,
    %c1_i32 = arith.constant 1 : i32
    %9 = arith.cmpi eq, %arg1, %c1_i32 : i32
    %10 = arith.extui %9 : i1 to i32
    %c0_i32_8 = arith.constant 0 : i32
    %11 = arith.cmpi ne, %10, %c0_i32_8 : i32
    scf.if %11 {
      %c0_9 = arith.constant 0 : index
      %c0_10 = arith.constant 0 : index
      %12 = vector.load %arg5[%c0_9, %c0_10] : memref<8x512xf32, #tpu.memory_space<vmem>>, vector<8x512xf32>
      %cst_11 = arith.constant 1.562500e-02 : f32
      %13 = vector.broadcast %cst_11 : f32 to vector<8x512xf32>
      %14 = arith.mulf %12, %13 : vector<8x512xf32>
      %c0_12 = arith.constant 0 : index
      %c0_13 = arith.constant 0 : index
      %15 = vector.load %arg4[%c0_12, %c0_13] : memref<1x512xf32, #tpu.memory_space<vmem>>, vector<1x512xf32>
      %16 = vector.broadcast %15 : vector<1x512xf32> to vector<8x512xf32>
      %17 = arith.addf %14, %16 : vector<8x512xf32>
      %cst_14 = arith.constant 0.000000e+00 : f32
      %18 = vector.broadcast %cst_14 : f32 to vector<8x512xf32>
      %19 = arith.cmpf oge, %17, %18 : vector<8x512xf32>
      %cst_15 = arith.constant 2.000000e-01 : f32
      %20 = vector.broadcast %cst_15 : f32 to vector<8x512xf32>
      %21 = arith.mulf %20, %17 : vector<8x512xf32>
      %22 = arith.select %19, %17, %21 : vector<8x512xi1>, vector<8x512xf32>
      %c0_16 = arith.constant 0 : index
      %c0_17 = arith.constant 0 : index
      %23 = vector.load %arg5[%c0_16, %c0_17] : memref<8x512xf32, #tpu.memory_space<vmem>>, vector<8x512xf32>
      tpu.vector_store %arg5[%c0_16, %c0_17], %22 {strides = array<i32>} : memref<8x512xf32, #tpu.memory_space<vmem>>, vector<8x512xf32>,
    } else {
    }
    return
  }
  func.func @transform_0(%arg0: i32, %arg1: i32) -> (i32, i32) {
    %c0_i32 = arith.constant 0 : i32
    %c0_i32_0 = arith.constant 0 : i32
    return %c0_i32, %arg1 : i32, i32
  }
  func.func @transform_1(%arg0: i32, %arg1: i32) -> (i32, i32) {
    %c0_i32 = arith.constant 0 : i32
    return %arg1, %arg0 : i32, i32
  }
  func.func @transform_2(%arg0: i32, %arg1: i32) -> (i32, i32) {
    %c0_i32 = arith.constant 0 : i32
    %c0_i32_0 = arith.constant 0 : i32
    return %c0_i32, %arg0 : i32, i32
  }
  func.func @transform_3(%arg0: i32, %arg1: i32) -> (i32, i32) {
    %c0_i32 = arith.constant 0 : i32
    %c0_i32_0 = arith.constant 0 : i32
    return %c0_i32, %arg0 : i32, i32
  }
}

</mosaic_0001>

<bundles_post_ra>
// kernel: _lambda_.3
= control target key start
LH: loop header
LB: loop body
LE: loop exit
PB: predicated region body
PF: predicated region fallthrough
CT: control target
= control target key end

     0   :  { %8 = vsyncpa [#allocation3], 0  ;;  %s876_s0 = inlined_call_operand.vmem [shape: f32[32,4], index: 0, kind: input, shape index: {}]   ;;  %s877_s1 = inlined_call_operand.hbm [shape: f32[4,512], index: 1, kind: input, shape index: {}]   ;;  %s878_s2 = inlined_call_operand.hbm [shape: f32[1,512], index: 2, kind: input, shape index: {}]   ;;  %s879_s3 = inlined_call_operand.vmem [shape: bf16[32,513], index: 3, kind: output, shape index: {}]  }
   0x1   :  { %9 = vsyncpa [#allocation5], 0  ;;  %s666_s12 = smov [#allocation2]   ;;  %s667_s14 = smov [#allocation4]  }
   0x2   :  { %s18_s13 = sshll.u32 %s666_s12, 4  ;;  %s28_s15 = sshll.u32 %s667_s14, 4  ;;  %s19_s13 = int_to_ptr.vmem [resolvable:$true] %s18_s13  ;;  %s29_s15 = int_to_ptr.vmem [resolvable:$true] %s28_s15 }
   0x3   :  { %s618_s18 = scalar_lea.hbm %s877_s1, 256 }
   0x4   :  { %p619_p0 = scmp.ne.s32.totalorder %s877_s1, %s618_s18  ;;  %p622_p1 = scmp.lt.u32.totalorder %s618_s18, %s877_s1 }
   0x6   :  { %p624_p2 = pnand %p622_p1, %p619_p0 }
   0x8   :  { %627 = shalt.err (!%p624_p2)
}
   0x9   :  { %s628_s23 = scalar_lea.vmem %s19_s13, 256  ;;  %p633_p4 = scmp.lt.s32.totalorder %s19_s13, %s19_s13 }
   0xa   :  { %p629_p3 = scmp.ne.s32.totalorder %s19_s13, %s628_s23  ;;  %p634_p5 = scmp.lt.s32.totalorder %s628_s23, %s628_s23 }
   0xc   :  { %p635_p6 = por %p634_p5, %p633_p4 }
   0xe   :  { %p636_p7 = pnand %p635_p6, %p629_p3 }
  0x10   :  { %639 = shalt.err (!%p636_p7)
}
  0x11   :  { %21 = dma.hbm_to_vmem [thread:$0]  %s877_s1, 256, %s19_s13, [#allocation3]  }
  0x12   :  { %s640_s28 = scalar_lea.hbm %s878_s2, 64 }
  0x13   :  { %p641_p8 = scmp.ne.s32.totalorder %s878_s2, %s640_s28  ;;  %p644_p9 = scmp.lt.u32.totalorder %s640_s28, %s878_s2 }
  0x15   :  { %p646_p10 = pnand %p644_p9, %p641_p8 }
  0x17   :  { %649 = shalt.err (!%p646_p10)
}
  0x18   :  { %s650_s6 = scalar_lea.vmem %s29_s15, 64  ;;  %p655_p12 = scmp.lt.s32.totalorder %s29_s15, %s29_s15 }
  0x19   :  { %p651_p11 = scmp.ne.s32.totalorder %s29_s15, %s650_s6  ;;  %p656_p13 = scmp.lt.s32.totalorder %s650_s6, %s650_s6 }
  0x1b   :  { %p657_p0 = por %p656_p13, %p655_p12 }
  0x1d   :  { %p658_p1 = pnand %p657_p0, %p651_p11 }
  0x1f   :  { %661 = shalt.err (!%p658_p1)
}
  0x20   :  { %31 = dma.hbm_to_vmem [thread:$0]  %s878_s2, 64, %s29_s15, [#allocation5]  }
  0x21   :  { %662 = dma.done.wait [#allocation3], 256  }
  0x22   :  { %663 = vsyncadd [#allocation3], 4294967040 }
  0x23   :  { %664 = dma.done.wait [#allocation5], 64  }
  0x24   :  { %665 = vsyncadd [#allocation5], 4294967232  ;;  %v668_v0 = vmov 0.0   ;;  %v42_v1 = vld [vmem:[#allocation2] sm:$0xff]  ;;  %vm61_vm0 = vcmask 1043456   ;;  %v43_v2 = vld [vmem:[#allocation2 + $0x8] sm:$0xff]  ;;  %v266_v9 = vlaneseq }
  0x25   :  { %134 = vmatprep.mubr.f32.mxu0 %v668_v0  ;;  %223 = vmatprep.mubr.f32.mxu1 %v668_v0  ;;  %v46_v3 = vcombine.high %v42_v1, %v42_v1  ;;  %v47_v4 = vcombine.high %v43_v2, %v43_v2  ;;  %v38_v5 = vld [vmem:[%s876_s0] sm:$0xff]  ;;  %vm48_vm1 = vcmask 31744   ;;  %v39_v6 = vld [vmem:[%s876_s0 + $0x8] sm:$0xff]  ;;  %v40_v7 = vld [vmem:[%s876_s0 + $0x10] sm:$0xff] }
  0x26   :  { %v41_v8 = vld [vmem:[%s876_s0 + $0x18] sm:$0xff]  ;;  %v267_v10 = vshrl.u32 %v266_v9, 7  ;;  %v264_v13 = vld [vmem:[#allocation4] sm:$0xf] }
  0x27   :  { %567 = vmatprep.subr.msk.mxu0 %vm61_vm0, %v46_v3  ;;  %573 = vmatprep.subr.msk.mxu1 %vm61_vm0, %v47_v4 }
  0x28   :  { %568 = vmatpush1.msk.msra.mxu0 %vm61_vm0, %v42_v1  ;;  %574 = vmatpush1.msk.msra.mxu1 %vm61_vm0, %v43_v2  ;;  %v268_v11 = vsub.s32 0, %v267_v10  ;;  %v276_v12 = vsub.s32 2, %v267_v10  ;;  %v272_v14 = vsub.s32 1, %v267_v10  ;;  %v280_v15 = vsub.s32 3, %v267_v10 }
  0x29   :  { %569 = vmatmul.mubr.msk.f32.vlgmr.msra.gmra.mrb[0].mxu0 %vm48_vm1, %v38_v5  ;;  %575 = vmatmul.mubr.msk.f32.vlgmr.msra.gmra.mrb[0].mxu1 %vm48_vm1, %v38_v5 }
  0x2a   :  { %140 = vmatprep.mubr.f32.mxu0 %v668_v0  ;;  %229 = vmatprep.mubr.f32.mxu1 %v668_v0  ;;  %v733_v16 = vrot.slane %v264_v13, %v268_v11  ;;  %v735_v17 = vrot.slane %v264_v13, %v276_v12  ;;  %v737_v20 = vrot.slane %v264_v13, %v272_v14 }
  0x2b   :  { %v739_v21 = vrot.slane %v264_v13, %v280_v15 }
  0x2d   :  { %570 = vmatmul.mubr.msk.f32.gmra.mrb[2].mxu0 %vm48_vm1, %v39_v6  ;;  %576 = vmatmul.mubr.msk.f32.gmra.mrb[2].mxu1 %vm48_vm1, %v39_v6 }
  0x2e   :  { %146 = vmatprep.mubr.f32.mxu0 %v668_v0  ;;  %235 = vmatprep.mubr.f32.mxu1 %v668_v0 }
  0x31   :  { %571 = vmatmul.mubr.msk.f32.gmra.mrb[4].mxu0 %vm48_vm1, %v40_v7  ;;  %577 = vmatmul.mubr.msk.f32.gmra.mrb[4].mxu1 %vm48_vm1, %v40_v7 }
  0x32   :  { %152 = vmatprep.mubr.f32.mxu0 %v668_v0  ;;  %241 = vmatprep.mubr.f32.mxu1 %v668_v0 }
  0x35   :  { %572 = vmatmul.mubr.msk.f32.gmra.mrb[6].mxu0 %vm48_vm1, %v41_v8  ;;  %578 = vmatmul.mubr.msk.f32.gmra.mrb[6].mxu1 %vm48_vm1, %v41_v8 }
  0xfc   :  { %v136_v18 = vpop.f32.mrb[0].mxu0  ;;  %v225_v19 = vpop.f32.mrb[0].mxu1 }
  0xfd   :  { %v248_v22 = vmul.f32 0.70710677, %v136_v18  ;;  %v250_v23 = vmul.f32 0.70710677, %v225_v19  ;;  %v138_v24 = vpop.f32.mrb[1].mxu0  ;;  %v227_v25 = vpop.f32.mrb[1].mxu1 }
  0xfe   :  { %v249_v26 = vmul.f32 0.70710677, %v138_v24  ;;  %v251_v27 = vmul.f32 0.70710677, %v227_v25 }
  0xff   :  { %v286_v28 = vadd.f32 %v733_v16, %v248_v22  ;;  %v288_v29 = vadd.f32 %v735_v17, %v250_v23 }
 0x100   :  { %v287_v30 = vadd.f32 %v737_v20, %v249_v26  ;;  %v289_v31 = vadd.f32 %v739_v21, %v251_v27  ;;  %v142_v32 = vpop.f32.mrb[2].mxu0  ;;  %v231_v33 = vpop.f32.mrb[2].mxu1 }
 0x101   :  { %vm302_vm2 = vcmp.ge.f32.partialorder %v286_v28, 0.0  ;;  %v318_v34 = vmul.f32 0.2, %v286_v28  ;;  %vm304_vm3 = vcmp.ge.f32.partialorder %v288_v29, 0.0  ;;  %v320_v35 = vmul.f32 0.2, %v288_v29 }
 0x102   :  { %vm303_vm4 = vcmp.ge.f32.partialorder %v287_v30, 0.0  ;;  %v319_v36 = vmul.f32 0.2, %v287_v30  ;;  %vm305_vm5 = vcmp.ge.f32.partialorder %v289_v31, 0.0  ;;  %v321_v37 = vmul.f32 0.2, %v289_v31 }
 0x103   :  { %v745_v38 = vsel %vm302_vm2, %v286_v28, %v318_v34  ;;  %v747_v39 = vsel %vm304_vm3, %v288_v29, %v320_v35  ;;  %v252_v40 = vmul.f32 0.70710677, %v142_v32  ;;  %v254_v41 = vmul.f32 0.70710677, %v231_v33  ;;  %v144_v42 = vpop.f32.mrb[3].mxu0  ;;  %v233_v43 = vpop.f32.mrb[3].mxu1 }
 0x104   :  { %v749_v44 = vsel %vm303_vm4, %v287_v30, %v319_v36  ;;  %v751_v45 = vsel %vm305_vm5, %v289_v31, %v321_v37  ;;  %v253_v46 = vmul.f32 0.70710677, %v144_v42  ;;  %v255_v47 = vmul.f32 0.70710677, %v233_v43  ;;  %v148_v48 = vpop.f32.mrb[4].mxu0  ;;  %v237_v49 = vpop.f32.mrb[4].mxu1 }
 0x105   :  { %v587_v50 = vpack.c.bf16 %v749_v44, %v745_v38  ;;  %v588_v51 = vpack.c.bf16 %v751_v45, %v747_v39  ;;  %v290_v52 = vadd.f32 %v733_v16, %v252_v40  ;;  %v292_v53 = vadd.f32 %v735_v17, %v254_v41  ;;  %v150_v54 = vpop.f32.mrb[5].mxu0  ;;  %v239_v55 = vpop.f32.mrb[5].mxu1 }
 0x106   :  { %v291_v56 = vadd.f32 %v737_v20, %v253_v46  ;;  %v293_v57 = vadd.f32 %v739_v21, %v255_v47  ;;  %v256_v58 = vmul.f32 0.70710677, %v148_v48  ;;  %v258_v59 = vmul.f32 0.70710677, %v237_v49 }
 0x107   :  { %546 = vst [vmem:[%s879_s3] sm:$0xff] %v587_v50  ;;  %547 = vst [vmem:[%s879_s3 + $0x8] sm:$0xff] %v588_v51  ;;  %vm306_vm6 = vcmp.ge.f32.partialorder %v290_v52, 0.0  ;;  %v322_v60 = vmul.f32 0.2, %v290_v52  ;;  %vm308_vm7 = vcmp.ge.f32.partialorder %v292_v53, 0.0 }
 0x108   :  { %v324_v61 = vmul.f32 0.2, %v292_v53  ;;  %vm307_vm8 = vcmp.ge.f32.partialorder %v291_v56, 0.0  ;;  %v323_v62 = vmul.f32 0.2, %v291_v56  ;;  %vm309_vm9 = vcmp.ge.f32.partialorder %v293_v57, 0.0 }
 0x109   :  { %v325_v63 = vmul.f32 0.2, %v293_v57  ;;  %v767_v0 = vsel %vm306_vm6, %v290_v52, %v322_v60  ;;  %v294_v2 = vadd.f32 %v733_v16, %v256_v58  ;;  %v296_v3 = vadd.f32 %v735_v17, %v258_v59  ;;  %v154_v4 = vpop.f32.mrb[6].mxu0  ;;  %v243_v5 = vpop.f32.mrb[6].mxu1 }
 0x10a   :  { %v769_v1 = vsel %vm308_vm7, %v292_v53, %v324_v61  ;;  %v773_v6 = vsel %vm307_vm8, %v291_v56, %v323_v62  ;;  %v257_v8 = vmul.f32 0.70710677, %v150_v54  ;;  %v259_v9 = vmul.f32 0.70710677, %v239_v55  ;;  %v156_v10 = vpop.f32.mrb[7].mxu0  ;;  %v777_v11 = vpop.f32.mrb[7].mxu1 }
 0x10b   :  { %v775_v7 = vsel %vm309_vm9, %v293_v57, %v325_v63  ;;  %v589_v12 = vpack.c.bf16 %v773_v6, %v767_v0  ;;  %vm310_vm10 = vcmp.ge.f32.partialorder %v294_v2, 0.0  ;;  %v326_v14 = vmul.f32 0.2, %v294_v2 }
 0x10c   :  { %v590_v13 = vpack.c.bf16 %v775_v7, %v769_v1  ;;  %vm312_vm11 = vcmp.ge.f32.partialorder %v296_v3, 0.0  ;;  %v328_v15 = vmul.f32 0.2, %v296_v3  ;;  %v295_v18 = vadd.f32 %v737_v20, %v257_v8 }
 0x10d   :  { %v297_v19 = vadd.f32 %v739_v21, %v259_v9  ;;  %548 = vst [vmem:[%s879_s3 + $0x14] sm:$0xff] %v589_v12  ;;  %v342_v22 = vsel %vm310_vm10, %v294_v2, %v326_v14  ;;  %v260_v23 = vmul.f32 0.70710677, %v154_v4  ;;  %v262_v24 = vmul.f32 0.70710677, %v243_v5 }
 0x10e   :  { %549 = vst [vmem:[%s879_s3 + $0x1c] sm:$0xff] %v590_v13  ;;  %v261_v25 = vmul.f32 0.70710677, %v156_v10  ;;  %v350_v26 = vadd.f32 %v342_v22, %v745_v38  ;;  %v344_v27 = vsel %vm312_vm11, %v296_v3, %v328_v15  ;;  %vm311_vm12 = vcmp.ge.f32.partialorder %v295_v18, 0.0 }
 0x10f   :  { %v327_v28 = vmul.f32 0.2, %v295_v18  ;;  %v352_v29 = vadd.f32 %v344_v27, %v747_v39  ;;  %vm313_vm13 = vcmp.ge.f32.partialorder %v297_v19, 0.0  ;;  %v329_v30 = vmul.f32 0.2, %v297_v19 }
 0x110   :  { %v298_v31 = vadd.f32 %v733_v16, %v260_v23  ;;  %v359_v32 = vmul.f32 0.5, %v350_v26  ;;  %v300_v34 = vadd.f32 %v735_v17, %v262_v24  ;;  %v299_v35 = vadd.f32 %v737_v20, %v261_v25 }
 0x111   :  { %v343_v33 = vsel %vm311_vm12, %v295_v18, %v327_v28  ;;  %v361_v36 = vmul.f32 0.5, %v352_v29  ;;  %v345_v41 = vsel %vm313_vm13, %v297_v19, %v329_v30  ;;  %v263_v15 = vmul.f32 0.70710677, %v777_v11 }
 0x112   :  { %v351_v37 = vadd.f32 %v343_v33, %v749_v44  ;;  %v591_v40 = vpack.c.bf16 %v343_v33, %v342_v22  ;;  %v367_v42 = vsub.f32 %v745_v38, %v359_v32  ;;  %v375_v43 = vsub.f32 %v342_v22, %v359_v32 }
 0x113   :  { %v353_v46 = vadd.f32 %v345_v41, %v751_v45  ;;  %v592_v47 = vpack.c.bf16 %v345_v41, %v344_v27  ;;  %v369_v48 = vsub.f32 %v747_v39, %v361_v36  ;;  %v377_v16 = vsub.f32 %v344_v27, %v361_v36 }
 0x114   :  { %v360_v49 = vmul.f32 0.5, %v351_v37  ;;  %550 = vst [vmem:[%s879_s3 + $0x28] sm:$0xff] %v591_v40  ;;  %vm314_vm14 = vcmp.ge.f32.partialorder %v298_v31, 0.0  ;;  %v383_v17 = vmul.f32 %v367_v42, %v367_v42  ;;  %v391_v20 = vmul.f32 %v375_v43, %v375_v43 }
 0x115   :  { %v362_v50 = vmul.f32 0.5, %v353_v46  ;;  %551 = vst [vmem:[%s879_s3 + $0x30] sm:$0xff] %v592_v47  ;;  %v330_v38 = vmul.f32 0.2, %v298_v31  ;;  %v385_v51 = vmul.f32 %v369_v48, %v369_v48  ;;  %v393_v52 = vmul.f32 %v377_v16, %v377_v16 }
 0x116   :  { %v368_v53 = vsub.f32 %v749_v44, %v360_v49  ;;  %v376_v39 = vsub.f32 %v343_v33, %v360_v49  ;;  %v399_v54 = vadd.f32 %v391_v20, %v383_v17  ;;  %vm316_vm15 = vcmp.ge.f32.partialorder %v300_v34, 0.0 }
 0x117   :  { %v370_v55 = vsub.f32 %v751_v45, %v362_v50  ;;  %v378_v56 = vsub.f32 %v345_v41, %v362_v50  ;;  %v346_v57 = vsel %vm314_vm14, %v298_v31, %v330_v38  ;;  %v401_v58 = vadd.f32 %v393_v52, %v385_v51 }
 0x118   :  { %v384_v59 = vmul.f32 %v368_v53, %v368_v53  ;;  %v392_v60 = vmul.f32 %v376_v39, %v376_v39  ;;  %v354_v61 = vadd.f32 %v346_v57, %v767_v0  ;;  %v407_v62 = vmul.f32 0.5, %v399_v54 }
 0x119   :  { %v386_v63 = vmul.f32 %v370_v55, %v370_v55  ;;  %v394_v2 = vmul.f32 %v378_v56, %v378_v56  ;;  %v332_v5 = vmul.f32 0.2, %v300_v34  ;;  %vm315_vm0 = vcmp.ge.f32.partialorder %v299_v35, 0.0 }
 0x11a   :  { %v400_v3 = vadd.f32 %v392_v60, %v384_v59  ;;  %v363_v4 = vmul.f32 0.5, %v354_v61  ;;  %v331_v44 = vmul.f32 0.2, %v299_v35  ;;  %v809_v9 = vadd.f32 1e-08, %v407_v62 }
 0x11b   :  { %v402_v8 = vadd.f32 %v394_v2, %v386_v63  ;;  %v348_v13 = vsel %vm316_vm15, %v300_v34, %v332_v5  ;;  %v409_v18 = vmul.f32 0.5, %v401_v58  ;;  %v301_v27 = vadd.f32 %v739_v21, %v263_v15 }
 0x11c   :  { %v408_v45 = vmul.f32 0.5, %v400_v3  ;;  %v371_v10 = vsub.f32 %v767_v0, %v363_v4  ;;  %v379_v12 = vsub.f32 %v346_v57, %v363_v4  ;;  %v347_v14 = vsel %vm315_vm0, %v299_v35, %v331_v44 }
 0x11d   :  { %v356_v23 = vadd.f32 %v348_v13, %v769_v1  ;;  %v355_v25 = vadd.f32 %v347_v14, %v773_v6  ;;  %v593_v26 = vpack.c.bf16 %v347_v14, %v346_v57  ;;  %602 = vrsqrt.f32 %v809_v9 }
 0x11e   :  { %v387_v19 = vmul.f32 %v371_v10, %v371_v10  ;;  %v395_v22 = vmul.f32 %v379_v12, %v379_v12  ;;  %v814_v24 = vadd.f32 1e-08, %v408_v45  ;;  %v410_v0 = vmul.f32 0.5, %v402_v8 }
 0x11f   :  { %v365_v29 = vmul.f32 0.5, %v356_v23  ;;  %v364_v30 = vmul.f32 0.5, %v355_v25  ;;  %552 = vst [vmem:[%s879_s3 + $0x3c] sm:$0xff] %v593_v26  ;;  %vm317_vm1 = vcmp.ge.f32.partialorder %v301_v27, 0.0  ;;  %v333_v11 = vmul.f32 0.2, %v301_v27 }
 0x120   :  { %v403_v28 = vadd.f32 %v395_v22, %v387_v19  ;;  %v822_v31 = vadd.f32 1e-08, %v409_v18  ;;  %604 = vrsqrt.f32 %v814_v24  ;;  %v418_v42 = vadd.f32 1e-08, %v410_v0 }
 0x121   :  { %v373_v33 = vsub.f32 %v769_v1, %v365_v29  ;;  %v381_v34 = vsub.f32 %v348_v13, %v365_v29  ;;  %v372_v21 = vsub.f32 %v773_v6, %v364_v30  ;;  %v380_v35 = vsub.f32 %v347_v14, %v364_v30 }
 0x122   :  { %v411_v32 = vmul.f32 0.5, %v403_v28  ;;  %v349_v36 = vsel %vm317_vm1, %v301_v27, %v333_v11  ;;  %606 = vrsqrt.f32 %v822_v31  ;;  %vm425_vm2 = vcmp.eq.f32.partialorder %v809_v9, inf }
 0x123   :  { %v389_v37 = vmul.f32 %v373_v33, %v373_v33  ;;  %v397_v40 = vmul.f32 %v381_v34, %v381_v34  ;;  %v357_v41 = vadd.f32 %v349_v36, %v775_v7  ;;  %v388_v43 = vmul.f32 %v372_v21, %v372_v21 }
 0x124   :  { %v396_v46 = vmul.f32 %v380_v35, %v380_v35  ;;  %v594_v47 = vpack.c.bf16 %v349_v36, %v348_v13  ;;  %v828_v49 = vadd.f32 1e-08, %v411_v32  ;;  %608 = vrsqrt.f32 %v418_v42 }
 0x125   :  { %v405_v48 = vadd.f32 %v397_v40, %v389_v37  ;;  %v366_v16 = vmul.f32 0.5, %v357_v41  ;;  %v428_v58 = vand.u32 2147483648, %v809_v9  ;;  %vm427_vm3 = vcmp.eq.f32.partialorder %v809_v9, 0.0 }
 0x126   :  { %v404_v1 = vadd.f32 %v396_v46, %v388_v43  ;;  %553 = vst [vmem:[%s879_s3 + $0x44] sm:$0xff] %v594_v47  ;;  %610 = vrsqrt.f32 %v828_v49  ;;  %vm432_vm4 = vcmp.eq.f32.partialorder %v814_v24, inf  ;;  %v435_v60 = vand.u32 2147483648, %v814_v24 }
 0x127   :  { %v413_v6 = vmul.f32 0.5, %v405_v48  ;;  %v374_v17 = vsub.f32 %v775_v7, %v366_v16  ;;  %v382_v20 = vsub.f32 %v349_v36, %v366_v16  ;;  %v603_v38 = vpop.eup %602  ;;  %vm434_vm5 = vcmp.eq.f32.partialorder %v814_v24, 0.0 }
 0x128   :  { %v412_v50 = vmul.f32 0.5, %v404_v1  ;;  %v424_v54 = vmul.f32 %v603_v38, %v809_v9  ;;  %vm439_vm6 = vcmp.eq.f32.partialorder %v822_v31, inf  ;;  %v442_v8 = vand.u32 2147483648, %v822_v31 }
 0x129   :  { %v835_v51 = vadd.f32 1e-08, %v413_v6  ;;  %v390_v52 = vmul.f32 %v374_v17, %v374_v17  ;;  %v398_v53 = vmul.f32 %v382_v20, %v382_v20  ;;  %vm441_vm7 = vcmp.eq.f32.partialorder %v822_v31, 0.0 }
 0x12a   :  { %v420_v39 = vadd.f32 1e-08, %v412_v50  ;;  %v605_v56 = vpop.eup %604  ;;  %v426_v7 = vsel %vm425_vm2, %v809_v9, %v424_v54  ;;  %vm446_vm8 = vcmp.eq.f32.partialorder %v418_v42, inf  ;;  %v449_v13 = vand.u32 2147483648, %v418_v42 }
 0x12b   :  { %v406_v55 = vadd.f32 %v398_v53, %v390_v52  ;;  %612 = vrsqrt.f32 %v835_v51  ;;  %v431_v59 = vmul.f32 %v605_v56, %v814_v24  ;;  %v429_v62 = vsel %vm427_vm3, %v428_v58, %v426_v7 }
 0x12c   :  { %614 = vrsqrt.f32 %v420_v39  ;;  %v607_v2 = vpop.eup %606  ;;  %vm448_vm9 = vcmp.eq.f32.partialorder %v418_v42, 0.0  ;;  %vm453_vm10 = vcmp.eq.f32.partialorder %v828_v49, inf  ;;  %vm455_vm11 = vcmp.eq.f32.partialorder %v828_v49, 0.0 }
 0x12d   :  { %v414_v57 = vmul.f32 0.5, %v406_v55  ;;  %v433_v63 = vsel %vm432_vm4, %v814_v24, %v431_v59  ;;  %v438_v4 = vmul.f32 %v607_v2, %v822_v31  ;;  %v456_v24 = vand.u32 2147483648, %v828_v49 }
 0x12e   :  { %v436_v3 = vsel %vm434_vm5, %v435_v60, %v433_v63  ;;  %v609_v5 = vpop.eup %608  ;;  %vm460_vm12 = vcmp.eq.f32.partialorder %v420_v39, inf  ;;  %v463_v0 = vand.u32 2147483648, %v420_v39  ;;  %vm467_vm13 = vcmp.eq.f32.partialorder %v835_v51, inf }
 0x12f   :  { %v422_v61 = vadd.f32 1e-08, %v414_v57  ;;  %v479_v44 = vadd.f32 %v436_v3, %v429_v62  ;;  %v440_v9 = vsel %vm439_vm6, %v822_v31, %v438_v4  ;;  %v445_v45 = vmul.f32 %v609_v5, %v418_v42 }
 0x130   :  { %v611_v10 = vpop.eup %610  ;;  %v443_v12 = vsel %vm441_vm7, %v442_v8, %v440_v9  ;;  %vm462_vm14 = vcmp.eq.f32.partialorder %v420_v39, 0.0  ;;  %v470_v33 = vand.u32 2147483648, %v835_v51  ;;  %vm469_vm15 = vcmp.eq.f32.partialorder %v835_v51, 0.0 }
 0x131   :  { %616 = vrsqrt.f32 %v422_v61  ;;  %v447_v15 = vsel %vm446_vm8, %v418_v42, %v445_v45  ;;  %v452_v18 = vmul.f32 %v611_v10, %v828_v49  ;;  %v480_v19 = vadd.f32 %v479_v44, %v443_v12 }
 0x132   :  { %v450_v23 = vsel %vm448_vm9, %v449_v13, %v447_v15  ;;  %vm474_vm0 = vcmp.eq.f32.partialorder %v422_v61, inf  ;;  %v477_v37 = vand.u32 2147483648, %v422_v61  ;;  %vm476_vm1 = vcmp.eq.f32.partialorder %v422_v61, 0.0 }
 0x133   :  { %v454_v26 = vsel %vm453_vm10, %v828_v49, %v452_v18  ;;  %v481_v28 = vadd.f32 %v480_v19, %v450_v23  ;;  %vm556_vm2 = vcmask 3072  }
 0x134   :  { %v457_v29 = vsel %vm455_vm11, %v456_v24, %v454_v26 }
 0x135   :  { %v613_v14 = vpop.eup %612  ;;  %v482_v31 = vadd.f32 %v481_v28, %v457_v29 }
 0x136   :  { %v615_v22 = vpop.eup %614  ;;  %v466_v25 = vmul.f32 %v613_v14, %v835_v51 }
 0x137   :  { %v459_v27 = vmul.f32 %v615_v22, %v420_v39 }
 0x138   :  { %v468_v11 = vsel %vm467_vm13, %v835_v51, %v466_v25 }
 0x139   :  { %v461_v30 = vsel %vm460_vm12, %v420_v39, %v459_v27  ;;  %v471_v35 = vsel %vm469_vm15, %v470_v33, %v468_v11 }
 0x13a   :  { %v464_v32 = vsel %vm462_vm14, %v463_v0, %v461_v30 }
 0x13b   :  { %v617_v34 = vpop.eup %616  ;;  %v483_v21 = vadd.f32 %v482_v31, %v464_v32 }
 0x13c   :  { %v473_v36 = vmul.f32 %v617_v34, %v422_v61 }
 0x13d   :  { %v484_v40 = vadd.f32 %v483_v21, %v471_v35 }
 0x13e   :  { %v475_v41 = vsel %vm474_vm0, %v422_v61, %v473_v36 }
 0x13f   :  { %v478_v42 = vsel %vm476_vm1, %v477_v37, %v475_v41 }
 0x140   :  { %v485_v43 = vadd.f32 %v484_v40, %v478_v42 }
 0x142   :  { %486 = vadd.xlane.f32.xlu0 %v485_v43 }
 0x1cf   :  { %v487_v46 = vpop.xlane.xlu0 %486 }
 0x1d0   :  { %v488_v47 = vrot.slane %v487_v46, 4 }
 0x1d2   :  { %v489_v48 = vadd.f32 %v488_v47, %v487_v46 }
 0x1d4   :  { %v490_v16 = vrot.slane %v489_v48, 2 }
 0x1d6   :  { %v491_v49 = vadd.f32 %v490_v16, %v489_v48 }
 0x1d8   :  { %v492_v1 = vrot.slane %v491_v49, 1 }
 0x1da   :  { %v493_v6 = vadd.f32 %v492_v1, %v491_v49 }
 0x1dc   :  { %595 = vpush %v493_v6 }
 0x20d   :  { %s596_s30 = spop %595 }
 0x20e   :  { %s497_s4 = smul.f32 0.00012207031, %s596_s30 }
 0x210   :  { %v554_v17 = vstv %s497_s4 }
 0x211   :  { %v555_v20 = vpack.c.bf16 %v554_v17, %v554_v17 }
 0x213   :  { %557 = vst.msk [vmem:[%s879_s3 + $0x10] sm:$0xf] %vm556_vm2, %v555_v20  ;;  %558 = vst.msk [vmem:[%s879_s3 + $0x24] sm:$0xf] %vm556_vm2, %v555_v20 }
 0x214   :  { %559 = vst.msk [vmem:[%s879_s3 + $0x38] sm:$0xf] %vm556_vm2, %v555_v20  ;;  %560 = vst.msk [vmem:[%s879_s3 + $0x4c] sm:$0xf] %vm556_vm2, %v555_v20 }
 0x215   :  { %565 = vsyncpa [#allocation3], 1 }
 0x216   :  { %566 = vsyncpa [#allocation5], 1 }

// kernel: _lambda_.4
= control target key start
LH: loop header
LB: loop body
LE: loop exit
PB: predicated region body
PF: predicated region fallthrough
CT: control target
= control target key end

     0   :  { %8 = vsyncpa [#allocation3], 0  ;;  %s13591_s0 = inlined_call_operand.vmem [shape: bf16[32,4736], index: 0, kind: input, shape index: {}]   ;;  %s13592_s1 = inlined_call_operand.hbm [shape: bf16[4736,512], index: 1, kind: input, shape index: {}]   ;;  %s13593_s2 = inlined_call_operand.hbm [shape: f32[1,512], index: 2, kind: input, shape index: {}]   ;;  %s13594_s3 = inlined_call_operand.vmem [shape: bf16[32,512], index: 3, kind: output, shape index: {}]  }
   0x1   :  { %9 = vsyncpa [#allocation5], 0  ;;  %s13272_s12 = smov [#allocation2]   ;;  %s13224_s16 = scalar_lea.hbm %s13592_s1, 151552 }
   0x2   :  { %s17_s13 = sshll.u32 %s13272_s12, 4  ;;  %p13225_p0 = scmp.ne.s32.totalorder %s13592_s1, %s13224_s16  ;;  %s18_s13 = int_to_ptr.vmem [resolvable:$true] %s17_s13 }
   0x3   :  { %p13228_p1 = scmp.lt.u32.totalorder %s13224_s16, %s13592_s1 }
   0x5   :  { %p13230_p2 = pnand %p13228_p1, %p13225_p0 }
   0x7   :  { %13233 = shalt.err (!%p13230_p2)
}
   0x8   :  { %s13234_s21 = scalar_lea.vmem %s18_s13, 151552  ;;  %p13239_p4 = scmp.lt.s32.totalorder %s18_s13, %s18_s13 }
   0x9   :  { %p13235_p3 = scmp.ne.s32.totalorder %s18_s13, %s13234_s21  ;;  %p13240_p5 = scmp.lt.s32.totalorder %s13234_s21, %s13234_s21 }
   0xb   :  { %p13241_p6 = por %p13240_p5, %p13239_p4 }
   0xd   :  { %p13242_p7 = pnand %p13241_p6, %p13235_p3 }
   0xf   :  { %13245 = shalt.err (!%p13242_p7)
}
  0x10   :  { %s13273_s22 = smov 256   ;;  %s13274_s23 = smov 16  }
  0x11   :  { %23 = dma.hbm_to_vmem [thread:$0]  %s13592_s1, 151552, %s18_s13, [#allocation3], %s13273_s22, %s13273_s22, %s13274_s23  }
  0x12   :  { %s13275_s26 = smov [#allocation4]   ;;  %s13246_s30 = scalar_lea.hbm %s13593_s2, 64 }
  0x13   :  { %s30_s27 = sshll.u32 %s13275_s26, 4  ;;  %p13247_p8 = scmp.ne.s32.totalorder %s13593_s2, %s13246_s30  ;;  %s31_s27 = int_to_ptr.vmem [resolvable:$true] %s30_s27 }
  0x14   :  { %p13250_p9 = scmp.lt.u32.totalorder %s13246_s30, %s13593_s2 }
  0x16   :  { %p13252_p10 = pnand %p13250_p9, %p13247_p8 }
  0x18   :  { %13255 = shalt.err (!%p13252_p10)
}
  0x19   :  { %s13256_s8 = scalar_lea.vmem %s31_s27, 64  ;;  %p13261_p12 = scmp.lt.s32.totalorder %s31_s27, %s31_s27 }
  0x1a   :  { %p13257_p11 = scmp.ne.s32.totalorder %s31_s27, %s13256_s8  ;;  %p13262_p13 = scmp.lt.s32.totalorder %s13256_s8, %s13256_s8 }
  0x1c   :  { %p13263_p0 = por %p13262_p13, %p13261_p12 }
  0x1e   :  { %p13264_p1 = pnand %p13263_p0, %p13257_p11 }
  0x20   :  { %13267 = shalt.err (!%p13264_p1)
}
  0x21   :  { %33 = dma.hbm_to_vmem [thread:$0]  %s13593_s2, 64, %s31_s27, [#allocation5]  }
  0x22   :  { %13268 = dma.done.wait [#allocation3], 151552  }
  0x23   :  { %13269 = vsyncadd [#allocation3], 4294815744 }
  0x24   :  { %13270 = dma.done.wait [#allocation5], 64  }
  0x25   :  { %13271 = vsyncadd [#allocation5], 4294967232  ;;  %v11338_v0 = vld [vmem:[#allocation2 + $0x4] ss:$16 sps:$4 sm:$0xff]   ;;  %v11340_v1 = vld [vmem:[#allocation2 + $0xc] ss:$16 sps:$4 sm:$0xff]  }
  0x26   :  { %7593 = vmatprep.subr.bf16.mxu0 %v11338_v0  ;;  %v11342_v2 = vld [vmem:[#allocation2] ss:$16 sps:$4 sm:$0xff]   ;;  %v11343_v3 = vld [vmem:[#allocation2 + $0x8] ss:$16 sps:$4 sm:$0xff]   ;;  %8600 = vmatprep.subr.bf16.mxu1 %v11340_v1  ;;  %v11344_v4 = vld [vmem:[#allocation2 + $0x24] ss:$16 sps:$4 sm:$0xff]  }
  0x27   :  { %7594 = vmatpush1.bf16.msra.mxu0 %v11342_v2  ;;  %8601 = vmatpush1.bf16.msra.mxu1 %v11343_v3  ;;  %v11346_v5 = vld [vmem:[#allocation2 + $0x2c] ss:$16 sps:$4 sm:$0xff]   ;;  %v11348_v6 = vld [vmem:[#allocation2 + $0x20] ss:$16 sps:$4 sm:$0xff]   ;;  %v11349_v7 = vld [vmem:[#allocation2 + $0x28] ss:$16 sps:$4 sm:$0xff]  }
  0x28   :  { %7595 = vmatprep.subr.bf16.mxu0 %v11344_v4  ;;  %8602 = vmatprep.subr.bf16.mxu1 %v11346_v5  ;;  %v11350_v8 = vld [vmem:[#allocation2 + $0x44] ss:$16 sps:$4 sm:$0xff]   ;;  %v11352_v9 = vld [vmem:[#allocation2 + $0x4c] ss:$16 sps:$4 sm:$0xff]   ;;  %v11354_v10 = vld [vmem:[#allocation2 + $0x40] ss:$16 sps:$4 sm:$0xff]  }
  0x29   :  { %v11355_v11 = vld [vmem:[#allocation2 + $0x48] ss:$16 sps:$4 sm:$0xff]   ;;  %v11356_v12 = vld [vmem:[#allocation2 + $0x64] ss:$16 sps:$4 sm:$0xff]   ;;  %v11358_v13 = vld [vmem:[#allocation2 + $0x6c] ss:$16 sps:$4 sm:$0xff]  }
  0x2a   :  { %v11360_v14 = vld [vmem:[#allocation2 + $0x60] ss:$16 sps:$4 sm:$0xff]   ;;  %v11361_v15 = vld [vmem:[#allocation2 + $0x68] ss:$16 sps:$4 sm:$0xff]   ;;  %v11362_v16 = vld [vmem:[#allocation2 + $0x84] ss:$16 sps:$4 sm:$0xff]  }
  0x2b   :  { %7596 = vmatpush1.bf16.msra.mxu0 %v11348_v6  ;;  %8603 = vmatpush1.bf16.msra.mxu1 %v11349_v7  ;;  %v11364_v17 = vld [vmem:[#allocation2 + $0x8c] ss:$16 sps:$4 sm:$0xff]   ;;  %v11366_v18 = vld [vmem:[#allocation2 + $0x80] ss:$16 sps:$4 sm:$0xff]   ;;  %v11367_v19 = vld [vmem:[#allocation2 + $0x88] ss:$16 sps:$4 sm:$0xff]  }
  0x2c   :  { %7597 = vmatprep.subr.bf16.mxu0 %v11350_v8  ;;  %8604 = vmatprep.subr.bf16.mxu1 %v11352_v9  ;;  %v11368_v20 = vld [vmem:[#allocation2 + $0xa4] ss:$16 sps:$4 sm:$0xff]   ;;  %v11370_v21 = vld [vmem:[#allocation2 + $0xac] ss:$16 sps:$4 sm:$0xff]   ;;  %v11372_v22 = vld [vmem:[#allocation2 + $0xa0] ss:$16 sps:$4 sm:$0xff]  }
  0x2d   :  { %v11373_v23 = vld [vmem:[#allocation2 + $0xa8] ss:$16 sps:$4 sm:$0xff]   ;;  %v11374_v24 = vld [vmem:[#allocation2 + $0xc4] ss:$16 sps:$4 sm:$0xff]   ;;  %v11376_v25 = vld [vmem:[#allocation2 + $0xcc] ss:$16 sps:$4 sm:$0xff]  }
  0x2e   :  { %v11378_v26 = vld [vmem:[#allocation2 + $0xc0] ss:$16 sps:$4 sm:$0xff]   ;;  %v11379_v27 = vld [vmem:[#allocation2 + $0xc8] ss:$16 sps:$4 sm:$0xff]   ;;  %v11380_v28 = vld [vmem:[#allocation2 + $0xe4] ss:$16 sps:$4 sm:$0xff]  }
  0x2f   :  { %7598 = vmatpush1.bf16.msra.mxu0 %v11354_v10  ;;  %8605 = vmatpush1.bf16.msra.mxu1 %v11355_v11  ;;  %v11382_v29 = vld [vmem:[#allocation2 + $0xec] ss:$16 sps:$4 sm:$0xff]   ;;  %v11384_v30 = vld [vmem:[#allocation2 + $0xe0] ss:$16 sps:$4 sm:$0xff]   ;;  %v11385_v31 = vld [vmem:[#allocation2 + $0xe8] ss:$16 sps:$4 sm:$0xff]  }
  0x30   :  { %7599 = vmatprep.subr.bf16.mxu0 %v11356_v12  ;;  %8606 = vmatprep.subr.bf16.mxu1 %v11358_v13  ;;  %v11386_v32 = vld [vmem:[#allocation2 + $0x104] ss:$16 sps:$4 sm:$0xff]   ;;  %v11388_v33 = vld [vmem:[#allocation2 + $0x10c] ss:$16 sps:$4 sm:$0xff]   ;;  %v11390_v34 = vld [vmem:[#allocation2 + $0x100] ss:$16 sps:$4 sm:$0xff]  }
  0x31   :  { %v11391_v35 = vld [vmem:[#allocation2 + $0x108] ss:$16 sps:$4 sm:$0xff]   ;;  %v11392_v36 = vld [vmem:[#allocation2 + $0x124] ss:$16 sps:$4 sm:$0xff]   ;;  %v11394_v37 = vld [vmem:[#allocation2 + $0x12c] ss:$16 sps:$4 sm:$0xff]  }
  0x32   :  { %v11396_v38 = vld [vmem:[#allocation2 + $0x120] ss:$16 sps:$4 sm:$0xff]   ;;  %v11397_v39 = vld [vmem:[#allocation2 + $0x128] ss:$16 sps:$4 sm:$0xff]   ;;  %v11398_v40 = vld [vmem:[#allocation2 + $0x144] ss:$16 sps:$4 sm:$0xff]  }
  0x33   :  { %7600 = vmatpush1.bf16.msra.mxu0 %v11360_v14  ;;  %8607 = vmatpush1.bf16.msra.mxu1 %v11361_v15  ;;  %v11400_v41 = vld [vmem:[#allocation2 + $0x14c] ss:$16 sps:$4 sm:$0xff]   ;;  %v11402_v42 = vld [vmem:[#allocation2 + $0x140] ss:$16 sps:$4 sm:$0xff]   ;;  %v11403_v43 = vld [vmem:[#allocation2 + $0x148] ss:$16 sps:$4 sm:$0xff]  }
  0x34   :  { %7601 = vmatprep.subr.bf16.mxu0 %v11362_v16  ;;  %8608 = vmatprep.subr.bf16.mxu1 %v11364_v17  ;;  %v11404_v44 = vld [vmem:[#allocation2 + $0x164] ss:$16 sps:$4 sm:$0xff]   ;;  %v11406_v45 = vld [vmem:[#allocation2 + $0x16c] ss:$16 sps:$4 sm:$0xff]   ;;  %v11408_v46 = vld [vmem:[#allocation2 + $0x160] ss:$16 sps:$4 sm:$0xff]  }
  0x35   :  { %v11409_v47 = vld [vmem:[#allocation2 + $0x168] ss:$16 sps:$4 sm:$0xff]   ;;  %v11410_v49 = vld [vmem:[#allocation2 + $0x184] ss:$16 sps:$4 sm:$0xff]   ;;  %v11412_v50 = vld [vmem:[#allocation2 + $0x18c] ss:$16 sps:$4 sm:$0xff]  }
  0x36   :  { %v11436_v48 = vld [vmem:[%s13591_s0 + $0x4] ss:$148 sps:$4 sm:$0xff]   ;;  %v11414_v51 = vld [vmem:[#allocation2 + $0x180] ss:$16 sps:$4 sm:$0xff]   ;;  %v11418_v54 = vld [vmem:[#allocation2 + $0x1ac] ss:$16 sps:$4 sm:$0xff]  }
  0x37   :  { %7602 = vmatpush1.bf16.msra.mxu0 %v11366_v18  ;;  %8609 = vmatpush1.bf16.msra.mxu1 %v11367_v19  ;;  %v11415_v52 = vld [vmem:[#allocation2 + $0x188] ss:$16 sps:$4 sm:$0xff]   ;;  %v11416_v53 = vld [vmem:[#allocation2 + $0x1a4] ss:$16 sps:$4 sm:$0xff]   ;;  %v11420_v55 = vld [vmem:[#allocation2 + $0x1a0] ss:$16 sps:$4 sm:$0xff]  }
  0x38   :  { %7603 = vmatprep.subr.bf16.mxu0 %v11368_v20  ;;  %8610 = vmatprep.subr.bf16.mxu1 %v11370_v21  ;;  %v11421_v56 = vld [vmem:[#allocation2 + $0x1a8] ss:$16 sps:$4 sm:$0xff]   ;;  %v11422_v57 = vld [vmem:[#allocation2 + $0x1c4] ss:$16 sps:$4 sm:$0xff]   ;;  %v11424_v58 = vld [vmem:[#allocation2 + $0x1cc] ss:$16 sps:$4 sm:$0xff]  }
  0x39   :  { %7625 = vmatprep.mubr.bf16.mxu0 %v11436_v48  ;;  %8632 = vmatprep.mubr.bf16.mxu1 %v11436_v48  ;;  %v11426_v59 = vld [vmem:[#allocation2 + $0x1c0] ss:$16 sps:$4 sm:$0xff]   ;;  %v11427_v60 = vld [vmem:[#allocation2 + $0x1c8] ss:$16 sps:$4 sm:$0xff]   ;;  %v11428_v61 = vld [vmem:[#allocation2 + $0x1e4] ss:$16 sps:$4 sm:$0xff]  }
  0x3a   :  { %v11430_v62 = vld [vmem:[#allocation2 + $0x1ec] ss:$16 sps:$4 sm:$0xff]   ;;  %v11432_v63 = vld [vmem:[#allocation2 + $0x1e0] ss:$16 sps:$4 sm:$0xff]   ;;  %v11433_v0 = vld [vmem:[#allocation2 + $0x1e8] ss:$16 sps:$4 sm:$0xff]  }
  0x3b   :  { %7604 = vmatpush1.bf16.msra.mxu0 %v11372_v22  ;;  %8611 = vmatpush1.bf16.msra.mxu1 %v11373_v23  ;;  %v11439_v1 = vld [vmem:[#allocation2 + $0x204] ss:$16 sps:$4 sm:$0xff]   ;;  %v11442_v2 = vld [vmem:[#allocation2 + $0x20c] ss:$16 sps:$4 sm:$0xff]   ;;  %v11437_v4 = vld [vmem:[#allocation2 + $0x200] ss:$16 sps:$4 sm:$0xff]  }
  0x3c   :  { %7605 = vmatprep.subr.bf16.mxu0 %v11374_v24  ;;  %8612 = vmatprep.subr.bf16.mxu1 %v11376_v25  ;;  %v11434_v3 = vld [vmem:[%s13591_s0] ss:$148 sps:$4 sm:$0xff]   ;;  %v11440_v5 = vld [vmem:[#allocation2 + $0x208] ss:$16 sps:$4 sm:$0xff]   ;;  %v11448_v7 = vld [vmem:[#allocation2 + $0x22c] ss:$16 sps:$4 sm:$0xff]  }
  0x3d   :  { %v11445_v6 = vld [vmem:[#allocation2 + $0x224] ss:$16 sps:$4 sm:$0xff]   ;;  %v11443_v8 = vld [vmem:[#allocation2 + $0x220] ss:$16 sps:$4 sm:$0xff]   ;;  %v11446_v9 = vld [vmem:[#allocation2 + $0x228] ss:$16 sps:$4 sm:$0xff]  }
  0x3e   :  { %v11451_v10 = vld [vmem:[#allocation2 + $0x244] ss:$16 sps:$4 sm:$0xff]   ;;  %v11454_v11 = vld [vmem:[#allocation2 + $0x24c] ss:$16 sps:$4 sm:$0xff]   ;;  %v11449_v12 = vld [vmem:[#allocation2 + $0x240] ss:$16 sps:$4 sm:$0xff]  }
  0x3f   :  { %7606 = vmatpush1.bf16.msra.mxu0 %v11378_v26  ;;  %8613 = vmatpush1.bf16.msra.mxu1 %v11379_v27  ;;  %v11452_v13 = vld [vmem:[#allocation2 + $0x248] ss:$16 sps:$4 sm:$0xff]   ;;  %v11457_v14 = vld [vmem:[#allocation2 + $0x264] ss:$16 sps:$4 sm:$0xff]   ;;  %v11460_v15 = vld [vmem:[#allocation2 + $0x26c] ss:$16 sps:$4 sm:$0xff]  }
  0x40   :  { %7607 = vmatprep.subr.bf16.mxu0 %v11380_v28  ;;  %8614 = vmatprep.subr.bf16.mxu1 %v11382_v29  ;;  %v11455_v16 = vld [vmem:[#allocation2 + $0x260] ss:$16 sps:$4 sm:$0xff]   ;;  %v11458_v17 = vld [vmem:[#allocation2 + $0x268] ss:$16 sps:$4 sm:$0xff]   ;;  %v11463_v18 = vld [vmem:[#allocation2 + $0x284] ss:$16 sps:$4 sm:$0xff]  }
  0x41   :  { %v11466_v19 = vld [vmem:[#allocation2 + $0x28c] ss:$16 sps:$4 sm:$0xff]   ;;  %v11461_v20 = vld [vmem:[#allocation2 + $0x280] ss:$16 sps:$4 sm:$0xff]   ;;  %v11464_v21 = vld [vmem:[#allocation2 + $0x288] ss:$16 sps:$4 sm:$0xff]  }
  0x42   :  { %v11469_v22 = vld [vmem:[#allocation2 + $0x2a4] ss:$16 sps:$4 sm:$0xff]   ;;  %v11472_v23 = vld [vmem:[#allocation2 + $0x2ac] ss:$16 sps:$4 sm:$0xff]   ;;  %v11467_v25 = vld [vmem:[#allocation2 + $0x2a0] ss:$16 sps:$4 sm:$0xff]  }
  0x43   :  { %7608 = vmatpush1.bf16.msra.mxu0 %v11384_v30  ;;  %8615 = vmatpush1.bf16.msra.mxu1 %v11385_v31  ;;  %v11521_v24 = vld [vmem:[%s13591_s0 + $0x12c] ss:$148 sps:$4 sm:$0xff]   ;;  %v11470_v26 = vld [vmem:[#allocation2 + $0x2a8] ss:$16 sps:$4 sm:$0xff]   ;;  %v11475_v27 = vld [vmem:[#allocation2 + $0x2c4] ss:$16 sps:$4 sm:$0xff]  }
  0x44   :  { %7609 = vmatprep.subr.bf16.mxu0 %v11386_v32  ;;  %8616 = vmatprep.subr.bf16.mxu1 %v11388_v33  ;;  %v11478_v28 = vld [vmem:[#allocation2 + $0x2cc] ss:$16 sps:$4 sm:$0xff]   ;;  %v11473_v30 = vld [vmem:[#allocation2 + $0x2c0] ss:$16 sps:$4 sm:$0xff]   ;;  %v11476_v31 = vld [vmem:[#allocation2 + $0x2c8] ss:$16 sps:$4 sm:$0xff]  }
  0x45   :  { %v11529_v29 = vld [vmem:[%s13591_s0 + $0x128] ss:$148 sps:$4 sm:$0xff]   ;;  %v11481_v32 = vld [vmem:[#allocation2 + $0x2e4] ss:$16 sps:$4 sm:$0xff]  }
  0x46   :  { %v11484_v33 = vld [vmem:[#allocation2 + $0x2ec] ss:$16 sps:$4 sm:$0xff]   ;;  %v11500_v48 = vld [vmem:[#allocation2 + $0x348] ss:$16 sps:$4 sm:$0xff]  }
  0x47   :  { %7610 = vmatpush1.bf16.msra.mxu0 %v11390_v34  ;;  %8617 = vmatpush1.bf16.msra.mxu1 %v11391_v35  ;;  %v11538_v34 = vld [vmem:[%s13591_s0 + $0xc] ss:$148 sps:$4 sm:$0xff]  }
  0x48   :  { %7611 = vmatprep.subr.bf16.mxu0 %v11392_v36  ;;  %8618 = vmatprep.subr.bf16.mxu1 %v11394_v37  ;;  %v11479_v35 = vld [vmem:[#allocation2 + $0x2e0] ss:$16 sps:$4 sm:$0xff]   ;;  %v11482_v36 = vld [vmem:[#allocation2 + $0x2e8] ss:$16 sps:$4 sm:$0xff]   ;;  %v11487_v37 = vld [vmem:[#allocation2 + $0x304] ss:$16 sps:$4 sm:$0xff]  }
  0x4b   :  { %7612 = vmatpush1.bf16.msra.mxu0 %v11396_v38  ;;  %8619 = vmatpush1.bf16.msra.mxu1 %v11397_v39  ;;  %v11490_v38 = vld [vmem:[#allocation2 + $0x30c] ss:$16 sps:$4 sm:$0xff]   ;;  %v11485_v39 = vld [vmem:[#allocation2 + $0x300] ss:$16 sps:$4 sm:$0xff]  }
  0x4c   :  { %7613 = vmatprep.subr.bf16.mxu0 %v11398_v40  ;;  %8620 = vmatprep.subr.bf16.mxu1 %v11400_v41  ;;  %v11488_v40 = vld [vmem:[#allocation2 + $0x308] ss:$16 sps:$4 sm:$0xff]   ;;  %v11493_v41 = vld [vmem:[#allocation2 + $0x324] ss:$16 sps:$4 sm:$0xff]  }
  0x4f   :  { %7614 = vmatpush1.bf16.msra.mxu0 %v11402_v42  ;;  %8621 = vmatpush1.bf16.msra.mxu1 %v11403_v43  ;;  %v11496_v42 = vld [vmem:[#allocation2 + $0x32c] ss:$16 sps:$4 sm:$0xff]   ;;  %v11491_v43 = vld [vmem:[#allocation2 + $0x320] ss:$16 sps:$4 sm:$0xff]  }
  0x50   :  { %7615 = vmatprep.subr.bf16.mxu0 %v11404_v44  ;;  %8622 = vmatprep.subr.bf16.mxu1 %v11406_v45  ;;  %v11494_v44 = vld [vmem:[#allocation2 + $0x328] ss:$16 sps:$4 sm:$0xff]   ;;  %v11499_v45 = vld [vmem:[#allocation2 + $0x344] ss:$16 sps:$4 sm:$0xff]  }
  0x53   :  { %7616 = vmatpush1.bf16.msra.mxu0 %v11408_v46  ;;  %8623 = vmatpush1.bf16.msra.mxu1 %v11409_v47  ;;  %v11502_v46 = vld [vmem:[#allocation2 + $0x34c] ss:$16 sps:$4 sm:$0xff]   ;;  %v11497_v47 = vld [vmem:[#allocation2 + $0x340] ss:$16 sps:$4 sm:$0xff]  }
  0x54   :  { %7617 = vmatprep.subr.bf16.mxu0 %v11410_v49  ;;  %8624 = vmatprep.subr.bf16.mxu1 %v11412_v50  ;;  %v11505_v49 = vld [vmem:[#allocation2 + $0x364] ss:$16 sps:$4 sm:$0xff]   ;;  %v11508_v50 = vld [vmem:[#allocation2 + $0x36c] ss:$16 sps:$4 sm:$0xff]  }
  0x57   :  { %7618 = vmatpush1.bf16.msra.mxu0 %v11414_v51  ;;  %8625 = vmatpush1.bf16.msra.mxu1 %v11415_v52  ;;  %v11503_v51 = vld [vmem:[#allocation2 + $0x360] ss:$16 sps:$4 sm:$0xff]   ;;  %v11506_v52 = vld [vmem:[#allocation2 + $0x368] ss:$16 sps:$4 sm:$0xff]  }
  0x58   :  { %7619 = vmatprep.subr.bf16.mxu0 %v11416_v53  ;;  %8626 = vmatprep.subr.bf16.mxu1 %v11418_v54  ;;  %v11511_v53 = vld [vmem:[#allocation2 + $0x384] ss:$16 sps:$4 sm:$0xff]   ;;  %v11514_v54 = vld [vmem:[#allocation2 + $0x38c] ss:$16 sps:$4 sm:$0xff]  }
  0x5b   :  { %7620 = vmatpush1.bf16.msra.mxu0 %v11420_v55  ;;  %8627 = vmatpush1.bf16.msra.mxu1 %v11421_v56  ;;  %v11509_v55 = vld [vmem:[#allocation2 + $0x380] ss:$16 sps:$4 sm:$0xff]   ;;  %v11512_v56 = vld [vmem:[#allocation2 + $0x388] ss:$16 sps:$4 sm:$0xff]  }
  0x5c   :  { %7621 = vmatprep.subr.bf16.mxu0 %v11422_v57  ;;  %8628 = vmatprep.subr.bf16.mxu1 %v11424_v58  ;;  %v11517_v57 = vld [vmem:[#allocation2 + $0x3a4] ss:$16 sps:$4 sm:$0xff]   ;;  %v11520_v58 = vld [vmem:[#allocation2 + $0x3ac] ss:$16 sps:$4 sm:$0xff]  }
  0x5f   :  { %7622 = vmatpush1.bf16.msra.mxu0 %v11426_v59  ;;  %8629 = vmatpush1.bf16.msra.mxu1 %v11427_v60  ;;  %v11515_v59 = vld [vmem:[#allocation2 + $0x3a0] ss:$16 sps:$4 sm:$0xff]   ;;  %v11518_v60 = vld [vmem:[#allocation2 + $0x3a8] ss:$16 sps:$4 sm:$0xff]  }
  0x60   :  { %7623 = vmatprep.subr.bf16.mxu0 %v11428_v61  ;;  %8630 = vmatprep.subr.bf16.mxu1 %v11430_v62  ;;  %v11525_v61 = vld [vmem:[#allocation2 + $0x3c4] ss:$16 sps:$4 sm:$0xff]   ;;  %v11528_v62 = vld [vmem:[#allocation2 + $0x3cc] ss:$16 sps:$4 sm:$0xff]  }
  0x63   :  { %7624 = vmatpush1.bf16.msra.mxu0 %v11432_v63  ;;  %8631 = vmatpush1.bf16.msra.mxu1 %v11433_v0  ;;  %v11523_v63 = vld [vmem:[#allocation2 + $0x3c0] ss:$16 sps:$4 sm:$0xff]   ;;  %v11526_v0 = vld [vmem:[#allocation2 + $0x3c8] ss:$16 sps:$4 sm:$0xff]  }
  0x64   :  { %7646 = vmatprep.subr.bf16.mxu0 %v11439_v1  ;;  %8653 = vmatprep.subr.bf16.mxu1 %v11442_v2  ;;  %v11532_v1 = vld [vmem:[#allocation2 + $0x3e4] ss:$16 sps:$4 sm:$0xff]   ;;  %v11535_v2 = vld [vmem:[#allocation2 + $0x3ec] ss:$16 sps:$4 sm:$0xff]  }
  0x66   :  { %7626 = vmatmul.mubr.bf16.vlgmr.msra.gmra.mrb[0].mxu0 %v11434_v3  ;;  %8633 = vmatmul.mubr.bf16.vlgmr.msra.gmra.mrb[0].mxu1 %v11434_v3  ;;  %v11530_v3 = vld [vmem:[#allocation2 + $0x3e0] ss:$16 sps:$4 sm:$0xff]  }
  0x67   :  { %7647 = vmatpush1.bf16.msra.mxu0 %v11437_v4  ;;  %8654 = vmatpush1.bf16.msra.mxu1 %v11440_v5  ;;  %v11533_v4 = vld [vmem:[#allocation2 + $0x3e8] ss:$16 sps:$4 sm:$0xff]   ;;  %v11541_v5 = vld [vmem:[#allocation2 + $0x404] ss:$16 sps:$4 sm:$0xff]  }
  0x68   :  { %7648 = vmatprep.subr.bf16.mxu0 %v11445_v6  ;;  %8655 = vmatprep.subr.bf16.mxu1 %v11448_v7  ;;  %v11544_v6 = vld [vmem:[#allocation2 + $0x40c] ss:$16 sps:$4 sm:$0xff]  }
  0x69   :  { %7635 = vmatprep.mubr.bf16.mxu0 %v11521_v24  ;;  %8642 = vmatprep.mubr.bf16.mxu1 %v11521_v24  ;;  %v11536_v7 = vld [vmem:[%s13591_s0 + $0x8] ss:$148 sps:$4 sm:$0xff]  }
  0x6a   :  { %v11560_v24 = vld [vmem:[#allocation2 + $0x468] ss:$16 sps:$4 sm:$0xff]  }
  0x6b   :  { %7649 = vmatpush1.bf16.msra.mxu0 %v11443_v8  ;;  %8656 = vmatpush1.bf16.msra.mxu1 %v11446_v9  ;;  %v11539_v8 = vld [vmem:[#allocation2 + $0x400] ss:$16 sps:$4 sm:$0xff]   ;;  %v11542_v9 = vld [vmem:[#allocation2 + $0x408] ss:$16 sps:$4 sm:$0xff]  }
  0x6c   :  { %7650 = vmatprep.subr.bf16.mxu0 %v11451_v10  ;;  %8657 = vmatprep.subr.bf16.mxu1 %v11454_v11  ;;  %v11547_v10 = vld [vmem:[#allocation2 + $0x424] ss:$16 sps:$4 sm:$0xff]   ;;  %v11550_v11 = vld [vmem:[#allocation2 + $0x42c] ss:$16 sps:$4 sm:$0xff]  }
  0x6e   :  { %7636 = vmatmul.mubr.bf16.gmra.mrb[4].mxu0 %v11529_v29  ;;  %8643 = vmatmul.mubr.bf16.gmra.mrb[4].mxu1 %v11529_v29  ;;  %v11571_v29 = vld [vmem:[#allocation2 + $0x4a4] ss:$16 sps:$4 sm:$0xff]  }
  0x6f   :  { %7651 = vmatpush1.bf16.msra.mxu0 %v11449_v12  ;;  %8658 = vmatpush1.bf16.msra.mxu1 %v11452_v13  ;;  %v11623_v12 = vld [vmem:[%s13591_s0 + $0x134] ss:$148 sps:$4 sm:$0xff]   ;;  %v11545_v13 = vld [vmem:[#allocation2 + $0x420] ss:$16 sps:$4 sm:$0xff]  }
  0x70   :  { %7652 = vmatprep.subr.bf16.mxu0 %v11457_v14  ;;  %8659 = vmatprep.subr.bf16.mxu1 %v11460_v15  ;;  %v11548_v14 = vld [vmem:[#allocation2 + $0x428] ss:$16 sps:$4 sm:$0xff]   ;;  %v11553_v15 = vld [vmem:[#allocation2 + $0x444] ss:$16 sps:$4 sm:$0xff]  }
  0x71   :  { %7678 = vmatprep.mubr.bf16.mxu0 %v11538_v34  ;;  %8685 = vmatprep.mubr.bf16.mxu1 %v11538_v34  ;;  %v11580_v34 = vld [vmem:[#allocation2 + $0x4cc] ss:$16 sps:$4 sm:$0xff]  }
  0x73   :  { %7653 = vmatpush1.bf16.msra.mxu0 %v11455_v16  ;;  %8660 = vmatpush1.bf16.msra.mxu1 %v11458_v17  ;;  %v11556_v16 = vld [vmem:[#allocation2 + $0x44c] ss:$16 sps:$4 sm:$0xff]   ;;  %v11551_v17 = vld [vmem:[#allocation2 + $0x440] ss:$16 sps:$4 sm:$0xff]  }
  0x74   :  { %7654 = vmatprep.subr.bf16.mxu0 %v11463_v18  ;;  %8661 = vmatprep.subr.bf16.mxu1 %v11466_v19  ;;  %v11554_v18 = vld [vmem:[#allocation2 + $0x448] ss:$16 sps:$4 sm:$0xff]   ;;  %v11631_v19 = vld [vmem:[%s13591_s0 + $0x130] ss:$148 sps:$4 sm:$0xff]  }
  0x77   :  { %7655 = vmatpush1.bf16.msra.mxu0 %v11461_v20  ;;  %8662 = vmatpush1.bf16.msra.mxu1 %v11464_v21  ;;  %v11559_v20 = vld [vmem:[#allocation2 + $0x464] ss:$16 sps:$4 sm:$0xff]   ;;  %v11562_v21 = vld [vmem:[#allocation2 + $0x46c] ss:$16 sps:$4 sm:$0xff]  }
  0x78   :  { %7656 = vmatprep.subr.bf16.mxu0 %v11469_v22  ;;  %8663 = vmatprep.subr.bf16.mxu1 %v11472_v23  ;;  %v11640_v22 = vld [vmem:[%s13591_s0 + $0x14] ss:$148 sps:$4 sm:$0xff]   ;;  %v11557_v23 = vld [vmem:[#allocation2 + $0x460] ss:$16 sps:$4 sm:$0xff]  }
  0x7b   :  { %7657 = vmatpush1.bf16.msra.mxu0 %v11467_v25  ;;  %8664 = vmatpush1.bf16.msra.mxu1 %v11470_v26  ;;  %v11565_v25 = vld [vmem:[#allocation2 + $0x484] ss:$16 sps:$4 sm:$0xff]   ;;  %v11568_v26 = vld [vmem:[#allocation2 + $0x48c] ss:$16 sps:$4 sm:$0xff]  }
  0x7c   :  { %7658 = vmatprep.subr.bf16.mxu0 %v11475_v27  ;;  %8665 = vmatprep.subr.bf16.mxu1 %v11478_v28  ;;  %v11563_v27 = vld [vmem:[#allocation2 + $0x480] ss:$16 sps:$4 sm:$0xff]   ;;  %v11566_v28 = vld [vmem:[#allocation2 + $0x488] ss:$16 sps:$4 sm:$0xff]  }
  0x7f   :  { %7659 = vmatpush1.bf16.msra.mxu0 %v11473_v30  ;;  %8666 = vmatpush1.bf16.msra.mxu1 %v11476_v31  ;;  %v11574_v30 = vld [vmem:[#allocation2 + $0x4ac] ss:$16 sps:$4 sm:$0xff]   ;;  %v11569_v31 = vld [vmem:[#allocation2 + $0x4a0] ss:$16 sps:$4 sm:$0xff]  }
  0x80   :  { %7660 = vmatprep.subr.bf16.mxu0 %v11481_v32  ;;  %8667 = vmatprep.subr.bf16.mxu1 %v11484_v33  ;;  %v11572_v32 = vld [vmem:[#allocation2 + $0x4a8] ss:$16 sps:$4 sm:$0xff]   ;;  %v11577_v33 = vld [vmem:[#allocation2 + $0x4c4] ss:$16 sps:$4 sm:$0xff]  }
  0x83   :  { %7661 = vmatpush1.bf16.msra.mxu0 %v11479_v35  ;;  %8668 = vmatpush1.bf16.msra.mxu1 %v11482_v36  ;;  %v11575_v35 = vld [vmem:[#allocation2 + $0x4c0] ss:$16 sps:$4 sm:$0xff]   ;;  %v11578_v36 = vld [vmem:[#allocation2 + $0x4c8] ss:$16 sps:$4 sm:$0xff]  }
  0x84   :  { %7662 = vmatprep.subr.bf16.mxu0 %v11487_v37  ;;  %8669 = vmatprep.subr.bf16.mxu1 %v11490_v38  ;;  %v11583_v37 = vld [vmem:[#allocation2 + $0x4e4] ss:$16 sps:$4 sm:$0xff]   ;;  %v11586_v38 = vld [vmem:[#allocation2 + $0x4ec] ss:$16 sps:$4 sm:$0xff]  }
  0x87   :  { %7663 = vmatpush1.bf16.msra.mxu0 %v11485_v39  ;;  %8670 = vmatpush1.bf16.msra.mxu1 %v11488_v40  ;;  %v11581_v39 = vld [vmem:[#allocation2 + $0x4e0] ss:$16 sps:$4 sm:$0xff]   ;;  %v11584_v40 = vld [vmem:[#allocation2 + $0x4e8] ss:$16 sps:$4 sm:$0xff]  }
  0x88   :  { %7664 = vmatprep.subr.bf16.mxu0 %v11493_v41  ;;  %8671 = vmatprep.subr.bf16.mxu1 %v11496_v42  ;;  %v11589_v41 = vld [vmem:[#allocation2 + $0x504] ss:$16 sps:$4 sm:$0xff]   ;;  %v11592_v42 = vld [vmem:[#allocation2 + $0x50c] ss:$16 sps:$4 sm:$0xff]  }
  0x8b   :  { %7665 = vmatpush1.bf16.msra.mxu0 %v11491_v43  ;;  %8672 = vmatpush1.bf16.msra.mxu1 %v11494_v44  ;;  %v11587_v43 = vld [vmem:[#allocation2 + $0x500] ss:$16 sps:$4 sm:$0xff]   ;;  %v11590_v44 = vld [vmem:[#allocation2 + $0x508] ss:$16 sps:$4 sm:$0xff]  }
  0x8c   :  { %7666 = vmatprep.subr.bf16.mxu0 %v11499_v45  ;;  %8673 = vmatprep.subr.bf16.mxu1 %v11502_v46  ;;  %v11595_v45 = vld [vmem:[#allocation2 + $0x524] ss:$16 sps:$4 sm:$0xff]   ;;  %v11598_v46 = vld [vmem:[#allocation2 + $0x52c] ss:$16 sps:$4 sm:$0xff]  }
  0x8f   :  { %7667 = vmatpush1.bf16.msra.mxu0 %v11497_v47  ;;  %8674 = vmatpush1.bf16.msra.mxu1 %v11500_v48  ;;  %v11593_v47 = vld [vmem:[#allocation2 + $0x520] ss:$16 sps:$4 sm:$0xff]   ;;  %v11596_v48 = vld [vmem:[#allocation2 + $0x528] ss:$16 sps:$4 sm:$0xff]  }
  0x90   :  { %7668 = vmatprep.subr.bf16.mxu0 %v11505_v49  ;;  %8675 = vmatprep.subr.bf16.mxu1 %v11508_v50  ;;  %v11601_v49 = vld [vmem:[#allocation2 + $0x544] ss:$16 sps:$4 sm:$0xff]   ;;  %v11604_v50 = vld [vmem:[#allocation2 + $0x54c] ss:$16 sps:$4 sm:$0xff]  }
  0x93   :  { %7669 = vmatpush1.bf16.msra.mxu0 %v11503_v51  ;;  %8676 = vmatpush1.bf16.msra.mxu1 %v11506_v52  ;;  %v11599_v51 = vld [vmem:[#allocation2 + $0x540] ss:$16 sps:$4 sm:$0xff]   ;;  %v11602_v52 = vld [vmem:[#allocation2 + $0x548] ss:$16 sps:$4 sm:$0xff]  }
  0x94   :  { %7670 = vmatprep.subr.bf16.mxu0 %v11511_v53  ;;  %8677 = vmatprep.subr.bf16.mxu1 %v11514_v54  ;;  %v11607_v53 = vld [vmem:[#allocation2 + $0x564] ss:$16 sps:$4 sm:$0xff]   ;;  %v11610_v54 = vld [vmem:[#allocation2 + $0x56c] ss:$16 sps:$4 sm:$0xff]  }
  0x97   :  { %7671 = vmatpush1.bf16.msra.mxu0 %v11509_v55  ;;  %8678 = vmatpush1.bf16.msra.mxu1 %v11512_v56  ;;  %v11605_v55 = vld [vmem:[#allocation2 + $0x560] ss:$16 sps:$4 sm:$0xff]   ;;  %v11608_v56 = vld [vmem:[#allocation2 + $0x568] ss:$16 sps:$4 sm:$0xff]  }
  0x98   :  { %7672 = vmatprep.subr.bf16.mxu0 %v11517_v57  ;;  %8679 = vmatprep.subr.bf16.mxu1 %v11520_v58  ;;  %v11613_v57 = vld [vmem:[#allocation2 + $0x584] ss:$16 sps:$4 sm:$0xff]   ;;  %v11616_v58 = vld [vmem:[#allocation2 + $0x58c] ss:$16 sps:$4 sm:$0xff]  }
  0x9b   :  { %7673 = vmatpush1.bf16.msra.mxu0 %v11515_v59  ;;  %8680 = vmatpush1.bf16.msra.mxu1 %v11518_v60  ;;  %v11611_v59 = vld [vmem:[#allocation2 + $0x580] ss:$16 sps:$4 sm:$0xff]   ;;  %v11614_v60 = vld [vmem:[#allocation2 + $0x588] ss:$16 sps:$4 sm:$0xff]  }
  0x9c   :  { %7674 = vmatprep.subr.bf16.mxu0 %v11525_v61  ;;  %8681 = vmatprep.subr.bf16.mxu1 %v11528_v62  ;;  %v11619_v61 = vld [vmem:[#allocation2 + $0x5a4] ss:$16 sps:$4 sm:$0xff]   ;;  %v11622_v62 = vld [vmem:[#allocation2 + $0x5ac] ss:$16 sps:$4 sm:$0xff]  }
  0x9f   :  { %7675 = vmatpush1.bf16.msra.mxu0 %v11523_v63  ;;  %8682 = vmatpush1.bf16.msra.mxu1 %v11526_v0  ;;  %v11617_v63 = vld [vmem:[#allocation2 + $0x5a0] ss:$16 sps:$4 sm:$0xff]   ;;  %v11620_v0 = vld [vmem:[#allocation2 + $0x5a8] ss:$16 sps:$4 sm:$0xff]  }
  0xa0   :  { %7676 = vmatprep.subr.bf16.mxu0 %v11532_v1  ;;  %8683 = vmatprep.subr.bf16.mxu1 %v11535_v2  ;;  %v11627_v1 = vld [vmem:[#allocation2 + $0x5c4] ss:$16 sps:$4 sm:$0xff]   ;;  %v11630_v2 = vld [vmem:[#allocation2 + $0x5cc] ss:$16 sps:$4 sm:$0xff]  }
  0xa3   :  { %7677 = vmatpush1.bf16.msra.mxu0 %v11530_v3  ;;  %8684 = vmatpush1.bf16.msra.mxu1 %v11533_v4  ;;  %v11625_v3 = vld [vmem:[#allocation2 + $0x5c0] ss:$16 sps:$4 sm:$0xff]   ;;  %v11628_v4 = vld [vmem:[#allocation2 + $0x5c8] ss:$16 sps:$4 sm:$0xff]  }
  0xa4   :  { %7699 = vmatprep.subr.bf16.mxu0 %v11541_v5  ;;  %8706 = vmatprep.subr.bf16.mxu1 %v11544_v6  ;;  %v11634_v5 = vld [vmem:[#allocation2 + $0x5e4] ss:$16 sps:$4 sm:$0xff]   ;;  %v11637_v6 = vld [vmem:[#allocation2 + $0x5ec] ss:$16 sps:$4 sm:$0xff]  }
  0xa6   :  { %7679 = vmatmul.mubr.bf16.vlgmr.msra.gmra.mrb[0].mxu0 %v11536_v7  ;;  %8686 = vmatmul.mubr.bf16.vlgmr.msra.gmra.mrb[0].mxu1 %v11536_v7  ;;  %v11632_v7 = vld [vmem:[#allocation2 + $0x5e0] ss:$16 sps:$4 sm:$0xff]  }
  0xa7   :  { %7700 = vmatpush1.bf16.msra.mxu0 %v11539_v8  ;;  %8707 = vmatpush1.bf16.msra.mxu1 %v11542_v9  ;;  %v11635_v8 = vld [vmem:[#allocation2 + $0x5e8] ss:$16 sps:$4 sm:$0xff]   ;;  %v11643_v9 = vld [vmem:[#allocation2 + $0x604] ss:$16 sps:$4 sm:$0xff]  }
  0xa8   :  { %7701 = vmatprep.subr.bf16.mxu0 %v11547_v10  ;;  %8708 = vmatprep.subr.bf16.mxu1 %v11550_v11  ;;  %v11646_v10 = vld [vmem:[#allocation2 + $0x60c] ss:$16 sps:$4 sm:$0xff]   ;;  %v11638_v11 = vld [vmem:[%s13591_s0 + $0x10] ss:$148 sps:$4 sm:$0xff]  }
  0xa9   :  { %7688 = vmatprep.mubr.bf16.mxu0 %v11623_v12  ;;  %8695 = vmatprep.mubr.bf16.mxu1 %v11623_v12  ;;  %v11641_v12 = vld [vmem:[#allocation2 + $0x600] ss:$16 sps:$4 sm:$0xff]  }
  0xab   :  { %7702 = vmatpush1.bf16.msra.mxu0 %v11545_v13  ;;  %8709 = vmatpush1.bf16.msra.mxu1 %v11548_v14  ;;  %v11644_v13 = vld [vmem:[#allocation2 + $0x608] ss:$16 sps:$4 sm:$0xff]   ;;  %v11649_v14 = vld [vmem:[#allocation2 + $0x624] ss:$16 sps:$4 sm:$0xff]  }
  0xac   :  { %7703 = vmatprep.subr.bf16.mxu0 %v11553_v15  ;;  %8710 = vmatprep.subr.bf16.mxu1 %v11556_v16  ;;  %v11652_v15 = vld [vmem:[#allocation2 + $0x62c] ss:$16 sps:$4 sm:$0xff]  }
  0xad   :  { %v11725_v16 = vld [vmem:[%s13591_s0 + $0x13c] ss:$148 sps:$4 sm:$0xff]  }
  0xae   :  { %7689 = vmatmul.mubr.bf16.gmra.mrb[4].mxu0 %v11631_v19  ;;  %8696 = vmatmul.mubr.bf16.gmra.mrb[4].mxu1 %v11631_v19  ;;  %v11655_v19 = vld [vmem:[#allocation2 + $0x644] ss:$16 sps:$4 sm:$0xff]  }
  0xaf   :  { %7704 = vmatpush1.bf16.msra.mxu0 %v11551_v17  ;;  %8711 = vmatpush1.bf16.msra.mxu1 %v11554_v18  ;;  %v11647_v17 = vld [vmem:[#allocation2 + $0x620] ss:$16 sps:$4 sm:$0xff]   ;;  %v11650_v18 = vld [vmem:[#allocation2 + $0x628] ss:$16 sps:$4 sm:$0xff]  }
  0xb0   :  { %7705 = vmatprep.subr.bf16.mxu0 %v11559_v20  ;;  %8712 = vmatprep.subr.bf16.mxu1 %v11562_v21  ;;  %v11658_v20 = vld [vmem:[#allocation2 + $0x64c] ss:$16 sps:$4 sm:$0xff]   ;;  %v11653_v21 = vld [vmem:[#allocation2 + $0x640] ss:$16 sps:$4 sm:$0xff]  }
  0xb1   :  { %7731 = vmatprep.mubr.bf16.mxu0 %v11640_v22  ;;  %8738 = vmatprep.mubr.bf16.mxu1 %v11640_v22  ;;  %v11656_v22 = vld [vmem:[#allocation2 + $0x648] ss:$16 sps:$4 sm:$0xff]  }
  0xb3   :  { %7706 = vmatpush1.bf16.msra.mxu0 %v11557_v23  ;;  %8713 = vmatpush1.bf16.msra.mxu1 %v11560_v24  ;;  %v11733_v23 = vld [vmem:[%s13591_s0 + $0x138] ss:$148 sps:$4 sm:$0xff]   ;;  %v11661_v24 = vld [vmem:[#allocation2 + $0x664] ss:$16 sps:$4 sm:$0xff]  }
  0xb4   :  { %7707 = vmatprep.subr.bf16.mxu0 %v11565_v25  ;;  %8714 = vmatprep.subr.bf16.mxu1 %v11568_v26  ;;  %v11664_v25 = vld [vmem:[#allocation2 + $0x66c] ss:$16 sps:$4 sm:$0xff]  }
  0xb5   :  { %v11742_v26 = vld [vmem:[%s13591_s0 + $0x1c] ss:$148 sps:$4 sm:$0xff]  }
  0xb7   :  { %7708 = vmatpush1.bf16.msra.mxu0 %v11563_v27  ;;  %8715 = vmatpush1.bf16.msra.mxu1 %v11566_v28  ;;  %v11659_v27 = vld [vmem:[#allocation2 + $0x660] ss:$16 sps:$4 sm:$0xff]   ;;  %v11662_v28 = vld [vmem:[#allocation2 + $0x668] ss:$16 sps:$4 sm:$0xff]  }
  0xb8   :  { %7709 = vmatprep.subr.bf16.mxu0 %v11571_v29  ;;  %8716 = vmatprep.subr.bf16.mxu1 %v11574_v30  ;;  %v11667_v29 = vld [vmem:[#allocation2 + $0x684] ss:$16 sps:$4 sm:$0xff]   ;;  %v11670_v30 = vld [vmem:[#allocation2 + $0x68c] ss:$16 sps:$4 sm:$0xff]  }
  0xbb   :  { %7710 = vmatpush1.bf16.msra.mxu0 %v11569_v31  ;;  %8717 = vmatpush1.bf16.msra.mxu1 %v11572_v32  ;;  %v11665_v31 = vld [vmem:[#allocation2 + $0x680] ss:$16 sps:$4 sm:$0xff]   ;;  %v11668_v32 = vld [vmem:[#allocation2 + $0x688] ss:$16 sps:$4 sm:$0xff]  }
  0xbc   :  { %7711 = vmatprep.subr.bf16.mxu0 %v11577_v33  ;;  %8718 = vmatprep.subr.bf16.mxu1 %v11580_v34  ;;  %v11673_v33 = vld [vmem:[#allocation2 + $0x6a4] ss:$16 sps:$4 sm:$0xff]   ;;  %v11676_v34 = vld [vmem:[#allocation2 + $0x6ac] ss:$16 sps:$4 sm:$0xff]  }
  0xbf   :  { %7712 = vmatpush1.bf16.msra.mxu0 %v11575_v35  ;;  %8719 = vmatpush1.bf16.msra.mxu1 %v11578_v36  ;;  %v11671_v35 = vld [vmem:[#allocation2 + $0x6a0] ss:$16 sps:$4 sm:$0xff]   ;;  %v11674_v36 = vld [vmem:[#allocation2 + $0x6a8] ss:$16 sps:$4 sm:$0xff]  }
  0xc0   :  { %7713 = vmatprep.subr.bf16.mxu0 %v11583_v37  ;;  %8720 = vmatprep.subr.bf16.mxu1 %v11586_v38  ;;  %v11679_v37 = vld [vmem:[#allocation2 + $0x6c4] ss:$16 sps:$4 sm:$0xff]   ;;  %v11682_v38 = vld [vmem:[#allocation2 + $0x6cc] ss:$16 sps:$4 sm:$0xff]  }
  0xc3   :  { %7714 = vmatpush1.bf16.msra.mxu0 %v11581_v39  ;;  %8721 = vmatpush1.bf16.msra.mxu1 %v11584_v40  ;;  %v11677_v39 = vld [vmem:[#allocation2 + $0x6c0] ss:$16 sps:$4 sm:$0xff]   ;;  %v11680_v40 = vld [vmem:[#allocation2 + $0x6c8] ss:$16 sps:$4 sm:$0xff]  }
  0xc4   :  { %7715 = vmatprep.subr.bf16.mxu0 %v11589_v41  ;;  %8722 = vmatprep.subr.bf16.mxu1 %v11592_v42  ;;  %v11685_v41 = vld [vmem:[#allocation2 + $0x6e4] ss:$16 sps:$4 sm:$0xff]   ;;  %v11688_v42 = vld [vmem:[#allocation2 + $0x6ec] ss:$16 sps:$4 sm:$0xff]  }
  0xc7   :  { %7716 = vmatpush1.bf16.msra.mxu0 %v11587_v43  ;;  %8723 = vmatpush1.bf16.msra.mxu1 %v11590_v44  ;;  %v11683_v43 = vld [vmem:[#allocation2 + $0x6e0] ss:$16 sps:$4 sm:$0xff]   ;;  %v11686_v44 = vld [vmem:[#allocation2 + $0x6e8] ss:$16 sps:$4 sm:$0xff]  }
  0xc8   :  { %7717 = vmatprep.subr.bf16.mxu0 %v11595_v45  ;;  %8724 = vmatprep.subr.bf16.mxu1 %v11598_v46  ;;  %v11691_v45 = vld [vmem:[#allocation2 + $0x704] ss:$16 sps:$4 sm:$0xff]   ;;  %v11694_v46 = vld [vmem:[#allocation2 + $0x70c] ss:$16 sps:$4 sm:$0xff]  }
  0xcb   :  { %7718 = vmatpush1.bf16.msra.mxu0 %v11593_v47  ;;  %8725 = vmatpush1.bf16.msra.mxu1 %v11596_v48  ;;  %v11689_v47 = vld [vmem:[#allocation2 + $0x700] ss:$16 sps:$4 sm:$0xff]   ;;  %v11692_v48 = vld [vmem:[#allocation2 + $0x708] ss:$16 sps:$4 sm:$0xff]  }
  0xcc   :  { %7719 = vmatprep.subr.bf16.mxu0 %v11601_v49  ;;  %8726 = vmatprep.subr.bf16.mxu1 %v11604_v50  ;;  %v11697_v49 = vld [vmem:[#allocation2 + $0x724] ss:$16 sps:$4 sm:$0xff]   ;;  %v11700_v50 = vld [vmem:[#allocation2 + $0x72c] ss:$16 sps:$4 sm:$0xff]  }
  0xcf   :  { %7720 = vmatpush1.bf16.msra.mxu0 %v11599_v51  ;;  %8727 = vmatpush1.bf16.msra.mxu1 %v11602_v52  ;;  %v11695_v51 = vld [vmem:[#allocation2 + $0x720] ss:$16 sps:$4 sm:$0xff]   ;;  %v11698_v52 = vld [vmem:[#allocation2 + $0x728] ss:$16 sps:$4 sm:$0xff]  }
  0xd0   :  { %7721 = vmatprep.subr.bf16.mxu0 %v11607_v53  ;;  %8728 = vmatprep.subr.bf16.mxu1 %v11610_v54  ;;  %v11703_v53 = vld [vmem:[#allocation2 + $0x744] ss:$16 sps:$4 sm:$0xff]   ;;  %v11706_v54 = vld [vmem:[#allocation2 + $0x74c] ss:$16 sps:$4 sm:$0xff]  }
  0xd3   :  { %7722 = vmatpush1.bf16.msra.mxu0 %v11605_v55  ;;  %8729 = vmatpush1.bf16.msra.mxu1 %v11608_v56  ;;  %v11701_v55 = vld [vmem:[#allocation2 + $0x740] ss:$16 sps:$4 sm:$0xff]   ;;  %v11704_v56 = vld [vmem:[#allocation2 + $0x748] ss:$16 sps:$4 sm:$0xff]  }
  0xd4   :  { %7723 = vmatprep.subr.bf16.mxu0 %v11613_v57  ;;  %8730 = vmatprep.subr.bf16.mxu1 %v11616_v58  ;;  %v11709_v57 = vld [vmem:[#allocation2 + $0x764] ss:$16 sps:$4 sm:$0xff]   ;;  %v11712_v58 = vld [vmem:[#allocation2 + $0x76c] ss:$16 sps:$4 sm:$0xff]  }
  0xd7   :  { %7724 = vmatpush1.bf16.msra.mxu0 %v11611_v59  ;;  %8731 = vmatpush1.bf16.msra.mxu1 %v11614_v60  ;;  %v11707_v59 = vld [vmem:[#allocation2 + $0x760] ss:$16 sps:$4 sm:$0xff]   ;;  %v11710_v60 = vld [vmem:[#allocation2 + $0x768] ss:$16 sps:$4 sm:$0xff]  }
  0xd8   :  { %7725 = vmatprep.subr.bf16.mxu0 %v11619_v61  ;;  %8732 = vmatprep.subr.bf16.mxu1 %v11622_v62  ;;  %v11715_v61 = vld [vmem:[#allocation2 + $0x784] ss:$16 sps:$4 sm:$0xff]   ;;  %v11718_v62 = vld [vmem:[#allocation2 + $0x78c] ss:$16 sps:$4 sm:$0xff]  }
  0xdb   :  { %7726 = vmatpush1.bf16.msra.mxu0 %v11617_v63  ;;  %8733 = vmatpush1.bf16.msra.mxu1 %v11620_v0  ;;  %v11713_v63 = vld [vmem:[#allocation2 + $0x780] ss:$16 sps:$4 sm:$0xff]   ;;  %v11716_v0 = vld [vmem:[#allocation2 + $0x788] ss:$16 sps:$4 sm:$0xff]  }
  0xdc   :  { %7727 = vmatprep.subr.bf16.mxu0 %v11627_v1  ;;  %8734 = vmatprep.subr.bf16.mxu1 %v11630_v2  ;;  %v11721_v1 = vld [vmem:[#allocation2 + $0x7a4] ss:$16 sps:$4 sm:$0xff]   ;;  %v11724_v2 = vld [vmem:[#allocation2 + $0x7ac] ss:$16 sps:$4 sm:$0xff]  }
  0xdf   :  { %7728 = vmatpush1.bf16.msra.mxu0 %v11625_v3  ;;  %8735 = vmatpush1.bf16.msra.mxu1 %v11628_v4  ;;  %v11719_v3 = vld [vmem:[#allocation2 + $0x7a0] ss:$16 sps:$4 sm:$0xff]   ;;  %v11722_v4 = vld [vmem:[#allocation2 + $0x7a8] ss:$16 sps:$4 sm:$0xff]  }
  0xe0   :  { %7729 = vmatprep.subr.bf16.mxu0 %v11634_v5  ;;  %8736 = vmatprep.subr.bf16.mxu1 %v11637_v6  ;;  %v11729_v5 = vld [vmem:[#allocation2 + $0x7c4] ss:$16 sps:$4 sm:$0xff]   ;;  %v11732_v6 = vld [vmem:[#allocation2 + $0x7cc] ss:$16 sps:$4 sm:$0xff]  }
  0xe3   :  { %7730 = vmatpush1.bf16.msra.mxu0 %v11632_v7  ;;  %8737 = vmatpush1.bf16.msra.mxu1 %v11635_v8  ;;  %v11727_v7 = vld [vmem:[#allocation2 + $0x7c0] ss:$16 sps:$4 sm:$0xff]   ;;  %v11730_v8 = vld [vmem:[#allocation2 + $0x7c8] ss:$16 sps:$4 sm:$0xff]  }
  0xe4   :  { %7752 = vmatprep.subr.bf16.mxu0 %v11643_v9  ;;  %8759 = vmatprep.subr.bf16.mxu1 %v11646_v10  ;;  %v11736_v9 = vld [vmem:[#allocation2 + $0x7e4] ss:$16 sps:$4 sm:$0xff]   ;;  %v11739_v10 = vld [vmem:[#allocation2 + $0x7ec] ss:$16 sps:$4 sm:$0xff]  }
  0xe6   :  { %7732 = vmatmul.mubr.bf16.vlgmr.msra.gmra.mrb[0].mxu0 %v11638_v11  ;;  %8739 = vmatmul.mubr.bf16.vlgmr.msra.gmra.mrb[0].mxu1 %v11638_v11  ;;  %v11734_v11 = vld [vmem:[#allocation2 + $0x7e0] ss:$16 sps:$4 sm:$0xff]  }
  0xe7   :  { %7753 = vmatpush1.bf16.msra.mxu0 %v11641_v12  ;;  %8760 = vmatpush1.bf16.msra.mxu1 %v11644_v13  ;;  %v11737_v12 = vld [vmem:[#allocation2 + $0x7e8] ss:$16 sps:$4 sm:$0xff]   ;;  %v11745_v13 = vld [vmem:[#allocation2 + $0x804] ss:$16 sps:$4 sm:$0xff]  }
  0xe8   :  { %7754 = vmatprep.subr.bf16.mxu0 %v11649_v14  ;;  %8761 = vmatprep.subr.bf16.mxu1 %v11652_v15  ;;  %v11748_v14 = vld [vmem:[#allocation2 + $0x80c] ss:$16 sps:$4 sm:$0xff]  }
  0xe9   :  { %7741 = vmatprep.mubr.bf16.mxu0 %v11725_v16  ;;  %8748 = vmatprep.mubr.bf16.mxu1 %v11725_v16  ;;  %v11740_v15 = vld [vmem:[%s13591_s0 + $0x18] ss:$148 sps:$4 sm:$0xff]   ;;  %v11743_v16 = vld [vmem:[#allocation2 + $0x800] ss:$16 sps:$4 sm:$0xff]  }
  0xeb   :  { %7755 = vmatpush1.bf16.msra.mxu0 %v11647_v17  ;;  %8762 = vmatpush1.bf16.msra.mxu1 %v11650_v18  ;;  %v11746_v17 = vld [vmem:[#allocation2 + $0x808] ss:$16 sps:$4 sm:$0xff]   ;;  %v11751_v18 = vld [vmem:[#allocation2 + $0x824] ss:$16 sps:$4 sm:$0xff]  }
  0xec   :  { %7756 = vmatprep.subr.bf16.mxu0 %v11655_v19  ;;  %8763 = vmatprep.subr.bf16.mxu1 %v11658_v20  ;;  %v11754_v19 = vld [vmem:[#allocation2 + $0x82c] ss:$16 sps:$4 sm:$0xff]   ;;  %v11827_v20 = vld [vmem:[%s13591_s0 + $0x144] ss:$148 sps:$4 sm:$0xff]  }
  0xee   :  { %7742 = vmatmul.mubr.bf16.gmra.mrb[4].mxu0 %v11733_v23  ;;  %8749 = vmatmul.mubr.bf16.gmra.mrb[4].mxu1 %v11733_v23  ;;  %v11757_v23 = vld [vmem:[#allocation2 + $0x844] ss:$16 sps:$4 sm:$0xff]  }
  0xef   :  { %7757 = vmatpush1.bf16.msra.mxu0 %v11653_v21  ;;  %8764 = vmatpush1.bf16.msra.mxu1 %v11656_v22  ;;  %v11749_v21 = vld [vmem:[#allocation2 + $0x820] ss:$16 sps:$4 sm:$0xff]   ;;  %v11752_v22 = vld [vmem:[#allocation2 + $0x828] ss:$16 sps:$4 sm:$0xff]  }
  0xf0   :  { %7758 = vmatprep.subr.bf16.mxu0 %v11661_v24  ;;  %8765 = vmatprep.subr.bf16.mxu1 %v11664_v25  ;;  %v11760_v24 = vld [vmem:[#allocation2 + $0x84c] ss:$16 sps:$4 sm:$0xff]   ;;  %v11755_v25 = vld [vmem:[#allocation2 + $0x840] ss:$16 sps:$4 sm:$0xff]  }
  0xf1   :  { %7784 = vmatprep.mubr.bf16.mxu0 %v11742_v26  ;;  %8791 = vmatprep.mubr.bf16.mxu1 %v11742_v26  ;;  %v11835_v26 = vld [vmem:[%s13591_s0 + $0x140] ss:$148 sps:$4 sm:$0xff]  }
  0xf3   :  { %7759 = vmatpush1.bf16.msra.mxu0 %v11659_v27  ;;  %8766 = vmatpush1.bf16.msra.mxu1 %v11662_v28  ;;  %v11758_v27 = vld [vmem:[#allocation2 + $0x848] ss:$16 sps:$4 sm:$0xff]   ;;  %v11763_v28 = vld [vmem:[#allocation2 + $0x864] ss:$16 sps:$4 sm:$0xff]  }
  0xf4   :  { %7760 = vmatprep.subr.bf16.mxu0 %v11667_v29  ;;  %8767 = vmatprep.subr.bf16.mxu1 %v11670_v30  ;;  %v11766_v29 = vld [vmem:[#allocation2 + $0x86c] ss:$16 sps:$4 sm:$0xff]   ;;  %v11844_v30 = vld [vmem:[%s13591_s0 + $0x24] ss:$148 sps:$4 sm:$0xff]  }
  0xf7   :  { %7761 = vmatpush1.bf16.msra.mxu0 %v11665_v31  ;;  %8768 = vmatpush1.bf16.msra.mxu1 %v11668_v32  ;;  %v11761_v31 = vld [vmem:[#allocation2 + $0x860] ss:$16 sps:$4 sm:$0xff]   ;;  %v11764_v32 = vld [vmem:[#allocation2 + $0x868] ss:$16 sps:$4 sm:$0xff]  }
  0xf8   :  { %7762 = vmatprep.subr.bf16.mxu0 %v11673_v33  ;;  %8769 = vmatprep.subr.bf16.mxu1 %v11676_v34  ;;  %v11769_v33 = vld [vmem:[#allocation2 + $0x884] ss:$16 sps:$4 sm:$0xff]   ;;  %v11772_v34 = vld [vmem:[#allocation2 + $0x88c] ss:$16 sps:$4 sm:$0xff]  }
  0xfb   :  { %7763 = vmatpush1.bf16.msra.mxu0 %v11671_v35  ;;  %8770 = vmatpush1.bf16.msra.mxu1 %v11674_v36  ;;  %v11767_v35 = vld [vmem:[#allocation2 + $0x880] ss:$16 sps:$4 sm:$0xff]   ;;  %v11770_v36 = vld [vmem:[#allocation2 + $0x888] ss:$16 sps:$4 sm:$0xff]  }
  0xfc   :  { %7764 = vmatprep.subr.bf16.mxu0 %v11679_v37  ;;  %8771 = vmatprep.subr.bf16.mxu1 %v11682_v38  ;;  %v11775_v37 = vld [vmem:[#allocation2 + $0x8a4] ss:$16 sps:$4 sm:$0xff]   ;;  %v11778_v38 = vld [vmem:[#allocation2 + $0x8ac] ss:$16 sps:$4 sm:$0xff]  }
  0xff   :  { %7765 = vmatpush1.bf16.msra.mxu0 %v11677_v39  ;;  %8772 = vmatpush1.bf16.msra.mxu1 %v11680_v40  ;;  %v11773_v39 = vld [vmem:[#allocation2 + $0x8a0] ss:$16 sps:$4 sm:$0xff]   ;;  %v11776_v40 = vld [vmem:[#allocation2 + $0x8a8] ss:$16 sps:$4 sm:$0xff]  }
 0x100   :  { %7766 = vmatprep.subr.bf16.mxu0 %v11685_v41  ;;  %8773 = vmatprep.subr.bf16.mxu1 %v11688_v42  ;;  %v11781_v41 = vld [vmem:[#allocation2 + $0x8c4] ss:$16 sps:$4 sm:$0xff]   ;;  %v11784_v42 = vld [vmem:[#allocation2 + $0x8cc] ss:$16 sps:$4 sm:$0xff]  }
 0x103   :  { %7767 = vmatpush1.bf16.msra.mxu0 %v11683_v43  ;;  %8774 = vmatpush1.bf16.msra.mxu1 %v11686_v44  ;;  %v11779_v43 = vld [vmem:[#allocation2 + $0x8c0] ss:$16 sps:$4 sm:$0xff]   ;;  %v11782_v44 = vld [vmem:[#allocation2 + $0x8c8] ss:$16 sps:$4 sm:$0xff]  }
 0x104   :  { %7768 = vmatprep.subr.bf16.mxu0 %v11691_v45  ;;  %8775 = vmatprep.subr.bf16.mxu1 %v11694_v46  ;;  %v11787_v45 = vld [vmem:[#allocation2 + $0x8e4] ss:$16 sps:$4 sm:$0xff]   ;;  %v11790_v46 = vld [vmem:[#allocation2 + $0x8ec] ss:$16 sps:$4 sm:$0xff]  }
 0x107   :  { %7769 = vmatpush1.bf16.msra.mxu0 %v11689_v47  ;;  %8776 = vmatpush1.bf16.msra.mxu1 %v11692_v48  ;;  %v11785_v47 = vld [vmem:[#allocation2 + $0x8e0] ss:$16 sps:$4 sm:$0xff]   ;;  %v11788_v48 = vld [vmem:[#allocation2 + $0x8e8] ss:$16 sps:$4 sm:$0xff]  }
 0x108   :  { %7770 = vmatprep.subr.bf16.mxu0 %v11697_v49  ;;  %8777 = vmatprep.subr.bf16.mxu1 %v11700_v50  ;;  %v11793_v49 = vld [vmem:[#allocation2 + $0x904] ss:$16 sps:$4 sm:$0xff]   ;;  %v11796_v50 = vld [vmem:[#allocation2 + $0x90c] ss:$16 sps:$4 sm:$0xff]  }
 0x10b   :  { %7771 = vmatpush1.bf16.msra.mxu0 %v11695_v51  ;;  %8778 = vmatpush1.bf16.msra.mxu1 %v11698_v52  ;;  %v11791_v51 = vld [vmem:[#allocation2 + $0x900] ss:$16 sps:$4 sm:$0xff]   ;;  %v11794_v52 = vld [vmem:[#allocation2 + $0x908] ss:$16 sps:$4 sm:$0xff]  }
 0x10c   :  { %7772 = vmatprep.subr.bf16.mxu0 %v11703_v53  ;;  %8779 = vmatprep.subr.bf16.mxu1 %v11706_v54  ;;  %v11799_v53 = vld [vmem:[#allocation2 + $0x924] ss:$16 sps:$4 sm:$0xff]   ;;  %v11802_v54 = vld [vmem:[#allocation2 + $0x92c] ss:$16 sps:$4 sm:$0xff]  }
 0x10f   :  { %7773 = vmatpush1.bf16.msra.mxu0 %v11701_v55  ;;  %8780 = vmatpush1.bf16.msra.mxu1 %v11704_v56  ;;  %v11797_v55 = vld [vmem:[#allocation2 + $0x920] ss:$16 sps:$4 sm:$0xff]   ;;  %v11800_v56 = vld [vmem:[#allocation2 + $0x928] ss:$16 sps:$4 sm:$0xff]  }
 0x110   :  { %7774 = vmatprep.subr.bf16.mxu0 %v11709_v57  ;;  %8781 = vmatprep.subr.bf16.mxu1 %v11712_v58  ;;  %v11805_v57 = vld [vmem:[#allocation2 + $0x944] ss:$16 sps:$4 sm:$0xff]   ;;  %v11808_v58 = vld [vmem:[#allocation2 + $0x94c] ss:$16 sps:$4 sm:$0xff]  }
 0x113   :  { %7775 = vmatpush1.bf16.msra.mxu0 %v11707_v59  ;;  %8782 = vmatpush1.bf16.msra.mxu1 %v11710_v60  ;;  %v11803_v59 = vld [vmem:[#allocation2 + $0x940] ss:$16 sps:$4 sm:$0xff]   ;;  %v11806_v60 = vld [vmem:[#allocation2 + $0x948] ss:$16 sps:$4 sm:$0xff]  }
 0x114   :  { %7776 = vmatprep.subr.bf16.mxu0 %v11715_v61  ;;  %8783 = vmatprep.subr.bf16.mxu1 %v11718_v62  ;;  %v11811_v61 = vld [vmem:[#allocation2 + $0x964] ss:$16 sps:$4 sm:$0xff]   ;;  %v11814_v62 = vld [vmem:[#allocation2 + $0x96c] ss:$16 sps:$4 sm:$0xff]  }
 0x117   :  { %7777 = vmatpush1.bf16.msra.mxu0 %v11713_v63  ;;  %8784 = vmatpush1.bf16.msra.mxu1 %v11716_v0  ;;  %v11809_v63 = vld [vmem:[#allocation2 + $0x960] ss:$16 sps:$4 sm:$0xff]   ;;  %v11812_v0 = vld [vmem:[#allocation2 + $0x968] ss:$16 sps:$4 sm:$0xff]  }
 0x118   :  { %7778 = vmatprep.subr.bf16.mxu0 %v11721_v1  ;;  %8785 = vmatprep.subr.bf16.mxu1 %v11724_v2  ;;  %v11817_v1 = vld [vmem:[#allocation2 + $0x984] ss:$16 sps:$4 sm:$0xff]   ;;  %v11820_v2 = vld [vmem:[#allocation2 + $0x98c] ss:$16 sps:$4 sm:$0xff]  }
 0x11b   :  { %7779 = vmatpush1.bf16.msra.mxu0 %v11719_v3  ;;  %8786 = vmatpush1.bf16.msra.mxu1 %v11722_v4  ;;  %v11815_v3 = vld [vmem:[#allocation2 + $0x980] ss:$16 sps:$4 sm:$0xff]   ;;  %v11818_v4 = vld [vmem:[#allocation2 + $0x988] ss:$16 sps:$4 sm:$0xff]  }
 0x11c   :  { %7780 = vmatprep.subr.bf16.mxu0 %v11729_v5  ;;  %8787 = vmatprep.subr.bf16.mxu1 %v11732_v6  ;;  %v11823_v5 = vld [vmem:[#allocation2 + $0x9a4] ss:$16 sps:$4 sm:$0xff]   ;;  %v11826_v6 = vld [vmem:[#allocation2 + $0x9ac] ss:$16 sps:$4 sm:$0xff]  }
 0x11f   :  { %7781 = vmatpush1.bf16.msra.mxu0 %v11727_v7  ;;  %8788 = vmatpush1.bf16.msra.mxu1 %v11730_v8  ;;  %v11821_v7 = vld [vmem:[#allocation2 + $0x9a0] ss:$16 sps:$4 sm:$0xff]   ;;  %v11824_v8 = vld [vmem:[#allocation2 + $0x9a8] ss:$16 sps:$4 sm:$0xff]  }
 0x120   :  { %7782 = vmatprep.subr.bf16.mxu0 %v11736_v9  ;;  %8789 = vmatprep.subr.bf16.mxu1 %v11739_v10  ;;  %v11831_v9 = vld [vmem:[#allocation2 + $0x9c4] ss:$16 sps:$4 sm:$0xff]   ;;  %v11834_v10 = vld [vmem:[#allocation2 + $0x9cc] ss:$16 sps:$4 sm:$0xff]  }
 0x123   :  { %7783 = vmatpush1.bf16.msra.mxu0 %v11734_v11  ;;  %8790 = vmatpush1.bf16.msra.mxu1 %v11737_v12  ;;  %v11829_v11 = vld [vmem:[#allocation2 + $0x9c0] ss:$16 sps:$4 sm:$0xff]   ;;  %v11832_v12 = vld [vmem:[#allocation2 + $0x9c8] ss:$16 sps:$4 sm:$0xff]  }
 0x124   :  { %7805 = vmatprep.subr.bf16.mxu0 %v11745_v13  ;;  %8812 = vmatprep.subr.bf16.mxu1 %v11748_v14  ;;  %v11838_v13 = vld [vmem:[#allocation2 + $0x9e4] ss:$16 sps:$4 sm:$0xff]   ;;  %v11841_v14 = vld [vmem:[#allocation2 + $0x9ec] ss:$16 sps:$4 sm:$0xff]  }
 0x126   :  { %7785 = vmatmul.mubr.bf16.vlgmr.msra.gmra.mrb[0].mxu0 %v11740_v15  ;;  %8792 = vmatmul.mubr.bf16.vlgmr.msra.gmra.mrb[0].mxu1 %v11740_v15  ;;  %v11836_v15 = vld [vmem:[#allocation2 + $0x9e0] ss:$16 sps:$4 sm:$0xff]  }
 0x127   :  { %7806 = vmatpush1.bf16.msra.mxu0 %v11743_v16  ;;  %8813 = vmatpush1.bf16.msra.mxu1 %v11746_v17  ;;  %v11839_v16 = vld [vmem:[#allocation2 + $0x9e8] ss:$16 sps:$4 sm:$0xff]   ;;  %v11842_v17 = vld [vmem:[%s13591_s0 + $0x20] ss:$148 sps:$4 sm:$0xff]  }
 0x128   :  { %7807 = vmatprep.subr.bf16.mxu0 %v11751_v18  ;;  %8814 = vmatprep.subr.bf16.mxu1 %v11754_v19  ;;  %v11847_v18 = vld [vmem:[#allocation2 + $0xa04] ss:$16 sps:$4 sm:$0xff]   ;;  %v11850_v19 = vld [vmem:[#allocation2 + $0xa0c] ss:$16 sps:$4 sm:$0xff]  }
 0x129   :  { %7794 = vmatprep.mubr.bf16.mxu0 %v11827_v20  ;;  %8801 = vmatprep.mubr.bf16.mxu1 %v11827_v20  ;;  %v11845_v20 = vld [vmem:[#allocation2 + $0xa00] ss:$16 sps:$4 sm:$0xff]  }
 0x12b   :  { %7808 = vmatpush1.bf16.msra.mxu0 %v11749_v21  ;;  %8815 = vmatpush1.bf16.msra.mxu1 %v11752_v22  ;;  %v11848_v21 = vld [vmem:[#allocation2 + $0xa08] ss:$16 sps:$4 sm:$0xff]   ;;  %v11853_v22 = vld [vmem:[#allocation2 + $0xa24] ss:$16 sps:$4 sm:$0xff]  }
 0x12c   :  { %7809 = vmatprep.subr.bf16.mxu0 %v11757_v23  ;;  %8816 = vmatprep.subr.bf16.mxu1 %v11760_v24  ;;  %v11856_v23 = vld [vmem:[#allocation2 + $0xa2c] ss:$16 sps:$4 sm:$0xff]  }
 0x12d   :  { %v11929_v24 = vld [vmem:[%s13591_s0 + $0x14c] ss:$148 sps:$4 sm:$0xff]  }
 0x12e   :  { %7795 = vmatmul.mubr.bf16.gmra.mrb[4].mxu0 %v11835_v26  ;;  %8802 = vmatmul.mubr.bf16.gmra.mrb[4].mxu1 %v11835_v26  ;;  %v11854_v26 = vld [vmem:[#allocation2 + $0xa28] ss:$16 sps:$4 sm:$0xff]  }
 0x12f   :  { %7810 = vmatpush1.bf16.msra.mxu0 %v11755_v25  ;;  %8817 = vmatpush1.bf16.msra.mxu1 %v11758_v27  ;;  %v11851_v25 = vld [vmem:[#allocation2 + $0xa20] ss:$16 sps:$4 sm:$0xff]   ;;  %v11859_v27 = vld [vmem:[#allocation2 + $0xa44] ss:$16 sps:$4 sm:$0xff]  }
 0x130   :  { %7811 = vmatprep.subr.bf16.mxu0 %v11763_v28  ;;  %8818 = vmatprep.subr.bf16.mxu1 %v11766_v29  ;;  %v11862_v28 = vld [vmem:[#allocation2 + $0xa4c] ss:$16 sps:$4 sm:$0xff]  }
 0x131   :  { %7837 = vmatprep.mubr.bf16.mxu0 %v11844_v30  ;;  %8844 = vmatprep.mubr.bf16.mxu1 %v11844_v30  ;;  %v11937_v29 = vld [vmem:[%s13591_s0 + $0x148] ss:$148 sps:$4 sm:$0xff]   ;;  %v11857_v30 = vld [vmem:[#allocation2 + $0xa40] ss:$16 sps:$4 sm:$0xff]  }
 0x133   :  { %7812 = vmatpush1.bf16.msra.mxu0 %v11761_v31  ;;  %8819 = vmatpush1.bf16.msra.mxu1 %v11764_v32  ;;  %v11860_v31 = vld [vmem:[#allocation2 + $0xa48] ss:$16 sps:$4 sm:$0xff]   ;;  %v11865_v32 = vld [vmem:[#allocation2 + $0xa64] ss:$16 sps:$4 sm:$0xff]  }
 0x134   :  { %7813 = vmatprep.subr.bf16.mxu0 %v11769_v33  ;;  %8820 = vmatprep.subr.bf16.mxu1 %v11772_v34  ;;  %v11868_v33 = vld [vmem:[#allocation2 + $0xa6c] ss:$16 sps:$4 sm:$0xff]  }
 0x135   :  { %v11946_v34 = vld [vmem:[%s13591_s0 + $0x2c] ss:$148 sps:$4 sm:$0xff]  }
 0x137   :  { %7814 = vmatpush1.bf16.msra.mxu0 %v11767_v35  ;;  %8821 = vmatpush1.bf16.msra.mxu1 %v11770_v36  ;;  %v11863_v35 = vld [vmem:[#allocation2 + $0xa60] ss:$16 sps:$4 sm:$0xff]   ;;  %v11866_v36 = vld [vmem:[#allocation2 + $0xa68] ss:$16 sps:$4 sm:$0xff]  }
 0x138   :  { %7815 = vmatprep.subr.bf16.mxu0 %v11775_v37  ;;  %8822 = vmatprep.subr.bf16.mxu1 %v11778_v38  ;;  %v11871_v37 = vld [vmem:[#allocation2 + $0xa84] ss:$16 sps:$4 sm:$0xff]   ;;  %v11874_v38 = vld [vmem:[#allocation2 + $0xa8c] ss:$16 sps:$4 sm:$0xff]  }
 0x13b   :  { %7816 = vmatpush1.bf16.msra.mxu0 %v11773_v39  ;;  %8823 = vmatpush1.bf16.msra.mxu1 %v11776_v40  ;;  %v11869_v39 = vld [vmem:[#allocation2 + $0xa80] ss:$16 sps:$4 sm:$0xff]   ;;  %v11872_v40 = vld [vmem:[#allocation2 + $0xa88] ss:$16 sps:$4 sm:$0xff]  }
 0x13c   :  { %7817 = vmatprep.subr.bf16.mxu0 %v11781_v41  ;;  %8824 = vmatprep.subr.bf16.mxu1 %v11784_v42  ;;  %v11877_v41 = vld [vmem:[#allocation2 + $0xaa4] ss:$16 sps:$4 sm:$0xff]   ;;  %v11880_v42 = vld [vmem:[#allocation2 + $0xaac] ss:$16 sps:$4 sm:$0xff]  }
 0x13f   :  { %7818 = vmatpush1.bf16.msra.mxu0 %v11779_v43  ;;  %8825 = vmatpush1.bf16.msra.mxu1 %v11782_v44  ;;  %v11875_v43 = vld [vmem:[#allocation2 + $0xaa0] ss:$16 sps:$4 sm:$0xff]   ;;  %v11878_v44 = vld [vmem:[#allocation2 + $0xaa8] ss:$16 sps:$4 sm:$0xff]  }
 0x140   :  { %7819 = vmatprep.subr.bf16.mxu0 %v11787_v45  ;;  %8826 = vmatprep.subr.bf16.mxu1 %v11790_v46  ;;  %v11883_v45 = vld [vmem:[#allocation2 + $0xac4] ss:$16 sps:$4 sm:$0xff]   ;;  %v11886_v46 = vld [vmem:[#allocation2 + $0xacc] ss:$16 sps:$4 sm:$0xff]  }
 0x143   :  { %7820 = vmatpush1.bf16.msra.mxu0 %v11785_v47  ;;  %8827 = vmatpush1.bf16.msra.mxu1 %v11788_v48  ;;  %v11881_v47 = vld [vmem:[#allocation2 + $0xac0] ss:$16 sps:$4 sm:$0xff]   ;;  %v11884_v48 = vld [vmem:[#allocation2 + $0xac8] ss:$16 sps:$4 sm:$0xff]  }
 0x144   :  { %7821 = vmatprep.subr.bf16.mxu0 %v11793_v49  ;;  %8828 = vmatprep.subr.bf16.mxu1 %v11796_v50  ;;  %v11889_v49 = vld [vmem:[#allocation2 + $0xae4] ss:$16 sps:$4 sm:$0xff]   ;;  %v11892_v50 = vld [vmem:[#allocation2 + $0xaec] ss:$16 sps:$4 sm:$0xff]  }
 0x147   :  { %7822 = vmatpush1.bf16.msra.mxu0 %v11791_v51  ;;  %8829 = vmatpush1.bf16.msra.mxu1 %v11794_v52  ;;  %v11887_v51 = vld [vmem:[#allocation2 + $0xae0] ss:$16 sps:$4 sm:$0xff]   ;;  %v11890_v52 = vld [vmem:[#allocation2 + $0xae8] ss:$16 sps:$4 sm:$0xff]  }
 0x148   :  { %7823 = vmatprep.subr.bf16.mxu0 %v11799_v53  ;;  %8830 = vmatprep.subr.bf16.mxu1 %v11802_v54  ;;  %v11895_v53 = vld [vmem:[#allocation2 + $0xb04] ss:$16 sps:$4 sm:$0xff]   ;;  %v11898_v54 = vld [vmem:[#allocation2 + $0xb0c] ss:$16 sps:$4 sm:$0xff]  }
 0x14b   :  { %7824 = vmatpush1.bf16.msra.mxu0 %v11797_v55  ;;  %8831 = vmatpush1.bf16.msra.mxu1 %v11800_v56  ;;  %v11893_v55 = vld [vmem:[#allocation2 + $0xb00] ss:$16 sps:$4 sm:$0xff]   ;;  %v11896_v56 = vld [vmem:[#allocation2 + $0xb08] ss:$16 sps:$4 sm:$0xff]  }
 0x14c   :  { %7825 = vmatprep.subr.bf16.mxu0 %v11805_v57  ;;  %8832 = vmatprep.subr.bf16.mxu1 %v11808_v58  ;;  %v11901_v57 = vld [vmem:[#allocation2 + $0xb24] ss:$16 sps:$4 sm:$0xff]   ;;  %v11904_v58 = vld [vmem:[#allocation2 + $0xb2c] ss:$16 sps:$4 sm:$0xff]  }
 0x14f   :  { %7826 = vmatpush1.bf16.msra.mxu0 %v11803_v59  ;;  %8833 = vmatpush1.bf16.msra.mxu1 %v11806_v60  ;;  %v11899_v59 = vld [vmem:[#allocation2 + $0xb20] ss:$16 sps:$4 sm:$0xff]   ;;  %v11902_v60 = vld [vmem:[#allocation2 + $0xb28] ss:$16 sps:$4 sm:$0xff]  }
 0x150   :  { %7827 = vmatprep.subr.bf16.mxu0 %v11811_v61  ;;  %8834 = vmatprep.subr.bf16.mxu1 %v11814_v62  ;;  %v11907_v61 = vld [vmem:[#allocation2 + $0xb44] ss:$16 sps:$4 sm:$0xff]   ;;  %v11910_v62 = vld [vmem:[#allocation2 + $0xb4c] ss:$16 sps:$4 sm:$0xff]  }
 0x153   :  { %7828 = vmatpush1.bf16.msra.mxu0 %v11809_v63  ;;  %8835 = vmatpush1.bf16.msra.mxu1 %v11812_v0  ;;  %v11905_v63 = vld [vmem:[#allocation2 + $0xb40] ss:$16 sps:$4 sm:$0xff]   ;;  %v11908_v0 = vld [vmem:[#allocation2 + $0xb48] ss:$16 sps:$4 sm:$0xff]  }
 0x154   :  { %7829 = vmatprep.subr.bf16.mxu0 %v11817_v1  ;;  %8836 = vmatprep.subr.bf16.mxu1 %v11820_v2  ;;  %v11913_v1 = vld [vmem:[#allocation2 + $0xb64] ss:$16 sps:$4 sm:$0xff]   ;;  %v11916_v2 = vld [vmem:[#allocation2 + $0xb6c] ss:$16 sps:$4 sm:$0xff]  }
 0x157   :  { %7830 = vmatpush1.bf16.msra.mxu0 %v11815_v3  ;;  %8837 = vmatpush1.bf16.msra.mxu1 %v11818_v4  ;;  %v11911_v3 = vld [vmem:[#allocation2 + $0xb60] ss:$16 sps:$4 sm:$0xff]   ;;  %v11914_v4 = vld [vmem:[#allocation2 + $0xb68] ss:$16 sps:$4 sm:$0xff]  }
 0x158   :  { %7831 = vmatprep.subr.bf16.mxu0 %v11823_v5  ;;  %8838 = vmatprep.subr.bf16.mxu1 %v11826_v6  ;;  %v11919_v5 = vld [vmem:[#allocation2 + $0xb84] ss:$16 sps:$4 sm:$0xff]   ;;  %v11922_v6 = vld [vmem:[#allocation2 + $0xb8c] ss:$16 sps:$4 sm:$0xff]  }
 0x15b   :  { %7832 = vmatpush1.bf16.msra.mxu0 %v11821_v7  ;;  %8839 = vmatpush1.bf16.msra.mxu1 %v11824_v8  ;;  %v11917_v7 = vld [vmem:[#allocation2 + $0xb80] ss:$16 sps:$4 sm:$0xff]   ;;  %v11920_v8 = vld [vmem:[#allocation2 + $0xb88] ss:$16 sps:$4 sm:$0xff]  }
 0x15c   :  { %7833 = vmatprep.subr.bf16.mxu0 %v11831_v9  ;;  %8840 = vmatprep.subr.bf16.mxu1 %v11834_v10  ;;  %v11925_v9 = vld [vmem:[#allocation2 + $0xba4] ss:$16 sps:$4 sm:$0xff]   ;;  %v11928_v10 = vld [vmem:[#allocation2 + $0xbac] ss:$16 sps:$4 sm:$0xff]  }
 0x15f   :  { %7834 = vmatpush1.bf16.msra.mxu0 %v11829_v11  ;;  %8841 = vmatpush1.bf16.msra.mxu1 %v11832_v12  ;;  %v11923_v11 = vld [vmem:[#allocation2 + $0xba0] ss:$16 sps:$4 sm:$0xff]   ;;  %v11926_v12 = vld [vmem:[#allocation2 + $0xba8] ss:$16 sps:$4 sm:$0xff]  }
 0x160   :  { %7835 = vmatprep.subr.bf16.mxu0 %v11838_v13  ;;  %8842 = vmatprep.subr.bf16.mxu1 %v11841_v14  ;;  %v11933_v13 = vld [vmem:[#allocation2 + $0xbc4] ss:$16 sps:$4 sm:$0xff]   ;;  %v11936_v14 = vld [vmem:[#allocation2 + $0xbcc] ss:$16 sps:$4 sm:$0xff]  }
 0x163   :  { %7836 = vmatpush1.bf16.msra.mxu0 %v11836_v15  ;;  %8843 = vmatpush1.bf16.msra.mxu1 %v11839_v16  ;;  %v11931_v15 = vld [vmem:[#allocation2 + $0xbc0] ss:$16 sps:$4 sm:$0xff]   ;;  %v11934_v16 = vld [vmem:[#allocation2 + $0xbc8] ss:$16 sps:$4 sm:$0xff]  }
 0x164   :  { %7858 = vmatprep.subr.bf16.mxu0 %v11847_v18  ;;  %8865 = vmatprep.subr.bf16.mxu1 %v11850_v19  ;;  %v11943_v18 = vld [vmem:[#allocation2 + $0xbec] ss:$16 sps:$4 sm:$0xff]   ;;  %v11938_v19 = vld [vmem:[#allocation2 + $0xbe0] ss:$16 sps:$4 sm:$0xff]  }
 0x166   :  { %7838 = vmatmul.mubr.bf16.vlgmr.msra.gmra.mrb[0].mxu0 %v11842_v17  ;;  %8845 = vmatmul.mubr.bf16.vlgmr.msra.gmra.mrb[0].mxu1 %v11842_v17  ;;  %v11940_v17 = vld [vmem:[#allocation2 + $0xbe4] ss:$16 sps:$4 sm:$0xff]  }
 0x167   :  { %7859 = vmatpush1.bf16.msra.mxu0 %v11845_v20  ;;  %8866 = vmatpush1.bf16.msra.mxu1 %v11848_v21  ;;  %v11941_v20 = vld [vmem:[#allocation2 + $0xbe8] ss:$16 sps:$4 sm:$0xff]  }
 0x168   :  { %7860 = vmatprep.subr.bf16.mxu0 %v11853_v22  ;;  %8867 = vmatprep.subr.bf16.mxu1 %v11856_v23  ;;  %v11944_v21 = vld [vmem:[%s13591_s0 + $0x28] ss:$148 sps:$4 sm:$0xff]   ;;  %v11949_v22 = vld [vmem:[#allocation2 + $0xc04] ss:$16 sps:$4 sm:$0xff]  }
 0x169   :  { %7847 = vmatprep.mubr.bf16.mxu0 %v11929_v24  ;;  %8854 = vmatprep.mubr.bf16.mxu1 %v11929_v24  ;;  %v11952_v23 = vld [vmem:[#allocation2 + $0xc0c] ss:$16 sps:$4 sm:$0xff]   ;;  %v11947_v24 = vld [vmem:[#allocation2 + $0xc00] ss:$16 sps:$4 sm:$0xff]  }
 0x16b   :  { %7861 = vmatpush1.bf16.msra.mxu0 %v11851_v25  ;;  %8868 = vmatpush1.bf16.msra.mxu1 %v11854_v26  ;;  %v11950_v25 = vld [vmem:[#allocation2 + $0xc08] ss:$16 sps:$4 sm:$0xff]   ;;  %v11955_v26 = vld [vmem:[#allocation2 + $0xc24] ss:$16 sps:$4 sm:$0xff]  }
 0x16c   :  { %7862 = vmatprep.subr.bf16.mxu0 %v11859_v27  ;;  %8869 = vmatprep.subr.bf16.mxu1 %v11862_v28  ;;  %v11958_v27 = vld [vmem:[#allocation2 + $0xc2c] ss:$16 sps:$4 sm:$0xff]   ;;  %v12031_v28 = vld [vmem:[%s13591_s0 + $0x154] ss:$148 sps:$4 sm:$0xff]  }
 0x16e   :  { %7848 = vmatmul.mubr.bf16.gmra.mrb[4].mxu0 %v11937_v29  ;;  %8855 = vmatmul.mubr.bf16.gmra.mrb[4].mxu1 %v11937_v29  ;;  %v11953_v29 = vld [vmem:[#allocation2 + $0xc20] ss:$16 sps:$4 sm:$0xff]  }
 0x16f   :  { %7863 = vmatpush1.bf16.msra.mxu0 %v11857_v30  ;;  %8870 = vmatpush1.bf16.msra.mxu1 %v11860_v31  ;;  %v11956_v30 = vld [vmem:[#allocation2 + $0xc28] ss:$16 sps:$4 sm:$0xff]   ;;  %v11961_v31 = vld [vmem:[#allocation2 + $0xc44] ss:$16 sps:$4 sm:$0xff]  }
 0x170   :  { %7864 = vmatprep.subr.bf16.mxu0 %v11865_v32  ;;  %8871 = vmatprep.subr.bf16.mxu1 %v11868_v33  ;;  %v11964_v32 = vld [vmem:[#allocation2 + $0xc4c] ss:$16 sps:$4 sm:$0xff]   ;;  %v12039_v33 = vld [vmem:[%s13591_s0 + $0x150] ss:$148 sps:$4 sm:$0xff]  }
 0x171   :  { %7890 = vmatprep.mubr.bf16.mxu0 %v11946_v34  ;;  %8897 = vmatprep.mubr.bf16.mxu1 %v11946_v34  ;;  %v11959_v34 = vld [vmem:[#allocation2 + $0xc40] ss:$16 sps:$4 sm:$0xff]  }
 0x173   :  { %7865 = vmatpush1.bf16.msra.mxu0 %v11863_v35  ;;  %8872 = vmatpush1.bf16.msra.mxu1 %v11866_v36  ;;  %v11962_v35 = vld [vmem:[#allocation2 + $0xc48] ss:$16 sps:$4 sm:$0xff]   ;;  %v11967_v36 = vld [vmem:[#allocation2 + $0xc64] ss:$16 sps:$4 sm:$0xff]  }
 0x174   :  { %7866 = vmatprep.subr.bf16.mxu0 %v11871_v37  ;;  %8873 = vmatprep.subr.bf16.mxu1 %v11874_v38  ;;  %v11970_v37 = vld [vmem:[#allocation2 + $0xc6c] ss:$16 sps:$4 sm:$0xff]   ;;  %v12048_v38 = vld [vmem:[%s13591_s0 + $0x34] ss:$148 sps:$4 sm:$0xff]  }
 0x177   :  { %7867 = vmatpush1.bf16.msra.mxu0 %v11869_v39  ;;  %8874 = vmatpush1.bf16.msra.mxu1 %v11872_v40  ;;  %v11965_v39 = vld [vmem:[#allocation2 + $0xc60] ss:$16 sps:$4 sm:$0xff]   ;;  %v11968_v40 = vld [vmem:[#allocation2 + $0xc68] ss:$16 sps:$4 sm:$0xff]  }
 0x178   :  { %7868 = vmatprep.subr.bf16.mxu0 %v11877_v41  ;;  %8875 = vmatprep.subr.bf16.mxu1 %v11880_v42  ;;  %v11973_v41 = vld [vmem:[#allocation2 + $0xc84] ss:$16 sps:$4 sm:$0xff]   ;;  %v11976_v42 = vld [vmem:[#allocation2 + $0xc8c] ss:$16 sps:$4 sm:$0xff]  }
 0x17b   :  { %7869 = vmatpush1.bf16.msra.mxu0 %v11875_v43  ;;  %8876 = vmatpush1.bf16.msra.mxu1 %v11878_v44  ;;  %v11971_v43 = vld [vmem:[#allocation2 + $0xc80] ss:$16 sps:$4 sm:$0xff]   ;;  %v11974_v44 = vld [vmem:[#allocation2 + $0xc88] ss:$16 sps:$4 sm:$0xff]  }
 0x17c   :  { %7870 = vmatprep.subr.bf16.mxu0 %v11883_v45  ;;  %8877 = vmatprep.subr.bf16.mxu1 %v11886_v46  ;;  %v11979_v45 = vld [vmem:[#allocation2 + $0xca4] ss:$16 sps:$4 sm:$0xff]   ;;  %v11982_v46 = vld [vmem:[#allocation2 + $0xcac] ss:$16 sps:$4 sm:$0xff]  }
 0x17f   :  { %7871 = vmatpush1.bf16.msra.mxu0 %v11881_v47  ;;  %8878 = vmatpush1.bf16.msra.mxu1 %v11884_v48  ;;  %v11977_v47 = vld [vmem:[#allocation2 + $0xca0] ss:$16 sps:$4 sm:$0xff]   ;;  %v11980_v48 = vld [vmem:[#allocation2 + $0xca8] ss:$16 sps:$4 sm:$0xff]  }
 0x180   :  { %7872 = vmatprep.subr.bf16.mxu0 %v11889_v49  ;;  %8879 = vmatprep.subr.bf16.mxu1 %v11892_v50  ;;  %v11985_v49 = vld [vmem:[#allocation2 + $0xcc4] ss:$16 sps:$4 sm:$0xff]   ;;  %v11988_v50 = vld [vmem:[#allocation2 + $0xccc] ss:$16 sps:$4 sm:$0xff]  }
 0x183   :  { %7873 = vmatpush1.bf16.msra.mxu0 %v11887_v51  ;;  %8880 = vmatpush1.bf16.msra.mxu1 %v11890_v52  ;;  %v11983_v51 = vld [vmem:[#allocation2 + $0xcc0] ss:$16 sps:$4 sm:$0xff]   ;;  %v11986_v52 = vld [vmem:[#allocation2 + $0xcc8] ss:$16 sps:$4 sm:$0xff]  }
 0x184   :  { %7874 = vmatprep.subr.bf16.mxu0 %v11895_v53  ;;  %8881 = vmatprep.subr.bf16.mxu1 %v11898_v54  ;;  %v11991_v53 = vld [vmem:[#allocation2 + $0xce4] ss:$16 sps:$4 sm:$0xff]   ;;  %v11994_v54 = vld [vmem:[#allocation2 + $0xcec] ss:$16 sps:$4 sm:$0xff]  }
 0x187   :  { %7875 = vmatpush1.bf16.msra.mxu0 %v11893_v55  ;;  %8882 = vmatpush1.bf16.msra.mxu1 %v11896_v56  ;;  %v11989_v55 = vld [vmem:[#allocation2 + $0xce0] ss:$16 sps:$4 sm:$0xff]   ;;  %v11992_v56 = vld [vmem:[#allocation2 + $0xce8] ss:$16 sps:$4 sm:$0xff]  }
 0x188   :  { %7876 = vmatprep.subr.bf16.mxu0 %v11901_v57  ;;  %8883 = vmatprep.subr.bf16.mxu1 %v11904_v58  ;;  %v11997_v57 = vld [vmem:[#allocation2 + $0xd04] ss:$16 sps:$4 sm:$0xff]   ;;  %v12000_v58 = vld [vmem:[#allocation2 + $0xd0c] ss:$16 sps:$4 sm:$0xff]  }
 0x18b   :  { %7877 = vmatpush1.bf16.msra.mxu0 %v11899_v59  ;;  %8884 = vmatpush1.bf16.msra.mxu1 %v11902_v60  ;;  %v11995_v59 = vld [vmem:[#allocation2 + $0xd00] ss:$16 sps:$4 sm:$0xff]   ;;  %v11998_v60 = vld [vmem:[#allocation2 + $0xd08] ss:$16 sps:$4 sm:$0xff]  }
 0x18c   :  { %7878 = vmatprep.subr.bf16.mxu0 %v11907_v61  ;;  %8885 = vmatprep.subr.bf16.mxu1 %v11910_v62  ;;  %v12003_v61 = vld [vmem:[#allocation2 + $0xd24] ss:$16 sps:$4 sm:$0xff]   ;;  %v12006_v62 = vld [vmem:[#allocation2 + $0xd2c] ss:$16 sps:$4 sm:$0xff]  }
 0x18f   :  { %7879 = vmatpush1.bf16.msra.mxu0 %v11905_v63  ;;  %8886 = vmatpush1.bf16.msra.mxu1 %v11908_v0  ;;  %v12001_v63 = vld [vmem:[#allocation2 + $0xd20] ss:$16 sps:$4 sm:$0xff]   ;;  %v12004_v0 = vld [vmem:[#allocation2 + $0xd28] ss:$16 sps:$4 sm:$0xff]  }
 0x190   :  { %7880 = vmatprep.subr.bf16.mxu0 %v11913_v1  ;;  %8887 = vmatprep.subr.bf16.mxu1 %v11916_v2  ;;  %v12009_v1 = vld [vmem:[#allocation2 + $0xd44] ss:$16 sps:$4 sm:$0xff]   ;;  %v12012_v2 = vld [vmem:[#allocation2 + $0xd4c] ss:$16 sps:$4 sm:$0xff]  }
 0x193   :  { %7881 = vmatpush1.bf16.msra.mxu0 %v11911_v3  ;;  %8888 = vmatpush1.bf16.msra.mxu1 %v11914_v4  ;;  %v12007_v3 = vld [vmem:[#allocation2 + $0xd40] ss:$16 sps:$4 sm:$0xff]   ;;  %v12010_v4 = vld [vmem:[#allocation2 + $0xd48] ss:$16 sps:$4 sm:$0xff]  }
 0x194   :  { %7882 = vmatprep.subr.bf16.mxu0 %v11919_v5  ;;  %8889 = vmatprep.subr.bf16.mxu1 %v11922_v6  ;;  %v12015_v5 = vld [vmem:[#allocation2 + $0xd64] ss:$16 sps:$4 sm:$0xff]   ;;  %v12018_v6 = vld [vmem:[#allocation2 + $0xd6c] ss:$16 sps:$4 sm:$0xff]  }
 0x197   :  { %7883 = vmatpush1.bf16.msra.mxu0 %v11917_v7  ;;  %8890 = vmatpush1.bf16.msra.mxu1 %v11920_v8  ;;  %v12013_v7 = vld [vmem:[#allocation2 + $0xd60] ss:$16 sps:$4 sm:$0xff]   ;;  %v12016_v8 = vld [vmem:[#allocation2 + $0xd68] ss:$16 sps:$4 sm:$0xff]  }
 0x198   :  { %7884 = vmatprep.subr.bf16.mxu0 %v11925_v9  ;;  %8891 = vmatprep.subr.bf16.mxu1 %v11928_v10  ;;  %v12021_v9 = vld [vmem:[#allocation2 + $0xd84] ss:$16 sps:$4 sm:$0xff]   ;;  %v12024_v10 = vld [vmem:[#allocation2 + $0xd8c] ss:$16 sps:$4 sm:$0xff]  }
 0x19b   :  { %7885 = vmatpush1.bf16.msra.mxu0 %v11923_v11  ;;  %8892 = vmatpush1.bf16.msra.mxu1 %v11926_v12  ;;  %v12019_v11 = vld [vmem:[#allocation2 + $0xd80] ss:$16 sps:$4 sm:$0xff]   ;;  %v12022_v12 = vld [vmem:[#allocation2 + $0xd88] ss:$16 sps:$4 sm:$0xff]  }
 0x19c   :  { %7886 = vmatprep.subr.bf16.mxu0 %v11933_v13  ;;  %8893 = vmatprep.subr.bf16.mxu1 %v11936_v14  ;;  %v12027_v13 = vld [vmem:[#allocation2 + $0xda4] ss:$16 sps:$4 sm:$0xff]   ;;  %v12030_v14 = vld [vmem:[#allocation2 + $0xdac] ss:$16 sps:$4 sm:$0xff]  }
 0x19f   :  { %7887 = vmatpush1.bf16.msra.mxu0 %v11931_v15  ;;  %8894 = vmatpush1.bf16.msra.mxu1 %v11934_v16  ;;  %v12025_v15 = vld [vmem:[#allocation2 + $0xda0] ss:$16 sps:$4 sm:$0xff]   ;;  %v12028_v16 = vld [vmem:[#allocation2 + $0xda8] ss:$16 sps:$4 sm:$0xff]  }
 0x1a0   :  { %7888 = vmatprep.subr.bf16.mxu0 %v11940_v17  ;;  %8895 = vmatprep.subr.bf16.mxu1 %v11943_v18  ;;  %v12035_v17 = vld [vmem:[#allocation2 + $0xdc4] ss:$16 sps:$4 sm:$0xff]   ;;  %v12038_v18 = vld [vmem:[#allocation2 + $0xdcc] ss:$16 sps:$4 sm:$0xff]  }
 0x1a3   :  { %7889 = vmatpush1.bf16.msra.mxu0 %v11938_v19  ;;  %8896 = vmatpush1.bf16.msra.mxu1 %v11941_v20  ;;  %v12033_v19 = vld [vmem:[#allocation2 + $0xdc0] ss:$16 sps:$4 sm:$0xff]   ;;  %v12036_v20 = vld [vmem:[#allocation2 + $0xdc8] ss:$16 sps:$4 sm:$0xff]  }
 0x1a4   :  { %7911 = vmatprep.subr.bf16.mxu0 %v11949_v22  ;;  %8918 = vmatprep.subr.bf16.mxu1 %v11952_v23  ;;  %v12045_v22 = vld [vmem:[#allocation2 + $0xdec] ss:$16 sps:$4 sm:$0xff]   ;;  %v12040_v23 = vld [vmem:[#allocation2 + $0xde0] ss:$16 sps:$4 sm:$0xff]  }
 0x1a6   :  { %7891 = vmatmul.mubr.bf16.vlgmr.msra.gmra.mrb[0].mxu0 %v11944_v21  ;;  %8898 = vmatmul.mubr.bf16.vlgmr.msra.gmra.mrb[0].mxu1 %v11944_v21  ;;  %v12042_v21 = vld [vmem:[#allocation2 + $0xde4] ss:$16 sps:$4 sm:$0xff]  }
 0x1a7   :  { %7912 = vmatpush1.bf16.msra.mxu0 %v11947_v24  ;;  %8919 = vmatpush1.bf16.msra.mxu1 %v11950_v25  ;;  %v12043_v24 = vld [vmem:[#allocation2 + $0xde8] ss:$16 sps:$4 sm:$0xff]   ;;  %v12046_v25 = vld [vmem:[%s13591_s0 + $0x30] ss:$148 sps:$4 sm:$0xff]  }
 0x1a8   :  { %7913 = vmatprep.subr.bf16.mxu0 %v11955_v26  ;;  %8920 = vmatprep.subr.bf16.mxu1 %v11958_v27  ;;  %v12051_v26 = vld [vmem:[#allocation2 + $0xe04] ss:$16 sps:$4 sm:$0xff]   ;;  %v12054_v27 = vld [vmem:[#allocation2 + $0xe0c] ss:$16 sps:$4 sm:$0xff]  }
 0x1a9   :  { %7900 = vmatprep.mubr.bf16.mxu0 %v12031_v28  ;;  %8907 = vmatprep.mubr.bf16.mxu1 %v12031_v28  ;;  %v12049_v28 = vld [vmem:[#allocation2 + $0xe00] ss:$16 sps:$4 sm:$0xff]  }
 0x1ab   :  { %7914 = vmatpush1.bf16.msra.mxu0 %v11953_v29  ;;  %8921 = vmatpush1.bf16.msra.mxu1 %v11956_v30  ;;  %v12052_v29 = vld [vmem:[#allocation2 + $0xe08] ss:$16 sps:$4 sm:$0xff]   ;;  %v12057_v30 = vld [vmem:[#allocation2 + $0xe24] ss:$16 sps:$4 sm:$0xff]  }
 0x1ac   :  { %7915 = vmatprep.subr.bf16.mxu0 %v11961_v31  ;;  %8922 = vmatprep.subr.bf16.mxu1 %v11964_v32  ;;  %v12060_v31 = vld [vmem:[#allocation2 + $0xe2c] ss:$16 sps:$4 sm:$0xff]  }
 0x1ad   :  { %v12133_v32 = vld [vmem:[%s13591_s0 + $0x15c] ss:$148 sps:$4 sm:$0xff]  }
 0x1ae   :  { %7901 = vmatmul.mubr.bf16.gmra.mrb[4].mxu0 %v12039_v33  ;;  %8908 = vmatmul.mubr.bf16.gmra.mrb[4].mxu1 %v12039_v33  ;;  %v12055_v33 = vld [vmem:[#allocation2 + $0xe20] ss:$16 sps:$4 sm:$0xff]  }
 0x1af   :  { %7916 = vmatpush1.bf16.msra.mxu0 %v11959_v34  ;;  %8923 = vmatpush1.bf16.msra.mxu1 %v11962_v35  ;;  %v12058_v34 = vld [vmem:[#allocation2 + $0xe28] ss:$16 sps:$4 sm:$0xff]   ;;  %v12063_v35 = vld [vmem:[#allocation2 + $0xe44] ss:$16 sps:$4 sm:$0xff]  }
 0x1b0   :  { %7917 = vmatprep.subr.bf16.mxu0 %v11967_v36  ;;  %8924 = vmatprep.subr.bf16.mxu1 %v11970_v37  ;;  %v12066_v36 = vld [vmem:[#allocation2 + $0xe4c] ss:$16 sps:$4 sm:$0xff]  }
 0x1b1   :  { %7943 = vmatprep.mubr.bf16.mxu0 %v12048_v38  ;;  %8950 = vmatprep.mubr.bf16.mxu1 %v12048_v38  ;;  %v12141_v37 = vld [vmem:[%s13591_s0 + $0x158] ss:$148 sps:$4 sm:$0xff]   ;;  %v12061_v38 = vld [vmem:[#allocation2 + $0xe40] ss:$16 sps:$4 sm:$0xff]  }
 0x1b3   :  { %7918 = vmatpush1.bf16.msra.mxu0 %v11965_v39  ;;  %8925 = vmatpush1.bf16.msra.mxu1 %v11968_v40  ;;  %v12064_v39 = vld [vmem:[#allocation2 + $0xe48] ss:$16 sps:$4 sm:$0xff]   ;;  %v12069_v40 = vld [vmem:[#allocation2 + $0xe64] ss:$16 sps:$4 sm:$0xff]  }
 0x1b4   :  { %7919 = vmatprep.subr.bf16.mxu0 %v11973_v41  ;;  %8926 = vmatprep.subr.bf16.mxu1 %v11976_v42  ;;  %v12072_v41 = vld [vmem:[#allocation2 + $0xe6c] ss:$16 sps:$4 sm:$0xff]  }
 0x1b5   :  { %v12150_v42 = vld [vmem:[%s13591_s0 + $0x3c] ss:$148 sps:$4 sm:$0xff]  }
 0x1b7   :  { %7920 = vmatpush1.bf16.msra.mxu0 %v11971_v43  ;;  %8927 = vmatpush1.bf16.msra.mxu1 %v11974_v44  ;;  %v12067_v43 = vld [vmem:[#allocation2 + $0xe60] ss:$16 sps:$4 sm:$0xff]   ;;  %v12070_v44 = vld [vmem:[#allocation2 + $0xe68] ss:$16 sps:$4 sm:$0xff]  }
 0x1b8   :  { %7921 = vmatprep.subr.bf16.mxu0 %v11979_v45  ;;  %8928 = vmatprep.subr.bf16.mxu1 %v11982_v46  ;;  %v12075_v45 = vld [vmem:[#allocation2 + $0xe84] ss:$16 sps:$4 sm:$0xff]   ;;  %v12078_v46 = vld [vmem:[#allocation2 + $0xe8c] ss:$16 sps:$4 sm:$0xff]  }
 0x1bb   :  { %7922 = vmatpush1.bf16.msra.mxu0 %v11977_v47  ;;  %8929 = vmatpush1.bf16.msra.mxu1 %v11980_v48  ;;  %v12073_v47 = vld [vmem:[#allocation2 + $0xe80] ss:$16 sps:$4 sm:$0xff]   ;;  %v12076_v48 = vld [vmem:[#allocation2 + $0xe88] ss:$16 sps:$4 sm:$0xff]  }
 0x1bc   :  { %7923 = vmatprep.subr.bf16.mxu0 %v11985_v49  ;;  %8930 = vmatprep.subr.bf16.mxu1 %v11988_v50  ;;  %v12081_v49 = vld [vmem:[#allocation2 + $0xea4] ss:$16 sps:$4 sm:$0xff]   ;;  %v12084_v50 = vld [vmem:[#allocation2 + $0xeac] ss:$16 sps:$4 sm:$0xff]  }
 0x1bf   :  { %7924 = vmatpush1.bf16.msra.mxu0 %v11983_v51  ;;  %8931 = vmatpush1.bf16.msra.mxu1 %v11986_v52  ;;  %v12079_v51 = vld [vmem:[#allocation2 + $0xea0] ss:$16 sps:$4 sm:$0xff]   ;;  %v12082_v52 = vld [vmem:[#allocation2 + $0xea8] ss:$16 sps:$4 sm:$0xff]  }
 0x1c0   :  { %7925 = vmatprep.subr.bf16.mxu0 %v11991_v53  ;;  %8932 = vmatprep.subr.bf16.mxu1 %v11994_v54  ;;  %v12087_v53 = vld [vmem:[#allocation2 + $0xec4] ss:$16 sps:$4 sm:$0xff]   ;;  %v12090_v54 = vld [vmem:[#allocation2 + $0xecc] ss:$16 sps:$4 sm:$0xff]  }
 0x1c3   :  { %7926 = vmatpush1.bf16.msra.mxu0 %v11989_v55  ;;  %8933 = vmatpush1.bf16.msra.mxu1 %v11992_v56  ;;  %v12085_v55 = vld [vmem:[#allocation2 + $0xec0] ss:$16 sps:$4 sm:$0xff]   ;;  %v12088_v56 = vld [vmem:[#allocation2 + $0xec8] ss:$16 sps:$4 sm:$0xff]  }
 0x1c4   :  { %7927 = vmatprep.subr.bf16.mxu0 %v11997_v57  ;;  %8934 = vmatprep.subr.bf16.mxu1 %v12000_v58  ;;  %v12093_v57 = vld [vmem:[#allocation2 + $0xee4] ss:$16 sps:$4 sm:$0xff]   ;;  %v12096_v58 = vld [vmem:[#allocation2 + $0xeec] ss:$16 sps:$4 sm:$0xff]  }
 0x1c7   :  { %7928 = vmatpush1.bf16.msra.mxu0 %v11995_v59  ;;  %8935 = vmatpush1.bf16.msra.mxu1 %v11998_v60  ;;  %v12091_v59 = vld [vmem:[#allocation2 + $0xee0] ss:$16 sps:$4 sm:$0xff]   ;;  %v12094_v60 = vld [vmem:[#allocation2 + $0xee8] ss:$16 sps:$4 sm:$0xff]  }
 0x1c8   :  { %7929 = vmatprep.subr.bf16.mxu0 %v12003_v61  ;;  %8936 = vmatprep.subr.bf16.mxu1 %v12006_v62  ;;  %v12099_v61 = vld [vmem:[#allocation2 + $0xf04] ss:$16 sps:$4 sm:$0xff]   ;;  %v12102_v62 = vld [vmem:[#allocation2 + $0xf0c] ss:$16 sps:$4 sm:$0xff]  }
 0x1cb   :  { %7930 = vmatpush1.bf16.msra.mxu0 %v12001_v63  ;;  %8937 = vmatpush1.bf16.msra.mxu1 %v12004_v0  ;;  %v12097_v63 = vld [vmem:[#allocation2 + $0xf00] ss:$16 sps:$4 sm:$0xff]   ;;  %v12100_v0 = vld [vmem:[#allocation2 + $0xf08] ss:$16 sps:$4 sm:$0xff]  }
 0x1cc   :  { %7931 = vmatprep.subr.bf16.mxu0 %v12009_v1  ;;  %8938 = vmatprep.subr.bf16.mxu1 %v12012_v2  ;;  %v12105_v1 = vld [vmem:[#allocation2 + $0xf24] ss:$16 sps:$4 sm:$0xff]   ;;  %v12108_v2 = vld [vmem:[#allocation2 + $0xf2c] ss:$16 sps:$4 sm:$0xff]  }
 0x1cf   :  { %7932 = vmatpush1.bf16.msra.mxu0 %v12007_v3  ;;  %8939 = vmatpush1.bf16.msra.mxu1 %v12010_v4  ;;  %v12103_v3 = vld [vmem:[#allocation2 + $0xf20] ss:$16 sps:$4 sm:$0xff]   ;;  %v12106_v4 = vld [vmem:[#allocation2 + $0xf28] ss:$16 sps:$4 sm:$0xff]  }
 0x1d0   :  { %7933 = vmatprep.subr.bf16.mxu0 %v12015_v5  ;;  %8940 = vmatprep.subr.bf16.mxu1 %v12018_v6  ;;  %v12111_v5 = vld [vmem:[#allocation2 + $0xf44] ss:$16 sps:$4 sm:$0xff]   ;;  %v12114_v6 = vld [vmem:[#allocation2 + $0xf4c] ss:$16 sps:$4 sm:$0xff]  }
 0x1d3   :  { %7934 = vmatpush1.bf16.msra.mxu0 %v12013_v7  ;;  %8941 = vmatpush1.bf16.msra.mxu1 %v12016_v8  ;;  %v12109_v7 = vld [vmem:[#allocation2 + $0xf40] ss:$16 sps:$4 sm:$0xff]   ;;  %v12112_v8 = vld [vmem:[#allocation2 + $0xf48] ss:$16 sps:$4 sm:$0xff]  }
 0x1d4   :  { %7935 = vmatprep.subr.bf16.mxu0 %v12021_v9  ;;  %8942 = vmatprep.subr.bf16.mxu1 %v12024_v10  ;;  %v12117_v9 = vld [vmem:[#allocation2 + $0xf64] ss:$16 sps:$4 sm:$0xff]   ;;  %v12120_v10 = vld [vmem:[#allocation2 + $0xf6c] ss:$16 sps:$4 sm:$0xff]  }
 0x1d7   :  { %7936 = vmatpush1.bf16.msra.mxu0 %v12019_v11  ;;  %8943 = vmatpush1.bf16.msra.mxu1 %v12022_v12  ;;  %v12115_v11 = vld [vmem:[#allocation2 + $0xf60] ss:$16 sps:$4 sm:$0xff]   ;;  %v12118_v12 = vld [vmem:[#allocation2 + $0xf68] ss:$16 sps:$4 sm:$0xff]  }
 0x1d8   :  { %7937 = vmatprep.subr.bf16.mxu0 %v12027_v13  ;;  %8944 = vmatprep.subr.bf16.mxu1 %v12030_v14  ;;  %v12123_v13 = vld [vmem:[#allocation2 + $0xf84] ss:$16 sps:$4 sm:$0xff]   ;;  %v12126_v14 = vld [vmem:[#allocation2 + $0xf8c] ss:$16 sps:$4 sm:$0xff]  }
 0x1db   :  { %7938 = vmatpush1.bf16.msra.mxu0 %v12025_v15  ;;  %8945 = vmatpush1.bf16.msra.mxu1 %v12028_v16  ;;  %v12121_v15 = vld [vmem:[#allocation2 + $0xf80] ss:$16 sps:$4 sm:$0xff]   ;;  %v12124_v16 = vld [vmem:[#allocation2 + $0xf88] ss:$16 sps:$4 sm:$0xff]  }
 0x1dc   :  { %7939 = vmatprep.subr.bf16.mxu0 %v12035_v17  ;;  %8946 = vmatprep.subr.bf16.mxu1 %v12038_v18  ;;  %v12129_v17 = vld [vmem:[#allocation2 + $0xfa4] ss:$16 sps:$4 sm:$0xff]   ;;  %v12132_v18 = vld [vmem:[#allocation2 + $0xfac] ss:$16 sps:$4 sm:$0xff]  }
 0x1df   :  { %7940 = vmatpush1.bf16.msra.mxu0 %v12033_v19  ;;  %8947 = vmatpush1.bf16.msra.mxu1 %v12036_v20  ;;  %v12127_v19 = vld [vmem:[#allocation2 + $0xfa0] ss:$16 sps:$4 sm:$0xff]   ;;  %v12130_v20 = vld [vmem:[#allocation2 + $0xfa8] ss:$16 sps:$4 sm:$0xff]  }
 0x1e0   :  { %7941 = vmatprep.subr.bf16.mxu0 %v12042_v21  ;;  %8948 = vmatprep.subr.bf16.mxu1 %v12045_v22  ;;  %v12137_v21 = vld [vmem:[#allocation2 + $0xfc4] ss:$16 sps:$4 sm:$0xff]   ;;  %v12140_v22 = vld [vmem:[#allocation2 + $0xfcc] ss:$16 sps:$4 sm:$0xff]  }
 0x1e3   :  { %7942 = vmatpush1.bf16.msra.mxu0 %v12040_v23  ;;  %8949 = vmatpush1.bf16.msra.mxu1 %v12043_v24  ;;  %v12135_v23 = vld [vmem:[#allocation2 + $0xfc0] ss:$16 sps:$4 sm:$0xff]   ;;  %v12138_v24 = vld [vmem:[#allocation2 + $0xfc8] ss:$16 sps:$4 sm:$0xff]  }
 0x1e4   :  { %7964 = vmatprep.subr.bf16.mxu0 %v12051_v26  ;;  %8971 = vmatprep.subr.bf16.mxu1 %v12054_v27  ;;  %v12147_v26 = vld [vmem:[#allocation2 + $0xfec] ss:$16 sps:$4 sm:$0xff]   ;;  %v12142_v27 = vld [vmem:[#allocation2 + $0xfe0] ss:$16 sps:$4 sm:$0xff]  }
 0x1e6   :  { %7944 = vmatmul.mubr.bf16.vlgmr.msra.gmra.mrb[0].mxu0 %v12046_v25  ;;  %8951 = vmatmul.mubr.bf16.vlgmr.msra.gmra.mrb[0].mxu1 %v12046_v25  ;;  %v12144_v25 = vld [vmem:[#allocation2 + $0xfe4] ss:$16 sps:$4 sm:$0xff]  }
 0x1e7   :  { %7965 = vmatpush1.bf16.msra.mxu0 %v12049_v28  ;;  %8972 = vmatpush1.bf16.msra.mxu1 %v12052_v29  ;;  %v12145_v28 = vld [vmem:[#allocation2 + $0xfe8] ss:$16 sps:$4 sm:$0xff]  }
 0x1e8   :  { %7966 = vmatprep.subr.bf16.mxu0 %v12057_v30  ;;  %8973 = vmatprep.subr.bf16.mxu1 %v12060_v31  ;;  %v12148_v29 = vld [vmem:[%s13591_s0 + $0x38] ss:$148 sps:$4 sm:$0xff]   ;;  %v12153_v30 = vld [vmem:[#allocation2 + $0x1004] ss:$16 sps:$4 sm:$0xff]  }
 0x1e9   :  { %7953 = vmatprep.mubr.bf16.mxu0 %v12133_v32  ;;  %8960 = vmatprep.mubr.bf16.mxu1 %v12133_v32  ;;  %v12156_v31 = vld [vmem:[#allocation2 + $0x100c] ss:$16 sps:$4 sm:$0xff]   ;;  %v12151_v32 = vld [vmem:[#allocation2 + $0x1000] ss:$16 sps:$4 sm:$0xff]  }
 0x1eb   :  { %7967 = vmatpush1.bf16.msra.mxu0 %v12055_v33  ;;  %8974 = vmatpush1.bf16.msra.mxu1 %v12058_v34  ;;  %v12154_v33 = vld [vmem:[#allocation2 + $0x1008] ss:$16 sps:$4 sm:$0xff]   ;;  %v12159_v34 = vld [vmem:[#allocation2 + $0x1024] ss:$16 sps:$4 sm:$0xff]  }
 0x1ec   :  { %7968 = vmatprep.subr.bf16.mxu0 %v12063_v35  ;;  %8975 = vmatprep.subr.bf16.mxu1 %v12066_v36  ;;  %v12162_v35 = vld [vmem:[#allocation2 + $0x102c] ss:$16 sps:$4 sm:$0xff]   ;;  %v12235_v36 = vld [vmem:[%s13591_s0 + $0x164] ss:$148 sps:$4 sm:$0xff]  }
 0x1ee   :  { %7954 = vmatmul.mubr.bf16.gmra.mrb[4].mxu0 %v12141_v37  ;;  %8961 = vmatmul.mubr.bf16.gmra.mrb[4].mxu1 %v12141_v37  ;;  %v12157_v37 = vld [vmem:[#allocation2 + $0x1020] ss:$16 sps:$4 sm:$0xff]  }
 0x1ef   :  { %7969 = vmatpush1.bf16.msra.mxu0 %v12061_v38  ;;  %8976 = vmatpush1.bf16.msra.mxu1 %v12064_v39  ;;  %v12160_v38 = vld [vmem:[#allocation2 + $0x1028] ss:$16 sps:$4 sm:$0xff]   ;;  %v12165_v39 = vld [vmem:[#allocation2 + $0x1044] ss:$16 sps:$4 sm:$0xff]  }
 0x1f0   :  { %7970 = vmatprep.subr.bf16.mxu0 %v12069_v40  ;;  %8977 = vmatprep.subr.bf16.mxu1 %v12072_v41  ;;  %v12168_v40 = vld [vmem:[#allocation2 + $0x104c] ss:$16 sps:$4 sm:$0xff]   ;;  %v12243_v41 = vld [vmem:[%s13591_s0 + $0x160] ss:$148 sps:$4 sm:$0xff]  }
 0x1f1   :  { %7996 = vmatprep.mubr.bf16.mxu0 %v12150_v42  ;;  %9003 = vmatprep.mubr.bf16.mxu1 %v12150_v42  ;;  %v12163_v42 = vld [vmem:[#allocation2 + $0x1040] ss:$16 sps:$4 sm:$0xff]  }
 0x1f3   :  { %7971 = vmatpush1.bf16.msra.mxu0 %v12067_v43  ;;  %8978 = vmatpush1.bf16.msra.mxu1 %v12070_v44  ;;  %v12166_v43 = vld [vmem:[#allocation2 + $0x1048] ss:$16 sps:$4 sm:$0xff]   ;;  %v12171_v44 = vld [vmem:[#allocation2 + $0x1064] ss:$16 sps:$4 sm:$0xff]  }
 0x1f4   :  { %7972 = vmatprep.subr.bf16.mxu0 %v12075_v45  ;;  %8979 = vmatprep.subr.bf16.mxu1 %v12078_v46  ;;  %v12174_v45 = vld [vmem:[#allocation2 + $0x106c] ss:$16 sps:$4 sm:$0xff]   ;;  %v12252_v46 = vld [vmem:[%s13591_s0 + $0x44] ss:$148 sps:$4 sm:$0xff]  }
 0x1f7   :  { %7973 = vmatpush1.bf16.msra.mxu0 %v12073_v47  ;;  %8980 = vmatpush1.bf16.msra.mxu1 %v12076_v48  ;;  %v12169_v47 = vld [vmem:[#allocation2 + $0x1060] ss:$16 sps:$4 sm:$0xff]   ;;  %v12172_v48 = vld [vmem:[#allocation2 + $0x1068] ss:$16 sps:$4 sm:$0xff]  }
 0x1f8   :  { %7974 = vmatprep.subr.bf16.mxu0 %v12081_v49  ;;  %8981 = vmatprep.subr.bf16.mxu1 %v12084_v50  ;;  %v12177_v49 = vld [vmem:[#allocation2 + $0x1084] ss:$16 sps:$4 sm:$0xff]   ;;  %v12180_v50 = vld [vmem:[#allocation2 + $0x108c] ss:$16 sps:$4 sm:$0xff]  }
 0x1fb   :  { %7975 = vmatpush1.bf16.msra.mxu0 %v12079_v51  ;;  %8982 = vmatpush1.bf16.msra.mxu1 %v12082_v52  ;;  %v12175_v51 = vld [vmem:[#allocation2 + $0x1080] ss:$16 sps:$4 sm:$0xff]   ;;  %v12178_v52 = vld [vmem:[#allocation2 + $0x1088] ss:$16 sps:$4 sm:$0xff]  }
 0x1fc   :  { %7976 = vmatprep.subr.bf16.mxu0 %v12087_v53  ;;  %8983 = vmatprep.subr.bf16.mxu1 %v12090_v54  ;;  %v12183_v53 = vld [vmem:[#allocation2 + $0x10a4] ss:$16 sps:$4 sm:$0xff]   ;;  %v12186_v54 = vld [vmem:[#allocation2 + $0x10ac] ss:$16 sps:$4 sm:$0xff]  }
 0x1ff   :  { %7977 = vmatpush1.bf16.msra.mxu0 %v12085_v55  ;;  %8984 = vmatpush1.bf16.msra.mxu1 %v12088_v56  ;;  %v12181_v55 = vld [vmem:[#allocation2 + $0x10a0] ss:$16 sps:$4 sm:$0xff]   ;;  %v12184_v56 = vld [vmem:[#allocation2 + $0x10a8] ss:$16 sps:$4 sm:$0xff]  }
 0x200   :  { %7978 = vmatprep.subr.bf16.mxu0 %v12093_v57  ;;  %8985 = vmatprep.subr.bf16.mxu1 %v12096_v58  ;;  %v12189_v57 = vld [vmem:[#allocation2 + $0x10c4] ss:$16 sps:$4 sm:$0xff]   ;;  %v12192_v58 = vld [vmem:[#allocation2 + $0x10cc] ss:$16 sps:$4 sm:$0xff]  }
 0x203   :  { %7979 = vmatpush1.bf16.msra.mxu0 %v12091_v59  ;;  %8986 = vmatpush1.bf16.msra.mxu1 %v12094_v60  ;;  %v12187_v59 = vld [vmem:[#allocation2 + $0x10c0] ss:$16 sps:$4 sm:$0xff]   ;;  %v12190_v60 = vld [vmem:[#allocation2 + $0x10c8] ss:$16 sps:$4 sm:$0xff]  }
 0x204   :  { %7980 = vmatprep.subr.bf16.mxu0 %v12099_v61  ;;  %8987 = vmatprep.subr.bf16.mxu1 %v12102_v62  ;;  %v12195_v61 = vld [vmem:[#allocation2 + $0x10e4] ss:$16 sps:$4 sm:$0xff]   ;;  %v12198_v62 = vld [vmem:[#allocation2 + $0x10ec] ss:$16 sps:$4 sm:$0xff]  }
 0x207   :  { %7981 = vmatpush1.bf16.msra.mxu0 %v12097_v63  ;;  %8988 = vmatpush1.bf16.msra.mxu1 %v12100_v0  ;;  %v12193_v63 = vld [vmem:[#allocation2 + $0x10e0] ss:$16 sps:$4 sm:$0xff]   ;;  %v12196_v0 = vld [vmem:[#allocation2 + $0x10e8] ss:$16 sps:$4 sm:$0xff]  }
 0x208   :  { %7982 = vmatprep.subr.bf16.mxu0 %v12105_v1  ;;  %8989 = vmatprep.subr.bf16.mxu1 %v12108_v2  ;;  %v12201_v1 = vld [vmem:[#allocation2 + $0x1104] ss:$16 sps:$4 sm:$0xff]   ;;  %v12204_v2 = vld [vmem:[#allocation2 + $0x110c] ss:$16 sps:$4 sm:$0xff]  }
 0x20b   :  { %7983 = vmatpush1.bf16.msra.mxu0 %v12103_v3  ;;  %8990 = vmatpush1.bf16.msra.mxu1 %v12106_v4  ;;  %v12199_v3 = vld [vmem:[#allocation2 + $0x1100] ss:$16 sps:$4 sm:$0xff]   ;;  %v12202_v4 = vld [vmem:[#allocation2 + $0x1108] ss:$16 sps:$4 sm:$0xff]  }
 0x20c   :  { %7984 = vmatprep.subr.bf16.mxu0 %v12111_v5  ;;  %8991 = vmatprep.subr.bf16.mxu1 %v12114_v6  ;;  %v12207_v5 = vld [vmem:[#allocation2 + $0x1124] ss:$16 sps:$4 sm:$0xff]   ;;  %v12210_v6 = vld [vmem:[#allocation2 + $0x112c] ss:$16 sps:$4 sm:$0xff]  }
 0x20f   :  { %7985 = vmatpush1.bf16.msra.mxu0 %v12109_v7  ;;  %8992 = vmatpush1.bf16.msra.mxu1 %v12112_v8  ;;  %v12205_v7 = vld [vmem:[#allocation2 + $0x1120] ss:$16 sps:$4 sm:$0xff]   ;;  %v12208_v8 = vld [vmem:[#allocation2 + $0x1128] ss:$16 sps:$4 sm:$0xff]  }
 0x210   :  { %7986 = vmatprep.subr.bf16.mxu0 %v12117_v9  ;;  %8993 = vmatprep.subr.bf16.mxu1 %v12120_v10  ;;  %v12213_v9 = vld [vmem:[#allocation2 + $0x1144] ss:$16 sps:$4 sm:$0xff]   ;;  %v12216_v10 = vld [vmem:[#allocation2 + $0x114c] ss:$16 sps:$4 sm:$0xff]  }
 0x213   :  { %7987 = vmatpush1.bf16.msra.mxu0 %v12115_v11  ;;  %8994 = vmatpush1.bf16.msra.mxu1 %v12118_v12  ;;  %v12211_v11 = vld [vmem:[#allocation2 + $0x1140] ss:$16 sps:$4 sm:$0xff]   ;;  %v12214_v12 = vld [vmem:[#allocation2 + $0x1148] ss:$16 sps:$4 sm:$0xff]  }
 0x214   :  { %7988 = vmatprep.subr.bf16.mxu0 %v12123_v13  ;;  %8995 = vmatprep.subr.bf16.mxu1 %v12126_v14  ;;  %v12219_v13 = vld [vmem:[#allocation2 + $0x1164] ss:$16 sps:$4 sm:$0xff]   ;;  %v12222_v14 = vld [vmem:[#allocation2 + $0x116c] ss:$16 sps:$4 sm:$0xff]  }
 0x217   :  { %7989 = vmatpush1.bf16.msra.mxu0 %v12121_v15  ;;  %8996 = vmatpush1.bf16.msra.mxu1 %v12124_v16  ;;  %v12217_v15 = vld [vmem:[#allocation2 + $0x1160] ss:$16 sps:$4 sm:$0xff]   ;;  %v12220_v16 = vld [vmem:[#allocation2 + $0x1168] ss:$16 sps:$4 sm:$0xff]  }
 0x218   :  { %7990 = vmatprep.subr.bf16.mxu0 %v12129_v17  ;;  %8997 = vmatprep.subr.bf16.mxu1 %v12132_v18  ;;  %v12225_v17 = vld [vmem:[#allocation2 + $0x1184] ss:$16 sps:$4 sm:$0xff]   ;;  %v12228_v18 = vld [vmem:[#allocation2 + $0x118c] ss:$16 sps:$4 sm:$0xff]  }
 0x21b   :  { %7991 = vmatpush1.bf16.msra.mxu0 %v12127_v19  ;;  %8998 = vmatpush1.bf16.msra.mxu1 %v12130_v20  ;;  %v12223_v19 = vld [vmem:[#allocation2 + $0x1180] ss:$16 sps:$4 sm:$0xff]   ;;  %v12226_v20 = vld [vmem:[#allocation2 + $0x1188] ss:$16 sps:$4 sm:$0xff]  }
 0x21c   :  { %7992 = vmatprep.subr.bf16.mxu0 %v12137_v21  ;;  %8999 = vmatprep.subr.bf16.mxu1 %v12140_v22  ;;  %v12231_v21 = vld [vmem:[#allocation2 + $0x11a4] ss:$16 sps:$4 sm:$0xff]   ;;  %v12234_v22 = vld [vmem:[#allocation2 + $0x11ac] ss:$16 sps:$4 sm:$0xff]  }
 0x21f   :  { %7993 = vmatpush1.bf16.msra.mxu0 %v12135_v23  ;;  %9000 = vmatpush1.bf16.msra.mxu1 %v12138_v24  ;;  %v12229_v23 = vld [vmem:[#allocation2 + $0x11a0] ss:$16 sps:$4 sm:$0xff]   ;;  %v12232_v24 = vld [vmem:[#allocation2 + $0x11a8] ss:$16 sps:$4 sm:$0xff]  }
 0x220   :  { %7994 = vmatprep.subr.bf16.mxu0 %v12144_v25  ;;  %9001 = vmatprep.subr.bf16.mxu1 %v12147_v26  ;;  %v12239_v25 = vld [vmem:[#allocation2 + $0x11c4] ss:$16 sps:$4 sm:$0xff]   ;;  %v12242_v26 = vld [vmem:[#allocation2 + $0x11cc] ss:$16 sps:$4 sm:$0xff]  }
 0x223   :  { %7995 = vmatpush1.bf16.msra.mxu0 %v12142_v27  ;;  %9002 = vmatpush1.bf16.msra.mxu1 %v12145_v28  ;;  %v12237_v27 = vld [vmem:[#allocation2 + $0x11c0] ss:$16 sps:$4 sm:$0xff]   ;;  %v12240_v28 = vld [vmem:[#allocation2 + $0x11c8] ss:$16 sps:$4 sm:$0xff]  }
 0x224   :  { %8017 = vmatprep.subr.bf16.mxu0 %v12153_v30  ;;  %9024 = vmatprep.subr.bf16.mxu1 %v12156_v31  ;;  %v12249_v30 = vld [vmem:[#allocation2 + $0x11ec] ss:$16 sps:$4 sm:$0xff]   ;;  %v12244_v31 = vld [vmem:[#allocation2 + $0x11e0] ss:$16 sps:$4 sm:$0xff]  }
 0x226   :  { %7997 = vmatmul.mubr.bf16.vlgmr.msra.gmra.mrb[0].mxu0 %v12148_v29  ;;  %9004 = vmatmul.mubr.bf16.vlgmr.msra.gmra.mrb[0].mxu1 %v12148_v29  ;;  %v12246_v29 = vld [vmem:[#allocation2 + $0x11e4] ss:$16 sps:$4 sm:$0xff]  }
 0x227   :  { %8018 = vmatpush1.bf16.msra.mxu0 %v12151_v32  ;;  %9025 = vmatpush1.bf16.msra.mxu1 %v12154_v33  ;;  %v12247_v32 = vld [vmem:[#allocation2 + $0x11e8] ss:$16 sps:$4 sm:$0xff]   ;;  %v12250_v33 = vld [vmem:[%s13591_s0 + $0x40] ss:$148 sps:$4 sm:$0xff]  }
 0x228   :  { %8019 = vmatprep.subr.bf16.mxu0 %v12159_v34  ;;  %9026 = vmatprep.subr.bf16.mxu1 %v12162_v35  ;;  %v12255_v34 = vld [vmem:[#allocation2 + $0x1204] ss:$16 sps:$4 sm:$0xff]   ;;  %v12258_v35 = vld [vmem:[#allocation2 + $0x120c] ss:$16 sps:$4 sm:$0xff]  }
 0x229   :  { %8006 = vmatprep.mubr.bf16.mxu0 %v12235_v36  ;;  %9013 = vmatprep.mubr.bf16.mxu1 %v12235_v36  ;;  %v12253_v36 = vld [vmem:[#allocation2 + $0x1200] ss:$16 sps:$4 sm:$0xff]  }
 0x22b   :  { %8020 = vmatpush1.bf16.msra.mxu0 %v12157_v37  ;;  %9027 = vmatpush1.bf16.msra.mxu1 %v12160_v38  ;;  %v12256_v37 = vld [vmem:[#allocation2 + $0x1208] ss:$16 sps:$4 sm:$0xff]   ;;  %v12261_v38 = vld [vmem:[#allocation2 + $0x1224] ss:$16 sps:$4 sm:$0xff]  }
 0x22c   :  { %8021 = vmatprep.subr.bf16.mxu0 %v12165_v39  ;;  %9028 = vmatprep.subr.bf16.mxu1 %v12168_v40  ;;  %v12264_v39 = vld [vmem:[#allocation2 + $0x122c] ss:$16 sps:$4 sm:$0xff]  }
 0x22d   :  { %v12337_v40 = vld [vmem:[%s13591_s0 + $0x16c] ss:$148 sps:$4 sm:$0xff]  }
 0x22e   :  { %8007 = vmatmul.mubr.bf16.gmra.mrb[4].mxu0 %v12243_v41  ;;  %9014 = vmatmul.mubr.bf16.gmra.mrb[4].mxu1 %v12243_v41  ;;  %v12259_v41 = vld [vmem:[#allocation2 + $0x1220] ss:$16 sps:$4 sm:$0xff]  }
 0x22f   :  { %8022 = vmatpush1.bf16.msra.mxu0 %v12163_v42  ;;  %9029 = vmatpush1.bf16.msra.mxu1 %v12166_v43  ;;  %v12262_v42 = vld [vmem:[#allocation2 + $0x1228] ss:$16 sps:$4 sm:$0xff]   ;;  %v12267_v43 = vld [vmem:[#allocation2 + $0x1244] ss:$16 sps:$4 sm:$0xff]  }
 0x230   :  { %8023 = vmatprep.subr.bf16.mxu0 %v12171_v44  ;;  %9030 = vmatprep.subr.bf16.mxu1 %v12174_v45  ;;  %v12270_v44 = vld [vmem:[#allocation2 + $0x124c] ss:$16 sps:$4 sm:$0xff]  }
 0x231   :  { %8049 = vmatprep.mubr.bf16.mxu0 %v12252_v46  ;;  %9056 = vmatprep.mubr.bf16.mxu1 %v12252_v46  ;;  %v12345_v45 = vld [vmem:[%s13591_s0 + $0x168] ss:$148 sps:$4 sm:$0xff]   ;;  %v12265_v46 = vld [vmem:[#allocation2 + $0x1240] ss:$16 sps:$4 sm:$0xff]  }
 0x233   :  { %8024 = vmatpush1.bf16.msra.mxu0 %v12169_v47  ;;  %9031 = vmatpush1.bf16.msra.mxu1 %v12172_v48  ;;  %v12268_v47 = vld [vmem:[#allocation2 + $0x1248] ss:$16 sps:$4 sm:$0xff]   ;;  %v12273_v48 = vld [vmem:[#allocation2 + $0x1264] ss:$16 sps:$4 sm:$0xff]  }
 0x234   :  { %8025 = vmatprep.subr.bf16.mxu0 %v12177_v49  ;;  %9032 = vmatprep.subr.bf16.mxu1 %v12180_v50  ;;  %v12276_v49 = vld [vmem:[#allocation2 + $0x126c] ss:$16 sps:$4 sm:$0xff]  }
 0x235   :  { %v12354_v50 = vld [vmem:[%s13591_s0 + $0x4c] ss:$148 sps:$4 sm:$0xff]  }
 0x237   :  { %8026 = vmatpush1.bf16.msra.mxu0 %v12175_v51  ;;  %9033 = vmatpush1.bf16.msra.mxu1 %v12178_v52  ;;  %v12271_v51 = vld [vmem:[#allocation2 + $0x1260] ss:$16 sps:$4 sm:$0xff]   ;;  %v12274_v52 = vld [vmem:[#allocation2 + $0x1268] ss:$16 sps:$4 sm:$0xff]  }
 0x238   :  { %8027 = vmatprep.subr.bf16.mxu0 %v12183_v53  ;;  %9034 = vmatprep.subr.bf16.mxu1 %v12186_v54  ;;  %v12279_v53 = vld [vmem:[#allocation2 + $0x1284] ss:$16 sps:$4 sm:$0xff]   ;;  %v12282_v54 = vld [vmem:[#allocation2 + $0x128c] ss:$16 sps:$4 sm:$0xff]  }
 0x23b   :  { %8028 = vmatpush1.bf16.msra.mxu0 %v12181_v55  ;;  %9035 = vmatpush1.bf16.msra.mxu1 %v12184_v56  ;;  %v12277_v55 = vld [vmem:[#allocation2 + $0x1280] ss:$16 sps:$4 sm:$0xff]   ;;  %v12280_v56 = vld [vmem:[#allocation2 + $0x1288] ss:$16 sps:$4 sm:$0xff]  }
 0x23c   :  { %8029 = vmatprep.subr.bf16.mxu0 %v12189_v57  ;;  %9036 = vmatprep.subr.bf16.mxu1 %v12192_v58  ;;  %v12285_v57 = vld [vmem:[#allocation2 + $0x12a4] ss:$16 sps:$4 sm:$0xff]   ;;  %v12288_v58 = vld [vmem:[#allocation2 + $0x12ac] ss:$16 sps:$4 sm:$0xff]  }
 0x23f   :  { %8030 = vmatpush1.bf16.msra.mxu0 %v12187_v59  ;;  %9037 = vmatpush1.bf16.msra.mxu1 %v12190_v60  ;;  %v12283_v59 = vld [vmem:[#allocation2 + $0x12a0] ss:$16 sps:$4 sm:$0xff]   ;;  %v12286_v60 = vld [vmem:[#allocation2 + $0x12a8] ss:$16 sps:$4 sm:$0xff]  }
 0x240   :  { %8031 = vmatprep.subr.bf16.mxu0 %v12195_v61  ;;  %9038 = vmatprep.subr.bf16.mxu1 %v12198_v62  ;;  %v12291_v61 = vld [vmem:[#allocation2 + $0x12c4] ss:$16 sps:$4 sm:$0xff]   ;;  %v12294_v62 = vld [vmem:[#allocation2 + $0x12cc] ss:$16 sps:$4 sm:$0xff]  }
 0x243   :  { %8032 = vmatpush1.bf16.msra.mxu0 %v12193_v63  ;;  %9039 = vmatpush1.bf16.msra.mxu1 %v12196_v0  ;;  %v12289_v63 = vld [vmem:[#allocation2 + $0x12c0] ss:$16 sps:$4 sm:$0xff]   ;;  %v12292_v0 = vld [vmem:[#allocation2 + $0x12c8] ss:$16 sps:$4 sm:$0xff]  }
 0x244   :  { %8033 = vmatprep.subr.bf16.mxu0 %v12201_v1  ;;  %9040 = vmatprep.subr.bf16.mxu1 %v12204_v2  ;;  %v12297_v1 = vld [vmem:[#allocation2 + $0x12e4] ss:$16 sps:$4 sm:$0xff]   ;;  %v12300_v2 = vld [vmem:[#allocation2 + $0x12ec] ss:$16 sps:$4 sm:$0xff]  }
 0x247   :  { %8034 = vmatpush1.bf16.msra.mxu0 %v12199_v3  ;;  %9041 = vmatpush1.bf16.msra.mxu1 %v12202_v4  ;;  %v12295_v3 = vld [vmem:[#allocation2 + $0x12e0] ss:$16 sps:$4 sm:$0xff]   ;;  %v12298_v4 = vld [vmem:[#allocation2 + $0x12e8] ss:$16 sps:$4 sm:$0xff]  }
 0x248   :  { %8035 = vmatprep.subr.bf16.mxu0 %v12207_v5  ;;  %9042 = vmatprep.subr.bf16.mxu1 %v12210_v6  ;;  %v12303_v5 = vld [vmem:[#allocation2 + $0x1304] ss:$16 sps:$4 sm:$0xff]   ;;  %v12306_v6 = vld [vmem:[#allocation2 + $0x130c] ss:$16 sps:$4 sm:$0xff]  }
 0x24b   :  { %8036 = vmatpush1.bf16.msra.mxu0 %v12205_v7  ;;  %9043 = vmatpush1.bf16.msra.mxu1 %v12208_v8  ;;  %v12301_v7 = vld [vmem:[#allocation2 + $0x1300] ss:$16 sps:$4 sm:$0xff]   ;;  %v12304_v8 = vld [vmem:[#allocation2 + $0x1308] ss:$16 sps:$4 sm:$0xff]  }
 0x24c   :  { %8037 = vmatprep.subr.bf16.mxu0 %v12213_v9  ;;  %9044 = vmatprep.subr.bf16.mxu1 %v12216_v10  ;;  %v12309_v9 = vld [vmem:[#allocation2 + $0x1324] ss:$16 sps:$4 sm:$0xff]   ;;  %v12312_v10 = vld [vmem:[#allocation2 + $0x132c] ss:$16 sps:$4 sm:$0xff]  }
 0x24f   :  { %8038 = vmatpush1.bf16.msra.mxu0 %v12211_v11  ;;  %9045 = vmatpush1.bf16.msra.mxu1 %v12214_v12  ;;  %v12307_v11 = vld [vmem:[#allocation2 + $0x1320] ss:$16 sps:$4 sm:$0xff]   ;;  %v12310_v12 = vld [vmem:[#allocation2 + $0x1328] ss:$16 sps:$4 sm:$0xff]  }
 0x250   :  { %8039 = vmatprep.subr.bf16.mxu0 %v12219_v13  ;;  %9046 = vmatprep.subr.bf16.mxu1 %v12222_v14  ;;  %v12315_v13 = vld [vmem:[#allocation2 + $0x1344] ss:$16 sps:$4 sm:$0xff]   ;;  %v12318_v14 = vld [vmem:[#allocation2 + $0x134c] ss:$16 sps:$4 sm:$0xff]  }
 0x253   :  { %8040 = vmatpush1.bf16.msra.mxu0 %v12217_v15  ;;  %9047 = vmatpush1.bf16.msra.mxu1 %v12220_v16  ;;  %v12313_v15 = vld [vmem:[#allocation2 + $0x1340] ss:$16 sps:$4 sm:$0xff]   ;;  %v12316_v16 = vld [vmem:[#allocation2 + $0x1348] ss:$16 sps:$4 sm:$0xff]  }
 0x254   :  { %8041 = vmatprep.subr.bf16.mxu0 %v12225_v17  ;;  %9048 = vmatprep.subr.bf16.mxu1 %v12228_v18  ;;  %v12321_v17 = vld [vmem:[#allocation2 + $0x1364] ss:$16 sps:$4 sm:$0xff]   ;;  %v12324_v18 = vld [vmem:[#allocation2 + $0x136c] ss:$16 sps:$4 sm:$0xff]  }
 0x257   :  { %8042 = vmatpush1.bf16.msra.mxu0 %v12223_v19  ;;  %9049 = vmatpush1.bf16.msra.mxu1 %v12226_v20  ;;  %v12319_v19 = vld [vmem:[#allocation2 + $0x1360] ss:$16 sps:$4 sm:$0xff]   ;;  %v12322_v20 = vld [vmem:[#allocation2 + $0x1368] ss:$16 sps:$4 sm:$0xff]  }
 0x258   :  { %8043 = vmatprep.subr.bf16.mxu0 %v12231_v21  ;;  %9050 = vmatprep.subr.bf16.mxu1 %v12234_v22  ;;  %v12327_v21 = vld [vmem:[#allocation2 + $0x1384] ss:$16 sps:$4 sm:$0xff]   ;;  %v12330_v22 = vld [vmem:[#allocation2 + $0x138c] ss:$16 sps:$4 sm:$0xff]  }
 0x25b   :  { %8044 = vmatpush1.bf16.msra.mxu0 %v12229_v23  ;;  %9051 = vmatpush1.bf16.msra.mxu1 %v12232_v24  ;;  %v12325_v23 = vld [vmem:[#allocation2 + $0x1380] ss:$16 sps:$4 sm:$0xff]   ;;  %v12328_v24 = vld [vmem:[#allocation2 + $0x1388] ss:$16 sps:$4 sm:$0xff]  }
 0x25c   :  { %8045 = vmatprep.subr.bf16.mxu0 %v12239_v25  ;;  %9052 = vmatprep.subr.bf16.mxu1 %v12242_v26  ;;  %v12333_v25 = vld [vmem:[#allocation2 + $0x13a4] ss:$16 sps:$4 sm:$0xff]   ;;  %v12336_v26 = vld [vmem:[#allocation2 + $0x13ac] ss:$16 sps:$4 sm:$0xff]  }
 0x25f   :  { %8046 = vmatpush1.bf16.msra.mxu0 %v12237_v27  ;;  %9053 = vmatpush1.bf16.msra.mxu1 %v12240_v28  ;;  %v12331_v27 = vld [vmem:[#allocation2 + $0x13a0] ss:$16 sps:$4 sm:$0xff]   ;;  %v12334_v28 = vld [vmem:[#allocation2 + $0x13a8] ss:$16 sps:$4 sm:$0xff]  }
 0x260   :  { %8047 = vmatprep.subr.bf16.mxu0 %v12246_v29  ;;  %9054 = vmatprep.subr.bf16.mxu1 %v12249_v30  ;;  %v12341_v29 = vld [vmem:[#allocation2 + $0x13c4] ss:$16 sps:$4 sm:$0xff]   ;;  %v12344_v30 = vld [vmem:[#allocation2 + $0x13cc] ss:$16 sps:$4 sm:$0xff]  }
 0x263   :  { %8048 = vmatpush1.bf16.msra.mxu0 %v12244_v31  ;;  %9055 = vmatpush1.bf16.msra.mxu1 %v12247_v32  ;;  %v12339_v31 = vld [vmem:[#allocation2 + $0x13c0] ss:$16 sps:$4 sm:$0xff]   ;;  %v12342_v32 = vld [vmem:[#allocation2 + $0x13c8] ss:$16 sps:$4 sm:$0xff]  }
 0x264   :  { %8070 = vmatprep.subr.bf16.mxu0 %v12255_v34  ;;  %9077 = vmatprep.subr.bf16.mxu1 %v12258_v35  ;;  %v12351_v34 = vld [vmem:[#allocation2 + $0x13ec] ss:$16 sps:$4 sm:$0xff]   ;;  %v12346_v35 = vld [vmem:[#allocation2 + $0x13e0] ss:$16 sps:$4 sm:$0xff]  }
 0x266   :  { %8050 = vmatmul.mubr.bf16.vlgmr.msra.gmra.mrb[0].mxu0 %v12250_v33  ;;  %9057 = vmatmul.mubr.bf16.vlgmr.msra.gmra.mrb[0].mxu1 %v12250_v33  ;;  %v12348_v33 = vld [vmem:[#allocation2 + $0x13e4] ss:$16 sps:$4 sm:$0xff]  }
 0x267   :  { %8071 = vmatpush1.bf16.msra.mxu0 %v12253_v36  ;;  %9078 = vmatpush1.bf16.msra.mxu1 %v12256_v37  ;;  %v12349_v36 = vld [vmem:[#allocation2 + $0x13e8] ss:$16 sps:$4 sm:$0xff]  }
 0x268   :  { %8072 = vmatprep.subr.bf16.mxu0 %v12261_v38  ;;  %9079 = vmatprep.subr.bf16.mxu1 %v12264_v39  ;;  %v12352_v37 = vld [vmem:[%s13591_s0 + $0x48] ss:$148 sps:$4 sm:$0xff]   ;;  %v12357_v38 = vld [vmem:[#allocation2 + $0x1404] ss:$16 sps:$4 sm:$0xff]  }
 0x269   :  { %8059 = vmatprep.mubr.bf16.mxu0 %v12337_v40  ;;  %9066 = vmatprep.mubr.bf16.mxu1 %v12337_v40  ;;  %v12360_v39 = vld [vmem:[#allocation2 + $0x140c] ss:$16 sps:$4 sm:$0xff]   ;;  %v12355_v40 = vld [vmem:[#allocation2 + $0x1400] ss:$16 sps:$4 sm:$0xff]  }
 0x26b   :  { %8073 = vmatpush1.bf16.msra.mxu0 %v12259_v41  ;;  %9080 = vmatpush1.bf16.msra.mxu1 %v12262_v42  ;;  %v12358_v41 = vld [vmem:[#allocation2 + $0x1408] ss:$16 sps:$4 sm:$0xff]   ;;  %v12363_v42 = vld [vmem:[#allocation2 + $0x1424] ss:$16 sps:$4 sm:$0xff]  }
 0x26c   :  { %8074 = vmatprep.subr.bf16.mxu0 %v12267_v43  ;;  %9081 = vmatprep.subr.bf16.mxu1 %v12270_v44  ;;  %v12366_v43 = vld [vmem:[#allocation2 + $0x142c] ss:$16 sps:$4 sm:$0xff]   ;;  %v12439_v44 = vld [vmem:[%s13591_s0 + $0x174] ss:$148 sps:$4 sm:$0xff]  }
 0x26e   :  { %8060 = vmatmul.mubr.bf16.gmra.mrb[4].mxu0 %v12345_v45  ;;  %9067 = vmatmul.mubr.bf16.gmra.mrb[4].mxu1 %v12345_v45  ;;  %v12361_v45 = vld [vmem:[#allocation2 + $0x1420] ss:$16 sps:$4 sm:$0xff]  }
 0x26f   :  { %8075 = vmatpush1.bf16.msra.mxu0 %v12265_v46  ;;  %9082 = vmatpush1.bf16.msra.mxu1 %v12268_v47  ;;  %v12364_v46 = vld [vmem:[#allocation2 + $0x1428] ss:$16 sps:$4 sm:$0xff]   ;;  %v12369_v47 = vld [vmem:[#allocation2 + $0x1444] ss:$16 sps:$4 sm:$0xff]  }
 0x270   :  { %8076 = vmatprep.subr.bf16.mxu0 %v12273_v48  ;;  %9083 = vmatprep.subr.bf16.mxu1 %v12276_v49  ;;  %v12372_v48 = vld [vmem:[#allocation2 + $0x144c] ss:$16 sps:$4 sm:$0xff]   ;;  %v12447_v49 = vld [vmem:[%s13591_s0 + $0x170] ss:$148 sps:$4 sm:$0xff]  }
 0x271   :  { %8102 = vmatprep.mubr.bf16.mxu0 %v12354_v50  ;;  %9109 = vmatprep.mubr.bf16.mxu1 %v12354_v50  ;;  %v12367_v50 = vld [vmem:[#allocation2 + $0x1440] ss:$16 sps:$4 sm:$0xff]  }
 0x273   :  { %8077 = vmatpush1.bf16.msra.mxu0 %v12271_v51  ;;  %9084 = vmatpush1.bf16.msra.mxu1 %v12274_v52  ;;  %v12370_v51 = vld [vmem:[#allocation2 + $0x1448] ss:$16 sps:$4 sm:$0xff]   ;;  %v12375_v52 = vld [vmem:[#allocation2 + $0x1464] ss:$16 sps:$4 sm:$0xff]  }
 0x274   :  { %8078 = vmatprep.subr.bf16.mxu0 %v12279_v53  ;;  %9085 = vmatprep.subr.bf16.mxu1 %v12282_v54  ;;  %v12378_v53 = vld [vmem:[#allocation2 + $0x146c] ss:$16 sps:$4 sm:$0xff]   ;;  %v12456_v54 = vld [vmem:[%s13591_s0 + $0x54] ss:$148 sps:$4 sm:$0xff]  }
 0x277   :  { %8079 = vmatpush1.bf16.msra.mxu0 %v12277_v55  ;;  %9086 = vmatpush1.bf16.msra.mxu1 %v12280_v56  ;;  %v12373_v55 = vld [vmem:[#allocation2 + $0x1460] ss:$16 sps:$4 sm:$0xff]   ;;  %v12376_v56 = vld [vmem:[#allocation2 + $0x1468] ss:$16 sps:$4 sm:$0xff]  }
 0x278   :  { %8080 = vmatprep.subr.bf16.mxu0 %v12285_v57  ;;  %9087 = vmatprep.subr.bf16.mxu1 %v12288_v58  ;;  %v12381_v57 = vld [vmem:[#allocation2 + $0x1484] ss:$16 sps:$4 sm:$0xff]   ;;  %v12384_v58 = vld [vmem:[#allocation2 + $0x148c] ss:$16 sps:$4 sm:$0xff]  }
 0x27b   :  { %8081 = vmatpush1.bf16.msra.mxu0 %v12283_v59  ;;  %9088 = vmatpush1.bf16.msra.mxu1 %v12286_v60  ;;  %v12379_v59 = vld [vmem:[#allocation2 + $0x1480] ss:$16 sps:$4 sm:$0xff]   ;;  %v12382_v60 = vld [vmem:[#allocation2 + $0x1488] ss:$16 sps:$4 sm:$0xff]  }
 0x27c   :  { %8082 = vmatprep.subr.bf16.mxu0 %v12291_v61  ;;  %9089 = vmatprep.subr.bf16.mxu1 %v12294_v62  ;;  %v12387_v61 = vld [vmem:[#allocation2 + $0x14a4] ss:$16 sps:$4 sm:$0xff]   ;;  %v12390_v62 = vld [vmem:[#allocation2 + $0x14ac] ss:$16 sps:$4 sm:$0xff]  }
 0x27f   :  { %8083 = vmatpush1.bf16.msra.mxu0 %v12289_v63  ;;  %9090 = vmatpush1.bf16.msra.mxu1 %v12292_v0  ;;  %v12385_v63 = vld [vmem:[#allocation2 + $0x14a0] ss:$16 sps:$4 sm:$0xff]   ;;  %v12388_v0 = vld [vmem:[#allocation2 + $0x14a8] ss:$16 sps:$4 sm:$0xff]  }
 0x280   :  { %8084 = vmatprep.subr.bf16.mxu0 %v12297_v1  ;;  %9091 = vmatprep.subr.bf16.mxu1 %v12300_v2  ;;  %v12393_v1 = vld [vmem:[#allocation2 + $0x14c4] ss:$16 sps:$4 sm:$0xff]   ;;  %v12396_v2 = vld [vmem:[#allocation2 + $0x14cc] ss:$16 sps:$4 sm:$0xff]  }
 0x283   :  { %8085 = vmatpush1.bf16.msra.mxu0 %v12295_v3  ;;  %9092 = vmatpush1.bf16.msra.mxu1 %v12298_v4  ;;  %v12391_v3 = vld [vmem:[#allocation2 + $0x14c0] ss:$16 sps:$4 sm:$0xff]   ;;  %v12394_v4 = vld [vmem:[#allocation2 + $0x14c8] ss:$16 sps:$4 sm:$0xff]  }
 0x284   :  { %8086 = vmatprep.subr.bf16.mxu0 %v12303_v5  ;;  %9093 = vmatprep.subr.bf16.mxu1 %v12306_v6  ;;  %v12399_v5 = vld [vmem:[#allocation2 + $0x14e4] ss:$16 sps:$4 sm:$0xff]   ;;  %v12402_v6 = vld [vmem:[#allocation2 + $0x14ec] ss:$16 sps:$4 sm:$0xff]  }
 0x287   :  { %8087 = vmatpush1.bf16.msra.mxu0 %v12301_v7  ;;  %9094 = vmatpush1.bf16.msra.mxu1 %v12304_v8  ;;  %v12397_v7 = vld [vmem:[#allocation2 + $0x14e0] ss:$16 sps:$4 sm:$0xff]   ;;  %v12400_v8 = vld [vmem:[#allocation2 + $0x14e8] ss:$16 sps:$4 sm:$0xff]  }
 0x288   :  { %8088 = vmatprep.subr.bf16.mxu0 %v12309_v9  ;;  %9095 = vmatprep.subr.bf16.mxu1 %v12312_v10  ;;  %v12405_v9 = vld [vmem:[#allocation2 + $0x1504] ss:$16 sps:$4 sm:$0xff]   ;;  %v12408_v10 = vld [vmem:[#allocation2 + $0x150c] ss:$16 sps:$4 sm:$0xff]  }
 0x28b   :  { %8089 = vmatpush1.bf16.msra.mxu0 %v12307_v11  ;;  %9096 = vmatpush1.bf16.msra.mxu1 %v12310_v12  ;;  %v12403_v11 = vld [vmem:[#allocation2 + $0x1500] ss:$16 sps:$4 sm:$0xff]   ;;  %v12406_v12 = vld [vmem:[#allocation2 + $0x1508] ss:$16 sps:$4 sm:$0xff]  }
 0x28c   :  { %8090 = vmatprep.subr.bf16.mxu0 %v12315_v13  ;;  %9097 = vmatprep.subr.bf16.mxu1 %v12318_v14  ;;  %v12411_v13 = vld [vmem:[#allocation2 + $0x1524] ss:$16 sps:$4 sm:$0xff]   ;;  %v12414_v14 = vld [vmem:[#allocation2 + $0x152c] ss:$16 sps:$4 sm:$0xff]  }
 0x28f   :  { %8091 = vmatpush1.bf16.msra.mxu0 %v12313_v15  ;;  %9098 = vmatpush1.bf16.msra.mxu1 %v12316_v16  ;;  %v12409_v15 = vld [vmem:[#allocation2 + $0x1520] ss:$16 sps:$4 sm:$0xff]   ;;  %v12412_v16 = vld [vmem:[#allocation2 + $0x1528] ss:$16 sps:$4 sm:$0xff]  }
 0x290   :  { %8092 = vmatprep.subr.bf16.mxu0 %v12321_v17  ;;  %9099 = vmatprep.subr.bf16.mxu1 %v12324_v18  ;;  %v12417_v17 = vld [vmem:[#allocation2 + $0x1544] ss:$16 sps:$4 sm:$0xff]   ;;  %v12420_v18 = vld [vmem:[#allocation2 + $0x154c] ss:$16 sps:$4 sm:$0xff]  }
 0x293   :  { %8093 = vmatpush1.bf16.msra.mxu0 %v12319_v19  ;;  %9100 = vmatpush1.bf16.msra.mxu1 %v12322_v20  ;;  %v12415_v19 = vld [vmem:[#allocation2 + $0x1540] ss:$16 sps:$4 sm:$0xff]   ;;  %v12418_v20 = vld [vmem:[#allocation2 + $0x1548] ss:$16 sps:$4 sm:$0xff]  }
 0x294   :  { %8094 = vmatprep.subr.bf16.mxu0 %v12327_v21  ;;  %9101 = vmatprep.subr.bf16.mxu1 %v12330_v22  ;;  %v12423_v21 = vld [vmem:[#allocation2 + $0x1564] ss:$16 sps:$4 sm:$0xff]   ;;  %v12426_v22 = vld [vmem:[#allocation2 + $0x156c] ss:$16 sps:$4 sm:$0xff]  }
 0x297   :  { %8095 = vmatpush1.bf16.msra.mxu0 %v12325_v23  ;;  %9102 = vmatpush1.bf16.msra.mxu1 %v12328_v24  ;;  %v12421_v23 = vld [vmem:[#allocation2 + $0x1560] ss:$16 sps:$4 sm:$0xff]   ;;  %v12424_v24 = vld [vmem:[#allocation2 + $0x1568] ss:$16 sps:$4 sm:$0xff]  }
 0x298   :  { %8096 = vmatprep.subr.bf16.mxu0 %v12333_v25  ;;  %9103 = vmatprep.subr.bf16.mxu1 %v12336_v26  ;;  %v12429_v25 = vld [vmem:[#allocation2 + $0x1584] ss:$16 sps:$4 sm:$0xff]   ;;  %v12432_v26 = vld [vmem:[#allocation2 + $0x158c] ss:$16 sps:$4 sm:$0xff]  }
 0x29b   :  { %8097 = vmatpush1.bf16.msra.mxu0 %v12331_v27  ;;  %9104 = vmatpush1.bf16.msra.mxu1 %v12334_v28  ;;  %v12427_v27 = vld [vmem:[#allocation2 + $0x1580] ss:$16 sps:$4 sm:$0xff]   ;;  %v12430_v28 = vld [vmem:[#allocation2 + $0x1588] ss:$16 sps:$4 sm:$0xff]  }
 0x29c   :  { %8098 = vmatprep.subr.bf16.mxu0 %v12341_v29  ;;  %9105 = vmatprep.subr.bf16.mxu1 %v12344_v30  ;;  %v12435_v29 = vld [vmem:[#allocation2 + $0x15a4] ss:$16 sps:$4 sm:$0xff]   ;;  %v12438_v30 = vld [vmem:[#allocation2 + $0x15ac] ss:$16 sps:$4 sm:$0xff]  }
 0x29f   :  { %8099 = vmatpush1.bf16.msra.mxu0 %v12339_v31  ;;  %9106 = vmatpush1.bf16.msra.mxu1 %v12342_v32  ;;  %v12433_v31 = vld [vmem:[#allocation2 + $0x15a0] ss:$16 sps:$4 sm:$0xff]   ;;  %v12436_v32 = vld [vmem:[#allocation2 + $0x15a8] ss:$16 sps:$4 sm:$0xff]  }
 0x2a0   :  { %8100 = vmatprep.subr.bf16.mxu0 %v12348_v33  ;;  %9107 = vmatprep.subr.bf16.mxu1 %v12351_v34  ;;  %v12443_v33 = vld [vmem:[#allocation2 + $0x15c4] ss:$16 sps:$4 sm:$0xff]   ;;  %v12446_v34 = vld [vmem:[#allocation2 + $0x15cc] ss:$16 sps:$4 sm:$0xff]  }
 0x2a3   :  { %8101 = vmatpush1.bf16.msra.mxu0 %v12346_v35  ;;  %9108 = vmatpush1.bf16.msra.mxu1 %v12349_v36  ;;  %v12441_v35 = vld [vmem:[#allocation2 + $0x15c0] ss:$16 sps:$4 sm:$0xff]   ;;  %v12444_v36 = vld [vmem:[#allocation2 + $0x15c8] ss:$16 sps:$4 sm:$0xff]  }
 0x2a4   :  { %8123 = vmatprep.subr.bf16.mxu0 %v12357_v38  ;;  %9130 = vmatprep.subr.bf16.mxu1 %v12360_v39  ;;  %v12453_v38 = vld [vmem:[#allocation2 + $0x15ec] ss:$16 sps:$4 sm:$0xff]   ;;  %v12448_v39 = vld [vmem:[#allocation2 + $0x15e0] ss:$16 sps:$4 sm:$0xff]  }
 0x2a6   :  { %8103 = vmatmul.mubr.bf16.vlgmr.msra.gmra.mrb[0].mxu0 %v12352_v37  ;;  %9110 = vmatmul.mubr.bf16.vlgmr.msra.gmra.mrb[0].mxu1 %v12352_v37  ;;  %v12450_v37 = vld [vmem:[#allocation2 + $0x15e4] ss:$16 sps:$4 sm:$0xff]  }
 0x2a7   :  { %8124 = vmatpush1.bf16.msra.mxu0 %v12355_v40  ;;  %9131 = vmatpush1.bf16.msra.mxu1 %v12358_v41  ;;  %v12451_v40 = vld [vmem:[#allocation2 + $0x15e8] ss:$16 sps:$4 sm:$0xff]   ;;  %v12454_v41 = vld [vmem:[%s13591_s0 + $0x50] ss:$148 sps:$4 sm:$0xff]  }
 0x2a8   :  { %8125 = vmatprep.subr.bf16.mxu0 %v12363_v42  ;;  %9132 = vmatprep.subr.bf16.mxu1 %v12366_v43  ;;  %v12459_v42 = vld [vmem:[#allocation2 + $0x1604] ss:$16 sps:$4 sm:$0xff]   ;;  %v12462_v43 = vld [vmem:[#allocation2 + $0x160c] ss:$16 sps:$4 sm:$0xff]  }
 0x2a9   :  { %8112 = vmatprep.mubr.bf16.mxu0 %v12439_v44  ;;  %9119 = vmatprep.mubr.bf16.mxu1 %v12439_v44  ;;  %v12457_v44 = vld [vmem:[#allocation2 + $0x1600] ss:$16 sps:$4 sm:$0xff]  }
 0x2ab   :  { %8126 = vmatpush1.bf16.msra.mxu0 %v12361_v45  ;;  %9133 = vmatpush1.bf16.msra.mxu1 %v12364_v46  ;;  %v12460_v45 = vld [vmem:[#allocation2 + $0x1608] ss:$16 sps:$4 sm:$0xff]   ;;  %v12465_v46 = vld [vmem:[#allocation2 + $0x1624] ss:$16 sps:$4 sm:$0xff]  }
 0x2ac   :  { %8127 = vmatprep.subr.bf16.mxu0 %v12369_v47  ;;  %9134 = vmatprep.subr.bf16.mxu1 %v12372_v48  ;;  %v12468_v47 = vld [vmem:[#allocation2 + $0x162c] ss:$16 sps:$4 sm:$0xff]  }
 0x2ad   :  { %v12541_v48 = vld [vmem:[%s13591_s0 + $0x17c] ss:$148 sps:$4 sm:$0xff]  }
 0x2ae   :  { %8113 = vmatmul.mubr.bf16.gmra.mrb[4].mxu0 %v12447_v49  ;;  %9120 = vmatmul.mubr.bf16.gmra.mrb[4].mxu1 %v12447_v49  ;;  %v12463_v49 = vld [vmem:[#allocation2 + $0x1620] ss:$16 sps:$4 sm:$0xff]  }
 0x2af   :  { %8128 = vmatpush1.bf16.msra.mxu0 %v12367_v50  ;;  %9135 = vmatpush1.bf16.msra.mxu1 %v12370_v51  ;;  %v12466_v50 = vld [vmem:[#allocation2 + $0x1628] ss:$16 sps:$4 sm:$0xff]   ;;  %v12471_v51 = vld [vmem:[#allocation2 + $0x1644] ss:$16 sps:$4 sm:$0xff]  }
 0x2b0   :  { %8129 = vmatprep.subr.bf16.mxu0 %v12375_v52  ;;  %9136 = vmatprep.subr.bf16.mxu1 %v12378_v53  ;;  %v12474_v52 = vld [vmem:[#allocation2 + $0x164c] ss:$16 sps:$4 sm:$0xff]  }
 0x2b1   :  { %8155 = vmatprep.mubr.bf16.mxu0 %v12456_v54  ;;  %9162 = vmatprep.mubr.bf16.mxu1 %v12456_v54  ;;  %v12549_v53 = vld [vmem:[%s13591_s0 + $0x178] ss:$148 sps:$4 sm:$0xff]   ;;  %v12469_v54 = vld [vmem:[#allocation2 + $0x1640] ss:$16 sps:$4 sm:$0xff]  }
 0x2b3   :  { %8130 = vmatpush1.bf16.msra.mxu0 %v12373_v55  ;;  %9137 = vmatpush1.bf16.msra.mxu1 %v12376_v56  ;;  %v12472_v55 = vld [vmem:[#allocation2 + $0x1648] ss:$16 sps:$4 sm:$0xff]   ;;  %v12477_v56 = vld [vmem:[#allocation2 + $0x1664] ss:$16 sps:$4 sm:$0xff]  }
 0x2b4   :  { %8131 = vmatprep.subr.bf16.mxu0 %v12381_v57  ;;  %9138 = vmatprep.subr.bf16.mxu1 %v12384_v58  ;;  %v12480_v57 = vld [vmem:[#allocation2 + $0x166c] ss:$16 sps:$4 sm:$0xff]  }
 0x2b5   :  { %v12558_v58 = vld [vmem:[%s13591_s0 + $0x5c] ss:$148 sps:$4 sm:$0xff]  }
 0x2b7   :  { %8132 = vmatpush1.bf16.msra.mxu0 %v12379_v59  ;;  %9139 = vmatpush1.bf16.msra.mxu1 %v12382_v60  ;;  %v12475_v59 = vld [vmem:[#allocation2 + $0x1660] ss:$16 sps:$4 sm:$0xff]   ;;  %v12478_v60 = vld [vmem:[#allocation2 + $0x1668] ss:$16 sps:$4 sm:$0xff]  }
 0x2b8   :  { %8133 = vmatprep.subr.bf16.mxu0 %v12387_v61  ;;  %9140 = vmatprep.subr.bf16.mxu1 %v12390_v62  ;;  %v12483_v61 = vld [vmem:[#allocation2 + $0x1684] ss:$16 sps:$4 sm:$0xff]   ;;  %v12486_v62 = vld [vmem:[#allocation2 + $0x168c] ss:$16 sps:$4 sm:$0xff]  }
 0x2bb   :  { %8134 = vmatpush1.bf16.msra.mxu0 %v12385_v63  ;;  %9141 = vmatpush1.bf16.msra.mxu1 %v12388_v0  ;;  %v12481_v63 = vld [vmem:[#allocation2 + $0x1680] ss:$16 sps:$4 sm:$0xff]   ;;  %v12484_v0 = vld [vmem:[#allocation2 + $0x1688] ss:$16 sps:$4 sm:$0xff]  }
 0x2bc   :  { %8135 = vmatprep.subr.bf16.mxu0 %v12393_v1  ;;  %9142 = vmatprep.subr.bf16.mxu1 %v12396_v2  ;;  %v12489_v1 = vld [vmem:[#allocation2 + $0x16a4] ss:$16 sps:$4 sm:$0xff]   ;;  %v12492_v2 = vld [vmem:[#allocation2 + $0x16ac] ss:$16 sps:$4 sm:$0xff]  }
 0x2bf   :  { %8136 = vmatpush1.bf16.msra.mxu0 %v12391_v3  ;;  %9143 = vmatpush1.bf16.msra.mxu1 %v12394_v4  ;;  %v12487_v3 = vld [vmem:[#allocation2 + $0x16a0] ss:$16 sps:$4 sm:$0xff]   ;;  %v12490_v4 = vld [vmem:[#allocation2 + $0x16a8] ss:$16 sps:$4 sm:$0xff]  }
 0x2c0   :  { %8137 = vmatprep.subr.bf16.mxu0 %v12399_v5  ;;  %9144 = vmatprep.subr.bf16.mxu1 %v12402_v6  ;;  %v12495_v5 = vld [vmem:[#allocation2 + $0x16c4] ss:$16 sps:$4 sm:$0xff]   ;;  %v12498_v6 = vld [vmem:[#allocation2 + $0x16cc] ss:$16 sps:$4 sm:$0xff]  }
 0x2c3   :  { %8138 = vmatpush1.bf16.msra.mxu0 %v12397_v7  ;;  %9145 = vmatpush1.bf16.msra.mxu1 %v12400_v8  ;;  %v12493_v7 = vld [vmem:[#allocation2 + $0x16c0] ss:$16 sps:$4 sm:$0xff]   ;;  %v12496_v8 = vld [vmem:[#allocation2 + $0x16c8] ss:$16 sps:$4 sm:$0xff]  }
 0x2c4   :  { %8139 = vmatprep.subr.bf16.mxu0 %v12405_v9  ;;  %9146 = vmatprep.subr.bf16.mxu1 %v12408_v10  ;;  %v12501_v9 = vld [vmem:[#allocation2 + $0x16e4] ss:$16 sps:$4 sm:$0xff]   ;;  %v12504_v10 = vld [vmem:[#allocation2 + $0x16ec] ss:$16 sps:$4 sm:$0xff]  }
 0x2c7   :  { %8140 = vmatpush1.bf16.msra.mxu0 %v12403_v11  ;;  %9147 = vmatpush1.bf16.msra.mxu1 %v12406_v12  ;;  %v12499_v11 = vld [vmem:[#allocation2 + $0x16e0] ss:$16 sps:$4 sm:$0xff]   ;;  %v12502_v12 = vld [vmem:[#allocation2 + $0x16e8] ss:$16 sps:$4 sm:$0xff]  }
 0x2c8   :  { %8141 = vmatprep.subr.bf16.mxu0 %v12411_v13  ;;  %9148 = vmatprep.subr.bf16.mxu1 %v12414_v14  ;;  %v12507_v13 = vld [vmem:[#allocation2 + $0x1704] ss:$16 sps:$4 sm:$0xff]   ;;  %v12510_v14 = vld [vmem:[#allocation2 + $0x170c] ss:$16 sps:$4 sm:$0xff]  }
 0x2cb   :  { %8142 = vmatpush1.bf16.msra.mxu0 %v12409_v15  ;;  %9149 = vmatpush1.bf16.msra.mxu1 %v12412_v16  ;;  %v12505_v15 = vld [vmem:[#allocation2 + $0x1700] ss:$16 sps:$4 sm:$0xff]   ;;  %v12508_v16 = vld [vmem:[#allocation2 + $0x1708] ss:$16 sps:$4 sm:$0xff]  }
 0x2cc   :  { %8143 = vmatprep.subr.bf16.mxu0 %v12417_v17  ;;  %9150 = vmatprep.subr.bf16.mxu1 %v12420_v18  ;;  %v12513_v17 = vld [vmem:[#allocation2 + $0x1724] ss:$16 sps:$4 sm:$0xff]   ;;  %v12516_v18 = vld [vmem:[#allocation2 + $0x172c] ss:$16 sps:$4 sm:$0xff]  }
 0x2cf   :  { %8144 = vmatpush1.bf16.msra.mxu0 %v12415_v19  ;;  %9151 = vmatpush1.bf16.msra.mxu1 %v12418_v20  ;;  %v12511_v19 = vld [vmem:[#allocation2 + $0x1720] ss:$16 sps:$4 sm:$0xff]   ;;  %v12514_v20 = vld [vmem:[#allocation2 + $0x1728] ss:$16 sps:$4 sm:$0xff]  }
 0x2d0   :  { %8145 = vmatprep.subr.bf16.mxu0 %v12423_v21  ;;  %9152 = vmatprep.subr.bf16.mxu1 %v12426_v22  ;;  %v12519_v21 = vld [vmem:[#allocation2 + $0x1744] ss:$16 sps:$4 sm:$0xff]   ;;  %v12522_v22 = vld [vmem:[#allocation2 + $0x174c] ss:$16 sps:$4 sm:$0xff]  }
 0x2d3   :  { %8146 = vmatpush1.bf16.msra.mxu0 %v12421_v23  ;;  %9153 = vmatpush1.bf16.msra.mxu1 %v12424_v24  ;;  %v12517_v23 = vld [vmem:[#allocation2 + $0x1740] ss:$16 sps:$4 sm:$0xff]   ;;  %v12520_v24 = vld [vmem:[#allocation2 + $0x1748] ss:$16 sps:$4 sm:$0xff]  }
 0x2d4   :  { %8147 = vmatprep.subr.bf16.mxu0 %v12429_v25  ;;  %9154 = vmatprep.subr.bf16.mxu1 %v12432_v26  ;;  %v12525_v25 = vld [vmem:[#allocation2 + $0x1764] ss:$16 sps:$4 sm:$0xff]   ;;  %v12528_v26 = vld [vmem:[#allocation2 + $0x176c] ss:$16 sps:$4 sm:$0xff]  }
 0x2d7   :  { %8148 = vmatpush1.bf16.msra.mxu0 %v12427_v27  ;;  %9155 = vmatpush1.bf16.msra.mxu1 %v12430_v28  ;;  %v12523_v27 = vld [vmem:[#allocation2 + $0x1760] ss:$16 sps:$4 sm:$0xff]   ;;  %v12526_v28 = vld [vmem:[#allocation2 + $0x1768] ss:$16 sps:$4 sm:$0xff]  }
 0x2d8   :  { %8149 = vmatprep.subr.bf16.mxu0 %v12435_v29  ;;  %9156 = vmatprep.subr.bf16.mxu1 %v12438_v30  ;;  %v12531_v29 = vld [vmem:[#allocation2 + $0x1784] ss:$16 sps:$4 sm:$0xff]   ;;  %v12534_v30 = vld [vmem:[#allocation2 + $0x178c] ss:$16 sps:$4 sm:$0xff]  }
 0x2db   :  { %8150 = vmatpush1.bf16.msra.mxu0 %v12433_v31  ;;  %9157 = vmatpush1.bf16.msra.mxu1 %v12436_v32  ;;  %v12529_v31 = vld [vmem:[#allocation2 + $0x1780] ss:$16 sps:$4 sm:$0xff]   ;;  %v12532_v32 = vld [vmem:[#allocation2 + $0x1788] ss:$16 sps:$4 sm:$0xff]  }
 0x2dc   :  { %8151 = vmatprep.subr.bf16.mxu0 %v12443_v33  ;;  %9158 = vmatprep.subr.bf16.mxu1 %v12446_v34  ;;  %v12537_v33 = vld [vmem:[#allocation2 + $0x17a4] ss:$16 sps:$4 sm:$0xff]   ;;  %v12540_v34 = vld [vmem:[#allocation2 + $0x17ac] ss:$16 sps:$4 sm:$0xff]  }
 0x2df   :  { %8152 = vmatpush1.bf16.msra.mxu0 %v12441_v35  ;;  %9159 = vmatpush1.bf16.msra.mxu1 %v12444_v36  ;;  %v12535_v35 = vld [vmem:[#allocation2 + $0x17a0] ss:$16 sps:$4 sm:$0xff]   ;;  %v12538_v36 = vld [vmem:[#allocation2 + $0x17a8] ss:$16 sps:$4 sm:$0xff]  }
 0x2e0   :  { %8153 = vmatprep.subr.bf16.mxu0 %v12450_v37  ;;  %9160 = vmatprep.subr.bf16.mxu1 %v12453_v38  ;;  %v12545_v37 = vld [vmem:[#allocation2 + $0x17c4] ss:$16 sps:$4 sm:$0xff]   ;;  %v12548_v38 = vld [vmem:[#allocation2 + $0x17cc] ss:$16 sps:$4 sm:$0xff]  }
 0x2e3   :  { %8154 = vmatpush1.bf16.msra.mxu0 %v12448_v39  ;;  %9161 = vmatpush1.bf16.msra.mxu1 %v12451_v40  ;;  %v12543_v39 = vld [vmem:[#allocation2 + $0x17c0] ss:$16 sps:$4 sm:$0xff]   ;;  %v12546_v40 = vld [vmem:[#allocation2 + $0x17c8] ss:$16 sps:$4 sm:$0xff]  }
 0x2e4   :  { %8176 = vmatprep.subr.bf16.mxu0 %v12459_v42  ;;  %9183 = vmatprep.subr.bf16.mxu1 %v12462_v43  ;;  %v12555_v42 = vld [vmem:[#allocation2 + $0x17ec] ss:$16 sps:$4 sm:$0xff]   ;;  %v12550_v43 = vld [vmem:[#allocation2 + $0x17e0] ss:$16 sps:$4 sm:$0xff]  }
 0x2e6   :  { %8156 = vmatmul.mubr.bf16.vlgmr.msra.gmra.mrb[0].mxu0 %v12454_v41  ;;  %9163 = vmatmul.mubr.bf16.vlgmr.msra.gmra.mrb[0].mxu1 %v12454_v41  ;;  %v12552_v41 = vld [vmem:[#allocation2 + $0x17e4] ss:$16 sps:$4 sm:$0xff]  }
 0x2e7   :  { %8177 = vmatpush1.bf16.msra.mxu0 %v12457_v44  ;;  %9184 = vmatpush1.bf16.msra.mxu1 %v12460_v45  ;;  %v12553_v44 = vld [vmem:[#allocation2 + $0x17e8] ss:$16 sps:$4 sm:$0xff]   ;;  %v12561_v45 = vld [vmem:[#allocation2 + $0x1804] ss:$16 sps:$4 sm:$0xff]  }
 0x2e8   :  { %8178 = vmatprep.subr.bf16.mxu0 %v12465_v46  ;;  %9185 = vmatprep.subr.bf16.mxu1 %v12468_v47  ;;  %v12564_v46 = vld [vmem:[#allocation2 + $0x180c] ss:$16 sps:$4 sm:$0xff]  }
 0x2e9   :  { %8165 = vmatprep.mubr.bf16.mxu0 %v12541_v48  ;;  %9172 = vmatprep.mubr.bf16.mxu1 %v12541_v48  ;;  %v12556_v47 = vld [vmem:[%s13591_s0 + $0x58] ss:$148 sps:$4 sm:$0xff]   ;;  %v12559_v48 = vld [vmem:[#allocation2 + $0x1800] ss:$16 sps:$4 sm:$0xff]  }
 0x2eb   :  { %8179 = vmatpush1.bf16.msra.mxu0 %v12463_v49  ;;  %9186 = vmatpush1.bf16.msra.mxu1 %v12466_v50  ;;  %v12562_v49 = vld [vmem:[#allocation2 + $0x1808] ss:$16 sps:$4 sm:$0xff]   ;;  %v12567_v50 = vld [vmem:[#allocation2 + $0x1824] ss:$16 sps:$4 sm:$0xff]  }
 0x2ec   :  { %8180 = vmatprep.subr.bf16.mxu0 %v12471_v51  ;;  %9187 = vmatprep.subr.bf16.mxu1 %v12474_v52  ;;  %v12570_v51 = vld [vmem:[#allocation2 + $0x182c] ss:$16 sps:$4 sm:$0xff]   ;;  %v12643_v52 = vld [vmem:[%s13591_s0 + $0x184] ss:$148 sps:$4 sm:$0xff]  }
 0x2ee   :  { %8166 = vmatmul.mubr.bf16.gmra.mrb[4].mxu0 %v12549_v53  ;;  %9173 = vmatmul.mubr.bf16.gmra.mrb[4].mxu1 %v12549_v53  ;;  %v12565_v53 = vld [vmem:[#allocation2 + $0x1820] ss:$16 sps:$4 sm:$0xff]  }
 0x2ef   :  { %8181 = vmatpush1.bf16.msra.mxu0 %v12469_v54  ;;  %9188 = vmatpush1.bf16.msra.mxu1 %v12472_v55  ;;  %v12568_v54 = vld [vmem:[#allocation2 + $0x1828] ss:$16 sps:$4 sm:$0xff]   ;;  %v12573_v55 = vld [vmem:[#allocation2 + $0x1844] ss:$16 sps:$4 sm:$0xff]  }
 0x2f0   :  { %8182 = vmatprep.subr.bf16.mxu0 %v12477_v56  ;;  %9189 = vmatprep.subr.bf16.mxu1 %v12480_v57  ;;  %v12576_v56 = vld [vmem:[#allocation2 + $0x184c] ss:$16 sps:$4 sm:$0xff]   ;;  %v12651_v57 = vld [vmem:[%s13591_s0 + $0x180] ss:$148 sps:$4 sm:$0xff]  }
 0x2f1   :  { %8208 = vmatprep.mubr.bf16.mxu0 %v12558_v58  ;;  %9215 = vmatprep.mubr.bf16.mxu1 %v12558_v58  ;;  %v12571_v58 = vld [vmem:[#allocation2 + $0x1840] ss:$16 sps:$4 sm:$0xff]  }
 0x2f3   :  { %8183 = vmatpush1.bf16.msra.mxu0 %v12475_v59  ;;  %9190 = vmatpush1.bf16.msra.mxu1 %v12478_v60  ;;  %v12574_v59 = vld [vmem:[#allocation2 + $0x1848] ss:$16 sps:$4 sm:$0xff]   ;;  %v12579_v60 = vld [vmem:[#allocation2 + $0x1864] ss:$16 sps:$4 sm:$0xff]  }
 0x2f4   :  { %8184 = vmatprep.subr.bf16.mxu0 %v12483_v61  ;;  %9191 = vmatprep.subr.bf16.mxu1 %v12486_v62  ;;  %v12582_v61 = vld [vmem:[#allocation2 + $0x186c] ss:$16 sps:$4 sm:$0xff]   ;;  %v12660_v62 = vld [vmem:[%s13591_s0 + $0x64] ss:$148 sps:$4 sm:$0xff]  }
 0x2f7   :  { %8185 = vmatpush1.bf16.msra.mxu0 %v12481_v63  ;;  %9192 = vmatpush1.bf16.msra.mxu1 %v12484_v0  ;;  %v12577_v63 = vld [vmem:[#allocation2 + $0x1860] ss:$16 sps:$4 sm:$0xff]   ;;  %v12580_v0 = vld [vmem:[#allocation2 + $0x1868] ss:$16 sps:$4 sm:$0xff]  }
 0x2f8   :  { %8186 = vmatprep.subr.bf16.mxu0 %v12489_v1  ;;  %9193 = vmatprep.subr.bf16.mxu1 %v12492_v2  ;;  %v12585_v1 = vld [vmem:[#allocation2 + $0x1884] ss:$16 sps:$4 sm:$0xff]   ;;  %v12588_v2 = vld [vmem:[#allocation2 + $0x188c] ss:$16 sps:$4 sm:$0xff]  }
 0x2fb   :  { %8187 = vmatpush1.bf16.msra.mxu0 %v12487_v3  ;;  %9194 = vmatpush1.bf16.msra.mxu1 %v12490_v4  ;;  %v12583_v3 = vld [vmem:[#allocation2 + $0x1880] ss:$16 sps:$4 sm:$0xff]   ;;  %v12586_v4 = vld [vmem:[#allocation2 + $0x1888] ss:$16 sps:$4 sm:$0xff]  }
 0x2fc   :  { %8188 = vmatprep.subr.bf16.mxu0 %v12495_v5  ;;  %9195 = vmatprep.subr.bf16.mxu1 %v12498_v6  ;;  %v12591_v5 = vld [vmem:[#allocation2 + $0x18a4] ss:$16 sps:$4 sm:$0xff]   ;;  %v12594_v6 = vld [vmem:[#allocation2 + $0x18ac] ss:$16 sps:$4 sm:$0xff]  }
 0x2ff   :  { %8189 = vmatpush1.bf16.msra.mxu0 %v12493_v7  ;;  %9196 = vmatpush1.bf16.msra.mxu1 %v12496_v8  ;;  %v12589_v7 = vld [vmem:[#allocation2 + $0x18a0] ss:$16 sps:$4 sm:$0xff]   ;;  %v12592_v8 = vld [vmem:[#allocation2 + $0x18a8] ss:$16 sps:$4 sm:$0xff]  }
 0x300   :  { %8190 = vmatprep.subr.bf16.mxu0 %v12501_v9  ;;  %9197 = vmatprep.subr.bf16.mxu1 %v12504_v10  ;;  %v12597_v9 = vld [vmem:[#allocation2 + $0x18c4] ss:$16 sps:$4 sm:$0xff]   ;;  %v12600_v10 = vld [vmem:[#allocation2 + $0x18cc] ss:$16 sps:$4 sm:$0xff]  }
 0x303   :  { %8191 = vmatpush1.bf16.msra.mxu0 %v12499_v11  ;;  %9198 = vmatpush1.bf16.msra.mxu1 %v12502_v12  ;;  %v12595_v11 = vld [vmem:[#allocation2 + $0x18c0] ss:$16 sps:$4 sm:$0xff]   ;;  %v12598_v12 = vld [vmem:[#allocation2 + $0x18c8] ss:$16 sps:$4 sm:$0xff]  }
 0x304   :  { %8192 = vmatprep.subr.bf16.mxu0 %v12507_v13  ;;  %9199 = vmatprep.subr.bf16.mxu1 %v12510_v14  ;;  %v12603_v13 = vld [vmem:[#allocation2 + $0x18e4] ss:$16 sps:$4 sm:$0xff]   ;;  %v12606_v14 = vld [vmem:[#allocation2 + $0x18ec] ss:$16 sps:$4 sm:$0xff]  }
 0x307   :  { %8193 = vmatpush1.bf16.msra.mxu0 %v12505_v15  ;;  %9200 = vmatpush1.bf16.msra.mxu1 %v12508_v16  ;;  %v12601_v15 = vld [vmem:[#allocation2 + $0x18e0] ss:$16 sps:$4 sm:$0xff]   ;;  %v12604_v16 = vld [vmem:[#allocation2 + $0x18e8] ss:$16 sps:$4 sm:$0xff]  }
 0x308   :  { %8194 = vmatprep.subr.bf16.mxu0 %v12513_v17  ;;  %9201 = vmatprep.subr.bf16.mxu1 %v12516_v18  ;;  %v12609_v17 = vld [vmem:[#allocation2 + $0x1904] ss:$16 sps:$4 sm:$0xff]   ;;  %v12612_v18 = vld [vmem:[#allocation2 + $0x190c] ss:$16 sps:$4 sm:$0xff]  }
 0x30b   :  { %8195 = vmatpush1.bf16.msra.mxu0 %v12511_v19  ;;  %9202 = vmatpush1.bf16.msra.mxu1 %v12514_v20  ;;  %v12607_v19 = vld [vmem:[#allocation2 + $0x1900] ss:$16 sps:$4 sm:$0xff]   ;;  %v12610_v20 = vld [vmem:[#allocation2 + $0x1908] ss:$16 sps:$4 sm:$0xff]  }
 0x30c   :  { %8196 = vmatprep.subr.bf16.mxu0 %v12519_v21  ;;  %9203 = vmatprep.subr.bf16.mxu1 %v12522_v22  ;;  %v12615_v21 = vld [vmem:[#allocation2 + $0x1924] ss:$16 sps:$4 sm:$0xff]   ;;  %v12618_v22 = vld [vmem:[#allocation2 + $0x192c] ss:$16 sps:$4 sm:$0xff]  }
 0x30f   :  { %8197 = vmatpush1.bf16.msra.mxu0 %v12517_v23  ;;  %9204 = vmatpush1.bf16.msra.mxu1 %v12520_v24  ;;  %v12613_v23 = vld [vmem:[#allocation2 + $0x1920] ss:$16 sps:$4 sm:$0xff]   ;;  %v12616_v24 = vld [vmem:[#allocation2 + $0x1928] ss:$16 sps:$4 sm:$0xff]  }
 0x310   :  { %8198 = vmatprep.subr.bf16.mxu0 %v12525_v25  ;;  %9205 = vmatprep.subr.bf16.mxu1 %v12528_v26  ;;  %v12621_v25 = vld [vmem:[#allocation2 + $0x1944] ss:$16 sps:$4 sm:$0xff]   ;;  %v12624_v26 = vld [vmem:[#allocation2 + $0x194c] ss:$16 sps:$4 sm:$0xff]  }
 0x313   :  { %8199 = vmatpush1.bf16.msra.mxu0 %v12523_v27  ;;  %9206 = vmatpush1.bf16.msra.mxu1 %v12526_v28  ;;  %v12619_v27 = vld [vmem:[#allocation2 + $0x1940] ss:$16 sps:$4 sm:$0xff]   ;;  %v12622_v28 = vld [vmem:[#allocation2 + $0x1948] ss:$16 sps:$4 sm:$0xff]  }
 0x314   :  { %8200 = vmatprep.subr.bf16.mxu0 %v12531_v29  ;;  %9207 = vmatprep.subr.bf16.mxu1 %v12534_v30  ;;  %v12627_v29 = vld [vmem:[#allocation2 + $0x1964] ss:$16 sps:$4 sm:$0xff]   ;;  %v12630_v30 = vld [vmem:[#allocation2 + $0x196c] ss:$16 sps:$4 sm:$0xff]  }
 0x317   :  { %8201 = vmatpush1.bf16.msra.mxu0 %v12529_v31  ;;  %9208 = vmatpush1.bf16.msra.mxu1 %v12532_v32  ;;  %v12625_v31 = vld [vmem:[#allocation2 + $0x1960] ss:$16 sps:$4 sm:$0xff]   ;;  %v12628_v32 = vld [vmem:[#allocation2 + $0x1968] ss:$16 sps:$4 sm:$0xff]  }
 0x318   :  { %8202 = vmatprep.subr.bf16.mxu0 %v12537_v33  ;;  %9209 = vmatprep.subr.bf16.mxu1 %v12540_v34  ;;  %v12633_v33 = vld [vmem:[#allocation2 + $0x1984] ss:$16 sps:$4 sm:$0xff]   ;;  %v12636_v34 = vld [vmem:[#allocation2 + $0x198c] ss:$16 sps:$4 sm:$0xff]  }
 0x31b   :  { %8203 = vmatpush1.bf16.msra.mxu0 %v12535_v35  ;;  %9210 = vmatpush1.bf16.msra.mxu1 %v12538_v36  ;;  %v12631_v35 = vld [vmem:[#allocation2 + $0x1980] ss:$16 sps:$4 sm:$0xff]   ;;  %v12634_v36 = vld [vmem:[#allocation2 + $0x1988] ss:$16 sps:$4 sm:$0xff]  }
 0x31c   :  { %8204 = vmatprep.subr.bf16.mxu0 %v12545_v37  ;;  %9211 = vmatprep.subr.bf16.mxu1 %v12548_v38  ;;  %v12639_v37 = vld [vmem:[#allocation2 + $0x19a4] ss:$16 sps:$4 sm:$0xff]   ;;  %v12642_v38 = vld [vmem:[#allocation2 + $0x19ac] ss:$16 sps:$4 sm:$0xff]  }
 0x31f   :  { %8205 = vmatpush1.bf16.msra.mxu0 %v12543_v39  ;;  %9212 = vmatpush1.bf16.msra.mxu1 %v12546_v40  ;;  %v12637_v39 = vld [vmem:[#allocation2 + $0x19a0] ss:$16 sps:$4 sm:$0xff]   ;;  %v12640_v40 = vld [vmem:[#allocation2 + $0x19a8] ss:$16 sps:$4 sm:$0xff]  }
 0x320   :  { %8206 = vmatprep.subr.bf16.mxu0 %v12552_v41  ;;  %9213 = vmatprep.subr.bf16.mxu1 %v12555_v42  ;;  %v12647_v41 = vld [vmem:[#allocation2 + $0x19c4] ss:$16 sps:$4 sm:$0xff]   ;;  %v12650_v42 = vld [vmem:[#allocation2 + $0x19cc] ss:$16 sps:$4 sm:$0xff]  }
 0x323   :  { %8207 = vmatpush1.bf16.msra.mxu0 %v12550_v43  ;;  %9214 = vmatpush1.bf16.msra.mxu1 %v12553_v44  ;;  %v12645_v43 = vld [vmem:[#allocation2 + $0x19c0] ss:$16 sps:$4 sm:$0xff]   ;;  %v12648_v44 = vld [vmem:[#allocation2 + $0x19c8] ss:$16 sps:$4 sm:$0xff]  }
 0x324   :  { %8229 = vmatprep.subr.bf16.mxu0 %v12561_v45  ;;  %9236 = vmatprep.subr.bf16.mxu1 %v12564_v46  ;;  %v12654_v45 = vld [vmem:[#allocation2 + $0x19e4] ss:$16 sps:$4 sm:$0xff]   ;;  %v12657_v46 = vld [vmem:[#allocation2 + $0x19ec] ss:$16 sps:$4 sm:$0xff]  }
 0x326   :  { %8209 = vmatmul.mubr.bf16.vlgmr.msra.gmra.mrb[0].mxu0 %v12556_v47  ;;  %9216 = vmatmul.mubr.bf16.vlgmr.msra.gmra.mrb[0].mxu1 %v12556_v47  ;;  %v12652_v47 = vld [vmem:[#allocation2 + $0x19e0] ss:$16 sps:$4 sm:$0xff]  }
 0x327   :  { %8230 = vmatpush1.bf16.msra.mxu0 %v12559_v48  ;;  %9237 = vmatpush1.bf16.msra.mxu1 %v12562_v49  ;;  %v12655_v48 = vld [vmem:[#allocation2 + $0x19e8] ss:$16 sps:$4 sm:$0xff]   ;;  %v12663_v49 = vld [vmem:[#allocation2 + $0x1a04] ss:$16 sps:$4 sm:$0xff]  }
 0x328   :  { %8231 = vmatprep.subr.bf16.mxu0 %v12567_v50  ;;  %9238 = vmatprep.subr.bf16.mxu1 %v12570_v51  ;;  %v12666_v50 = vld [vmem:[#allocation2 + $0x1a0c] ss:$16 sps:$4 sm:$0xff]   ;;  %v12658_v51 = vld [vmem:[%s13591_s0 + $0x60] ss:$148 sps:$4 sm:$0xff]  }
 0x329   :  { %8218 = vmatprep.mubr.bf16.mxu0 %v12643_v52  ;;  %9225 = vmatprep.mubr.bf16.mxu1 %v12643_v52  ;;  %v12661_v52 = vld [vmem:[#allocation2 + $0x1a00] ss:$16 sps:$4 sm:$0xff]  }
 0x32b   :  { %8232 = vmatpush1.bf16.msra.mxu0 %v12565_v53  ;;  %9239 = vmatpush1.bf16.msra.mxu1 %v12568_v54  ;;  %v12664_v53 = vld [vmem:[#allocation2 + $0x1a08] ss:$16 sps:$4 sm:$0xff]   ;;  %v12669_v54 = vld [vmem:[#allocation2 + $0x1a24] ss:$16 sps:$4 sm:$0xff]  }
 0x32c   :  { %8233 = vmatprep.subr.bf16.mxu0 %v12573_v55  ;;  %9240 = vmatprep.subr.bf16.mxu1 %v12576_v56  ;;  %v12672_v55 = vld [vmem:[#allocation2 + $0x1a2c] ss:$16 sps:$4 sm:$0xff]  }
 0x32d   :  { %v12745_v56 = vld [vmem:[%s13591_s0 + $0x18c] ss:$148 sps:$4 sm:$0xff]  }
 0x32e   :  { %8219 = vmatmul.mubr.bf16.gmra.mrb[4].mxu0 %v12651_v57  ;;  %9226 = vmatmul.mubr.bf16.gmra.mrb[4].mxu1 %v12651_v57  ;;  %v12667_v57 = vld [vmem:[#allocation2 + $0x1a20] ss:$16 sps:$4 sm:$0xff]  }
 0x32f   :  { %8234 = vmatpush1.bf16.msra.mxu0 %v12571_v58  ;;  %9241 = vmatpush1.bf16.msra.mxu1 %v12574_v59  ;;  %v12670_v58 = vld [vmem:[#allocation2 + $0x1a28] ss:$16 sps:$4 sm:$0xff]   ;;  %v12675_v59 = vld [vmem:[#allocation2 + $0x1a44] ss:$16 sps:$4 sm:$0xff]  }
 0x330   :  { %8235 = vmatprep.subr.bf16.mxu0 %v12579_v60  ;;  %9242 = vmatprep.subr.bf16.mxu1 %v12582_v61  ;;  %v12678_v60 = vld [vmem:[#allocation2 + $0x1a4c] ss:$16 sps:$4 sm:$0xff]  }
 0x331   :  { %8261 = vmatprep.mubr.bf16.mxu0 %v12660_v62  ;;  %9268 = vmatprep.mubr.bf16.mxu1 %v12660_v62  ;;  %v12753_v61 = vld [vmem:[%s13591_s0 + $0x188] ss:$148 sps:$4 sm:$0xff]   ;;  %v12673_v62 = vld [vmem:[#allocation2 + $0x1a40] ss:$16 sps:$4 sm:$0xff]  }
 0x333   :  { %8236 = vmatpush1.bf16.msra.mxu0 %v12577_v63  ;;  %9243 = vmatpush1.bf16.msra.mxu1 %v12580_v0  ;;  %v12676_v63 = vld [vmem:[#allocation2 + $0x1a48] ss:$16 sps:$4 sm:$0xff]   ;;  %v12681_v0 = vld [vmem:[#allocation2 + $0x1a64] ss:$16 sps:$4 sm:$0xff]  }
 0x334   :  { %8237 = vmatprep.subr.bf16.mxu0 %v12585_v1  ;;  %9244 = vmatprep.subr.bf16.mxu1 %v12588_v2  ;;  %v12684_v1 = vld [vmem:[#allocation2 + $0x1a6c] ss:$16 sps:$4 sm:$0xff]  }
 0x335   :  { %v12762_v2 = vld [vmem:[%s13591_s0 + $0x6c] ss:$148 sps:$4 sm:$0xff]  }
 0x337   :  { %8238 = vmatpush1.bf16.msra.mxu0 %v12583_v3  ;;  %9245 = vmatpush1.bf16.msra.mxu1 %v12586_v4  ;;  %v12679_v3 = vld [vmem:[#allocation2 + $0x1a60] ss:$16 sps:$4 sm:$0xff]   ;;  %v12682_v4 = vld [vmem:[#allocation2 + $0x1a68] ss:$16 sps:$4 sm:$0xff]  }
 0x338   :  { %8239 = vmatprep.subr.bf16.mxu0 %v12591_v5  ;;  %9246 = vmatprep.subr.bf16.mxu1 %v12594_v6  ;;  %v12687_v5 = vld [vmem:[#allocation2 + $0x1a84] ss:$16 sps:$4 sm:$0xff]   ;;  %v12690_v6 = vld [vmem:[#allocation2 + $0x1a8c] ss:$16 sps:$4 sm:$0xff]  }
 0x33b   :  { %8240 = vmatpush1.bf16.msra.mxu0 %v12589_v7  ;;  %9247 = vmatpush1.bf16.msra.mxu1 %v12592_v8  ;;  %v12685_v7 = vld [vmem:[#allocation2 + $0x1a80] ss:$16 sps:$4 sm:$0xff]   ;;  %v12688_v8 = vld [vmem:[#allocation2 + $0x1a88] ss:$16 sps:$4 sm:$0xff]  }
 0x33c   :  { %8241 = vmatprep.subr.bf16.mxu0 %v12597_v9  ;;  %9248 = vmatprep.subr.bf16.mxu1 %v12600_v10  ;;  %v12693_v9 = vld [vmem:[#allocation2 + $0x1aa4] ss:$16 sps:$4 sm:$0xff]   ;;  %v12696_v10 = vld [vmem:[#allocation2 + $0x1aac] ss:$16 sps:$4 sm:$0xff]  }
 0x33f   :  { %8242 = vmatpush1.bf16.msra.mxu0 %v12595_v11  ;;  %9249 = vmatpush1.bf16.msra.mxu1 %v12598_v12  ;;  %v12691_v11 = vld [vmem:[#allocation2 + $0x1aa0] ss:$16 sps:$4 sm:$0xff]   ;;  %v12694_v12 = vld [vmem:[#allocation2 + $0x1aa8] ss:$16 sps:$4 sm:$0xff]  }
 0x340   :  { %8243 = vmatprep.subr.bf16.mxu0 %v12603_v13  ;;  %9250 = vmatprep.subr.bf16.mxu1 %v12606_v14  ;;  %v12699_v13 = vld [vmem:[#allocation2 + $0x1ac4] ss:$16 sps:$4 sm:$0xff]   ;;  %v12702_v14 = vld [vmem:[#allocation2 + $0x1acc] ss:$16 sps:$4 sm:$0xff]  }
 0x343   :  { %8244 = vmatpush1.bf16.msra.mxu0 %v12601_v15  ;;  %9251 = vmatpush1.bf16.msra.mxu1 %v12604_v16  ;;  %v12697_v15 = vld [vmem:[#allocation2 + $0x1ac0] ss:$16 sps:$4 sm:$0xff]   ;;  %v12700_v16 = vld [vmem:[#allocation2 + $0x1ac8] ss:$16 sps:$4 sm:$0xff]  }
 0x344   :  { %8245 = vmatprep.subr.bf16.mxu0 %v12609_v17  ;;  %9252 = vmatprep.subr.bf16.mxu1 %v12612_v18  ;;  %v12705_v17 = vld [vmem:[#allocation2 + $0x1ae4] ss:$16 sps:$4 sm:$0xff]   ;;  %v12708_v18 = vld [vmem:[#allocation2 + $0x1aec] ss:$16 sps:$4 sm:$0xff]  }
 0x347   :  { %8246 = vmatpush1.bf16.msra.mxu0 %v12607_v19  ;;  %9253 = vmatpush1.bf16.msra.mxu1 %v12610_v20  ;;  %v12703_v19 = vld [vmem:[#allocation2 + $0x1ae0] ss:$16 sps:$4 sm:$0xff]   ;;  %v12706_v20 = vld [vmem:[#allocation2 + $0x1ae8] ss:$16 sps:$4 sm:$0xff]  }
 0x348   :  { %8247 = vmatprep.subr.bf16.mxu0 %v12615_v21  ;;  %9254 = vmatprep.subr.bf16.mxu1 %v12618_v22  ;;  %v12711_v21 = vld [vmem:[#allocation2 + $0x1b04] ss:$16 sps:$4 sm:$0xff]   ;;  %v12714_v22 = vld [vmem:[#allocation2 + $0x1b0c] ss:$16 sps:$4 sm:$0xff]  }
 0x34b   :  { %8248 = vmatpush1.bf16.msra.mxu0 %v12613_v23  ;;  %9255 = vmatpush1.bf16.msra.mxu1 %v12616_v24  ;;  %v12709_v23 = vld [vmem:[#allocation2 + $0x1b00] ss:$16 sps:$4 sm:$0xff]   ;;  %v12712_v24 = vld [vmem:[#allocation2 + $0x1b08] ss:$16 sps:$4 sm:$0xff]  }
 0x34c   :  { %8249 = vmatprep.subr.bf16.mxu0 %v12621_v25  ;;  %9256 = vmatprep.subr.bf16.mxu1 %v12624_v26  ;;  %v12717_v25 = vld [vmem:[#allocation2 + $0x1b24] ss:$16 sps:$4 sm:$0xff]   ;;  %v12720_v26 = vld [vmem:[#allocation2 + $0x1b2c] ss:$16 sps:$4 sm:$0xff]  }
 0x34f   :  { %8250 = vmatpush1.bf16.msra.mxu0 %v12619_v27  ;;  %9257 = vmatpush1.bf16.msra.mxu1 %v12622_v28  ;;  %v12715_v27 = vld [vmem:[#allocation2 + $0x1b20] ss:$16 sps:$4 sm:$0xff]   ;;  %v12718_v28 = vld [vmem:[#allocation2 + $0x1b28] ss:$16 sps:$4 sm:$0xff]  }
 0x350   :  { %8251 = vmatprep.subr.bf16.mxu0 %v12627_v29  ;;  %9258 = vmatprep.subr.bf16.mxu1 %v12630_v30  ;;  %v12723_v29 = vld [vmem:[#allocation2 + $0x1b44] ss:$16 sps:$4 sm:$0xff]   ;;  %v12726_v30 = vld [vmem:[#allocation2 + $0x1b4c] ss:$16 sps:$4 sm:$0xff]  }
 0x353   :  { %8252 = vmatpush1.bf16.msra.mxu0 %v12625_v31  ;;  %9259 = vmatpush1.bf16.msra.mxu1 %v12628_v32  ;;  %v12721_v31 = vld [vmem:[#allocation2 + $0x1b40] ss:$16 sps:$4 sm:$0xff]   ;;  %v12724_v32 = vld [vmem:[#allocation2 + $0x1b48] ss:$16 sps:$4 sm:$0xff]  }
 0x354   :  { %8253 = vmatprep.subr.bf16.mxu0 %v12633_v33  ;;  %9260 = vmatprep.subr.bf16.mxu1 %v12636_v34  ;;  %v12729_v33 = vld [vmem:[#allocation2 + $0x1b64] ss:$16 sps:$4 sm:$0xff]   ;;  %v12732_v34 = vld [vmem:[#allocation2 + $0x1b6c] ss:$16 sps:$4 sm:$0xff]  }
 0x357   :  { %8254 = vmatpush1.bf16.msra.mxu0 %v12631_v35  ;;  %9261 = vmatpush1.bf16.msra.mxu1 %v12634_v36  ;;  %v12727_v35 = vld [vmem:[#allocation2 + $0x1b60] ss:$16 sps:$4 sm:$0xff]   ;;  %v12730_v36 = vld [vmem:[#allocation2 + $0x1b68] ss:$16 sps:$4 sm:$0xff]  }
 0x358   :  { %8255 = vmatprep.subr.bf16.mxu0 %v12639_v37  ;;  %9262 = vmatprep.subr.bf16.mxu1 %v12642_v38  ;;  %v12735_v37 = vld [vmem:[#allocation2 + $0x1b84] ss:$16 sps:$4 sm:$0xff]   ;;  %v12738_v38 = vld [vmem:[#allocation2 + $0x1b8c] ss:$16 sps:$4 sm:$0xff]  }
 0x35b   :  { %8256 = vmatpush1.bf16.msra.mxu0 %v12637_v39  ;;  %9263 = vmatpush1.bf16.msra.mxu1 %v12640_v40  ;;  %v12733_v39 = vld [vmem:[#allocation2 + $0x1b80] ss:$16 sps:$4 sm:$0xff]   ;;  %v12736_v40 = vld [vmem:[#allocation2 + $0x1b88] ss:$16 sps:$4 sm:$0xff]  }
 0x35c   :  { %8257 = vmatprep.subr.bf16.mxu0 %v12647_v41  ;;  %9264 = vmatprep.subr.bf16.mxu1 %v12650_v42  ;;  %v12741_v41 = vld [vmem:[#allocation2 + $0x1ba4] ss:$16 sps:$4 sm:$0xff]   ;;  %v12744_v42 = vld [vmem:[#allocation2 + $0x1bac] ss:$16 sps:$4 sm:$0xff]  }
 0x35f   :  { %8258 = vmatpush1.bf16.msra.mxu0 %v12645_v43  ;;  %9265 = vmatpush1.bf16.msra.mxu1 %v12648_v44  ;;  %v12739_v43 = vld [vmem:[#allocation2 + $0x1ba0] ss:$16 sps:$4 sm:$0xff]   ;;  %v12742_v44 = vld [vmem:[#allocation2 + $0x1ba8] ss:$16 sps:$4 sm:$0xff]  }
 0x360   :  { %8259 = vmatprep.subr.bf16.mxu0 %v12654_v45  ;;  %9266 = vmatprep.subr.bf16.mxu1 %v12657_v46  ;;  %v12749_v45 = vld [vmem:[#allocation2 + $0x1bc4] ss:$16 sps:$4 sm:$0xff]   ;;  %v12752_v46 = vld [vmem:[#allocation2 + $0x1bcc] ss:$16 sps:$4 sm:$0xff]  }
 0x363   :  { %8260 = vmatpush1.bf16.msra.mxu0 %v12652_v47  ;;  %9267 = vmatpush1.bf16.msra.mxu1 %v12655_v48  ;;  %v12747_v47 = vld [vmem:[#allocation2 + $0x1bc0] ss:$16 sps:$4 sm:$0xff]   ;;  %v12750_v48 = vld [vmem:[#allocation2 + $0x1bc8] ss:$16 sps:$4 sm:$0xff]  }
 0x364   :  { %8282 = vmatprep.subr.bf16.mxu0 %v12663_v49  ;;  %9289 = vmatprep.subr.bf16.mxu1 %v12666_v50  ;;  %v12756_v49 = vld [vmem:[#allocation2 + $0x1be4] ss:$16 sps:$4 sm:$0xff]   ;;  %v12759_v50 = vld [vmem:[#allocation2 + $0x1bec] ss:$16 sps:$4 sm:$0xff]  }
 0x366   :  { %8262 = vmatmul.mubr.bf16.vlgmr.msra.gmra.mrb[0].mxu0 %v12658_v51  ;;  %9269 = vmatmul.mubr.bf16.vlgmr.msra.gmra.mrb[0].mxu1 %v12658_v51  ;;  %v12754_v51 = vld [vmem:[#allocation2 + $0x1be0] ss:$16 sps:$4 sm:$0xff]  }
 0x367   :  { %8283 = vmatpush1.bf16.msra.mxu0 %v12661_v52  ;;  %9290 = vmatpush1.bf16.msra.mxu1 %v12664_v53  ;;  %v12757_v52 = vld [vmem:[#allocation2 + $0x1be8] ss:$16 sps:$4 sm:$0xff]   ;;  %v12765_v53 = vld [vmem:[#allocation2 + $0x1c04] ss:$16 sps:$4 sm:$0xff]  }
 0x368   :  { %8284 = vmatprep.subr.bf16.mxu0 %v12669_v54  ;;  %9291 = vmatprep.subr.bf16.mxu1 %v12672_v55  ;;  %v12768_v54 = vld [vmem:[#allocation2 + $0x1c0c] ss:$16 sps:$4 sm:$0xff]  }
 0x369   :  { %8271 = vmatprep.mubr.bf16.mxu0 %v12745_v56  ;;  %9278 = vmatprep.mubr.bf16.mxu1 %v12745_v56  ;;  %v12760_v55 = vld [vmem:[%s13591_s0 + $0x68] ss:$148 sps:$4 sm:$0xff]   ;;  %v12763_v56 = vld [vmem:[#allocation2 + $0x1c00] ss:$16 sps:$4 sm:$0xff]  }
 0x36b   :  { %8285 = vmatpush1.bf16.msra.mxu0 %v12667_v57  ;;  %9292 = vmatpush1.bf16.msra.mxu1 %v12670_v58  ;;  %v12766_v57 = vld [vmem:[#allocation2 + $0x1c08] ss:$16 sps:$4 sm:$0xff]   ;;  %v12771_v58 = vld [vmem:[#allocation2 + $0x1c24] ss:$16 sps:$4 sm:$0xff]  }
 0x36c   :  { %8286 = vmatprep.subr.bf16.mxu0 %v12675_v59  ;;  %9293 = vmatprep.subr.bf16.mxu1 %v12678_v60  ;;  %v12774_v59 = vld [vmem:[#allocation2 + $0x1c2c] ss:$16 sps:$4 sm:$0xff]   ;;  %v12847_v60 = vld [vmem:[%s13591_s0 + $0x194] ss:$148 sps:$4 sm:$0xff]  }
 0x36e   :  { %8272 = vmatmul.mubr.bf16.gmra.mrb[4].mxu0 %v12753_v61  ;;  %9279 = vmatmul.mubr.bf16.gmra.mrb[4].mxu1 %v12753_v61  ;;  %v12769_v61 = vld [vmem:[#allocation2 + $0x1c20] ss:$16 sps:$4 sm:$0xff]  }
 0x36f   :  { %8287 = vmatpush1.bf16.msra.mxu0 %v12673_v62  ;;  %9294 = vmatpush1.bf16.msra.mxu1 %v12676_v63  ;;  %v12772_v62 = vld [vmem:[#allocation2 + $0x1c28] ss:$16 sps:$4 sm:$0xff]   ;;  %v12777_v63 = vld [vmem:[#allocation2 + $0x1c44] ss:$16 sps:$4 sm:$0xff]  }
 0x370   :  { %8288 = vmatprep.subr.bf16.mxu0 %v12681_v0  ;;  %9295 = vmatprep.subr.bf16.mxu1 %v12684_v1  ;;  %v12780_v0 = vld [vmem:[#allocation2 + $0x1c4c] ss:$16 sps:$4 sm:$0xff]   ;;  %v12855_v1 = vld [vmem:[%s13591_s0 + $0x190] ss:$148 sps:$4 sm:$0xff]  }
 0x371   :  { %8314 = vmatprep.mubr.bf16.mxu0 %v12762_v2  ;;  %9321 = vmatprep.mubr.bf16.mxu1 %v12762_v2  ;;  %v12775_v2 = vld [vmem:[#allocation2 + $0x1c40] ss:$16 sps:$4 sm:$0xff]  }
 0x373   :  { %8289 = vmatpush1.bf16.msra.mxu0 %v12679_v3  ;;  %9296 = vmatpush1.bf16.msra.mxu1 %v12682_v4  ;;  %v12778_v3 = vld [vmem:[#allocation2 + $0x1c48] ss:$16 sps:$4 sm:$0xff]   ;;  %v12783_v4 = vld [vmem:[#allocation2 + $0x1c64] ss:$16 sps:$4 sm:$0xff]  }
 0x374   :  { %8290 = vmatprep.subr.bf16.mxu0 %v12687_v5  ;;  %9297 = vmatprep.subr.bf16.mxu1 %v12690_v6  ;;  %v12786_v5 = vld [vmem:[#allocation2 + $0x1c6c] ss:$16 sps:$4 sm:$0xff]   ;;  %v12864_v6 = vld [vmem:[%s13591_s0 + $0x74] ss:$148 sps:$4 sm:$0xff]  }
 0x377   :  { %8291 = vmatpush1.bf16.msra.mxu0 %v12685_v7  ;;  %9298 = vmatpush1.bf16.msra.mxu1 %v12688_v8  ;;  %v12781_v7 = vld [vmem:[#allocation2 + $0x1c60] ss:$16 sps:$4 sm:$0xff]   ;;  %v12784_v8 = vld [vmem:[#allocation2 + $0x1c68] ss:$16 sps:$4 sm:$0xff]  }
 0x378   :  { %8292 = vmatprep.subr.bf16.mxu0 %v12693_v9  ;;  %9299 = vmatprep.subr.bf16.mxu1 %v12696_v10  ;;  %v12789_v9 = vld [vmem:[#allocation2 + $0x1c84] ss:$16 sps:$4 sm:$0xff]   ;;  %v12792_v10 = vld [vmem:[#allocation2 + $0x1c8c] ss:$16 sps:$4 sm:$0xff]  }
 0x37b   :  { %8293 = vmatpush1.bf16.msra.mxu0 %v12691_v11  ;;  %9300 = vmatpush1.bf16.msra.mxu1 %v12694_v12  ;;  %v12787_v11 = vld [vmem:[#allocation2 + $0x1c80] ss:$16 sps:$4 sm:$0xff]   ;;  %v12790_v12 = vld [vmem:[#allocation2 + $0x1c88] ss:$16 sps:$4 sm:$0xff]  }
 0x37c   :  { %8294 = vmatprep.subr.bf16.mxu0 %v12699_v13  ;;  %9301 = vmatprep.subr.bf16.mxu1 %v12702_v14  ;;  %v12795_v13 = vld [vmem:[#allocation2 + $0x1ca4] ss:$16 sps:$4 sm:$0xff]   ;;  %v12798_v14 = vld [vmem:[#allocation2 + $0x1cac] ss:$16 sps:$4 sm:$0xff]  }
 0x37f   :  { %8295 = vmatpush1.bf16.msra.mxu0 %v12697_v15  ;;  %9302 = vmatpush1.bf16.msra.mxu1 %v12700_v16  ;;  %v12793_v15 = vld [vmem:[#allocation2 + $0x1ca0] ss:$16 sps:$4 sm:$0xff]   ;;  %v12796_v16 = vld [vmem:[#allocation2 + $0x1ca8] ss:$16 sps:$4 sm:$0xff]  }
 0x380   :  { %8296 = vmatprep.subr.bf16.mxu0 %v12705_v17  ;;  %9303 = vmatprep.subr.bf16.mxu1 %v12708_v18  ;;  %v12801_v17 = vld [vmem:[#allocation2 + $0x1cc4] ss:$16 sps:$4 sm:$0xff]   ;;  %v12804_v18 = vld [vmem:[#allocation2 + $0x1ccc] ss:$16 sps:$4 sm:$0xff]  }
 0x383   :  { %8297 = vmatpush1.bf16.msra.mxu0 %v12703_v19  ;;  %9304 = vmatpush1.bf16.msra.mxu1 %v12706_v20  ;;  %v12799_v19 = vld [vmem:[#allocation2 + $0x1cc0] ss:$16 sps:$4 sm:$0xff]   ;;  %v12802_v20 = vld [vmem:[#allocation2 + $0x1cc8] ss:$16 sps:$4 sm:$0xff]  }
 0x384   :  { %8298 = vmatprep.subr.bf16.mxu0 %v12711_v21  ;;  %9305 = vmatprep.subr.bf16.mxu1 %v12714_v22  ;;  %v12807_v21 = vld [vmem:[#allocation2 + $0x1ce4] ss:$16 sps:$4 sm:$0xff]   ;;  %v12810_v22 = vld [vmem:[#allocation2 + $0x1cec] ss:$16 sps:$4 sm:$0xff]  }
 0x387   :  { %8299 = vmatpush1.bf16.msra.mxu0 %v12709_v23  ;;  %9306 = vmatpush1.bf16.msra.mxu1 %v12712_v24  ;;  %v12805_v23 = vld [vmem:[#allocation2 + $0x1ce0] ss:$16 sps:$4 sm:$0xff]   ;;  %v12808_v24 = vld [vmem:[#allocation2 + $0x1ce8] ss:$16 sps:$4 sm:$0xff]  }
 0x388   :  { %8300 = vmatprep.subr.bf16.mxu0 %v12717_v25  ;;  %9307 = vmatprep.subr.bf16.mxu1 %v12720_v26  ;;  %v12813_v25 = vld [vmem:[#allocation2 + $0x1d04] ss:$16 sps:$4 sm:$0xff]   ;;  %v12816_v26 = vld [vmem:[#allocation2 + $0x1d0c] ss:$16 sps:$4 sm:$0xff]  }
 0x38b   :  { %8301 = vmatpush1.bf16.msra.mxu0 %v12715_v27  ;;  %9308 = vmatpush1.bf16.msra.mxu1 %v12718_v28  ;;  %v12811_v27 = vld [vmem:[#allocation2 + $0x1d00] ss:$16 sps:$4 sm:$0xff]   ;;  %v12814_v28 = vld [vmem:[#allocation2 + $0x1d08] ss:$16 sps:$4 sm:$0xff]  }
 0x38c   :  { %8302 = vmatprep.subr.bf16.mxu0 %v12723_v29  ;;  %9309 = vmatprep.subr.bf16.mxu1 %v12726_v30  ;;  %v12819_v29 = vld [vmem:[#allocation2 + $0x1d24] ss:$16 sps:$4 sm:$0xff]   ;;  %v12822_v30 = vld [vmem:[#allocation2 + $0x1d2c] ss:$16 sps:$4 sm:$0xff]  }
 0x38f   :  { %8303 = vmatpush1.bf16.msra.mxu0 %v12721_v31  ;;  %9310 = vmatpush1.bf16.msra.mxu1 %v12724_v32  ;;  %v12817_v31 = vld [vmem:[#allocation2 + $0x1d20] ss:$16 sps:$4 sm:$0xff]   ;;  %v12820_v32 = vld [vmem:[#allocation2 + $0x1d28] ss:$16 sps:$4 sm:$0xff]  }
 0x390   :  { %8304 = vmatprep.subr.bf16.mxu0 %v12729_v33  ;;  %9311 = vmatprep.subr.bf16.mxu1 %v12732_v34  ;;  %v12825_v33 = vld [vmem:[#allocation2 + $0x1d44] ss:$16 sps:$4 sm:$0xff]   ;;  %v12828_v34 = vld [vmem:[#allocation2 + $0x1d4c] ss:$16 sps:$4 sm:$0xff]  }
 0x393   :  { %8305 = vmatpush1.bf16.msra.mxu0 %v12727_v35  ;;  %9312 = vmatpush1.bf16.msra.mxu1 %v12730_v36  ;;  %v12823_v35 = vld [vmem:[#allocation2 + $0x1d40] ss:$16 sps:$4 sm:$0xff]   ;;  %v12826_v36 = vld [vmem:[#allocation2 + $0x1d48] ss:$16 sps:$4 sm:$0xff]  }
 0x394   :  { %8306 = vmatprep.subr.bf16.mxu0 %v12735_v37  ;;  %9313 = vmatprep.subr.bf16.mxu1 %v12738_v38  ;;  %v12831_v37 = vld [vmem:[#allocation2 + $0x1d64] ss:$16 sps:$4 sm:$0xff]   ;;  %v12834_v38 = vld [vmem:[#allocation2 + $0x1d6c] ss:$16 sps:$4 sm:$0xff]  }
 0x397   :  { %8307 = vmatpush1.bf16.msra.mxu0 %v12733_v39  ;;  %9314 = vmatpush1.bf16.msra.mxu1 %v12736_v40  ;;  %v12829_v39 = vld [vmem:[#allocation2 + $0x1d60] ss:$16 sps:$4 sm:$0xff]   ;;  %v12832_v40 = vld [vmem:[#allocation2 + $0x1d68] ss:$16 sps:$4 sm:$0xff]  }
 0x398   :  { %8308 = vmatprep.subr.bf16.mxu0 %v12741_v41  ;;  %9315 = vmatprep.subr.bf16.mxu1 %v12744_v42  ;;  %v12837_v41 = vld [vmem:[#allocation2 + $0x1d84] ss:$16 sps:$4 sm:$0xff]   ;;  %v12840_v42 = vld [vmem:[#allocation2 + $0x1d8c] ss:$16 sps:$4 sm:$0xff]  }
 0x39b   :  { %8309 = vmatpush1.bf16.msra.mxu0 %v12739_v43  ;;  %9316 = vmatpush1.bf16.msra.mxu1 %v12742_v44  ;;  %v12835_v43 = vld [vmem:[#allocation2 + $0x1d80] ss:$16 sps:$4 sm:$0xff]   ;;  %v12838_v44 = vld [vmem:[#allocation2 + $0x1d88] ss:$16 sps:$4 sm:$0xff]  }
 0x39c   :  { %8310 = vmatprep.subr.bf16.mxu0 %v12749_v45  ;;  %9317 = vmatprep.subr.bf16.mxu1 %v12752_v46  ;;  %v12843_v45 = vld [vmem:[#allocation2 + $0x1da4] ss:$16 sps:$4 sm:$0xff]   ;;  %v12846_v46 = vld [vmem:[#allocation2 + $0x1dac] ss:$16 sps:$4 sm:$0xff]  }
 0x39f   :  { %8311 = vmatpush1.bf16.msra.mxu0 %v12747_v47  ;;  %9318 = vmatpush1.bf16.msra.mxu1 %v12750_v48  ;;  %v12841_v47 = vld [vmem:[#allocation2 + $0x1da0] ss:$16 sps:$4 sm:$0xff]   ;;  %v12844_v48 = vld [vmem:[#allocation2 + $0x1da8] ss:$16 sps:$4 sm:$0xff]  }
 0x3a0   :  { %8312 = vmatprep.subr.bf16.mxu0 %v12756_v49  ;;  %9319 = vmatprep.subr.bf16.mxu1 %v12759_v50  ;;  %v12851_v49 = vld [vmem:[#allocation2 + $0x1dc4] ss:$16 sps:$4 sm:$0xff]   ;;  %v12854_v50 = vld [vmem:[#allocation2 + $0x1dcc] ss:$16 sps:$4 sm:$0xff]  }
 0x3a3   :  { %8313 = vmatpush1.bf16.msra.mxu0 %v12754_v51  ;;  %9320 = vmatpush1.bf16.msra.mxu1 %v12757_v52  ;;  %v12849_v51 = vld [vmem:[#allocation2 + $0x1dc0] ss:$16 sps:$4 sm:$0xff]   ;;  %v12852_v52 = vld [vmem:[#allocation2 + $0x1dc8] ss:$16 sps:$4 sm:$0xff]  }
 0x3a4   :  { %8335 = vmatprep.subr.bf16.mxu0 %v12765_v53  ;;  %9342 = vmatprep.subr.bf16.mxu1 %v12768_v54  ;;  %v12858_v53 = vld [vmem:[#allocation2 + $0x1de4] ss:$16 sps:$4 sm:$0xff]   ;;  %v12861_v54 = vld [vmem:[#allocation2 + $0x1dec] ss:$16 sps:$4 sm:$0xff]  }
 0x3a6   :  { %8315 = vmatmul.mubr.bf16.vlgmr.msra.gmra.mrb[0].mxu0 %v12760_v55  ;;  %9322 = vmatmul.mubr.bf16.vlgmr.msra.gmra.mrb[0].mxu1 %v12760_v55  ;;  %v12856_v55 = vld [vmem:[#allocation2 + $0x1de0] ss:$16 sps:$4 sm:$0xff]  }
 0x3a7   :  { %8336 = vmatpush1.bf16.msra.mxu0 %v12763_v56  ;;  %9343 = vmatpush1.bf16.msra.mxu1 %v12766_v57  ;;  %v12859_v56 = vld [vmem:[#allocation2 + $0x1de8] ss:$16 sps:$4 sm:$0xff]   ;;  %v12867_v57 = vld [vmem:[#allocation2 + $0x1e04] ss:$16 sps:$4 sm:$0xff]  }
 0x3a8   :  { %8337 = vmatprep.subr.bf16.mxu0 %v12771_v58  ;;  %9344 = vmatprep.subr.bf16.mxu1 %v12774_v59  ;;  %v12870_v58 = vld [vmem:[#allocation2 + $0x1e0c] ss:$16 sps:$4 sm:$0xff]   ;;  %v12862_v59 = vld [vmem:[%s13591_s0 + $0x70] ss:$148 sps:$4 sm:$0xff]  }
 0x3a9   :  { %8324 = vmatprep.mubr.bf16.mxu0 %v12847_v60  ;;  %9331 = vmatprep.mubr.bf16.mxu1 %v12847_v60  ;;  %v12865_v60 = vld [vmem:[#allocation2 + $0x1e00] ss:$16 sps:$4 sm:$0xff]  }
 0x3ab   :  { %8338 = vmatpush1.bf16.msra.mxu0 %v12769_v61  ;;  %9345 = vmatpush1.bf16.msra.mxu1 %v12772_v62  ;;  %v12868_v61 = vld [vmem:[#allocation2 + $0x1e08] ss:$16 sps:$4 sm:$0xff]   ;;  %v12873_v62 = vld [vmem:[#allocation2 + $0x1e24] ss:$16 sps:$4 sm:$0xff]  }
 0x3ac   :  { %8339 = vmatprep.subr.bf16.mxu0 %v12777_v63  ;;  %9346 = vmatprep.subr.bf16.mxu1 %v12780_v0  ;;  %v12876_v63 = vld [vmem:[#allocation2 + $0x1e2c] ss:$16 sps:$4 sm:$0xff]  }
 0x3ad   :  { %v12949_v0 = vld [vmem:[%s13591_s0 + $0x19c] ss:$148 sps:$4 sm:$0xff]  }
 0x3ae   :  { %8325 = vmatmul.mubr.bf16.gmra.mrb[4].mxu0 %v12855_v1  ;;  %9332 = vmatmul.mubr.bf16.gmra.mrb[4].mxu1 %v12855_v1  ;;  %v12871_v1 = vld [vmem:[#allocation2 + $0x1e20] ss:$16 sps:$4 sm:$0xff]  }
 0x3af   :  { %8340 = vmatpush1.bf16.msra.mxu0 %v12775_v2  ;;  %9347 = vmatpush1.bf16.msra.mxu1 %v12778_v3  ;;  %v12874_v2 = vld [vmem:[#allocation2 + $0x1e28] ss:$16 sps:$4 sm:$0xff]   ;;  %v12879_v3 = vld [vmem:[#allocation2 + $0x1e44] ss:$16 sps:$4 sm:$0xff]  }
 0x3b0   :  { %8341 = vmatprep.subr.bf16.mxu0 %v12783_v4  ;;  %9348 = vmatprep.subr.bf16.mxu1 %v12786_v5  ;;  %v12882_v4 = vld [vmem:[#allocation2 + $0x1e4c] ss:$16 sps:$4 sm:$0xff]  }
 0x3b1   :  { %8367 = vmatprep.mubr.bf16.mxu0 %v12864_v6  ;;  %9374 = vmatprep.mubr.bf16.mxu1 %v12864_v6  ;;  %v12957_v5 = vld [vmem:[%s13591_s0 + $0x198] ss:$148 sps:$4 sm:$0xff]   ;;  %v12877_v6 = vld [vmem:[#allocation2 + $0x1e40] ss:$16 sps:$4 sm:$0xff]  }
 0x3b3   :  { %8342 = vmatpush1.bf16.msra.mxu0 %v12781_v7  ;;  %9349 = vmatpush1.bf16.msra.mxu1 %v12784_v8  ;;  %v12880_v7 = vld [vmem:[#allocation2 + $0x1e48] ss:$16 sps:$4 sm:$0xff]   ;;  %v12885_v8 = vld [vmem:[#allocation2 + $0x1e64] ss:$16 sps:$4 sm:$0xff]  }
 0x3b4   :  { %8343 = vmatprep.subr.bf16.mxu0 %v12789_v9  ;;  %9350 = vmatprep.subr.bf16.mxu1 %v12792_v10  ;;  %v12888_v9 = vld [vmem:[#allocation2 + $0x1e6c] ss:$16 sps:$4 sm:$0xff]  }
 0x3b5   :  { %v12966_v10 = vld [vmem:[%s13591_s0 + $0x7c] ss:$148 sps:$4 sm:$0xff]  }
 0x3b7   :  { %8344 = vmatpush1.bf16.msra.mxu0 %v12787_v11  ;;  %9351 = vmatpush1.bf16.msra.mxu1 %v12790_v12  ;;  %v12883_v11 = vld [vmem:[#allocation2 + $0x1e60] ss:$16 sps:$4 sm:$0xff]   ;;  %v12886_v12 = vld [vmem:[#allocation2 + $0x1e68] ss:$16 sps:$4 sm:$0xff]  }
 0x3b8   :  { %8345 = vmatprep.subr.bf16.mxu0 %v12795_v13  ;;  %9352 = vmatprep.subr.bf16.mxu1 %v12798_v14  ;;  %v12891_v13 = vld [vmem:[#allocation2 + $0x1e84] ss:$16 sps:$4 sm:$0xff]   ;;  %v12894_v14 = vld [vmem:[#allocation2 + $0x1e8c] ss:$16 sps:$4 sm:$0xff]  }
 0x3bb   :  { %8346 = vmatpush1.bf16.msra.mxu0 %v12793_v15  ;;  %9353 = vmatpush1.bf16.msra.mxu1 %v12796_v16  ;;  %v12889_v15 = vld [vmem:[#allocation2 + $0x1e80] ss:$16 sps:$4 sm:$0xff]   ;;  %v12892_v16 = vld [vmem:[#allocation2 + $0x1e88] ss:$16 sps:$4 sm:$0xff]  }
 0x3bc   :  { %8347 = vmatprep.subr.bf16.mxu0 %v12801_v17  ;;  %9354 = vmatprep.subr.bf16.mxu1 %v12804_v18  ;;  %v12897_v17 = vld [vmem:[#allocation2 + $0x1ea4] ss:$16 sps:$4 sm:$0xff]   ;;  %v12900_v18 = vld [vmem:[#allocation2 + $0x1eac] ss:$16 sps:$4 sm:$0xff]  }
 0x3bf   :  { %8348 = vmatpush1.bf16.msra.mxu0 %v12799_v19  ;;  %9355 = vmatpush1.bf16.msra.mxu1 %v12802_v20  ;;  %v12895_v19 = vld [vmem:[#allocation2 + $0x1ea0] ss:$16 sps:$4 sm:$0xff]   ;;  %v12898_v20 = vld [vmem:[#allocation2 + $0x1ea8] ss:$16 sps:$4 sm:$0xff]  }
 0x3c0   :  { %8349 = vmatprep.subr.bf16.mxu0 %v12807_v21  ;;  %9356 = vmatprep.subr.bf16.mxu1 %v12810_v22  ;;  %v12903_v21 = vld [vmem:[#allocation2 + $0x1ec4] ss:$16 sps:$4 sm:$0xff]   ;;  %v12906_v22 = vld [vmem:[#allocation2 + $0x1ecc] ss:$16 sps:$4 sm:$0xff]  }
 0x3c3   :  { %8350 = vmatpush1.bf16.msra.mxu0 %v12805_v23  ;;  %9357 = vmatpush1.bf16.msra.mxu1 %v12808_v24  ;;  %v12901_v23 = vld [vmem:[#allocation2 + $0x1ec0] ss:$16 sps:$4 sm:$0xff]   ;;  %v12904_v24 = vld [vmem:[#allocation2 + $0x1ec8] ss:$16 sps:$4 sm:$0xff]  }
 0x3c4   :  { %8351 = vmatprep.subr.bf16.mxu0 %v12813_v25  ;;  %9358 = vmatprep.subr.bf16.mxu1 %v12816_v26  ;;  %v12909_v25 = vld [vmem:[#allocation2 + $0x1ee4] ss:$16 sps:$4 sm:$0xff]   ;;  %v12912_v26 = vld [vmem:[#allocation2 + $0x1eec] ss:$16 sps:$4 sm:$0xff]  }
 0x3c7   :  { %8352 = vmatpush1.bf16.msra.mxu0 %v12811_v27  ;;  %9359 = vmatpush1.bf16.msra.mxu1 %v12814_v28  ;;  %v12907_v27 = vld [vmem:[#allocation2 + $0x1ee0] ss:$16 sps:$4 sm:$0xff]   ;;  %v12910_v28 = vld [vmem:[#allocation2 + $0x1ee8] ss:$16 sps:$4 sm:$0xff]  }
 0x3c8   :  { %8353 = vmatprep.subr.bf16.mxu0 %v12819_v29  ;;  %9360 = vmatprep.subr.bf16.mxu1 %v12822_v30  ;;  %v12915_v29 = vld [vmem:[#allocation2 + $0x1f04] ss:$16 sps:$4 sm:$0xff]   ;;  %v12918_v30 = vld [vmem:[#allocation2 + $0x1f0c] ss:$16 sps:$4 sm:$0xff]  }
 0x3cb   :  { %8354 = vmatpush1.bf16.msra.mxu0 %v12817_v31  ;;  %9361 = vmatpush1.bf16.msra.mxu1 %v12820_v32  ;;  %v12913_v31 = vld [vmem:[#allocation2 + $0x1f00] ss:$16 sps:$4 sm:$0xff]   ;;  %v12916_v32 = vld [vmem:[#allocation2 + $0x1f08] ss:$16 sps:$4 sm:$0xff]  }
 0x3cc   :  { %8355 = vmatprep.subr.bf16.mxu0 %v12825_v33  ;;  %9362 = vmatprep.subr.bf16.mxu1 %v12828_v34  ;;  %v12921_v33 = vld [vmem:[#allocation2 + $0x1f24] ss:$16 sps:$4 sm:$0xff]   ;;  %v12924_v34 = vld [vmem:[#allocation2 + $0x1f2c] ss:$16 sps:$4 sm:$0xff]  }
 0x3cf   :  { %8356 = vmatpush1.bf16.msra.mxu0 %v12823_v35  ;;  %9363 = vmatpush1.bf16.msra.mxu1 %v12826_v36  ;;  %v12919_v35 = vld [vmem:[#allocation2 + $0x1f20] ss:$16 sps:$4 sm:$0xff]   ;;  %v12922_v36 = vld [vmem:[#allocation2 + $0x1f28] ss:$16 sps:$4 sm:$0xff]  }
 0x3d0   :  { %8357 = vmatprep.subr.bf16.mxu0 %v12831_v37  ;;  %9364 = vmatprep.subr.bf16.mxu1 %v12834_v38  ;;  %v12927_v37 = vld [vmem:[#allocation2 + $0x1f44] ss:$16 sps:$4 sm:$0xff]   ;;  %v12930_v38 = vld [vmem:[#allocation2 + $0x1f4c] ss:$16 sps:$4 sm:$0xff]  }
 0x3d3   :  { %8358 = vmatpush1.bf16.msra.mxu0 %v12829_v39  ;;  %9365 = vmatpush1.bf16.msra.mxu1 %v12832_v40  ;;  %v12925_v39 = vld [vmem:[#allocation2 + $0x1f40] ss:$16 sps:$4 sm:$0xff]   ;;  %v12928_v40 = vld [vmem:[#allocation2 + $0x1f48] ss:$16 sps:$4 sm:$0xff]  }
 0x3d4   :  { %8359 = vmatprep.subr.bf16.mxu0 %v12837_v41  ;;  %9366 = vmatprep.subr.bf16.mxu1 %v12840_v42  ;;  %v12933_v41 = vld [vmem:[#allocation2 + $0x1f64] ss:$16 sps:$4 sm:$0xff]   ;;  %v12936_v42 = vld [vmem:[#allocation2 + $0x1f6c] ss:$16 sps:$4 sm:$0xff]  }
 0x3d7   :  { %8360 = vmatpush1.bf16.msra.mxu0 %v12835_v43  ;;  %9367 = vmatpush1.bf16.msra.mxu1 %v12838_v44  ;;  %v12931_v43 = vld [vmem:[#allocation2 + $0x1f60] ss:$16 sps:$4 sm:$0xff]   ;;  %v12934_v44 = vld [vmem:[#allocation2 + $0x1f68] ss:$16 sps:$4 sm:$0xff]  }
 0x3d8   :  { %8361 = vmatprep.subr.bf16.mxu0 %v12843_v45  ;;  %9368 = vmatprep.subr.bf16.mxu1 %v12846_v46  ;;  %v12939_v45 = vld [vmem:[#allocation2 + $0x1f84] ss:$16 sps:$4 sm:$0xff]   ;;  %v12942_v46 = vld [vmem:[#allocation2 + $0x1f8c] ss:$16 sps:$4 sm:$0xff]  }
 0x3db   :  { %8362 = vmatpush1.bf16.msra.mxu0 %v12841_v47  ;;  %9369 = vmatpush1.bf16.msra.mxu1 %v12844_v48  ;;  %v12937_v47 = vld [vmem:[#allocation2 + $0x1f80] ss:$16 sps:$4 sm:$0xff]   ;;  %v12940_v48 = vld [vmem:[#allocation2 + $0x1f88] ss:$16 sps:$4 sm:$0xff]  }
 0x3dc   :  { %8363 = vmatprep.subr.bf16.mxu0 %v12851_v49  ;;  %9370 = vmatprep.subr.bf16.mxu1 %v12854_v50  ;;  %v12945_v49 = vld [vmem:[#allocation2 + $0x1fa4] ss:$16 sps:$4 sm:$0xff]   ;;  %v12948_v50 = vld [vmem:[#allocation2 + $0x1fac] ss:$16 sps:$4 sm:$0xff]  }
 0x3df   :  { %8364 = vmatpush1.bf16.msra.mxu0 %v12849_v51  ;;  %9371 = vmatpush1.bf16.msra.mxu1 %v12852_v52  ;;  %v12943_v51 = vld [vmem:[#allocation2 + $0x1fa0] ss:$16 sps:$4 sm:$0xff]   ;;  %v12946_v52 = vld [vmem:[#allocation2 + $0x1fa8] ss:$16 sps:$4 sm:$0xff]  }
 0x3e0   :  { %8365 = vmatprep.subr.bf16.mxu0 %v12858_v53  ;;  %9372 = vmatprep.subr.bf16.mxu1 %v12861_v54  ;;  %v12953_v53 = vld [vmem:[#allocation2 + $0x1fc4] ss:$16 sps:$4 sm:$0xff]   ;;  %v12956_v54 = vld [vmem:[#allocation2 + $0x1fcc] ss:$16 sps:$4 sm:$0xff]  }
 0x3e3   :  { %8366 = vmatpush1.bf16.msra.mxu0 %v12856_v55  ;;  %9373 = vmatpush1.bf16.msra.mxu1 %v12859_v56  ;;  %v12951_v55 = vld [vmem:[#allocation2 + $0x1fc0] ss:$16 sps:$4 sm:$0xff]   ;;  %v12954_v56 = vld [vmem:[#allocation2 + $0x1fc8] ss:$16 sps:$4 sm:$0xff]  }
 0x3e4   :  { %8388 = vmatprep.subr.bf16.mxu0 %v12867_v57  ;;  %9395 = vmatprep.subr.bf16.mxu1 %v12870_v58  ;;  %v12960_v57 = vld [vmem:[#allocation2 + $0x1fe4] ss:$16 sps:$4 sm:$0xff]   ;;  %v12963_v58 = vld [vmem:[#allocation2 + $0x1fec] ss:$16 sps:$4 sm:$0xff]  }
 0x3e6   :  { %8368 = vmatmul.mubr.bf16.vlgmr.msra.gmra.mrb[0].mxu0 %v12862_v59  ;;  %9375 = vmatmul.mubr.bf16.vlgmr.msra.gmra.mrb[0].mxu1 %v12862_v59  ;;  %v12958_v59 = vld [vmem:[#allocation2 + $0x1fe0] ss:$16 sps:$4 sm:$0xff]  }
 0x3e7   :  { %8389 = vmatpush1.bf16.msra.mxu0 %v12865_v60  ;;  %9396 = vmatpush1.bf16.msra.mxu1 %v12868_v61  ;;  %v12961_v60 = vld [vmem:[#allocation2 + $0x1fe8] ss:$16 sps:$4 sm:$0xff]   ;;  %v12969_v61 = vld [vmem:[#allocation2 + $0x2004] ss:$16 sps:$4 sm:$0xff]  }
 0x3e8   :  { %8390 = vmatprep.subr.bf16.mxu0 %v12873_v62  ;;  %9397 = vmatprep.subr.bf16.mxu1 %v12876_v63  ;;  %v12972_v62 = vld [vmem:[#allocation2 + $0x200c] ss:$16 sps:$4 sm:$0xff]  }
 0x3e9   :  { %8377 = vmatprep.mubr.bf16.mxu0 %v12949_v0  ;;  %9384 = vmatprep.mubr.bf16.mxu1 %v12949_v0  ;;  %v12964_v63 = vld [vmem:[%s13591_s0 + $0x78] ss:$148 sps:$4 sm:$0xff]   ;;  %v12967_v0 = vld [vmem:[#allocation2 + $0x2000] ss:$16 sps:$4 sm:$0xff]  }
 0x3eb   :  { %8391 = vmatpush1.bf16.msra.mxu0 %v12871_v1  ;;  %9398 = vmatpush1.bf16.msra.mxu1 %v12874_v2  ;;  %v12970_v1 = vld [vmem:[#allocation2 + $0x2008] ss:$16 sps:$4 sm:$0xff]   ;;  %v12975_v2 = vld [vmem:[#allocation2 + $0x2024] ss:$16 sps:$4 sm:$0xff]  }
 0x3ec   :  { %8392 = vmatprep.subr.bf16.mxu0 %v12879_v3  ;;  %9399 = vmatprep.subr.bf16.mxu1 %v12882_v4  ;;  %v12978_v3 = vld [vmem:[#allocation2 + $0x202c] ss:$16 sps:$4 sm:$0xff]   ;;  %v13051_v4 = vld [vmem:[%s13591_s0 + $0x1a4] ss:$148 sps:$4 sm:$0xff]  }
 0x3ee   :  { %8378 = vmatmul.mubr.bf16.gmra.mrb[4].mxu0 %v12957_v5  ;;  %9385 = vmatmul.mubr.bf16.gmra.mrb[4].mxu1 %v12957_v5  ;;  %v12973_v5 = vld [vmem:[#allocation2 + $0x2020] ss:$16 sps:$4 sm:$0xff]  }
 0x3ef   :  { %8393 = vmatpush1.bf16.msra.mxu0 %v12877_v6  ;;  %9400 = vmatpush1.bf16.msra.mxu1 %v12880_v7  ;;  %v12976_v6 = vld [vmem:[#allocation2 + $0x2028] ss:$16 sps:$4 sm:$0xff]   ;;  %v12981_v7 = vld [vmem:[#allocation2 + $0x2044] ss:$16 sps:$4 sm:$0xff]  }
 0x3f0   :  { %8394 = vmatprep.subr.bf16.mxu0 %v12885_v8  ;;  %9401 = vmatprep.subr.bf16.mxu1 %v12888_v9  ;;  %v12984_v8 = vld [vmem:[#allocation2 + $0x204c] ss:$16 sps:$4 sm:$0xff]   ;;  %v13059_v9 = vld [vmem:[%s13591_s0 + $0x1a0] ss:$148 sps:$4 sm:$0xff]  }
 0x3f1   :  { %8420 = vmatprep.mubr.bf16.mxu0 %v12966_v10  ;;  %9427 = vmatprep.mubr.bf16.mxu1 %v12966_v10  ;;  %v12979_v10 = vld [vmem:[#allocation2 + $0x2040] ss:$16 sps:$4 sm:$0xff]  }
 0x3f3   :  { %8395 = vmatpush1.bf16.msra.mxu0 %v12883_v11  ;;  %9402 = vmatpush1.bf16.msra.mxu1 %v12886_v12  ;;  %v12982_v11 = vld [vmem:[#allocation2 + $0x2048] ss:$16 sps:$4 sm:$0xff]   ;;  %v12987_v12 = vld [vmem:[#allocation2 + $0x2064] ss:$16 sps:$4 sm:$0xff]  }
 0x3f4   :  { %8396 = vmatprep.subr.bf16.mxu0 %v12891_v13  ;;  %9403 = vmatprep.subr.bf16.mxu1 %v12894_v14  ;;  %v12990_v13 = vld [vmem:[#allocation2 + $0x206c] ss:$16 sps:$4 sm:$0xff]   ;;  %v13068_v14 = vld [vmem:[%s13591_s0 + $0x84] ss:$148 sps:$4 sm:$0xff]  }
 0x3f7   :  { %8397 = vmatpush1.bf16.msra.mxu0 %v12889_v15  ;;  %9404 = vmatpush1.bf16.msra.mxu1 %v12892_v16  ;;  %v12985_v15 = vld [vmem:[#allocation2 + $0x2060] ss:$16 sps:$4 sm:$0xff]   ;;  %v12988_v16 = vld [vmem:[#allocation2 + $0x2068] ss:$16 sps:$4 sm:$0xff]  }
 0x3f8   :  { %8398 = vmatprep.subr.bf16.mxu0 %v12897_v17  ;;  %9405 = vmatprep.subr.bf16.mxu1 %v12900_v18  ;;  %v12993_v17 = vld [vmem:[#allocation2 + $0x2084] ss:$16 sps:$4 sm:$0xff]   ;;  %v12996_v18 = vld [vmem:[#allocation2 + $0x208c] ss:$16 sps:$4 sm:$0xff]  }
 0x3fb   :  { %8399 = vmatpush1.bf16.msra.mxu0 %v12895_v19  ;;  %9406 = vmatpush1.bf16.msra.mxu1 %v12898_v20  ;;  %v12991_v19 = vld [vmem:[#allocation2 + $0x2080] ss:$16 sps:$4 sm:$0xff]   ;;  %v12994_v20 = vld [vmem:[#allocation2 + $0x2088] ss:$16 sps:$4 sm:$0xff]  }
 0x3fc   :  { %8400 = vmatprep.subr.bf16.mxu0 %v12903_v21  ;;  %9407 = vmatprep.subr.bf16.mxu1 %v12906_v22  ;;  %v12999_v21 = vld [vmem:[#allocation2 + $0x20a4] ss:$16 sps:$4 sm:$0xff]   ;;  %v13002_v22 = vld [vmem:[#allocation2 + $0x20ac] ss:$16 sps:$4 sm:$0xff]  }
 0x3ff   :  { %8401 = vmatpush1.bf16.msra.mxu0 %v12901_v23  ;;  %9408 = vmatpush1.bf16.msra.mxu1 %v12904_v24  ;;  %v12997_v23 = vld [vmem:[#allocation2 + $0x20a0] ss:$16 sps:$4 sm:$0xff]   ;;  %v13000_v24 = vld [vmem:[#allocation2 + $0x20a8] ss:$16 sps:$4 sm:$0xff]  }
 0x400   :  { %8402 = vmatprep.subr.bf16.mxu0 %v12909_v25  ;;  %9409 = vmatprep.subr.bf16.mxu1 %v12912_v26  ;;  %v13005_v25 = vld [vmem:[#allocation2 + $0x20c4] ss:$16 sps:$4 sm:$0xff]   ;;  %v13008_v26 = vld [vmem:[#allocation2 + $0x20cc] ss:$16 sps:$4 sm:$0xff]  }
 0x403   :  { %8403 = vmatpush1.bf16.msra.mxu0 %v12907_v27  ;;  %9410 = vmatpush1.bf16.msra.mxu1 %v12910_v28  ;;  %v13003_v27 = vld [vmem:[#allocation2 + $0x20c0] ss:$16 sps:$4 sm:$0xff]   ;;  %v13006_v28 = vld [vmem:[#allocation2 + $0x20c8] ss:$16 sps:$4 sm:$0xff]  }
 0x404   :  { %8404 = vmatprep.subr.bf16.mxu0 %v12915_v29  ;;  %9411 = vmatprep.subr.bf16.mxu1 %v12918_v30  ;;  %v13011_v29 = vld [vmem:[#allocation2 + $0x20e4] ss:$16 sps:$4 sm:$0xff]   ;;  %v13014_v30 = vld [vmem:[#allocation2 + $0x20ec] ss:$16 sps:$4 sm:$0xff]  }
 0x407   :  { %8405 = vmatpush1.bf16.msra.mxu0 %v12913_v31  ;;  %9412 = vmatpush1.bf16.msra.mxu1 %v12916_v32  ;;  %v13009_v31 = vld [vmem:[#allocation2 + $0x20e0] ss:$16 sps:$4 sm:$0xff]   ;;  %v13012_v32 = vld [vmem:[#allocation2 + $0x20e8] ss:$16 sps:$4 sm:$0xff]  }
 0x408   :  { %8406 = vmatprep.subr.bf16.mxu0 %v12921_v33  ;;  %9413 = vmatprep.subr.bf16.mxu1 %v12924_v34  ;;  %v13017_v33 = vld [vmem:[#allocation2 + $0x2104] ss:$16 sps:$4 sm:$0xff]   ;;  %v13020_v34 = vld [vmem:[#allocation2 + $0x210c] ss:$16 sps:$4 sm:$0xff]  }
 0x40b   :  { %8407 = vmatpush1.bf16.msra.mxu0 %v12919_v35  ;;  %9414 = vmatpush1.bf16.msra.mxu1 %v12922_v36  ;;  %v13015_v35 = vld [vmem:[#allocation2 + $0x2100] ss:$16 sps:$4 sm:$0xff]   ;;  %v13018_v36 = vld [vmem:[#allocation2 + $0x2108] ss:$16 sps:$4 sm:$0xff]  }
 0x40c   :  { %8408 = vmatprep.subr.bf16.mxu0 %v12927_v37  ;;  %9415 = vmatprep.subr.bf16.mxu1 %v12930_v38  ;;  %v13023_v37 = vld [vmem:[#allocation2 + $0x2124] ss:$16 sps:$4 sm:$0xff]   ;;  %v13026_v38 = vld [vmem:[#allocation2 + $0x212c] ss:$16 sps:$4 sm:$0xff]  }
 0x40f   :  { %8409 = vmatpush1.bf16.msra.mxu0 %v12925_v39  ;;  %9416 = vmatpush1.bf16.msra.mxu1 %v12928_v40  ;;  %v13021_v39 = vld [vmem:[#allocation2 + $0x2120] ss:$16 sps:$4 sm:$0xff]   ;;  %v13024_v40 = vld [vmem:[#allocation2 + $0x2128] ss:$16 sps:$4 sm:$0xff]  }
 0x410   :  { %8410 = vmatprep.subr.bf16.mxu0 %v12933_v41  ;;  %9417 = vmatprep.subr.bf16.mxu1 %v12936_v42  ;;  %v13029_v41 = vld [vmem:[#allocation2 + $0x2144] ss:$16 sps:$4 sm:$0xff]   ;;  %v13032_v42 = vld [vmem:[#allocation2 + $0x214c] ss:$16 sps:$4 sm:$0xff]  }
 0x413   :  { %8411 = vmatpush1.bf16.msra.mxu0 %v12931_v43  ;;  %9418 = vmatpush1.bf16.msra.mxu1 %v12934_v44  ;;  %v13027_v43 = vld [vmem:[#allocation2 + $0x2140] ss:$16 sps:$4 sm:$0xff]   ;;  %v13030_v44 = vld [vmem:[#allocation2 + $0x2148] ss:$16 sps:$4 sm:$0xff]  }
 0x414   :  { %8412 = vmatprep.subr.bf16.mxu0 %v12939_v45  ;;  %9419 = vmatprep.subr.bf16.mxu1 %v12942_v46  ;;  %v13035_v45 = vld [vmem:[#allocation2 + $0x2164] ss:$16 sps:$4 sm:$0xff]   ;;  %v13038_v46 = vld [vmem:[#allocation2 + $0x216c] ss:$16 sps:$4 sm:$0xff]  }
 0x417   :  { %8413 = vmatpush1.bf16.msra.mxu0 %v12937_v47  ;;  %9420 = vmatpush1.bf16.msra.mxu1 %v12940_v48  ;;  %v13033_v47 = vld [vmem:[#allocation2 + $0x2160] ss:$16 sps:$4 sm:$0xff]   ;;  %v13036_v48 = vld [vmem:[#allocation2 + $0x2168] ss:$16 sps:$4 sm:$0xff]  }
 0x418   :  { %8414 = vmatprep.subr.bf16.mxu0 %v12945_v49  ;;  %9421 = vmatprep.subr.bf16.mxu1 %v12948_v50  ;;  %v13041_v49 = vld [vmem:[#allocation2 + $0x2184] ss:$16 sps:$4 sm:$0xff]   ;;  %v13044_v50 = vld [vmem:[#allocation2 + $0x218c] ss:$16 sps:$4 sm:$0xff]  }
 0x41b   :  { %8415 = vmatpush1.bf16.msra.mxu0 %v12943_v51  ;;  %9422 = vmatpush1.bf16.msra.mxu1 %v12946_v52  ;;  %v13039_v51 = vld [vmem:[#allocation2 + $0x2180] ss:$16 sps:$4 sm:$0xff]   ;;  %v13042_v52 = vld [vmem:[#allocation2 + $0x2188] ss:$16 sps:$4 sm:$0xff]  }
 0x41c   :  { %8416 = vmatprep.subr.bf16.mxu0 %v12953_v53  ;;  %9423 = vmatprep.subr.bf16.mxu1 %v12956_v54  ;;  %v13047_v53 = vld [vmem:[#allocation2 + $0x21a4] ss:$16 sps:$4 sm:$0xff]   ;;  %v13050_v54 = vld [vmem:[#allocation2 + $0x21ac] ss:$16 sps:$4 sm:$0xff]  }
 0x41f   :  { %8417 = vmatpush1.bf16.msra.mxu0 %v12951_v55  ;;  %9424 = vmatpush1.bf16.msra.mxu1 %v12954_v56  ;;  %v13045_v55 = vld [vmem:[#allocation2 + $0x21a0] ss:$16 sps:$4 sm:$0xff]   ;;  %v13048_v56 = vld [vmem:[#allocation2 + $0x21a8] ss:$16 sps:$4 sm:$0xff]  }
 0x420   :  { %8418 = vmatprep.subr.bf16.mxu0 %v12960_v57  ;;  %9425 = vmatprep.subr.bf16.mxu1 %v12963_v58  ;;  %v13055_v57 = vld [vmem:[#allocation2 + $0x21c4] ss:$16 sps:$4 sm:$0xff]   ;;  %v13058_v58 = vld [vmem:[#allocation2 + $0x21cc] ss:$16 sps:$4 sm:$0xff]  }
 0x423   :  { %8419 = vmatpush1.bf16.msra.mxu0 %v12958_v59  ;;  %9426 = vmatpush1.bf16.msra.mxu1 %v12961_v60  ;;  %v13053_v59 = vld [vmem:[#allocation2 + $0x21c0] ss:$16 sps:$4 sm:$0xff]   ;;  %v13056_v60 = vld [vmem:[#allocation2 + $0x21c8] ss:$16 sps:$4 sm:$0xff]  }
 0x424   :  { %8441 = vmatprep.subr.bf16.mxu0 %v12969_v61  ;;  %9448 = vmatprep.subr.bf16.mxu1 %v12972_v62  ;;  %v13062_v61 = vld [vmem:[#allocation2 + $0x21e4] ss:$16 sps:$4 sm:$0xff]   ;;  %v13065_v62 = vld [vmem:[#allocation2 + $0x21ec] ss:$16 sps:$4 sm:$0xff]  }
 0x426   :  { %8421 = vmatmul.mubr.bf16.vlgmr.msra.gmra.mrb[0].mxu0 %v12964_v63  ;;  %9428 = vmatmul.mubr.bf16.vlgmr.msra.gmra.mrb[0].mxu1 %v12964_v63  ;;  %v13060_v63 = vld [vmem:[#allocation2 + $0x21e0] ss:$16 sps:$4 sm:$0xff]  }
 0x427   :  { %8442 = vmatpush1.bf16.msra.mxu0 %v12967_v0  ;;  %9449 = vmatpush1.bf16.msra.mxu1 %v12970_v1  ;;  %v13063_v0 = vld [vmem:[#allocation2 + $0x21e8] ss:$16 sps:$4 sm:$0xff]   ;;  %v13071_v1 = vld [vmem:[#allocation2 + $0x2204] ss:$16 sps:$4 sm:$0xff]  }
 0x428   :  { %8443 = vmatprep.subr.bf16.mxu0 %v12975_v2  ;;  %9450 = vmatprep.subr.bf16.mxu1 %v12978_v3  ;;  %v13074_v2 = vld [vmem:[#allocation2 + $0x220c] ss:$16 sps:$4 sm:$0xff]   ;;  %v13066_v3 = vld [vmem:[%s13591_s0 + $0x80] ss:$148 sps:$4 sm:$0xff]  }
 0x429   :  { %8430 = vmatprep.mubr.bf16.mxu0 %v13051_v4  ;;  %9437 = vmatprep.mubr.bf16.mxu1 %v13051_v4  ;;  %v13069_v4 = vld [vmem:[#allocation2 + $0x2200] ss:$16 sps:$4 sm:$0xff]  }
 0x42b   :  { %8444 = vmatpush1.bf16.msra.mxu0 %v12973_v5  ;;  %9451 = vmatpush1.bf16.msra.mxu1 %v12976_v6  ;;  %v13072_v5 = vld [vmem:[#allocation2 + $0x2208] ss:$16 sps:$4 sm:$0xff]   ;;  %v13077_v6 = vld [vmem:[#allocation2 + $0x2224] ss:$16 sps:$4 sm:$0xff]  }
 0x42c   :  { %8445 = vmatprep.subr.bf16.mxu0 %v12981_v7  ;;  %9452 = vmatprep.subr.bf16.mxu1 %v12984_v8  ;;  %v13080_v7 = vld [vmem:[#allocation2 + $0x222c] ss:$16 sps:$4 sm:$0xff]  }
 0x42d   :  { %v13153_v8 = vld [vmem:[%s13591_s0 + $0x1ac] ss:$148 sps:$4 sm:$0xff]  }
 0x42e   :  { %8431 = vmatmul.mubr.bf16.gmra.mrb[4].mxu0 %v13059_v9  ;;  %9438 = vmatmul.mubr.bf16.gmra.mrb[4].mxu1 %v13059_v9  ;;  %v13075_v9 = vld [vmem:[#allocation2 + $0x2220] ss:$16 sps:$4 sm:$0xff]  }
 0x42f   :  { %8446 = vmatpush1.bf16.msra.mxu0 %v12979_v10  ;;  %9453 = vmatpush1.bf16.msra.mxu1 %v12982_v11  ;;  %v13078_v10 = vld [vmem:[#allocation2 + $0x2228] ss:$16 sps:$4 sm:$0xff]   ;;  %v13083_v11 = vld [vmem:[#allocation2 + $0x2244] ss:$16 sps:$4 sm:$0xff]  }
 0x430   :  { %8447 = vmatprep.subr.bf16.mxu0 %v12987_v12  ;;  %9454 = vmatprep.subr.bf16.mxu1 %v12990_v13  ;;  %v13086_v12 = vld [vmem:[#allocation2 + $0x224c] ss:$16 sps:$4 sm:$0xff]  }
 0x431   :  { %8473 = vmatprep.mubr.bf16.mxu0 %v13068_v14  ;;  %9480 = vmatprep.mubr.bf16.mxu1 %v13068_v14  ;;  %v13161_v13 = vld [vmem:[%s13591_s0 + $0x1a8] ss:$148 sps:$4 sm:$0xff]   ;;  %v13081_v14 = vld [vmem:[#allocation2 + $0x2240] ss:$16 sps:$4 sm:$0xff]  }
 0x433   :  { %8448 = vmatpush1.bf16.msra.mxu0 %v12985_v15  ;;  %9455 = vmatpush1.bf16.msra.mxu1 %v12988_v16  ;;  %v13084_v15 = vld [vmem:[#allocation2 + $0x2248] ss:$16 sps:$4 sm:$0xff]   ;;  %v13089_v16 = vld [vmem:[#allocation2 + $0x2264] ss:$16 sps:$4 sm:$0xff]  }
 0x434   :  { %8449 = vmatprep.subr.bf16.mxu0 %v12993_v17  ;;  %9456 = vmatprep.subr.bf16.mxu1 %v12996_v18  ;;  %v13092_v17 = vld [vmem:[#allocation2 + $0x226c] ss:$16 sps:$4 sm:$0xff]  }
 0x435   :  { %v13170_v18 = vld [vmem:[%s13591_s0 + $0x8c] ss:$148 sps:$4 sm:$0xff]  }
 0x437   :  { %8450 = vmatpush1.bf16.msra.mxu0 %v12991_v19  ;;  %9457 = vmatpush1.bf16.msra.mxu1 %v12994_v20  ;;  %v13087_v19 = vld [vmem:[#allocation2 + $0x2260] ss:$16 sps:$4 sm:$0xff]   ;;  %v13090_v20 = vld [vmem:[#allocation2 + $0x2268] ss:$16 sps:$4 sm:$0xff]  }
 0x438   :  { %8451 = vmatprep.subr.bf16.mxu0 %v12999_v21  ;;  %9458 = vmatprep.subr.bf16.mxu1 %v13002_v22  ;;  %v13095_v21 = vld [vmem:[#allocation2 + $0x2284] ss:$16 sps:$4 sm:$0xff]   ;;  %v13098_v22 = vld [vmem:[#allocation2 + $0x228c] ss:$16 sps:$4 sm:$0xff]  }
 0x43b   :  { %8452 = vmatpush1.bf16.msra.mxu0 %v12997_v23  ;;  %9459 = vmatpush1.bf16.msra.mxu1 %v13000_v24  ;;  %v13093_v23 = vld [vmem:[#allocation2 + $0x2280] ss:$16 sps:$4 sm:$0xff]   ;;  %v13096_v24 = vld [vmem:[#allocation2 + $0x2288] ss:$16 sps:$4 sm:$0xff]  }
 0x43c   :  { %8453 = vmatprep.subr.bf16.mxu0 %v13005_v25  ;;  %9460 = vmatprep.subr.bf16.mxu1 %v13008_v26  ;;  %v13101_v25 = vld [vmem:[#allocation2 + $0x22a4] ss:$16 sps:$4 sm:$0xff]   ;;  %v13104_v26 = vld [vmem:[#allocation2 + $0x22ac] ss:$16 sps:$4 sm:$0xff]  }
 0x43f   :  { %8454 = vmatpush1.bf16.msra.mxu0 %v13003_v27  ;;  %9461 = vmatpush1.bf16.msra.mxu1 %v13006_v28  ;;  %v13099_v27 = vld [vmem:[#allocation2 + $0x22a0] ss:$16 sps:$4 sm:$0xff]   ;;  %v13102_v28 = vld [vmem:[#allocation2 + $0x22a8] ss:$16 sps:$4 sm:$0xff]  }
 0x440   :  { %8455 = vmatprep.subr.bf16.mxu0 %v13011_v29  ;;  %9462 = vmatprep.subr.bf16.mxu1 %v13014_v30  ;;  %v13107_v29 = vld [vmem:[#allocation2 + $0x22c4] ss:$16 sps:$4 sm:$0xff]   ;;  %v13110_v30 = vld [vmem:[#allocation2 + $0x22cc] ss:$16 sps:$4 sm:$0xff]  }
 0x443   :  { %8456 = vmatpush1.bf16.msra.mxu0 %v13009_v31  ;;  %9463 = vmatpush1.bf16.msra.mxu1 %v13012_v32  ;;  %v13105_v31 = vld [vmem:[#allocation2 + $0x22c0] ss:$16 sps:$4 sm:$0xff]   ;;  %v13108_v32 = vld [vmem:[#allocation2 + $0x22c8] ss:$16 sps:$4 sm:$0xff]  }
 0x444   :  { %8457 = vmatprep.subr.bf16.mxu0 %v13017_v33  ;;  %9464 = vmatprep.subr.bf16.mxu1 %v13020_v34  ;;  %v13113_v33 = vld [vmem:[#allocation2 + $0x22e4] ss:$16 sps:$4 sm:$0xff]   ;;  %v13116_v34 = vld [vmem:[#allocation2 + $0x22ec] ss:$16 sps:$4 sm:$0xff]  }
 0x447   :  { %8458 = vmatpush1.bf16.msra.mxu0 %v13015_v35  ;;  %9465 = vmatpush1.bf16.msra.mxu1 %v13018_v36  ;;  %v13111_v35 = vld [vmem:[#allocation2 + $0x22e0] ss:$16 sps:$4 sm:$0xff]   ;;  %v13114_v36 = vld [vmem:[#allocation2 + $0x22e8] ss:$16 sps:$4 sm:$0xff]  }
 0x448   :  { %8459 = vmatprep.subr.bf16.mxu0 %v13023_v37  ;;  %9466 = vmatprep.subr.bf16.mxu1 %v13026_v38  ;;  %v13119_v37 = vld [vmem:[#allocation2 + $0x2304] ss:$16 sps:$4 sm:$0xff]   ;;  %v13122_v38 = vld [vmem:[#allocation2 + $0x230c] ss:$16 sps:$4 sm:$0xff]  }
 0x44b   :  { %8460 = vmatpush1.bf16.msra.mxu0 %v13021_v39  ;;  %9467 = vmatpush1.bf16.msra.mxu1 %v13024_v40  ;;  %v13117_v39 = vld [vmem:[#allocation2 + $0x2300] ss:$16 sps:$4 sm:$0xff]   ;;  %v13120_v40 = vld [vmem:[#allocation2 + $0x2308] ss:$16 sps:$4 sm:$0xff]  }
 0x44c   :  { %8461 = vmatprep.subr.bf16.mxu0 %v13029_v41  ;;  %9468 = vmatprep.subr.bf16.mxu1 %v13032_v42  ;;  %v13125_v41 = vld [vmem:[#allocation2 + $0x2324] ss:$16 sps:$4 sm:$0xff]   ;;  %v13128_v42 = vld [vmem:[#allocation2 + $0x232c] ss:$16 sps:$4 sm:$0xff]  }
 0x44f   :  { %8462 = vmatpush1.bf16.msra.mxu0 %v13027_v43  ;;  %9469 = vmatpush1.bf16.msra.mxu1 %v13030_v44  ;;  %v13123_v43 = vld [vmem:[#allocation2 + $0x2320] ss:$16 sps:$4 sm:$0xff]   ;;  %v13126_v44 = vld [vmem:[#allocation2 + $0x2328] ss:$16 sps:$4 sm:$0xff]  }
 0x450   :  { %8463 = vmatprep.subr.bf16.mxu0 %v13035_v45  ;;  %9470 = vmatprep.subr.bf16.mxu1 %v13038_v46  ;;  %v13131_v45 = vld [vmem:[#allocation2 + $0x2344] ss:$16 sps:$4 sm:$0xff]   ;;  %v13134_v46 = vld [vmem:[#allocation2 + $0x234c] ss:$16 sps:$4 sm:$0xff]  }
 0x453   :  { %8464 = vmatpush1.bf16.msra.mxu0 %v13033_v47  ;;  %9471 = vmatpush1.bf16.msra.mxu1 %v13036_v48  ;;  %v13129_v47 = vld [vmem:[#allocation2 + $0x2340] ss:$16 sps:$4 sm:$0xff]   ;;  %v13132_v48 = vld [vmem:[#allocation2 + $0x2348] ss:$16 sps:$4 sm:$0xff]  }
 0x454   :  { %8465 = vmatprep.subr.bf16.mxu0 %v13041_v49  ;;  %9472 = vmatprep.subr.bf16.mxu1 %v13044_v50  ;;  %v13137_v49 = vld [vmem:[#allocation2 + $0x2364] ss:$16 sps:$4 sm:$0xff]   ;;  %v13140_v50 = vld [vmem:[#allocation2 + $0x236c] ss:$16 sps:$4 sm:$0xff]  }
 0x457   :  { %8466 = vmatpush1.bf16.msra.mxu0 %v13039_v51  ;;  %9473 = vmatpush1.bf16.msra.mxu1 %v13042_v52  ;;  %v13135_v51 = vld [vmem:[#allocation2 + $0x2360] ss:$16 sps:$4 sm:$0xff]   ;;  %v13138_v52 = vld [vmem:[#allocation2 + $0x2368] ss:$16 sps:$4 sm:$0xff]  }
 0x458   :  { %8467 = vmatprep.subr.bf16.mxu0 %v13047_v53  ;;  %9474 = vmatprep.subr.bf16.mxu1 %v13050_v54  ;;  %v13143_v53 = vld [vmem:[#allocation2 + $0x2384] ss:$16 sps:$4 sm:$0xff]   ;;  %v13146_v54 = vld [vmem:[#allocation2 + $0x238c] ss:$16 sps:$4 sm:$0xff]  }
 0x45b   :  { %8468 = vmatpush1.bf16.msra.mxu0 %v13045_v55  ;;  %9475 = vmatpush1.bf16.msra.mxu1 %v13048_v56  ;;  %v13141_v55 = vld [vmem:[#allocation2 + $0x2380] ss:$16 sps:$4 sm:$0xff]   ;;  %v13144_v56 = vld [vmem:[#allocation2 + $0x2388] ss:$16 sps:$4 sm:$0xff]  }
 0x45c   :  { %8469 = vmatprep.subr.bf16.mxu0 %v13055_v57  ;;  %9476 = vmatprep.subr.bf16.mxu1 %v13058_v58  ;;  %v13149_v57 = vld [vmem:[#allocation2 + $0x23a4] ss:$16 sps:$4 sm:$0xff]   ;;  %v13152_v58 = vld [vmem:[#allocation2 + $0x23ac] ss:$16 sps:$4 sm:$0xff]  }
 0x45f   :  { %8470 = vmatpush1.bf16.msra.mxu0 %v13053_v59  ;;  %9477 = vmatpush1.bf16.msra.mxu1 %v13056_v60  ;;  %v13147_v59 = vld [vmem:[#allocation2 + $0x23a0] ss:$16 sps:$4 sm:$0xff]   ;;  %v13150_v60 = vld [vmem:[#allocation2 + $0x23a8] ss:$16 sps:$4 sm:$0xff]  }
 0x460   :  { %8471 = vmatprep.subr.bf16.mxu0 %v13062_v61  ;;  %9478 = vmatprep.subr.bf16.mxu1 %v13065_v62  ;;  %v13157_v61 = vld [vmem:[#allocation2 + $0x23c4] ss:$16 sps:$4 sm:$0xff]   ;;  %v13160_v62 = vld [vmem:[#allocation2 + $0x23cc] ss:$16 sps:$4 sm:$0xff]  }
 0x463   :  { %8472 = vmatpush1.bf16.msra.mxu0 %v13060_v63  ;;  %9479 = vmatpush1.bf16.msra.mxu1 %v13063_v0  ;;  %v13155_v63 = vld [vmem:[#allocation2 + $0x23c0] ss:$16 sps:$4 sm:$0xff]   ;;  %v13158_v0 = vld [vmem:[#allocation2 + $0x23c8] ss:$16 sps:$4 sm:$0xff]  }
 0x464   :  { %8494 = vmatprep.subr.bf16.mxu0 %v13071_v1  ;;  %9501 = vmatprep.subr.bf16.mxu1 %v13074_v2  ;;  %v13164_v1 = vld [vmem:[#allocation2 + $0x23e4] ss:$16 sps:$4 sm:$0xff]   ;;  %v13167_v2 = vld [vmem:[#allocation2 + $0x23ec] ss:$16 sps:$4 sm:$0xff]  }
 0x466   :  { %8474 = vmatmul.mubr.bf16.vlgmr.msra.gmra.mrb[0].mxu0 %v13066_v3  ;;  %9481 = vmatmul.mubr.bf16.vlgmr.msra.gmra.mrb[0].mxu1 %v13066_v3  ;;  %v13162_v3 = vld [vmem:[#allocation2 + $0x23e0] ss:$16 sps:$4 sm:$0xff]  }
 0x467   :  { %8495 = vmatpush1.bf16.msra.mxu0 %v13069_v4  ;;  %9502 = vmatpush1.bf16.msra.mxu1 %v13072_v5  ;;  %v13165_v4 = vld [vmem:[#allocation2 + $0x23e8] ss:$16 sps:$4 sm:$0xff]   ;;  %v13173_v5 = vld [vmem:[#allocation2 + $0x2404] ss:$16 sps:$4 sm:$0xff]  }
 0x468   :  { %8496 = vmatprep.subr.bf16.mxu0 %v13077_v6  ;;  %9503 = vmatprep.subr.bf16.mxu1 %v13080_v7  ;;  %v13176_v6 = vld [vmem:[#allocation2 + $0x240c] ss:$16 sps:$4 sm:$0xff]  }
 0x469   :  { %8483 = vmatprep.mubr.bf16.mxu0 %v13153_v8  ;;  %9490 = vmatprep.mubr.bf16.mxu1 %v13153_v8  ;;  %v13168_v7 = vld [vmem:[%s13591_s0 + $0x88] ss:$148 sps:$4 sm:$0xff]   ;;  %v13171_v8 = vld [vmem:[#allocation2 + $0x2400] ss:$16 sps:$4 sm:$0xff]  }
 0x46b   :  { %8497 = vmatpush1.bf16.msra.mxu0 %v13075_v9  ;;  %9504 = vmatpush1.bf16.msra.mxu1 %v13078_v10  ;;  %v13174_v9 = vld [vmem:[#allocation2 + $0x2408] ss:$16 sps:$4 sm:$0xff]   ;;  %v13179_v10 = vld [vmem:[#allocation2 + $0x2424] ss:$16 sps:$4 sm:$0xff]  }
 0x46c   :  { %8498 = vmatprep.subr.bf16.mxu0 %v13083_v11  ;;  %9505 = vmatprep.subr.bf16.mxu1 %v13086_v12  ;;  %v13182_v11 = vld [vmem:[#allocation2 + $0x242c] ss:$16 sps:$4 sm:$0xff]   ;;  %v13207_v12 = vld [vmem:[%s13591_s0 + $0x1b4] ss:$148 sps:$4 sm:$0xff]  }
 0x46e   :  { %8484 = vmatmul.mubr.bf16.gmra.mrb[4].mxu0 %v13161_v13  ;;  %9491 = vmatmul.mubr.bf16.gmra.mrb[4].mxu1 %v13161_v13  ;;  %v13177_v13 = vld [vmem:[#allocation2 + $0x2420] ss:$16 sps:$4 sm:$0xff]  }
 0x46f   :  { %8499 = vmatpush1.bf16.msra.mxu0 %v13081_v14  ;;  %9506 = vmatpush1.bf16.msra.mxu1 %v13084_v15  ;;  %v13180_v14 = vld [vmem:[#allocation2 + $0x2428] ss:$16 sps:$4 sm:$0xff]   ;;  %v13185_v15 = vld [vmem:[#allocation2 + $0x2444] ss:$16 sps:$4 sm:$0xff]  }
 0x470   :  { %8500 = vmatprep.subr.bf16.mxu0 %v13089_v16  ;;  %9507 = vmatprep.subr.bf16.mxu1 %v13092_v17  ;;  %v13188_v16 = vld [vmem:[#allocation2 + $0x244c] ss:$16 sps:$4 sm:$0xff]   ;;  %v13209_v17 = vld [vmem:[%s13591_s0 + $0x1b0] ss:$148 sps:$4 sm:$0xff]  }
 0x471   :  { %8526 = vmatprep.mubr.bf16.mxu0 %v13170_v18  ;;  %9533 = vmatprep.mubr.bf16.mxu1 %v13170_v18  ;;  %v13183_v18 = vld [vmem:[#allocation2 + $0x2440] ss:$16 sps:$4 sm:$0xff]  }
 0x473   :  { %8501 = vmatpush1.bf16.msra.mxu0 %v13087_v19  ;;  %9508 = vmatpush1.bf16.msra.mxu1 %v13090_v20  ;;  %v13186_v19 = vld [vmem:[#allocation2 + $0x2448] ss:$16 sps:$4 sm:$0xff]   ;;  %v13191_v20 = vld [vmem:[#allocation2 + $0x2464] ss:$16 sps:$4 sm:$0xff]  }
 0x474   :  { %8502 = vmatprep.subr.bf16.mxu0 %v13095_v21  ;;  %9509 = vmatprep.subr.bf16.mxu1 %v13098_v22  ;;  %v13194_v21 = vld [vmem:[#allocation2 + $0x246c] ss:$16 sps:$4 sm:$0xff]   ;;  %v13189_v22 = vld [vmem:[#allocation2 + $0x2460] ss:$16 sps:$4 sm:$0xff]  }
 0x477   :  { %8503 = vmatpush1.bf16.msra.mxu0 %v13093_v23  ;;  %9510 = vmatpush1.bf16.msra.mxu1 %v13096_v24  ;;  %v13192_v23 = vld [vmem:[#allocation2 + $0x2468] ss:$16 sps:$4 sm:$0xff]   ;;  %v13197_v24 = vld [vmem:[#allocation2 + $0x2484] ss:$16 sps:$4 sm:$0xff]  }
 0x478   :  { %8504 = vmatprep.subr.bf16.mxu0 %v13101_v25  ;;  %9511 = vmatprep.subr.bf16.mxu1 %v13104_v26  ;;  %v13200_v25 = vld [vmem:[#allocation2 + $0x248c] ss:$16 sps:$4 sm:$0xff]   ;;  %v13276_v26 = vmov 0  }
 0x47b   :  { %8505 = vmatpush1.bf16.msra.mxu0 %v13099_v27  ;;  %9512 = vmatpush1.bf16.msra.mxu1 %v13102_v28  ;;  %v13195_v27 = vld [vmem:[#allocation2 + $0x2480] ss:$16 sps:$4 sm:$0xff]   ;;  %v13198_v28 = vld [vmem:[#allocation2 + $0x2488] ss:$16 sps:$4 sm:$0xff]  }
 0x47c   :  { %8506 = vmatprep.subr.bf16.mxu0 %v13107_v29  ;;  %9513 = vmatprep.subr.bf16.mxu1 %v13110_v30  ;;  %v13203_v29 = vld [vmem:[#allocation2 + $0x24a4] ss:$16 sps:$4 sm:$0xff]   ;;  %v13206_v30 = vld [vmem:[#allocation2 + $0x24ac] ss:$16 sps:$4 sm:$0xff]  }
 0x47f   :  { %8507 = vmatpush1.bf16.msra.mxu0 %v13105_v31  ;;  %9514 = vmatpush1.bf16.msra.mxu1 %v13108_v32  ;;  %v13201_v31 = vld [vmem:[#allocation2 + $0x24a0] ss:$16 sps:$4 sm:$0xff]   ;;  %v13204_v32 = vld [vmem:[#allocation2 + $0x24a8] ss:$16 sps:$4 sm:$0xff]  }
 0x480   :  { %8508 = vmatprep.subr.bf16.mxu0 %v13113_v33  ;;  %9515 = vmatprep.subr.bf16.mxu1 %v13116_v34  ;;  %v13212_v33 = vld [vmem:[#allocation2 + $0x24c4] ss:$16 sps:$4 sm:$0xff]   ;;  %v13215_v34 = vld [vmem:[#allocation2 + $0x24cc] ss:$16 sps:$4 sm:$0xff]  }
 0x483   :  { %8509 = vmatpush1.bf16.msra.mxu0 %v13111_v35  ;;  %9516 = vmatpush1.bf16.msra.mxu1 %v13114_v36  ;;  %v13210_v35 = vld [vmem:[#allocation2 + $0x24c0] ss:$16 sps:$4 sm:$0xff]   ;;  %v13213_v36 = vld [vmem:[#allocation2 + $0x24c8] ss:$16 sps:$4 sm:$0xff]  }
 0x484   :  { %8510 = vmatprep.subr.bf16.mxu0 %v13119_v37  ;;  %9517 = vmatprep.subr.bf16.mxu1 %v13122_v38  ;;  %v13218_v37 = vld [vmem:[#allocation2 + $0x24e4] ss:$16 sps:$4 sm:$0xff]   ;;  %v13221_v38 = vld [vmem:[#allocation2 + $0x24ec] ss:$16 sps:$4 sm:$0xff]  }
 0x487   :  { %8511 = vmatpush1.bf16.msra.mxu0 %v13117_v39  ;;  %9518 = vmatpush1.bf16.msra.mxu1 %v13120_v40  ;;  %v13216_v39 = vld [vmem:[#allocation2 + $0x24e0] ss:$16 sps:$4 sm:$0xff]   ;;  %v13219_v40 = vld [vmem:[#allocation2 + $0x24e8] ss:$16 sps:$4 sm:$0xff]  }
 0x488   :  { %8512 = vmatprep.subr.bf16.mxu0 %v13125_v41  ;;  %9519 = vmatprep.subr.bf16.mxu1 %v13128_v42  ;;  %v13222_v41 = vld [vmem:[%s13591_s0 + $0x90] ss:$148 sps:$4 sm:$0xff]   ;;  %v13223_v42 = vld [vmem:[%s13591_s0 + $0x1b8] ss:$148 sps:$4 sm:$0xff]  }
 0x48b   :  { %8513 = vmatpush1.bf16.msra.mxu0 %v13123_v43  ;;  %9520 = vmatpush1.bf16.msra.mxu1 %v13126_v44  ;;  %v9625_v43 = vlaneseq }
 0x48c   :  { %8514 = vmatprep.subr.bf16.mxu0 %v13131_v45  ;;  %9521 = vmatprep.subr.bf16.mxu1 %v13134_v46 }
 0x48d   :  { %v9626_v44 = vshrl.u32 %v9625_v43, 7 }
 0x48f   :  { %8515 = vmatpush1.bf16.msra.mxu0 %v13129_v47  ;;  %9522 = vmatpush1.bf16.msra.mxu1 %v13132_v48  ;;  %v9627_v45 = vsub.s32 0, %v9626_v44  ;;  %v9635_v46 = vsub.s32 2, %v9626_v44  ;;  %v9623_v47 = vld [vmem:[#allocation4] sm:$0xf]  ;;  %v9631_v48 = vsub.s32 1, %v9626_v44 }
 0x490   :  { %8516 = vmatprep.subr.bf16.mxu0 %v13137_v49  ;;  %9523 = vmatprep.subr.bf16.mxu1 %v13140_v50  ;;  %v9639_v49 = vsub.s32 3, %v9626_v44 }
 0x491   :  { %v13543_v50 = vrot.slane %v9623_v47, %v9627_v45 }
 0x493   :  { %8517 = vmatpush1.bf16.msra.mxu0 %v13135_v51  ;;  %9524 = vmatpush1.bf16.msra.mxu1 %v13138_v52  ;;  %v13545_v51 = vrot.slane %v9623_v47, %v9635_v46 }
 0x494   :  { %8518 = vmatprep.subr.bf16.mxu0 %v13143_v53  ;;  %9525 = vmatprep.subr.bf16.mxu1 %v13146_v54  ;;  %v13547_v54 = vrot.slane %v9623_v47, %v9631_v48 }
 0x497   :  { %8519 = vmatpush1.bf16.msra.mxu0 %v13141_v55  ;;  %9526 = vmatpush1.bf16.msra.mxu1 %v13144_v56  ;;  %v13549_v55 = vrot.slane %v9623_v47, %v9639_v49 }
 0x498   :  { %8520 = vmatprep.subr.bf16.mxu0 %v13149_v57  ;;  %9527 = vmatprep.subr.bf16.mxu1 %v13152_v58 }
 0x49b   :  { %8521 = vmatpush1.bf16.msra.mxu0 %v13147_v59  ;;  %9528 = vmatpush1.bf16.msra.mxu1 %v13150_v60 }
 0x49c   :  { %8522 = vmatprep.subr.bf16.mxu0 %v13157_v61  ;;  %9529 = vmatprep.subr.bf16.mxu1 %v13160_v62 }
 0x49f   :  { %8523 = vmatpush1.bf16.msra.mxu0 %v13155_v63  ;;  %9530 = vmatpush1.bf16.msra.mxu1 %v13158_v0 }
 0x4a0   :  { %8524 = vmatprep.subr.bf16.mxu0 %v13164_v1  ;;  %9531 = vmatprep.subr.bf16.mxu1 %v13167_v2 }
 0x4a3   :  { %8525 = vmatpush1.bf16.msra.mxu0 %v13162_v3  ;;  %9532 = vmatpush1.bf16.msra.mxu1 %v13165_v4 }
 0x4a4   :  { %8547 = vmatprep.subr.bf16.mxu0 %v13173_v5  ;;  %9554 = vmatprep.subr.bf16.mxu1 %v13176_v6 }
 0x4a6   :  { %8527 = vmatmul.mubr.bf16.vlgmr.msra.gmra.mrb[0].mxu0 %v13168_v7  ;;  %9534 = vmatmul.mubr.bf16.vlgmr.msra.gmra.mrb[0].mxu1 %v13168_v7 }
 0x4a7   :  { %8548 = vmatpush1.bf16.msra.mxu0 %v13171_v8  ;;  %9555 = vmatpush1.bf16.msra.mxu1 %v13174_v9 }
 0x4a8   :  { %8549 = vmatprep.subr.bf16.mxu0 %v13179_v10  ;;  %9556 = vmatprep.subr.bf16.mxu1 %v13182_v11 }
 0x4a9   :  { %8536 = vmatprep.mubr.bf16.mxu0 %v13207_v12  ;;  %9543 = vmatprep.mubr.bf16.mxu1 %v13207_v12 }
 0x4ab   :  { %8550 = vmatpush1.bf16.msra.mxu0 %v13177_v13  ;;  %9557 = vmatpush1.bf16.msra.mxu1 %v13180_v14 }
 0x4ac   :  { %8551 = vmatprep.subr.bf16.mxu0 %v13185_v15  ;;  %9558 = vmatprep.subr.bf16.mxu1 %v13188_v16 }
 0x4ae   :  { %8537 = vmatmul.mubr.bf16.gmra.mrb[4].mxu0 %v13209_v17  ;;  %9544 = vmatmul.mubr.bf16.gmra.mrb[4].mxu1 %v13209_v17 }
 0x4af   :  { %8552 = vmatpush1.bf16.msra.mxu0 %v13183_v18  ;;  %9559 = vmatpush1.bf16.msra.mxu1 %v13186_v19 }
 0x4b0   :  { %8553 = vmatprep.subr.bf16.mxu0 %v13191_v20  ;;  %9560 = vmatprep.subr.bf16.mxu1 %v13194_v21 }
 0x4b1   :  { %8579 = vmatprep.mubr.bf16.mxu0 %v13276_v26  ;;  %9586 = vmatprep.mubr.bf16.mxu1 %v13276_v26 }
 0x4b3   :  { %8554 = vmatpush1.bf16.msra.mxu0 %v13189_v22  ;;  %9561 = vmatpush1.bf16.msra.mxu1 %v13192_v23 }
 0x4b4   :  { %8555 = vmatprep.subr.bf16.mxu0 %v13197_v24  ;;  %9562 = vmatprep.subr.bf16.mxu1 %v13200_v25 }
 0x4b7   :  { %8556 = vmatpush1.bf16.msra.mxu0 %v13195_v27  ;;  %9563 = vmatpush1.bf16.msra.mxu1 %v13198_v28 }
 0x4b8   :  { %8557 = vmatprep.subr.bf16.mxu0 %v13203_v29  ;;  %9564 = vmatprep.subr.bf16.mxu1 %v13206_v30 }
 0x4bb   :  { %8558 = vmatpush1.bf16.msra.mxu0 %v13201_v31  ;;  %9565 = vmatpush1.bf16.msra.mxu1 %v13204_v32 }
 0x4bc   :  { %8559 = vmatprep.subr.bf16.mxu0 %v13212_v33  ;;  %9566 = vmatprep.subr.bf16.mxu1 %v13215_v34 }
 0x4bf   :  { %8560 = vmatpush1.bf16.msra.mxu0 %v13210_v35  ;;  %9567 = vmatpush1.bf16.msra.mxu1 %v13213_v36 }
 0x4c0   :  { %8561 = vmatprep.subr.bf16.mxu0 %v13218_v37  ;;  %9568 = vmatprep.subr.bf16.mxu1 %v13221_v38 }
 0x4c3   :  { %8562 = vmatpush1.bf16.msra.mxu0 %v13216_v39  ;;  %9569 = vmatpush1.bf16.msra.mxu1 %v13219_v40 }
 0x4c6   :  { %8580 = vmatmul.mubr.bf16.vlgmr.msra.gmra.mrb[0].mxu0 %v13222_v41  ;;  %9587 = vmatmul.mubr.bf16.vlgmr.msra.gmra.mrb[0].mxu1 %v13222_v41 }
 0x4c7   :  { %8589 = vmatprep.mubr.bf16.mxu0 %v13276_v26  ;;  %9596 = vmatprep.mubr.bf16.mxu1 %v13276_v26 }
 0x4ce   :  { %8590 = vmatmul.mubr.bf16.gmra.mrb[4].mxu0 %v13223_v42  ;;  %9597 = vmatmul.mubr.bf16.gmra.mrb[4].mxu1 %v13223_v42 }
 0x599   :  { %v8581_v52 = vpop.f32.mrb[0].mxu0  ;;  %v9588_v53 = vpop.f32.mrb[0].mxu1 }
 0x59a   :  { %v9607_v56 = vmul.f32 0.020813018, %v8581_v52  ;;  %v9609_v57 = vmul.f32 0.020813018, %v9588_v53  ;;  %v8583_v58 = vpop.f32.mrb[1].mxu0  ;;  %v9590_v59 = vpop.f32.mrb[1].mxu1 }
 0x59b   :  { %v9608_v60 = vmul.f32 0.020813018, %v8583_v58  ;;  %v9610_v61 = vmul.f32 0.020813018, %v9590_v59  ;;  %v8585_v62 = vpop.f32.mrb[2].mxu0  ;;  %v9592_v63 = vpop.f32.mrb[2].mxu1 }
 0x59c   :  { %v9645_v0 = vadd.f32 %v13543_v50, %v9607_v56  ;;  %v9647_v1 = vadd.f32 %v13545_v51, %v9609_v57  ;;  %v9611_v2 = vmul.f32 0.020813018, %v8585_v62  ;;  %v9613_v3 = vmul.f32 0.020813018, %v9592_v63  ;;  %v8587_v4 = vpop.f32.mrb[3].mxu0  ;;  %v9594_v5 = vpop.f32.mrb[3].mxu1 }
 0x59d   :  { %v9646_v6 = vadd.f32 %v13547_v54, %v9608_v60  ;;  %v9648_v7 = vadd.f32 %v13549_v55, %v9610_v61  ;;  %v9612_v8 = vmul.f32 0.020813018, %v8587_v4  ;;  %v9614_v9 = vmul.f32 0.020813018, %v9594_v5 }
 0x59e   :  { %vm9661_vm0 = vcmp.ge.f32.partialorder %v9645_v0, 0.0  ;;  %v9677_v10 = vmul.f32 0.2, %v9645_v0  ;;  %vm9663_vm1 = vcmp.ge.f32.partialorder %v9647_v1, 0.0  ;;  %v9679_v11 = vmul.f32 0.2, %v9647_v1 }
 0x59f   :  { %vm9662_vm2 = vcmp.ge.f32.partialorder %v9646_v6, 0.0  ;;  %v9678_v12 = vmul.f32 0.2, %v9646_v6  ;;  %vm9664_vm3 = vcmp.ge.f32.partialorder %v9648_v7, 0.0  ;;  %v9680_v13 = vmul.f32 0.2, %v9648_v7 }
 0x5a0   :  { %v9693_v14 = vsel %vm9661_vm0, %v9645_v0, %v9677_v10  ;;  %v9695_v15 = vsel %vm9663_vm1, %v9647_v1, %v9679_v11  ;;  %v9649_v16 = vadd.f32 %v13543_v50, %v9611_v2  ;;  %v9651_v17 = vadd.f32 %v13545_v51, %v9613_v3 }
 0x5a1   :  { %v9694_v18 = vsel %vm9662_vm2, %v9646_v6, %v9678_v12  ;;  %v9696_v19 = vsel %vm9664_vm3, %v9648_v7, %v9680_v13  ;;  %v9650_v20 = vadd.f32 %v13547_v54, %v9612_v8  ;;  %v9652_v21 = vadd.f32 %v13549_v55, %v9614_v9  ;;  %v8591_v22 = vpop.f32.mrb[4].mxu0  ;;  %v9598_v23 = vpop.f32.mrb[4].mxu1 }
 0x5a2   :  { %v11037_v24 = vpack.c.bf16 %v9694_v18, %v9693_v14  ;;  %v11038_v25 = vpack.c.bf16 %v9696_v19, %v9695_v15  ;;  %vm9665_vm4 = vcmp.ge.f32.partialorder %v9649_v16, 0.0  ;;  %v9681_v26 = vmul.f32 0.2, %v9649_v16  ;;  %v8593_v27 = vpop.f32.mrb[5].mxu0  ;;  %v9600_v28 = vpop.f32.mrb[5].mxu1 }
 0x5a3   :  { %vm9667_vm5 = vcmp.ge.f32.partialorder %v9651_v17, 0.0  ;;  %v9683_v29 = vmul.f32 0.2, %v9651_v17  ;;  %vm9666_vm6 = vcmp.ge.f32.partialorder %v9650_v20, 0.0  ;;  %v9682_v30 = vmul.f32 0.2, %v9650_v20 }
 0x5a4   :  { %9757 = vst [vmem:[%s13594_s3] sm:$0xff] %v11037_v24  ;;  %9758 = vst [vmem:[%s13594_s3 + $0x8] sm:$0xff] %v11038_v25  ;;  %v9697_v31 = vsel %vm9665_vm4, %v9649_v16, %v9681_v26  ;;  %vm9668_vm7 = vcmp.ge.f32.partialorder %v9652_v21, 0.0  ;;  %v9684_v32 = vmul.f32 0.2, %v9652_v21  ;;  %v9615_v33 = vmul.f32 0.020813018, %v8591_v22 }
 0x5a5   :  { %v8595_v34 = vpop.f32.mrb[6].mxu0  ;;  %v9699_v35 = vsel %vm9667_vm5, %v9651_v17, %v9683_v29  ;;  %v9698_v36 = vsel %vm9666_vm6, %v9650_v20, %v9682_v30  ;;  %v9617_v37 = vmul.f32 0.020813018, %v9598_v23  ;;  %v9616_v38 = vmul.f32 0.020813018, %v8593_v27  ;;  %v9602_v39 = vpop.f32.mrb[6].mxu1 }
 0x5a6   :  { %v8597_v40 = vpop.f32.mrb[7].mxu0  ;;  %v11039_v41 = vpack.c.bf16 %v9698_v36, %v9697_v31  ;;  %v9700_v42 = vsel %vm9668_vm7, %v9652_v21, %v9684_v32  ;;  %v9653_v43 = vadd.f32 %v13543_v50, %v9615_v33  ;;  %v9618_v44 = vmul.f32 0.020813018, %v9600_v28  ;;  %v9604_v45 = vpop.f32.mrb[7].mxu1 }
 0x5a7   :  { %v11040_v46 = vpack.c.bf16 %v9700_v42, %v9699_v35  ;;  %v9655_v47 = vadd.f32 %v13545_v51, %v9617_v37  ;;  %v9654_v48 = vadd.f32 %v13547_v54, %v9616_v38  ;;  %v9619_v49 = vmul.f32 0.020813018, %v8595_v34 }
 0x5a8   :  { %9759 = vst [vmem:[%s13594_s3 + $0x10] sm:$0xff] %v11039_v41  ;;  %vm9669_vm8 = vcmp.ge.f32.partialorder %v9653_v43, 0.0  ;;  %v9685_v52 = vmul.f32 0.2, %v9653_v43  ;;  %v9656_v53 = vadd.f32 %v13549_v55, %v9618_v44  ;;  %v9621_v56 = vmul.f32 0.020813018, %v9602_v39 }
 0x5a9   :  { %9760 = vst [vmem:[%s13594_s3 + $0x18] sm:$0xff] %v11040_v46  ;;  %vm9671_vm9 = vcmp.ge.f32.partialorder %v9655_v47, 0.0  ;;  %v9687_v57 = vmul.f32 0.2, %v9655_v47  ;;  %vm9670_vm10 = vcmp.ge.f32.partialorder %v9654_v48, 0.0  ;;  %v9657_v61 = vadd.f32 %v13543_v50, %v9619_v49 }
 0x5aa   :  { %v9686_v58 = vmul.f32 0.2, %v9654_v48  ;;  %v9701_v59 = vsel %vm9669_vm8, %v9653_v43, %v9685_v52  ;;  %vm9672_vm11 = vcmp.ge.f32.partialorder %v9656_v53, 0.0  ;;  %v9688_v60 = vmul.f32 0.2, %v9656_v53 }
 0x5ab   :  { %v9703_v62 = vsel %vm9671_vm9, %v9655_v47, %v9687_v57  ;;  %v9659_v0 = vadd.f32 %v13545_v51, %v9621_v56  ;;  %v9620_v1 = vmul.f32 0.020813018, %v8597_v40  ;;  %vm9673_vm12 = vcmp.ge.f32.partialorder %v9657_v61, 0.0 }
 0x5ac   :  { %v9702_v63 = vsel %vm9670_vm10, %v9654_v48, %v9686_v58  ;;  %v9704_v3 = vsel %vm9672_vm11, %v9656_v53, %v9688_v60  ;;  %v9689_v4 = vmul.f32 0.2, %v9657_v61  ;;  %v9622_v8 = vmul.f32 0.020813018, %v9604_v45 }
 0x5ad   :  { %v11041_v2 = vpack.c.bf16 %v9702_v63, %v9701_v59  ;;  %v11042_v5 = vpack.c.bf16 %v9704_v3, %v9703_v62  ;;  %v9658_v6 = vadd.f32 %v13547_v54, %v9620_v1  ;;  %v9691_v7 = vmul.f32 0.2, %v9659_v0 }
 0x5ae   :  { %v9705_v50 = vsel %vm9673_vm12, %v9657_v61, %v9689_v4  ;;  %vm9675_vm13 = vcmp.ge.f32.partialorder %v9659_v0, 0.0  ;;  %v9660_v9 = vadd.f32 %v13549_v55, %v9622_v8 }
 0x5af   :  { %9761 = vst [vmem:[%s13594_s3 + $0x20] sm:$0xff] %v11041_v2  ;;  %9762 = vst [vmem:[%s13594_s3 + $0x28] sm:$0xff] %v11042_v5  ;;  %vm9674_vm14 = vcmp.ge.f32.partialorder %v9658_v6, 0.0  ;;  %v9690_v51 = vmul.f32 0.2, %v9658_v6  ;;  %v9707_v11 = vsel %vm9675_vm13, %v9659_v0, %v9691_v7 }
 0x5b0   :  { %vm9676_vm15 = vcmp.ge.f32.partialorder %v9660_v9, 0.0  ;;  %v9692_v54 = vmul.f32 0.2, %v9660_v9 }
 0x5b1   :  { %v9706_v10 = vsel %vm9674_vm14, %v9658_v6, %v9690_v51 }
 0x5b2   :  { %v11043_v12 = vpack.c.bf16 %v9706_v10, %v9705_v50  ;;  %v9708_v13 = vsel %vm9676_vm15, %v9660_v9, %v9692_v54 }
 0x5b3   :  { %v11044_v14 = vpack.c.bf16 %v9708_v13, %v9707_v11 }
 0x5b4   :  { %9763 = vst [vmem:[%s13594_s3 + $0x30] sm:$0xff] %v11043_v12 }
 0x5b5   :  { %9764 = vst [vmem:[%s13594_s3 + $0x38] sm:$0xff] %v11044_v14 }
 0x5b6   :  { %9769 = vsyncpa [#allocation3], 1 }
 0x5b7   :  { %9770 = vsyncpa [#allocation5], 1 }

// kernel: _lambda_.5
= control target key start
LH: loop header
LB: loop body
LE: loop exit
PB: predicated region body
PF: predicated region fallthrough
CT: control target
= control target key end

     0   :  { %s10707_s12 = smov 0   ;;  %s10709_s13 = smov 0   ;;  %s12131_s0 = inlined_call_operand.vmem [shape: bf16[8,8192], index: 0, kind: input, shape index: {}]   ;;  %s12132_s1 = inlined_call_operand.vmem [shape: bf16[8192,512], index: 1, kind: input, shape index: {}]   ;;  %s12133_s2 = inlined_call_operand.vmem [shape: f32[1,512], index: 2, kind: input, shape index: {}]   ;;  %s12134_s3 = inlined_call_operand.vmem [shape: f32[8,512], index: 3, kind: output, shape index: {}]  }
   0x1   :  { %s10711_s14 = smov 0  }
   0x2 LB: > { %s22_s15 = sadd.s32 1, %s10680_s13  ;;  %p8000_p0 = scmp.ge.s32.totalorder %s10684_s14, 1  ;;  %s10684_s14 = sphi %s10711_s14, %s13_s14   ;;  %s10680_s13 = sphi %s10709_s13, %s12136_s13   ;;  %s10676_s12 = sphi %s10707_s12, %s12135_s12  }
   0x3   : > { %p23_p1 = scmp.ge.s32.totalorder %s22_s15, 2  ;;  %p179_p2 = scmp.lt.s32.totalorder %s10684_s14, 3 }
   0x5   : > { %s12138_s15 = smov (%p23_p1, %s22_s15), 0  ;;  %p180_p3 = pnand %p8000_p0, %p179_p2 }
   0x6   : > { %s8001_s16 = sshll.u32 (!%p180_p3), %s10676_s12, 5  ;;  %s8003_s17 = sshll.u32 (!%p180_p3), %s10676_s12, 9 }
   0x7   : > { %183 = sbr.rel (%p180_p3) target bundleno = 1284 (0x504), region = 32  ;;  %p218_p4 = scmp.lt.s32.totalorder (!%p180_p3), %s8001_s16, 63 }
   0x8   : > { %p225_p5 = scmp.lt.s32.totalorder (!%p180_p3), %s8003_s17, 1023  ;;  %p8006_p6 = scmp.ne.s32.totalorder (!%p180_p3), %s10676_s12, 0 }
   0xe   : > { %s12140_s16 = smov (!%p218_p4, %s8001_s16), 63  ;;  %s12142_s17 = smov (!%p225_p5, %s8003_s17), 1023 }
   0xf   : > { %s8002_s18 = sshll.u32 %s12140_s16, 2  ;;  %s9068_s22 = sshll.u32 %s12142_s17, 4  ;;  %v10686_v0 = vmov (!%p8006_p6), 0.0  }
  0x10   : > { %s10732_s21 = scalar_lea.vmem %s12131_s0, %s8002_s18  ;;  %s10737_s25 = scalar_lea.vmem %s12132_s1, %s9068_s22  ;;  %250 = vst [vmem:[%s12134_s3] sm:$0xff] (!%p8006_p6), %v10686_v0  ;;  %251 = vst [vmem:[%s12134_s3 + $0x8] sm:$0xff] (!%p8006_p6), %v10686_v0 }
  0x11   : > { %249 = sbr.rel (%p8006_p6) target bundleno = 24 (0x18), region = 36  ;;  %252 = vst [vmem:[%s12134_s3 + $0x10] sm:$0xff] (!%p8006_p6), %v10686_v0  ;;  %253 = vst [vmem:[%s12134_s3 + $0x18] sm:$0xff] (!%p8006_p6), %v10686_v0 }
  0x18 PF: > { %v9094_v1 = vld [vmem:[%s10737_s25 + $0x4] ss:$16 sps:$4 sm:$0xff]   ;;  %v9098_v3 = vld [vmem:[%s10737_s25] ss:$16 sps:$4 sm:$0xff]   ;;  %v259_v49 = vld [vmem:[%s10732_s21 + $0x8] sm:$0xff]  ;;  %p9063_p7 = scmp.ne.s32.totalorder %s10676_s12, 1 }
  0x19   : > { %v9096_v2 = vld [vmem:[%s10737_s25 + $0x204] ss:$16 sps:$4 sm:$0xff]   ;;  %6530 = vmatprep.subr.bf16.mxu0 %v9094_v1  ;;  %v9099_v4 = vld [vmem:[%s10737_s25 + $0x200] ss:$16 sps:$4 sm:$0xff]   ;;  %v10804_v52 = vcombine.high %v259_v49, %v259_v49 }
  0x1a   : > { %6571 = vmatprep.subr.bf16.mxu1 %v9096_v2  ;;  %v9100_v5 = vld [vmem:[%s10737_s25 + $0x24] ss:$16 sps:$4 sm:$0xff]   ;;  %6531 = vmatpush1.bf16.msra.mxu0 %v9098_v3  ;;  %v9104_v7 = vld [vmem:[%s10737_s25 + $0x20] ss:$16 sps:$4 sm:$0xff]  }
  0x1b   : > { %6572 = vmatpush1.bf16.msra.mxu1 %v9099_v4  ;;  %v9102_v6 = vld [vmem:[%s10737_s25 + $0x224] ss:$16 sps:$4 sm:$0xff]   ;;  %6532 = vmatprep.subr.bf16.mxu0 %v9100_v5  ;;  %v9105_v8 = vld [vmem:[%s10737_s25 + $0x220] ss:$16 sps:$4 sm:$0xff]  }
  0x1c   : > { %6573 = vmatprep.subr.bf16.mxu1 %v9102_v6  ;;  %v9106_v9 = vld [vmem:[%s10737_s25 + $0x44] ss:$16 sps:$4 sm:$0xff]   ;;  %v9110_v11 = vld [vmem:[%s10737_s25 + $0x40] ss:$16 sps:$4 sm:$0xff]   ;;  %6603 = vmatprep.mubr.bf16.mxu1 %v10804_v52 }
  0x1d   : > { %v9108_v10 = vld [vmem:[%s10737_s25 + $0x244] ss:$16 sps:$4 sm:$0xff]   ;;  %v9111_v12 = vld [vmem:[%s10737_s25 + $0x240] ss:$16 sps:$4 sm:$0xff]  }
  0x1e   : > { %6533 = vmatpush1.bf16.msra.mxu0 %v9104_v7  ;;  %v9112_v13 = vld [vmem:[%s10737_s25 + $0x64] ss:$16 sps:$4 sm:$0xff]   ;;  %v9116_v15 = vld [vmem:[%s10737_s25 + $0x60] ss:$16 sps:$4 sm:$0xff]  }
  0x1f   : > { %6574 = vmatpush1.bf16.msra.mxu1 %v9105_v8  ;;  %6534 = vmatprep.subr.bf16.mxu0 %v9106_v9  ;;  %v9114_v14 = vld [vmem:[%s10737_s25 + $0x264] ss:$16 sps:$4 sm:$0xff]   ;;  %v9117_v16 = vld [vmem:[%s10737_s25 + $0x260] ss:$16 sps:$4 sm:$0xff]   ;;  %v10828_v8 = vcombine.low %v259_v49, %v259_v49 }
  0x20   : > { %6575 = vmatprep.subr.bf16.mxu1 %v9108_v10  ;;  %v9118_v17 = vld [vmem:[%s10737_s25 + $0x84] ss:$16 sps:$4 sm:$0xff]   ;;  %v9122_v19 = vld [vmem:[%s10737_s25 + $0x80] ss:$16 sps:$4 sm:$0xff]  }
  0x21   : > { %v9120_v18 = vld [vmem:[%s10737_s25 + $0x284] ss:$16 sps:$4 sm:$0xff]   ;;  %v9123_v20 = vld [vmem:[%s10737_s25 + $0x280] ss:$16 sps:$4 sm:$0xff]  }
  0x22   : > { %6535 = vmatpush1.bf16.msra.mxu0 %v9110_v11  ;;  %v9124_v21 = vld [vmem:[%s10737_s25 + $0xa4] ss:$16 sps:$4 sm:$0xff]   ;;  %v9128_v23 = vld [vmem:[%s10737_s25 + $0xa0] ss:$16 sps:$4 sm:$0xff]  }
  0x23   : > { %6576 = vmatpush1.bf16.msra.mxu1 %v9111_v12  ;;  %6536 = vmatprep.subr.bf16.mxu0 %v9112_v13  ;;  %v9126_v22 = vld [vmem:[%s10737_s25 + $0x2a4] ss:$16 sps:$4 sm:$0xff]   ;;  %v9129_v24 = vld [vmem:[%s10737_s25 + $0x2a0] ss:$16 sps:$4 sm:$0xff]  }
  0x24   : > { %6577 = vmatprep.subr.bf16.mxu1 %v9114_v14  ;;  %v9130_v25 = vld [vmem:[%s10737_s25 + $0xc4] ss:$16 sps:$4 sm:$0xff]   ;;  %v9134_v27 = vld [vmem:[%s10737_s25 + $0xc0] ss:$16 sps:$4 sm:$0xff]  }
  0x25   : > { %v9132_v26 = vld [vmem:[%s10737_s25 + $0x2c4] ss:$16 sps:$4 sm:$0xff]   ;;  %v9135_v28 = vld [vmem:[%s10737_s25 + $0x2c0] ss:$16 sps:$4 sm:$0xff]  }
  0x26   : > { %6537 = vmatpush1.bf16.msra.mxu0 %v9116_v15  ;;  %v9136_v29 = vld [vmem:[%s10737_s25 + $0xe4] ss:$16 sps:$4 sm:$0xff]   ;;  %v9140_v31 = vld [vmem:[%s10737_s25 + $0xe0] ss:$16 sps:$4 sm:$0xff]  }
  0x27   : > { %6578 = vmatpush1.bf16.msra.mxu1 %v9117_v16  ;;  %6538 = vmatprep.subr.bf16.mxu0 %v9118_v17  ;;  %v9138_v30 = vld [vmem:[%s10737_s25 + $0x2e4] ss:$16 sps:$4 sm:$0xff]   ;;  %v9141_v32 = vld [vmem:[%s10737_s25 + $0x2e0] ss:$16 sps:$4 sm:$0xff]  }
  0x28   : > { %6579 = vmatprep.subr.bf16.mxu1 %v9120_v18  ;;  %v9142_v33 = vld [vmem:[%s10737_s25 + $0x104] ss:$16 sps:$4 sm:$0xff]   ;;  %v9146_v35 = vld [vmem:[%s10737_s25 + $0x100] ss:$16 sps:$4 sm:$0xff]  }
  0x29   : > { %v9144_v34 = vld [vmem:[%s10737_s25 + $0x304] ss:$16 sps:$4 sm:$0xff]   ;;  %v9147_v36 = vld [vmem:[%s10737_s25 + $0x300] ss:$16 sps:$4 sm:$0xff]  }
  0x2a   : > { %6539 = vmatpush1.bf16.msra.mxu0 %v9122_v19  ;;  %v9148_v37 = vld [vmem:[%s10737_s25 + $0x124] ss:$16 sps:$4 sm:$0xff]   ;;  %v9152_v39 = vld [vmem:[%s10737_s25 + $0x120] ss:$16 sps:$4 sm:$0xff]  }
  0x2b   : > { %6580 = vmatpush1.bf16.msra.mxu1 %v9123_v20  ;;  %6540 = vmatprep.subr.bf16.mxu0 %v9124_v21  ;;  %v9150_v38 = vld [vmem:[%s10737_s25 + $0x324] ss:$16 sps:$4 sm:$0xff]   ;;  %v9153_v40 = vld [vmem:[%s10737_s25 + $0x320] ss:$16 sps:$4 sm:$0xff]  }
  0x2c   : > { %6581 = vmatprep.subr.bf16.mxu1 %v9126_v22  ;;  %v9154_v41 = vld [vmem:[%s10737_s25 + $0x144] ss:$16 sps:$4 sm:$0xff]   ;;  %v9158_v43 = vld [vmem:[%s10737_s25 + $0x140] ss:$16 sps:$4 sm:$0xff]  }
  0x2d   : > { %v9156_v42 = vld [vmem:[%s10737_s25 + $0x344] ss:$16 sps:$4 sm:$0xff]   ;;  %v9159_v44 = vld [vmem:[%s10737_s25 + $0x340] ss:$16 sps:$4 sm:$0xff]  }
  0x2e   : > { %6541 = vmatpush1.bf16.msra.mxu0 %v9128_v23  ;;  %v9160_v45 = vld [vmem:[%s10737_s25 + $0x164] ss:$16 sps:$4 sm:$0xff]   ;;  %v9164_v50 = vld [vmem:[%s10737_s25 + $0x160] ss:$16 sps:$4 sm:$0xff]  }
  0x2f   : > { %6582 = vmatpush1.bf16.msra.mxu1 %v9129_v24  ;;  %6542 = vmatprep.subr.bf16.mxu0 %v9130_v25  ;;  %v9162_v46 = vld [vmem:[%s10737_s25 + $0x364] ss:$16 sps:$4 sm:$0xff]   ;;  %v9165_v51 = vld [vmem:[%s10737_s25 + $0x360] ss:$16 sps:$4 sm:$0xff]  }
  0x30   : > { %6583 = vmatprep.subr.bf16.mxu1 %v9132_v26  ;;  %v258_v47 = vld [vmem:[%s10732_s21] sm:$0xff] }
  0x31   : > { %v10799_v48 = vcombine.high %v258_v47, %v258_v47  ;;  %v9166_v53 = vld [vmem:[%s10737_s25 + $0x184] ss:$16 sps:$4 sm:$0xff]   ;;  %v9170_v55 = vld [vmem:[%s10737_s25 + $0x180] ss:$16 sps:$4 sm:$0xff]   ;;  %v10826_v7 = vcombine.low %v258_v47, %v258_v47 }
  0x32   : > { %6543 = vmatpush1.bf16.msra.mxu0 %v9134_v27  ;;  %v9168_v54 = vld [vmem:[%s10737_s25 + $0x384] ss:$16 sps:$4 sm:$0xff]   ;;  %v9171_v56 = vld [vmem:[%s10737_s25 + $0x380] ss:$16 sps:$4 sm:$0xff]  }
  0x33   : > { %6584 = vmatpush1.bf16.msra.mxu1 %v9135_v28  ;;  %6544 = vmatprep.subr.bf16.mxu0 %v9136_v29  ;;  %v9172_v57 = vld [vmem:[%s10737_s25 + $0x1a4] ss:$16 sps:$4 sm:$0xff]   ;;  %v9176_v59 = vld [vmem:[%s10737_s25 + $0x1a0] ss:$16 sps:$4 sm:$0xff]  }
  0x34   : > { %6585 = vmatprep.subr.bf16.mxu1 %v9138_v30  ;;  %6562 = vmatprep.mubr.bf16.mxu0 %v10799_v48  ;;  %v9174_v58 = vld [vmem:[%s10737_s25 + $0x3a4] ss:$16 sps:$4 sm:$0xff]   ;;  %v9177_v60 = vld [vmem:[%s10737_s25 + $0x3a0] ss:$16 sps:$4 sm:$0xff]  }
  0x35   : > { %v9178_v61 = vld [vmem:[%s10737_s25 + $0x1c4] ss:$16 sps:$4 sm:$0xff]   ;;  %v9182_v63 = vld [vmem:[%s10737_s25 + $0x1c0] ss:$16 sps:$4 sm:$0xff]  }
  0x36   : > { %6545 = vmatpush1.bf16.msra.mxu0 %v9140_v31  ;;  %v9180_v62 = vld [vmem:[%s10737_s25 + $0x3c4] ss:$16 sps:$4 sm:$0xff]   ;;  %v9183_v0 = vld [vmem:[%s10737_s25 + $0x3c0] ss:$16 sps:$4 sm:$0xff]  }
  0x37   : > { %6586 = vmatpush1.bf16.msra.mxu1 %v9141_v32  ;;  %6546 = vmatprep.subr.bf16.mxu0 %v9142_v33  ;;  %v9184_v1 = vld [vmem:[%s10737_s25 + $0x1e4] ss:$16 sps:$4 sm:$0xff]   ;;  %v9188_v3 = vld [vmem:[%s10737_s25 + $0x1e0] ss:$16 sps:$4 sm:$0xff]  }
  0x38   : > { %6587 = vmatprep.subr.bf16.mxu1 %v9144_v34  ;;  %v9186_v2 = vld [vmem:[%s10737_s25 + $0x3e4] ss:$16 sps:$4 sm:$0xff]   ;;  %v9189_v4 = vld [vmem:[%s10737_s25 + $0x3e0] ss:$16 sps:$4 sm:$0xff]   ;;  %v10860_v34 = vld [vmem:[%s10732_s21 + $0x18] sm:$0xff] }
  0x39   : > { %v9196_v5 = vld [vmem:[%s10737_s25 + $0x404] ss:$16 sps:$4 sm:$0xff]   ;;  %v9194_v9 = vld [vmem:[%s10737_s25 + $0x400] ss:$16 sps:$4 sm:$0xff]  }
  0x3a   : > { %6547 = vmatpush1.bf16.msra.mxu0 %v9146_v35  ;;  %v9199_v6 = vld [vmem:[%s10737_s25 + $0x604] ss:$16 sps:$4 sm:$0xff]   ;;  %v9197_v10 = vld [vmem:[%s10737_s25 + $0x600] ss:$16 sps:$4 sm:$0xff]  }
  0x3b   : > { %6588 = vmatpush1.bf16.msra.mxu1 %v9147_v36  ;;  %6548 = vmatprep.subr.bf16.mxu0 %v9148_v37  ;;  %v9202_v11 = vld [vmem:[%s10737_s25 + $0x424] ss:$16 sps:$4 sm:$0xff]   ;;  %v9200_v13 = vld [vmem:[%s10737_s25 + $0x420] ss:$16 sps:$4 sm:$0xff]  }
  0x3c   : > { %6589 = vmatprep.subr.bf16.mxu1 %v9150_v38  ;;  %v9205_v12 = vld [vmem:[%s10737_s25 + $0x624] ss:$16 sps:$4 sm:$0xff]   ;;  %v9203_v14 = vld [vmem:[%s10737_s25 + $0x620] ss:$16 sps:$4 sm:$0xff]   ;;  %v10870_v38 = vcombine.high %v10860_v34, %v10860_v34 }
  0x3d   : > { %v9208_v15 = vld [vmem:[%s10737_s25 + $0x444] ss:$16 sps:$4 sm:$0xff]   ;;  %v9206_v17 = vld [vmem:[%s10737_s25 + $0x440] ss:$16 sps:$4 sm:$0xff]  }
  0x3e   : > { %6549 = vmatpush1.bf16.msra.mxu0 %v9152_v39  ;;  %v9211_v16 = vld [vmem:[%s10737_s25 + $0x644] ss:$16 sps:$4 sm:$0xff]   ;;  %v9209_v18 = vld [vmem:[%s10737_s25 + $0x640] ss:$16 sps:$4 sm:$0xff]  }
  0x3f   : > { %6590 = vmatpush1.bf16.msra.mxu1 %v9153_v40  ;;  %6550 = vmatprep.subr.bf16.mxu0 %v9154_v41  ;;  %v9214_v19 = vld [vmem:[%s10737_s25 + $0x464] ss:$16 sps:$4 sm:$0xff]   ;;  %v9212_v21 = vld [vmem:[%s10737_s25 + $0x460] ss:$16 sps:$4 sm:$0xff]  }
  0x40   : > { %6591 = vmatprep.subr.bf16.mxu1 %v9156_v42  ;;  %v9217_v20 = vld [vmem:[%s10737_s25 + $0x664] ss:$16 sps:$4 sm:$0xff]   ;;  %v9215_v22 = vld [vmem:[%s10737_s25 + $0x660] ss:$16 sps:$4 sm:$0xff]  }
  0x41   : > { %v9220_v23 = vld [vmem:[%s10737_s25 + $0x484] ss:$16 sps:$4 sm:$0xff]   ;;  %v9218_v25 = vld [vmem:[%s10737_s25 + $0x480] ss:$16 sps:$4 sm:$0xff]  }
  0x42   : > { %6551 = vmatpush1.bf16.msra.mxu0 %v9158_v43  ;;  %v9223_v24 = vld [vmem:[%s10737_s25 + $0x684] ss:$16 sps:$4 sm:$0xff]   ;;  %v9221_v26 = vld [vmem:[%s10737_s25 + $0x680] ss:$16 sps:$4 sm:$0xff]  }
  0x43   : > { %6592 = vmatpush1.bf16.msra.mxu1 %v9159_v44  ;;  %6552 = vmatprep.subr.bf16.mxu0 %v9160_v45  ;;  %v9226_v27 = vld [vmem:[%s10737_s25 + $0x4a4] ss:$16 sps:$4 sm:$0xff]   ;;  %v9224_v29 = vld [vmem:[%s10737_s25 + $0x4a0] ss:$16 sps:$4 sm:$0xff]  }
  0x44   : > { %6593 = vmatprep.subr.bf16.mxu1 %v9162_v46  ;;  %v9229_v28 = vld [vmem:[%s10737_s25 + $0x6a4] ss:$16 sps:$4 sm:$0xff]   ;;  %v9227_v30 = vld [vmem:[%s10737_s25 + $0x6a0] ss:$16 sps:$4 sm:$0xff]  }
  0x45   : > { %v9232_v31 = vld [vmem:[%s10737_s25 + $0x4c4] ss:$16 sps:$4 sm:$0xff]   ;;  %v9230_v35 = vld [vmem:[%s10737_s25 + $0x4c0] ss:$16 sps:$4 sm:$0xff]  }
  0x46   : > { %6553 = vmatpush1.bf16.msra.mxu0 %v9164_v50  ;;  %v9235_v32 = vld [vmem:[%s10737_s25 + $0x6c4] ss:$16 sps:$4 sm:$0xff]   ;;  %v9233_v36 = vld [vmem:[%s10737_s25 + $0x6c0] ss:$16 sps:$4 sm:$0xff]  }
  0x47   : > { %6594 = vmatpush1.bf16.msra.mxu1 %v9165_v51  ;;  %6554 = vmatprep.subr.bf16.mxu0 %v9166_v53  ;;  %v10857_v33 = vld [vmem:[%s10732_s21 + $0x10] sm:$0xff] }
  0x48   : > { %6595 = vmatprep.subr.bf16.mxu1 %v9168_v54  ;;  %v10866_v37 = vcombine.high %v10857_v33, %v10857_v33  ;;  %v9238_v39 = vld [vmem:[%s10737_s25 + $0x4e4] ss:$16 sps:$4 sm:$0xff]   ;;  %v9236_v41 = vld [vmem:[%s10737_s25 + $0x4e0] ss:$16 sps:$4 sm:$0xff]  }
  0x49   : > { %v9241_v40 = vld [vmem:[%s10737_s25 + $0x6e4] ss:$16 sps:$4 sm:$0xff]   ;;  %v9239_v42 = vld [vmem:[%s10737_s25 + $0x6e0] ss:$16 sps:$4 sm:$0xff]  }
  0x4a   : > { %6555 = vmatpush1.bf16.msra.mxu0 %v9170_v55  ;;  %v9244_v43 = vld [vmem:[%s10737_s25 + $0x504] ss:$16 sps:$4 sm:$0xff]   ;;  %v9242_v45 = vld [vmem:[%s10737_s25 + $0x500] ss:$16 sps:$4 sm:$0xff]  }
  0x4b   : > { %6596 = vmatpush1.bf16.msra.mxu1 %v9171_v56  ;;  %6556 = vmatprep.subr.bf16.mxu0 %v9172_v57  ;;  %v9247_v44 = vld [vmem:[%s10737_s25 + $0x704] ss:$16 sps:$4 sm:$0xff]   ;;  %v9245_v46 = vld [vmem:[%s10737_s25 + $0x700] ss:$16 sps:$4 sm:$0xff]  }
  0x4c   : > { %6597 = vmatprep.subr.bf16.mxu1 %v9174_v58  ;;  %v9250_v47 = vld [vmem:[%s10737_s25 + $0x524] ss:$16 sps:$4 sm:$0xff]   ;;  %v9248_v50 = vld [vmem:[%s10737_s25 + $0x520] ss:$16 sps:$4 sm:$0xff]  }
  0x4d   : > { %v9253_v49 = vld [vmem:[%s10737_s25 + $0x724] ss:$16 sps:$4 sm:$0xff]   ;;  %v9251_v51 = vld [vmem:[%s10737_s25 + $0x720] ss:$16 sps:$4 sm:$0xff]  }
  0x4e   : > { %6557 = vmatpush1.bf16.msra.mxu0 %v9176_v59  ;;  %v9256_v53 = vld [vmem:[%s10737_s25 + $0x544] ss:$16 sps:$4 sm:$0xff]   ;;  %v9254_v55 = vld [vmem:[%s10737_s25 + $0x540] ss:$16 sps:$4 sm:$0xff]  }
  0x4f   : > { %6598 = vmatpush1.bf16.msra.mxu1 %v9177_v60  ;;  %6558 = vmatprep.subr.bf16.mxu0 %v9178_v61  ;;  %v9259_v54 = vld [vmem:[%s10737_s25 + $0x744] ss:$16 sps:$4 sm:$0xff]   ;;  %v9257_v56 = vld [vmem:[%s10737_s25 + $0x740] ss:$16 sps:$4 sm:$0xff]  }
  0x50   : > { %6599 = vmatprep.subr.bf16.mxu1 %v9180_v62  ;;  %v9262_v57 = vld [vmem:[%s10737_s25 + $0x564] ss:$16 sps:$4 sm:$0xff]   ;;  %v9260_v59 = vld [vmem:[%s10737_s25 + $0x560] ss:$16 sps:$4 sm:$0xff]  }
  0x51   : > { %v9265_v58 = vld [vmem:[%s10737_s25 + $0x764] ss:$16 sps:$4 sm:$0xff]   ;;  %v9263_v60 = vld [vmem:[%s10737_s25 + $0x760] ss:$16 sps:$4 sm:$0xff]  }
  0x52   : > { %6559 = vmatpush1.bf16.msra.mxu0 %v9182_v63  ;;  %v9268_v61 = vld [vmem:[%s10737_s25 + $0x584] ss:$16 sps:$4 sm:$0xff]   ;;  %v9266_v63 = vld [vmem:[%s10737_s25 + $0x580] ss:$16 sps:$4 sm:$0xff]  }
  0x53   : > { %6600 = vmatpush1.bf16.msra.mxu1 %v9183_v0  ;;  %6560 = vmatprep.subr.bf16.mxu0 %v9184_v1  ;;  %v9271_v62 = vld [vmem:[%s10737_s25 + $0x784] ss:$16 sps:$4 sm:$0xff]   ;;  %v9269_v0 = vld [vmem:[%s10737_s25 + $0x780] ss:$16 sps:$4 sm:$0xff]  }
  0x54   : > { %6601 = vmatprep.subr.bf16.mxu1 %v9186_v2  ;;  %v9274_v1 = vld [vmem:[%s10737_s25 + $0x5a4] ss:$16 sps:$4 sm:$0xff]  }
  0x55   : > { %v9277_v2 = vld [vmem:[%s10737_s25 + $0x7a4] ss:$16 sps:$4 sm:$0xff]  }
  0x56   : > { %6561 = vmatpush1.bf16.msra.mxu0 %v9188_v3  ;;  %v9272_v3 = vld [vmem:[%s10737_s25 + $0x5a0] ss:$16 sps:$4 sm:$0xff]  }
  0x57   : > { %6602 = vmatpush1.bf16.msra.mxu1 %v9189_v4  ;;  %6612 = vmatprep.subr.bf16.mxu0 %v9196_v5  ;;  %v9275_v4 = vld [vmem:[%s10737_s25 + $0x7a0] ss:$16 sps:$4 sm:$0xff]   ;;  %v9280_v5 = vld [vmem:[%s10737_s25 + $0x5c4] ss:$16 sps:$4 sm:$0xff]  }
  0x58   : > { %6653 = vmatprep.subr.bf16.mxu1 %v9199_v6  ;;  %v9283_v6 = vld [vmem:[%s10737_s25 + $0x7c4] ss:$16 sps:$4 sm:$0xff]  }
  0x59   : > { %6563 = vmatmul.mubr.bf16.vlgmr.msra.gmra.mrb[0].mxu0 %v10826_v7 }
  0x5a   : > { %6604 = vmatmul.mubr.bf16.vlgmr.msra.gmra.mrb[0].mxu1 %v10828_v8  ;;  %6613 = vmatpush1.bf16.msra.mxu0 %v9194_v9  ;;  %v9278_v9 = vld [vmem:[%s10737_s25 + $0x5c0] ss:$16 sps:$4 sm:$0xff]  }
  0x5b   : > { %6654 = vmatpush1.bf16.msra.mxu1 %v9197_v10  ;;  %6614 = vmatprep.subr.bf16.mxu0 %v9202_v11  ;;  %v9281_v10 = vld [vmem:[%s10737_s25 + $0x7c0] ss:$16 sps:$4 sm:$0xff]   ;;  %v9286_v11 = vld [vmem:[%s10737_s25 + $0x5e4] ss:$16 sps:$4 sm:$0xff]  }
  0x5c   : > { %6655 = vmatprep.subr.bf16.mxu1 %v9205_v12  ;;  %6644 = vmatprep.mubr.bf16.mxu0 %v10866_v37  ;;  %v9289_v12 = vld [vmem:[%s10737_s25 + $0x7e4] ss:$16 sps:$4 sm:$0xff]  }
  0x5d   : > { %6685 = vmatprep.mubr.bf16.mxu1 %v10870_v38 }
  0x5e   : > { %6615 = vmatpush1.bf16.msra.mxu0 %v9200_v13  ;;  %v9284_v13 = vld [vmem:[%s10737_s25 + $0x5e0] ss:$16 sps:$4 sm:$0xff]  }
  0x5f   : > { %6656 = vmatpush1.bf16.msra.mxu1 %v9203_v14  ;;  %6616 = vmatprep.subr.bf16.mxu0 %v9208_v15  ;;  %v9287_v14 = vld [vmem:[%s10737_s25 + $0x7e0] ss:$16 sps:$4 sm:$0xff]   ;;  %v9296_v15 = vld [vmem:[%s10737_s25 + $0x804] ss:$16 sps:$4 sm:$0xff]  }
  0x60   : > { %6657 = vmatprep.subr.bf16.mxu1 %v9211_v16  ;;  %v9299_v16 = vld [vmem:[%s10737_s25 + $0xa04] ss:$16 sps:$4 sm:$0xff]  }
  0x62   : > { %6617 = vmatpush1.bf16.msra.mxu0 %v9206_v17  ;;  %v10914_v17 = vcombine.low %v10857_v33, %v10857_v33  ;;  %v9314_v33 = vld [vmem:[%s10737_s25 + $0x864] ss:$16 sps:$4 sm:$0xff]  }
  0x63   : > { %6658 = vmatpush1.bf16.msra.mxu1 %v9209_v18  ;;  %6618 = vmatprep.subr.bf16.mxu0 %v9214_v19  ;;  %v10918_v18 = vcombine.low %v10860_v34, %v10860_v34  ;;  %v9294_v19 = vld [vmem:[%s10737_s25 + $0x800] ss:$16 sps:$4 sm:$0xff]   ;;  %v9317_v34 = vld [vmem:[%s10737_s25 + $0xa64] ss:$16 sps:$4 sm:$0xff]  }
  0x64   : > { %6659 = vmatprep.subr.bf16.mxu1 %v9217_v20  ;;  %v9297_v20 = vld [vmem:[%s10737_s25 + $0xa00] ss:$16 sps:$4 sm:$0xff]  }
  0x66   : > { %6619 = vmatpush1.bf16.msra.mxu0 %v9212_v21  ;;  %v9302_v21 = vld [vmem:[%s10737_s25 + $0x824] ss:$16 sps:$4 sm:$0xff]  }
  0x67   : > { %6660 = vmatpush1.bf16.msra.mxu1 %v9215_v22  ;;  %6620 = vmatprep.subr.bf16.mxu0 %v9220_v23  ;;  %v9305_v22 = vld [vmem:[%s10737_s25 + $0xa24] ss:$16 sps:$4 sm:$0xff]  }
  0x68   : > { %6661 = vmatprep.subr.bf16.mxu1 %v9223_v24  ;;  %v10925_v23 = vld [vmem:[%s10732_s21 + $0x20] sm:$0xff]  ;;  %v10928_v24 = vld [vmem:[%s10732_s21 + $0x28] sm:$0xff] }
  0x6a   : > { %6621 = vmatpush1.bf16.msra.mxu0 %v9218_v25  ;;  %v10932_v25 = vcombine.high %v10925_v23, %v10925_v23 }
  0x6b   : > { %6662 = vmatpush1.bf16.msra.mxu1 %v9221_v26  ;;  %6622 = vmatprep.subr.bf16.mxu0 %v9226_v27  ;;  %v10936_v26 = vcombine.high %v10928_v24, %v10928_v24  ;;  %v9300_v27 = vld [vmem:[%s10737_s25 + $0x820] ss:$16 sps:$4 sm:$0xff]  }
  0x6c   : > { %6663 = vmatprep.subr.bf16.mxu1 %v9229_v28  ;;  %v9303_v28 = vld [vmem:[%s10737_s25 + $0xa20] ss:$16 sps:$4 sm:$0xff]  }
  0x6e   : > { %6623 = vmatpush1.bf16.msra.mxu0 %v9224_v29  ;;  %v9308_v29 = vld [vmem:[%s10737_s25 + $0x844] ss:$16 sps:$4 sm:$0xff]  }
  0x6f   : > { %6664 = vmatpush1.bf16.msra.mxu1 %v9227_v30  ;;  %6624 = vmatprep.subr.bf16.mxu0 %v9232_v31  ;;  %v9311_v30 = vld [vmem:[%s10737_s25 + $0xa44] ss:$16 sps:$4 sm:$0xff]   ;;  %v9306_v31 = vld [vmem:[%s10737_s25 + $0x840] ss:$16 sps:$4 sm:$0xff]  }
  0x70   : > { %6665 = vmatprep.subr.bf16.mxu1 %v9235_v32  ;;  %v9309_v32 = vld [vmem:[%s10737_s25 + $0xa40] ss:$16 sps:$4 sm:$0xff]  }
  0x72   : > { %6625 = vmatpush1.bf16.msra.mxu0 %v9230_v35  ;;  %v9312_v35 = vld [vmem:[%s10737_s25 + $0x860] ss:$16 sps:$4 sm:$0xff]  }
  0x73   : > { %6666 = vmatpush1.bf16.msra.mxu1 %v9233_v36  ;;  %6626 = vmatprep.subr.bf16.mxu0 %v9238_v39  ;;  %v9315_v36 = vld [vmem:[%s10737_s25 + $0xa60] ss:$16 sps:$4 sm:$0xff]   ;;  %v9320_v39 = vld [vmem:[%s10737_s25 + $0x884] ss:$16 sps:$4 sm:$0xff]  }
  0x74   : > { %6667 = vmatprep.subr.bf16.mxu1 %v9241_v40  ;;  %v9323_v40 = vld [vmem:[%s10737_s25 + $0xa84] ss:$16 sps:$4 sm:$0xff]  }
  0x76   : > { %6627 = vmatpush1.bf16.msra.mxu0 %v9236_v41  ;;  %v9318_v41 = vld [vmem:[%s10737_s25 + $0x880] ss:$16 sps:$4 sm:$0xff]  }
  0x77   : > { %6668 = vmatpush1.bf16.msra.mxu1 %v9239_v42  ;;  %6628 = vmatprep.subr.bf16.mxu0 %v9244_v43  ;;  %v9321_v42 = vld [vmem:[%s10737_s25 + $0xa80] ss:$16 sps:$4 sm:$0xff]   ;;  %v9326_v43 = vld [vmem:[%s10737_s25 + $0x8a4] ss:$16 sps:$4 sm:$0xff]  }
  0x78   : > { %6669 = vmatprep.subr.bf16.mxu1 %v9247_v44  ;;  %v9329_v44 = vld [vmem:[%s10737_s25 + $0xaa4] ss:$16 sps:$4 sm:$0xff]  }
  0x7a   : > { %6629 = vmatpush1.bf16.msra.mxu0 %v9242_v45  ;;  %v9324_v45 = vld [vmem:[%s10737_s25 + $0x8a0] ss:$16 sps:$4 sm:$0xff]  }
  0x7b   : > { %6670 = vmatpush1.bf16.msra.mxu1 %v9245_v46  ;;  %6630 = vmatprep.subr.bf16.mxu0 %v9250_v47  ;;  %v9327_v46 = vld [vmem:[%s10737_s25 + $0xaa0] ss:$16 sps:$4 sm:$0xff]   ;;  %v9332_v47 = vld [vmem:[%s10737_s25 + $0x8c4] ss:$16 sps:$4 sm:$0xff]  }
  0x7c   : > { %6671 = vmatprep.subr.bf16.mxu1 %v9253_v49  ;;  %v9335_v49 = vld [vmem:[%s10737_s25 + $0xac4] ss:$16 sps:$4 sm:$0xff]  }
  0x7e   : > { %6631 = vmatpush1.bf16.msra.mxu0 %v9248_v50  ;;  %v9330_v50 = vld [vmem:[%s10737_s25 + $0x8c0] ss:$16 sps:$4 sm:$0xff]  }
  0x7f   : > { %6672 = vmatpush1.bf16.msra.mxu1 %v9251_v51  ;;  %6632 = vmatprep.subr.bf16.mxu0 %v9256_v53  ;;  %v9333_v51 = vld [vmem:[%s10737_s25 + $0xac0] ss:$16 sps:$4 sm:$0xff]   ;;  %v9338_v53 = vld [vmem:[%s10737_s25 + $0x8e4] ss:$16 sps:$4 sm:$0xff]  }
  0x80   : > { %6673 = vmatprep.subr.bf16.mxu1 %v9259_v54  ;;  %v9341_v54 = vld [vmem:[%s10737_s25 + $0xae4] ss:$16 sps:$4 sm:$0xff]  }
  0x82   : > { %6633 = vmatpush1.bf16.msra.mxu0 %v9254_v55  ;;  %v9336_v55 = vld [vmem:[%s10737_s25 + $0x8e0] ss:$16 sps:$4 sm:$0xff]  }
  0x83   : > { %6674 = vmatpush1.bf16.msra.mxu1 %v9257_v56  ;;  %6634 = vmatprep.subr.bf16.mxu0 %v9262_v57  ;;  %v9339_v56 = vld [vmem:[%s10737_s25 + $0xae0] ss:$16 sps:$4 sm:$0xff]   ;;  %v9344_v57 = vld [vmem:[%s10737_s25 + $0x904] ss:$16 sps:$4 sm:$0xff]  }
  0x84   : > { %6675 = vmatprep.subr.bf16.mxu1 %v9265_v58  ;;  %v9347_v58 = vld [vmem:[%s10737_s25 + $0xb04] ss:$16 sps:$4 sm:$0xff]  }
  0x86   : > { %6635 = vmatpush1.bf16.msra.mxu0 %v9260_v59  ;;  %v9342_v59 = vld [vmem:[%s10737_s25 + $0x900] ss:$16 sps:$4 sm:$0xff]  }
  0x87   : > { %6676 = vmatpush1.bf16.msra.mxu1 %v9263_v60  ;;  %6636 = vmatprep.subr.bf16.mxu0 %v9268_v61  ;;  %v9345_v60 = vld [vmem:[%s10737_s25 + $0xb00] ss:$16 sps:$4 sm:$0xff]   ;;  %v9350_v61 = vld [vmem:[%s10737_s25 + $0x924] ss:$16 sps:$4 sm:$0xff]  }
  0x88   : > { %6677 = vmatprep.subr.bf16.mxu1 %v9271_v62  ;;  %v9353_v62 = vld [vmem:[%s10737_s25 + $0xb24] ss:$16 sps:$4 sm:$0xff]  }
  0x8a   : > { %6637 = vmatpush1.bf16.msra.mxu0 %v9266_v63  ;;  %v9348_v63 = vld [vmem:[%s10737_s25 + $0x920] ss:$16 sps:$4 sm:$0xff]  }
  0x8b   : > { %6678 = vmatpush1.bf16.msra.mxu1 %v9269_v0  ;;  %6638 = vmatprep.subr.bf16.mxu0 %v9274_v1  ;;  %v9351_v0 = vld [vmem:[%s10737_s25 + $0xb20] ss:$16 sps:$4 sm:$0xff]   ;;  %v9356_v1 = vld [vmem:[%s10737_s25 + $0x944] ss:$16 sps:$4 sm:$0xff]  }
  0x8c   : > { %6679 = vmatprep.subr.bf16.mxu1 %v9277_v2  ;;  %v9359_v2 = vld [vmem:[%s10737_s25 + $0xb44] ss:$16 sps:$4 sm:$0xff]  }
  0x8e   : > { %6639 = vmatpush1.bf16.msra.mxu0 %v9272_v3  ;;  %v9354_v3 = vld [vmem:[%s10737_s25 + $0x940] ss:$16 sps:$4 sm:$0xff]  }
  0x8f   : > { %6680 = vmatpush1.bf16.msra.mxu1 %v9275_v4  ;;  %6640 = vmatprep.subr.bf16.mxu0 %v9280_v5  ;;  %v9357_v4 = vld [vmem:[%s10737_s25 + $0xb40] ss:$16 sps:$4 sm:$0xff]   ;;  %v9362_v5 = vld [vmem:[%s10737_s25 + $0x964] ss:$16 sps:$4 sm:$0xff]  }
  0x90   : > { %6681 = vmatprep.subr.bf16.mxu1 %v9283_v6  ;;  %v9365_v6 = vld [vmem:[%s10737_s25 + $0xb64] ss:$16 sps:$4 sm:$0xff]  }
  0x92   : > { %6641 = vmatpush1.bf16.msra.mxu0 %v9278_v9  ;;  %v9360_v9 = vld [vmem:[%s10737_s25 + $0x960] ss:$16 sps:$4 sm:$0xff]  }
  0x93   : > { %6682 = vmatpush1.bf16.msra.mxu1 %v9281_v10  ;;  %6642 = vmatprep.subr.bf16.mxu0 %v9286_v11  ;;  %v9363_v10 = vld [vmem:[%s10737_s25 + $0xb60] ss:$16 sps:$4 sm:$0xff]   ;;  %v9368_v11 = vld [vmem:[%s10737_s25 + $0x984] ss:$16 sps:$4 sm:$0xff]  }
  0x94   : > { %6683 = vmatprep.subr.bf16.mxu1 %v9289_v12  ;;  %v9371_v12 = vld [vmem:[%s10737_s25 + $0xb84] ss:$16 sps:$4 sm:$0xff]  }
  0x96   : > { %6643 = vmatpush1.bf16.msra.mxu0 %v9284_v13  ;;  %v9366_v13 = vld [vmem:[%s10737_s25 + $0x980] ss:$16 sps:$4 sm:$0xff]  }
  0x97   : > { %6684 = vmatpush1.bf16.msra.mxu1 %v9287_v14  ;;  %6694 = vmatprep.subr.bf16.mxu0 %v9296_v15  ;;  %v9369_v14 = vld [vmem:[%s10737_s25 + $0xb80] ss:$16 sps:$4 sm:$0xff]   ;;  %v9374_v15 = vld [vmem:[%s10737_s25 + $0x9a4] ss:$16 sps:$4 sm:$0xff]  }
  0x98   : > { %6735 = vmatprep.subr.bf16.mxu1 %v9299_v16  ;;  %v9377_v16 = vld [vmem:[%s10737_s25 + $0xba4] ss:$16 sps:$4 sm:$0xff]  }
  0x99   : > { %6645 = vmatmul.mubr.bf16.vlgmr.msra.gmra.mrb[4].mxu0 %v10914_v17 }
  0x9a   : > { %6686 = vmatmul.mubr.bf16.vlgmr.msra.gmra.mrb[4].mxu1 %v10918_v18  ;;  %6695 = vmatpush1.bf16.msra.mxu0 %v9294_v19  ;;  %v9372_v19 = vld [vmem:[%s10737_s25 + $0x9a0] ss:$16 sps:$4 sm:$0xff]  }
  0x9b   : > { %6736 = vmatpush1.bf16.msra.mxu1 %v9297_v20  ;;  %6696 = vmatprep.subr.bf16.mxu0 %v9302_v21  ;;  %v9375_v20 = vld [vmem:[%s10737_s25 + $0xba0] ss:$16 sps:$4 sm:$0xff]   ;;  %v9380_v21 = vld [vmem:[%s10737_s25 + $0x9c4] ss:$16 sps:$4 sm:$0xff]  }
  0x9c   : > { %6737 = vmatprep.subr.bf16.mxu1 %v9305_v22  ;;  %6726 = vmatprep.mubr.bf16.mxu0 %v10932_v25  ;;  %v9383_v22 = vld [vmem:[%s10737_s25 + $0xbc4] ss:$16 sps:$4 sm:$0xff]  }
  0x9d   : > { %6767 = vmatprep.mubr.bf16.mxu1 %v10936_v26 }
  0x9e   : > { %6697 = vmatpush1.bf16.msra.mxu0 %v9300_v27  ;;  %v9378_v27 = vld [vmem:[%s10737_s25 + $0x9c0] ss:$16 sps:$4 sm:$0xff]  }
  0x9f   : > { %6738 = vmatpush1.bf16.msra.mxu1 %v9303_v28  ;;  %6698 = vmatprep.subr.bf16.mxu0 %v9308_v29  ;;  %v9381_v28 = vld [vmem:[%s10737_s25 + $0xbc0] ss:$16 sps:$4 sm:$0xff]   ;;  %v9386_v29 = vld [vmem:[%s10737_s25 + $0x9e4] ss:$16 sps:$4 sm:$0xff]  }
  0xa0   : > { %6739 = vmatprep.subr.bf16.mxu1 %v9311_v30  ;;  %v9389_v30 = vld [vmem:[%s10737_s25 + $0xbe4] ss:$16 sps:$4 sm:$0xff]  }
  0xa2   : > { %6699 = vmatpush1.bf16.msra.mxu0 %v9306_v31  ;;  %v9384_v31 = vld [vmem:[%s10737_s25 + $0x9e0] ss:$16 sps:$4 sm:$0xff]  }
  0xa3   : > { %6740 = vmatpush1.bf16.msra.mxu1 %v9309_v32  ;;  %6700 = vmatprep.subr.bf16.mxu0 %v9314_v33  ;;  %v9387_v32 = vld [vmem:[%s10737_s25 + $0xbe0] ss:$16 sps:$4 sm:$0xff]   ;;  %v9396_v33 = vld [vmem:[%s10737_s25 + $0xc04] ss:$16 sps:$4 sm:$0xff]  }
  0xa4   : > { %6741 = vmatprep.subr.bf16.mxu1 %v9317_v34  ;;  %v9399_v34 = vld [vmem:[%s10737_s25 + $0xe04] ss:$16 sps:$4 sm:$0xff]  }
  0xa6   : > { %6701 = vmatpush1.bf16.msra.mxu0 %v9312_v35  ;;  %v9394_v35 = vld [vmem:[%s10737_s25 + $0xc00] ss:$16 sps:$4 sm:$0xff]  }
  0xa7   : > { %6742 = vmatpush1.bf16.msra.mxu1 %v9315_v36  ;;  %6702 = vmatprep.subr.bf16.mxu0 %v9320_v39  ;;  %v9397_v36 = vld [vmem:[%s10737_s25 + $0xe00] ss:$16 sps:$4 sm:$0xff]   ;;  %v11006_v39 = vcombine.low %v10925_v23, %v10925_v23 }
  0xa8   : > { %6743 = vmatprep.subr.bf16.mxu1 %v9323_v40  ;;  %v11010_v40 = vcombine.low %v10928_v24, %v10928_v24 }
  0xaa   : > { %6703 = vmatpush1.bf16.msra.mxu0 %v9318_v41  ;;  %v11013_v41 = vld [vmem:[%s10732_s21 + $0x30] sm:$0xff] }
  0xab   : > { %6744 = vmatpush1.bf16.msra.mxu1 %v9321_v42  ;;  %6704 = vmatprep.subr.bf16.mxu0 %v9326_v43  ;;  %v11016_v42 = vld [vmem:[%s10732_s21 + $0x38] sm:$0xff]  ;;  %v9402_v43 = vld [vmem:[%s10737_s25 + $0xc24] ss:$16 sps:$4 sm:$0xff]   ;;  %v11022_v23 = vcombine.high %v11013_v41, %v11013_v41 }
  0xac   : > { %6745 = vmatprep.subr.bf16.mxu1 %v9329_v44  ;;  %v9405_v44 = vld [vmem:[%s10737_s25 + $0xe24] ss:$16 sps:$4 sm:$0xff]   ;;  %v11026_v24 = vcombine.high %v11016_v42, %v11016_v42 }
  0xae   : > { %6705 = vmatpush1.bf16.msra.mxu0 %v9324_v45  ;;  %v9400_v45 = vld [vmem:[%s10737_s25 + $0xc20] ss:$16 sps:$4 sm:$0xff]  }
  0xaf   : > { %6746 = vmatpush1.bf16.msra.mxu1 %v9327_v46  ;;  %6706 = vmatprep.subr.bf16.mxu0 %v9332_v47  ;;  %v9403_v46 = vld [vmem:[%s10737_s25 + $0xe20] ss:$16 sps:$4 sm:$0xff]   ;;  %v9408_v47 = vld [vmem:[%s10737_s25 + $0xc44] ss:$16 sps:$4 sm:$0xff]  }
  0xb0   : > { %6747 = vmatprep.subr.bf16.mxu1 %v9335_v49  ;;  %v9411_v49 = vld [vmem:[%s10737_s25 + $0xe44] ss:$16 sps:$4 sm:$0xff]  }
  0xb2   : > { %6707 = vmatpush1.bf16.msra.mxu0 %v9330_v50  ;;  %v9406_v50 = vld [vmem:[%s10737_s25 + $0xc40] ss:$16 sps:$4 sm:$0xff]  }
  0xb3   : > { %6748 = vmatpush1.bf16.msra.mxu1 %v9333_v51  ;;  %6708 = vmatprep.subr.bf16.mxu0 %v9338_v53  ;;  %v9409_v51 = vld [vmem:[%s10737_s25 + $0xe40] ss:$16 sps:$4 sm:$0xff]   ;;  %v9414_v53 = vld [vmem:[%s10737_s25 + $0xc64] ss:$16 sps:$4 sm:$0xff]  }
  0xb4   : > { %6749 = vmatprep.subr.bf16.mxu1 %v9341_v54  ;;  %v9417_v54 = vld [vmem:[%s10737_s25 + $0xe64] ss:$16 sps:$4 sm:$0xff]  }
  0xb6   : > { %6709 = vmatpush1.bf16.msra.mxu0 %v9336_v55  ;;  %v9412_v55 = vld [vmem:[%s10737_s25 + $0xc60] ss:$16 sps:$4 sm:$0xff]  }
  0xb7   : > { %6750 = vmatpush1.bf16.msra.mxu1 %v9339_v56  ;;  %6710 = vmatprep.subr.bf16.mxu0 %v9344_v57  ;;  %v9415_v56 = vld [vmem:[%s10737_s25 + $0xe60] ss:$16 sps:$4 sm:$0xff]   ;;  %v9420_v57 = vld [vmem:[%s10737_s25 + $0xc84] ss:$16 sps:$4 sm:$0xff]  }
  0xb8   : > { %6751 = vmatprep.subr.bf16.mxu1 %v9347_v58  ;;  %v9423_v58 = vld [vmem:[%s10737_s25 + $0xe84] ss:$16 sps:$4 sm:$0xff]  }
  0xba   : > { %6711 = vmatpush1.bf16.msra.mxu0 %v9342_v59  ;;  %v9418_v59 = vld [vmem:[%s10737_s25 + $0xc80] ss:$16 sps:$4 sm:$0xff]  }
  0xbb   : > { %6752 = vmatpush1.bf16.msra.mxu1 %v9345_v60  ;;  %6712 = vmatprep.subr.bf16.mxu0 %v9350_v61  ;;  %v9421_v60 = vld [vmem:[%s10737_s25 + $0xe80] ss:$16 sps:$4 sm:$0xff]   ;;  %v9426_v61 = vld [vmem:[%s10737_s25 + $0xca4] ss:$16 sps:$4 sm:$0xff]  }
  0xbc   : > { %6753 = vmatprep.subr.bf16.mxu1 %v9353_v62  ;;  %v9429_v62 = vld [vmem:[%s10737_s25 + $0xea4] ss:$16 sps:$4 sm:$0xff]  }
  0xbe   : > { %6713 = vmatpush1.bf16.msra.mxu0 %v9348_v63  ;;  %v9424_v63 = vld [vmem:[%s10737_s25 + $0xca0] ss:$16 sps:$4 sm:$0xff]  }
  0xbf   : > { %6754 = vmatpush1.bf16.msra.mxu1 %v9351_v0  ;;  %6714 = vmatprep.subr.bf16.mxu0 %v9356_v1  ;;  %v9427_v0 = vld [vmem:[%s10737_s25 + $0xea0] ss:$16 sps:$4 sm:$0xff]   ;;  %v9432_v1 = vld [vmem:[%s10737_s25 + $0xcc4] ss:$16 sps:$4 sm:$0xff]  }
  0xc0   : > { %6755 = vmatprep.subr.bf16.mxu1 %v9359_v2  ;;  %v9435_v2 = vld [vmem:[%s10737_s25 + $0xec4] ss:$16 sps:$4 sm:$0xff]  }
  0xc2   : > { %6715 = vmatpush1.bf16.msra.mxu0 %v9354_v3  ;;  %v9430_v3 = vld [vmem:[%s10737_s25 + $0xcc0] ss:$16 sps:$4 sm:$0xff]  }
  0xc3   : > { %6756 = vmatpush1.bf16.msra.mxu1 %v9357_v4  ;;  %6716 = vmatprep.subr.bf16.mxu0 %v9362_v5  ;;  %v9433_v4 = vld [vmem:[%s10737_s25 + $0xec0] ss:$16 sps:$4 sm:$0xff]   ;;  %v9438_v5 = vld [vmem:[%s10737_s25 + $0xce4] ss:$16 sps:$4 sm:$0xff]  }
  0xc4   : > { %6757 = vmatprep.subr.bf16.mxu1 %v9365_v6  ;;  %v9441_v6 = vld [vmem:[%s10737_s25 + $0xee4] ss:$16 sps:$4 sm:$0xff]  }
  0xc6   : > { %6717 = vmatpush1.bf16.msra.mxu0 %v9360_v9  ;;  %v9436_v9 = vld [vmem:[%s10737_s25 + $0xce0] ss:$16 sps:$4 sm:$0xff]  }
  0xc7   : > { %6758 = vmatpush1.bf16.msra.mxu1 %v9363_v10  ;;  %6718 = vmatprep.subr.bf16.mxu0 %v9368_v11  ;;  %v9439_v10 = vld [vmem:[%s10737_s25 + $0xee0] ss:$16 sps:$4 sm:$0xff]   ;;  %v9444_v11 = vld [vmem:[%s10737_s25 + $0xd04] ss:$16 sps:$4 sm:$0xff]  }
  0xc8   : > { %6759 = vmatprep.subr.bf16.mxu1 %v9371_v12  ;;  %v9447_v12 = vld [vmem:[%s10737_s25 + $0xf04] ss:$16 sps:$4 sm:$0xff]  }
  0xca   : > { %6719 = vmatpush1.bf16.msra.mxu0 %v9366_v13  ;;  %v9442_v13 = vld [vmem:[%s10737_s25 + $0xd00] ss:$16 sps:$4 sm:$0xff]  }
  0xcb   : > { %6760 = vmatpush1.bf16.msra.mxu1 %v9369_v14  ;;  %6720 = vmatprep.subr.bf16.mxu0 %v9374_v15  ;;  %v9445_v14 = vld [vmem:[%s10737_s25 + $0xf00] ss:$16 sps:$4 sm:$0xff]   ;;  %v9450_v15 = vld [vmem:[%s10737_s25 + $0xd24] ss:$16 sps:$4 sm:$0xff]  }
  0xcc   : > { %6761 = vmatprep.subr.bf16.mxu1 %v9377_v16  ;;  %v9453_v16 = vld [vmem:[%s10737_s25 + $0xf24] ss:$16 sps:$4 sm:$0xff]  }
  0xce   : > { %6721 = vmatpush1.bf16.msra.mxu0 %v9372_v19  ;;  %v9448_v19 = vld [vmem:[%s10737_s25 + $0xd20] ss:$16 sps:$4 sm:$0xff]  }
  0xcf   : > { %6762 = vmatpush1.bf16.msra.mxu1 %v9375_v20  ;;  %6722 = vmatprep.subr.bf16.mxu0 %v9380_v21  ;;  %v9451_v20 = vld [vmem:[%s10737_s25 + $0xf20] ss:$16 sps:$4 sm:$0xff]   ;;  %v9456_v21 = vld [vmem:[%s10737_s25 + $0xd44] ss:$16 sps:$4 sm:$0xff]  }
  0xd0   : > { %6763 = vmatprep.subr.bf16.mxu1 %v9383_v22  ;;  %v9459_v22 = vld [vmem:[%s10737_s25 + $0xf44] ss:$16 sps:$4 sm:$0xff]  }
  0xd2   : > { %6723 = vmatpush1.bf16.msra.mxu0 %v9378_v27  ;;  %v9454_v27 = vld [vmem:[%s10737_s25 + $0xd40] ss:$16 sps:$4 sm:$0xff]  }
  0xd3   : > { %6764 = vmatpush1.bf16.msra.mxu1 %v9381_v28  ;;  %6724 = vmatprep.subr.bf16.mxu0 %v9386_v29  ;;  %v9457_v28 = vld [vmem:[%s10737_s25 + $0xf40] ss:$16 sps:$4 sm:$0xff]   ;;  %v9462_v29 = vld [vmem:[%s10737_s25 + $0xd64] ss:$16 sps:$4 sm:$0xff]  }
  0xd4   : > { %6765 = vmatprep.subr.bf16.mxu1 %v9389_v30  ;;  %v9465_v30 = vld [vmem:[%s10737_s25 + $0xf64] ss:$16 sps:$4 sm:$0xff]  }
  0xd6   : > { %6725 = vmatpush1.bf16.msra.mxu0 %v9384_v31  ;;  %v9460_v31 = vld [vmem:[%s10737_s25 + $0xd60] ss:$16 sps:$4 sm:$0xff]  }
  0xd7   : > { %6766 = vmatpush1.bf16.msra.mxu1 %v9387_v32  ;;  %6776 = vmatprep.subr.bf16.mxu0 %v9396_v33  ;;  %v9463_v32 = vld [vmem:[%s10737_s25 + $0xf60] ss:$16 sps:$4 sm:$0xff]   ;;  %v9468_v33 = vld [vmem:[%s10737_s25 + $0xd84] ss:$16 sps:$4 sm:$0xff]  }
  0xd8   : > { %6817 = vmatprep.subr.bf16.mxu1 %v9399_v34  ;;  %v9471_v34 = vld [vmem:[%s10737_s25 + $0xf84] ss:$16 sps:$4 sm:$0xff]  }
  0xd9   : > { %6727 = vmatmul.mubr.bf16.vlgmr.msra.gmra.mrb[8].mxu0 %v11006_v39 }
  0xda   : > { %6768 = vmatmul.mubr.bf16.vlgmr.msra.gmra.mrb[8].mxu1 %v11010_v40  ;;  %6777 = vmatpush1.bf16.msra.mxu0 %v9394_v35  ;;  %v9466_v35 = vld [vmem:[%s10737_s25 + $0xd80] ss:$16 sps:$4 sm:$0xff]  }
  0xdb   : > { %6818 = vmatpush1.bf16.msra.mxu1 %v9397_v36  ;;  %6778 = vmatprep.subr.bf16.mxu0 %v9402_v43  ;;  %v9469_v36 = vld [vmem:[%s10737_s25 + $0xf80] ss:$16 sps:$4 sm:$0xff]   ;;  %v9474_v43 = vld [vmem:[%s10737_s25 + $0xda4] ss:$16 sps:$4 sm:$0xff]  }
  0xdc   : > { %6819 = vmatprep.subr.bf16.mxu1 %v9405_v44  ;;  %6808 = vmatprep.mubr.bf16.mxu0 %v11022_v23  ;;  %v9477_v44 = vld [vmem:[%s10737_s25 + $0xfa4] ss:$16 sps:$4 sm:$0xff]  }
  0xdd   : > { %6849 = vmatprep.mubr.bf16.mxu1 %v11026_v24 }
  0xde   : > { %6779 = vmatpush1.bf16.msra.mxu0 %v9400_v45  ;;  %v9472_v45 = vld [vmem:[%s10737_s25 + $0xda0] ss:$16 sps:$4 sm:$0xff]  }
  0xdf   : > { %6820 = vmatpush1.bf16.msra.mxu1 %v9403_v46  ;;  %6780 = vmatprep.subr.bf16.mxu0 %v9408_v47  ;;  %v9475_v46 = vld [vmem:[%s10737_s25 + $0xfa0] ss:$16 sps:$4 sm:$0xff]   ;;  %v9480_v47 = vld [vmem:[%s10737_s25 + $0xdc4] ss:$16 sps:$4 sm:$0xff]  }
  0xe0   : > { %6821 = vmatprep.subr.bf16.mxu1 %v9411_v49  ;;  %v9483_v49 = vld [vmem:[%s10737_s25 + $0xfc4] ss:$16 sps:$4 sm:$0xff]  }
  0xe2   : > { %6781 = vmatpush1.bf16.msra.mxu0 %v9406_v50  ;;  %v9478_v50 = vld [vmem:[%s10737_s25 + $0xdc0] ss:$16 sps:$4 sm:$0xff]  }
  0xe3   : > { %6822 = vmatpush1.bf16.msra.mxu1 %v9409_v51  ;;  %6782 = vmatprep.subr.bf16.mxu0 %v9414_v53  ;;  %v9481_v51 = vld [vmem:[%s10737_s25 + $0xfc0] ss:$16 sps:$4 sm:$0xff]   ;;  %v9486_v53 = vld [vmem:[%s10737_s25 + $0xde4] ss:$16 sps:$4 sm:$0xff]  }
  0xe4   : > { %6823 = vmatprep.subr.bf16.mxu1 %v9417_v54  ;;  %v9489_v54 = vld [vmem:[%s10737_s25 + $0xfe4] ss:$16 sps:$4 sm:$0xff]  }
  0xe6   : > { %6783 = vmatpush1.bf16.msra.mxu0 %v9412_v55  ;;  %v9484_v55 = vld [vmem:[%s10737_s25 + $0xde0] ss:$16 sps:$4 sm:$0xff]  }
  0xe7   : > { %6824 = vmatpush1.bf16.msra.mxu1 %v9415_v56  ;;  %6784 = vmatprep.subr.bf16.mxu0 %v9420_v57  ;;  %v9487_v56 = vld [vmem:[%s10737_s25 + $0xfe0] ss:$16 sps:$4 sm:$0xff]   ;;  %v9496_v57 = vld [vmem:[%s10737_s25 + $0x1004] ss:$16 sps:$4 sm:$0xff]  }
  0xe8   : > { %6825 = vmatprep.subr.bf16.mxu1 %v9423_v58  ;;  %v9499_v58 = vld [vmem:[%s10737_s25 + $0x1204] ss:$16 sps:$4 sm:$0xff]  }
  0xea   : > { %6785 = vmatpush1.bf16.msra.mxu0 %v9418_v59  ;;  %v11093_v59 = vld [vmem:[%s10732_s21 + $0x40] sm:$0xff] }
  0xeb   : > { %6826 = vmatpush1.bf16.msra.mxu1 %v9421_v60  ;;  %6786 = vmatprep.subr.bf16.mxu0 %v9426_v61  ;;  %v11097_v60 = vcombine.low %v11013_v41, %v11013_v41  ;;  %v11101_v61 = vcombine.low %v11016_v42, %v11016_v42  ;;  %v11112_v41 = vcombine.high %v11093_v59, %v11093_v59 }
  0xec   : > { %6827 = vmatprep.subr.bf16.mxu1 %v9429_v62  ;;  %v11104_v62 = vld [vmem:[%s10732_s21 + $0x48] sm:$0xff] }
  0xed   : > { %v11116_v42 = vcombine.high %v11104_v62, %v11104_v62 }
  0xee   : > { %6787 = vmatpush1.bf16.msra.mxu0 %v9424_v63  ;;  %v9494_v63 = vld [vmem:[%s10737_s25 + $0x1000] ss:$16 sps:$4 sm:$0xff]  }
  0xef   : > { %6828 = vmatpush1.bf16.msra.mxu1 %v9427_v0  ;;  %6788 = vmatprep.subr.bf16.mxu0 %v9432_v1  ;;  %v9497_v0 = vld [vmem:[%s10737_s25 + $0x1200] ss:$16 sps:$4 sm:$0xff]   ;;  %v9502_v1 = vld [vmem:[%s10737_s25 + $0x1024] ss:$16 sps:$4 sm:$0xff]  }
  0xf0   : > { %6829 = vmatprep.subr.bf16.mxu1 %v9435_v2  ;;  %v9505_v2 = vld [vmem:[%s10737_s25 + $0x1224] ss:$16 sps:$4 sm:$0xff]  }
  0xf2   : > { %6789 = vmatpush1.bf16.msra.mxu0 %v9430_v3  ;;  %v9500_v3 = vld [vmem:[%s10737_s25 + $0x1020] ss:$16 sps:$4 sm:$0xff]  }
  0xf3   : > { %6830 = vmatpush1.bf16.msra.mxu1 %v9433_v4  ;;  %6790 = vmatprep.subr.bf16.mxu0 %v9438_v5  ;;  %v9503_v4 = vld [vmem:[%s10737_s25 + $0x1220] ss:$16 sps:$4 sm:$0xff]   ;;  %v9508_v5 = vld [vmem:[%s10737_s25 + $0x1044] ss:$16 sps:$4 sm:$0xff]  }
  0xf4   : > { %6831 = vmatprep.subr.bf16.mxu1 %v9441_v6  ;;  %v9511_v6 = vld [vmem:[%s10737_s25 + $0x1244] ss:$16 sps:$4 sm:$0xff]  }
  0xf6   : > { %6791 = vmatpush1.bf16.msra.mxu0 %v9436_v9  ;;  %v9506_v9 = vld [vmem:[%s10737_s25 + $0x1040] ss:$16 sps:$4 sm:$0xff]  }
  0xf7   : > { %6832 = vmatpush1.bf16.msra.mxu1 %v9439_v10  ;;  %6792 = vmatprep.subr.bf16.mxu0 %v9444_v11  ;;  %v9509_v10 = vld [vmem:[%s10737_s25 + $0x1240] ss:$16 sps:$4 sm:$0xff]   ;;  %v9514_v11 = vld [vmem:[%s10737_s25 + $0x1064] ss:$16 sps:$4 sm:$0xff]  }
  0xf8   : > { %6833 = vmatprep.subr.bf16.mxu1 %v9447_v12  ;;  %v9517_v12 = vld [vmem:[%s10737_s25 + $0x1264] ss:$16 sps:$4 sm:$0xff]  }
  0xfa   : > { %6793 = vmatpush1.bf16.msra.mxu0 %v9442_v13  ;;  %v9512_v13 = vld [vmem:[%s10737_s25 + $0x1060] ss:$16 sps:$4 sm:$0xff]  }
  0xfb   : > { %6834 = vmatpush1.bf16.msra.mxu1 %v9445_v14  ;;  %6794 = vmatprep.subr.bf16.mxu0 %v9450_v15  ;;  %v9515_v14 = vld [vmem:[%s10737_s25 + $0x1260] ss:$16 sps:$4 sm:$0xff]   ;;  %v9520_v15 = vld [vmem:[%s10737_s25 + $0x1084] ss:$16 sps:$4 sm:$0xff]  }
  0xfc   : > { %6835 = vmatprep.subr.bf16.mxu1 %v9453_v16  ;;  %v9523_v16 = vld [vmem:[%s10737_s25 + $0x1284] ss:$16 sps:$4 sm:$0xff]  }
  0xfe   : > { %6795 = vmatpush1.bf16.msra.mxu0 %v9448_v19  ;;  %v9518_v19 = vld [vmem:[%s10737_s25 + $0x1080] ss:$16 sps:$4 sm:$0xff]  }
  0xff   : > { %6836 = vmatpush1.bf16.msra.mxu1 %v9451_v20  ;;  %6796 = vmatprep.subr.bf16.mxu0 %v9456_v21  ;;  %v9521_v20 = vld [vmem:[%s10737_s25 + $0x1280] ss:$16 sps:$4 sm:$0xff]   ;;  %v9526_v21 = vld [vmem:[%s10737_s25 + $0x10a4] ss:$16 sps:$4 sm:$0xff]  }
 0x100   : > { %6837 = vmatprep.subr.bf16.mxu1 %v9459_v22  ;;  %v9529_v22 = vld [vmem:[%s10737_s25 + $0x12a4] ss:$16 sps:$4 sm:$0xff]  }
 0x102   : > { %6797 = vmatpush1.bf16.msra.mxu0 %v9454_v27  ;;  %v9524_v27 = vld [vmem:[%s10737_s25 + $0x10a0] ss:$16 sps:$4 sm:$0xff]  }
 0x103   : > { %6838 = vmatpush1.bf16.msra.mxu1 %v9457_v28  ;;  %6798 = vmatprep.subr.bf16.mxu0 %v9462_v29  ;;  %v9527_v28 = vld [vmem:[%s10737_s25 + $0x12a0] ss:$16 sps:$4 sm:$0xff]   ;;  %v9532_v29 = vld [vmem:[%s10737_s25 + $0x10c4] ss:$16 sps:$4 sm:$0xff]  }
 0x104   : > { %6839 = vmatprep.subr.bf16.mxu1 %v9465_v30  ;;  %v9535_v30 = vld [vmem:[%s10737_s25 + $0x12c4] ss:$16 sps:$4 sm:$0xff]  }
 0x106   : > { %6799 = vmatpush1.bf16.msra.mxu0 %v9460_v31 }
 0x107   : > { %6840 = vmatpush1.bf16.msra.mxu1 %v9463_v32  ;;  %6800 = vmatprep.subr.bf16.mxu0 %v9468_v33  ;;  %v9530_v33 = vld [vmem:[%s10737_s25 + $0x10c0] ss:$16 sps:$4 sm:$0xff]  }
 0x108   : > { %6841 = vmatprep.subr.bf16.mxu1 %v9471_v34  ;;  %v9533_v34 = vld [vmem:[%s10737_s25 + $0x12c0] ss:$16 sps:$4 sm:$0xff]  }
 0x10a   : > { %6801 = vmatpush1.bf16.msra.mxu0 %v9466_v35 }
 0x10b   : > { %6842 = vmatpush1.bf16.msra.mxu1 %v9469_v36  ;;  %6802 = vmatprep.subr.bf16.mxu0 %v9474_v43 }
 0x10c   : > { %6843 = vmatprep.subr.bf16.mxu1 %v9477_v44 }
 0x10e   : > { %6803 = vmatpush1.bf16.msra.mxu0 %v9472_v45 }
 0x10f   : > { %6844 = vmatpush1.bf16.msra.mxu1 %v9475_v46  ;;  %6804 = vmatprep.subr.bf16.mxu0 %v9480_v47 }
 0x110   : > { %6845 = vmatprep.subr.bf16.mxu1 %v9483_v49 }
 0x112   : > { %6805 = vmatpush1.bf16.msra.mxu0 %v9478_v50  ;;  %v9538_v50 = vld [vmem:[%s10737_s25 + $0x10e4] ss:$16 sps:$4 sm:$0xff]  }
 0x113   : > { %6846 = vmatpush1.bf16.msra.mxu1 %v9481_v51  ;;  %6806 = vmatprep.subr.bf16.mxu0 %v9486_v53  ;;  %v9541_v51 = vld [vmem:[%s10737_s25 + $0x12e4] ss:$16 sps:$4 sm:$0xff]   ;;  %v9536_v53 = vld [vmem:[%s10737_s25 + $0x10e0] ss:$16 sps:$4 sm:$0xff]  }
 0x114   : > { %6847 = vmatprep.subr.bf16.mxu1 %v9489_v54  ;;  %v9539_v54 = vld [vmem:[%s10737_s25 + $0x12e0] ss:$16 sps:$4 sm:$0xff]  }
 0x116   : > { %6807 = vmatpush1.bf16.msra.mxu0 %v9484_v55  ;;  %v9544_v55 = vld [vmem:[%s10737_s25 + $0x1104] ss:$16 sps:$4 sm:$0xff]  }
 0x117   : > { %6848 = vmatpush1.bf16.msra.mxu1 %v9487_v56  ;;  %6858 = vmatprep.subr.bf16.mxu0 %v9496_v57  ;;  %v9547_v56 = vld [vmem:[%s10737_s25 + $0x1304] ss:$16 sps:$4 sm:$0xff]   ;;  %v9542_v57 = vld [vmem:[%s10737_s25 + $0x1100] ss:$16 sps:$4 sm:$0xff]  }
 0x118   : > { %6899 = vmatprep.subr.bf16.mxu1 %v9499_v58  ;;  %v9545_v58 = vld [vmem:[%s10737_s25 + $0x1300] ss:$16 sps:$4 sm:$0xff]  }
 0x119   : > { %6809 = vmatmul.mubr.bf16.vlgmr.msra.gmra.mrb[12].mxu0 %v11097_v60 }
 0x11a   : > { %6850 = vmatmul.mubr.bf16.vlgmr.msra.gmra.mrb[12].mxu1 %v11101_v61  ;;  %6859 = vmatpush1.bf16.msra.mxu0 %v9494_v63  ;;  %v9550_v63 = vld [vmem:[%s10737_s25 + $0x1124] ss:$16 sps:$4 sm:$0xff]  }
 0x11b   : > { %6900 = vmatpush1.bf16.msra.mxu1 %v9497_v0  ;;  %6860 = vmatprep.subr.bf16.mxu0 %v9502_v1  ;;  %v9553_v0 = vld [vmem:[%s10737_s25 + $0x1324] ss:$16 sps:$4 sm:$0xff]   ;;  %v9548_v1 = vld [vmem:[%s10737_s25 + $0x1120] ss:$16 sps:$4 sm:$0xff]  }
 0x11c   : > { %6901 = vmatprep.subr.bf16.mxu1 %v9505_v2  ;;  %6890 = vmatprep.mubr.bf16.mxu0 %v11112_v41  ;;  %v9551_v2 = vld [vmem:[%s10737_s25 + $0x1320] ss:$16 sps:$4 sm:$0xff]  }
 0x11d   : > { %6931 = vmatprep.mubr.bf16.mxu1 %v11116_v42 }
 0x11e   : > { %6861 = vmatpush1.bf16.msra.mxu0 %v9500_v3  ;;  %v9556_v3 = vld [vmem:[%s10737_s25 + $0x1144] ss:$16 sps:$4 sm:$0xff]  }
 0x11f   : > { %6902 = vmatpush1.bf16.msra.mxu1 %v9503_v4  ;;  %6862 = vmatprep.subr.bf16.mxu0 %v9508_v5  ;;  %v9559_v4 = vld [vmem:[%s10737_s25 + $0x1344] ss:$16 sps:$4 sm:$0xff]   ;;  %v9554_v5 = vld [vmem:[%s10737_s25 + $0x1140] ss:$16 sps:$4 sm:$0xff]  }
 0x120   : > { %6903 = vmatprep.subr.bf16.mxu1 %v9511_v6  ;;  %v9557_v6 = vld [vmem:[%s10737_s25 + $0x1340] ss:$16 sps:$4 sm:$0xff]  }
 0x122   : > { %6863 = vmatpush1.bf16.msra.mxu0 %v9506_v9  ;;  %v9562_v9 = vld [vmem:[%s10737_s25 + $0x1164] ss:$16 sps:$4 sm:$0xff]  }
 0x123   : > { %6904 = vmatpush1.bf16.msra.mxu1 %v9509_v10  ;;  %6864 = vmatprep.subr.bf16.mxu0 %v9514_v11  ;;  %v9565_v10 = vld [vmem:[%s10737_s25 + $0x1364] ss:$16 sps:$4 sm:$0xff]   ;;  %v9560_v11 = vld [vmem:[%s10737_s25 + $0x1160] ss:$16 sps:$4 sm:$0xff]  }
 0x124   : > { %6905 = vmatprep.subr.bf16.mxu1 %v9517_v12  ;;  %v9563_v12 = vld [vmem:[%s10737_s25 + $0x1360] ss:$16 sps:$4 sm:$0xff]  }
 0x126   : > { %6865 = vmatpush1.bf16.msra.mxu0 %v9512_v13  ;;  %v9568_v13 = vld [vmem:[%s10737_s25 + $0x1184] ss:$16 sps:$4 sm:$0xff]  }
 0x127   : > { %6906 = vmatpush1.bf16.msra.mxu1 %v9515_v14  ;;  %6866 = vmatprep.subr.bf16.mxu0 %v9520_v15  ;;  %v9571_v14 = vld [vmem:[%s10737_s25 + $0x1384] ss:$16 sps:$4 sm:$0xff]   ;;  %v9566_v15 = vld [vmem:[%s10737_s25 + $0x1180] ss:$16 sps:$4 sm:$0xff]  }
 0x128   : > { %6907 = vmatprep.subr.bf16.mxu1 %v9523_v16  ;;  %v9569_v16 = vld [vmem:[%s10737_s25 + $0x1380] ss:$16 sps:$4 sm:$0xff]  }
 0x12a   : > { %6867 = vmatpush1.bf16.msra.mxu0 %v9518_v19  ;;  %v9574_v19 = vld [vmem:[%s10737_s25 + $0x11a4] ss:$16 sps:$4 sm:$0xff]  }
 0x12b   : > { %6908 = vmatpush1.bf16.msra.mxu1 %v9521_v20  ;;  %6868 = vmatprep.subr.bf16.mxu0 %v9526_v21  ;;  %v9577_v20 = vld [vmem:[%s10737_s25 + $0x13a4] ss:$16 sps:$4 sm:$0xff]   ;;  %v9572_v21 = vld [vmem:[%s10737_s25 + $0x11a0] ss:$16 sps:$4 sm:$0xff]  }
 0x12c   : > { %6909 = vmatprep.subr.bf16.mxu1 %v9529_v22  ;;  %v6564_v31 = vpop.f32.mrb[0].mxu0  ;;  %v9575_v22 = vld [vmem:[%s10737_s25 + $0x13a0] ss:$16 sps:$4 sm:$0xff]  }
 0x12d   : > { %v6605_v32 = vpop.f32.mrb[0].mxu1  ;;  %v6566_v36 = vpop.f32.mrb[1].mxu0 }
 0x12e   : > { %v11144_v35 = vadd.f32 %v6605_v32, %v6564_v31  ;;  %v6607_v43 = vpop.f32.mrb[1].mxu1  ;;  %v6568_v45 = vpop.f32.mrb[2].mxu0  ;;  %6869 = vmatpush1.bf16.msra.mxu0 %v9524_v27  ;;  %v9580_v27 = vld [vmem:[%s10737_s25 + $0x11c4] ss:$16 sps:$4 sm:$0xff]  }
 0x12f   : > { %v11146_v44 = vadd.f32 %v6607_v43, %v6566_v36  ;;  %v6609_v46 = vpop.f32.mrb[2].mxu1  ;;  %6910 = vmatpush1.bf16.msra.mxu1 %v9527_v28  ;;  %v6569_v47 = vpop.f32.mrb[3].mxu0  ;;  %6870 = vmatprep.subr.bf16.mxu0 %v9532_v29  ;;  %v9583_v28 = vld [vmem:[%s10737_s25 + $0x13c4] ss:$16 sps:$4 sm:$0xff]   ;;  %v9578_v29 = vld [vmem:[%s10737_s25 + $0x11c0] ss:$16 sps:$4 sm:$0xff]  }
 0x130   : > { %v6610_v49 = vpop.f32.mrb[3].mxu1  ;;  %6911 = vmatprep.subr.bf16.mxu1 %v9535_v30  ;;  %v9581_v30 = vld [vmem:[%s10737_s25 + $0x13c0] ss:$16 sps:$4 sm:$0xff]   ;;  %v9586_v31 = vld [vmem:[%s10737_s25 + $0x11e4] ss:$16 sps:$4 sm:$0xff]   ;;  %v11190_v47 = vcombine.low %v11093_v59, %v11093_v59 }
 0x131   : > { %v9589_v32 = vld [vmem:[%s10737_s25 + $0x13e4] ss:$16 sps:$4 sm:$0xff]   ;;  %v9594_v45 = vld [vmem:[%s10737_s25 + $0x1400] ss:$16 sps:$4 sm:$0xff]   ;;  %v11194_v49 = vcombine.low %v11104_v62, %v11104_v62 }
 0x132   : > { %6871 = vmatpush1.bf16.msra.mxu0 %v9530_v33  ;;  %v9584_v33 = vld [vmem:[%s10737_s25 + $0x11e0] ss:$16 sps:$4 sm:$0xff]   ;;  %v9596_v36 = vld [vmem:[%s10737_s25 + $0x1404] ss:$16 sps:$4 sm:$0xff]  }
 0x133   : > { %6912 = vmatpush1.bf16.msra.mxu1 %v9533_v34  ;;  %6872 = vmatprep.subr.bf16.mxu0 %v9538_v50  ;;  %v9587_v34 = vld [vmem:[%s10737_s25 + $0x13e0] ss:$16 sps:$4 sm:$0xff]   ;;  %v9599_v43 = vld [vmem:[%s10737_s25 + $0x1604] ss:$16 sps:$4 sm:$0xff]  }
 0x134   : > { %6913 = vmatprep.subr.bf16.mxu1 %v9541_v51  ;;  %v9597_v46 = vld [vmem:[%s10737_s25 + $0x1600] ss:$16 sps:$4 sm:$0xff]   ;;  %v11200_v51 = vld [vmem:[%s10732_s21 + $0x58] sm:$0xff] }
 0x135   : > { %v11197_v50 = vld [vmem:[%s10732_s21 + $0x50] sm:$0xff]  ;;  %v11210_v62 = vcombine.high %v11200_v51, %v11200_v51 }
 0x136   : > { %6873 = vmatpush1.bf16.msra.mxu0 %v9536_v53  ;;  %v9602_v53 = vld [vmem:[%s10737_s25 + $0x1424] ss:$16 sps:$4 sm:$0xff]   ;;  %v11206_v59 = vcombine.high %v11197_v50, %v11197_v50 }
 0x137   : > { %6914 = vmatpush1.bf16.msra.mxu1 %v9539_v54  ;;  %6874 = vmatprep.subr.bf16.mxu0 %v9544_v55  ;;  %v9605_v54 = vld [vmem:[%s10737_s25 + $0x1624] ss:$16 sps:$4 sm:$0xff]   ;;  %v9600_v55 = vld [vmem:[%s10737_s25 + $0x1420] ss:$16 sps:$4 sm:$0xff]  }
 0x138   : > { %6915 = vmatprep.subr.bf16.mxu1 %v9547_v56  ;;  %v9603_v56 = vld [vmem:[%s10737_s25 + $0x1620] ss:$16 sps:$4 sm:$0xff]  }
 0x13a   : > { %6875 = vmatpush1.bf16.msra.mxu0 %v9542_v57  ;;  %v9608_v57 = vld [vmem:[%s10737_s25 + $0x1444] ss:$16 sps:$4 sm:$0xff]  }
 0x13b   : > { %6916 = vmatpush1.bf16.msra.mxu1 %v9545_v58  ;;  %6876 = vmatprep.subr.bf16.mxu0 %v9550_v63  ;;  %v9611_v58 = vld [vmem:[%s10737_s25 + $0x1644] ss:$16 sps:$4 sm:$0xff]   ;;  %v9606_v63 = vld [vmem:[%s10737_s25 + $0x1440] ss:$16 sps:$4 sm:$0xff]  }
 0x13c   : > { %6917 = vmatprep.subr.bf16.mxu1 %v9553_v0  ;;  %v9609_v0 = vld [vmem:[%s10737_s25 + $0x1640] ss:$16 sps:$4 sm:$0xff]  }
 0x13e   : > { %6877 = vmatpush1.bf16.msra.mxu0 %v9548_v1  ;;  %v9614_v1 = vld [vmem:[%s10737_s25 + $0x1464] ss:$16 sps:$4 sm:$0xff]  }
 0x13f   : > { %6918 = vmatpush1.bf16.msra.mxu1 %v9551_v2  ;;  %6878 = vmatprep.subr.bf16.mxu0 %v9556_v3  ;;  %v9617_v2 = vld [vmem:[%s10737_s25 + $0x1664] ss:$16 sps:$4 sm:$0xff]   ;;  %v9612_v3 = vld [vmem:[%s10737_s25 + $0x1460] ss:$16 sps:$4 sm:$0xff]  }
 0x140   : > { %6919 = vmatprep.subr.bf16.mxu1 %v9559_v4  ;;  %v9615_v4 = vld [vmem:[%s10737_s25 + $0x1660] ss:$16 sps:$4 sm:$0xff]  }
 0x142   : > { %6879 = vmatpush1.bf16.msra.mxu0 %v9554_v5  ;;  %v9620_v5 = vld [vmem:[%s10737_s25 + $0x1484] ss:$16 sps:$4 sm:$0xff]  }
 0x143   : > { %6920 = vmatpush1.bf16.msra.mxu1 %v9557_v6  ;;  %6880 = vmatprep.subr.bf16.mxu0 %v9562_v9  ;;  %v9623_v6 = vld [vmem:[%s10737_s25 + $0x1684] ss:$16 sps:$4 sm:$0xff]   ;;  %v9618_v9 = vld [vmem:[%s10737_s25 + $0x1480] ss:$16 sps:$4 sm:$0xff]  }
 0x144   : > { %6921 = vmatprep.subr.bf16.mxu1 %v9565_v10  ;;  %v9621_v10 = vld [vmem:[%s10737_s25 + $0x1680] ss:$16 sps:$4 sm:$0xff]  }
 0x146   : > { %6881 = vmatpush1.bf16.msra.mxu0 %v9560_v11  ;;  %v9626_v11 = vld [vmem:[%s10737_s25 + $0x14a4] ss:$16 sps:$4 sm:$0xff]  }
 0x147   : > { %6922 = vmatpush1.bf16.msra.mxu1 %v9563_v12  ;;  %6882 = vmatprep.subr.bf16.mxu0 %v9568_v13  ;;  %v9629_v12 = vld [vmem:[%s10737_s25 + $0x16a4] ss:$16 sps:$4 sm:$0xff]   ;;  %v9624_v13 = vld [vmem:[%s10737_s25 + $0x14a0] ss:$16 sps:$4 sm:$0xff]  }
 0x148   : > { %6923 = vmatprep.subr.bf16.mxu1 %v9571_v14  ;;  %v9627_v14 = vld [vmem:[%s10737_s25 + $0x16a0] ss:$16 sps:$4 sm:$0xff]  }
 0x14a   : > { %6883 = vmatpush1.bf16.msra.mxu0 %v9566_v15  ;;  %v9632_v15 = vld [vmem:[%s10737_s25 + $0x14c4] ss:$16 sps:$4 sm:$0xff]  }
 0x14b   : > { %6924 = vmatpush1.bf16.msra.mxu1 %v9569_v16  ;;  %6884 = vmatprep.subr.bf16.mxu0 %v9574_v19  ;;  %v9635_v16 = vld [vmem:[%s10737_s25 + $0x16c4] ss:$16 sps:$4 sm:$0xff]  }
 0x14c   : > { %6925 = vmatprep.subr.bf16.mxu1 %v9577_v20 }
 0x14e   : > { %6885 = vmatpush1.bf16.msra.mxu0 %v9572_v21  ;;  %v9630_v21 = vld [vmem:[%s10737_s25 + $0x14c0] ss:$16 sps:$4 sm:$0xff]  }
 0x14f   : > { %6926 = vmatpush1.bf16.msra.mxu1 %v9575_v22  ;;  %6886 = vmatprep.subr.bf16.mxu0 %v9580_v27  ;;  %v9633_v22 = vld [vmem:[%s10737_s25 + $0x16c0] ss:$16 sps:$4 sm:$0xff]  }
 0x150   : > { %6927 = vmatprep.subr.bf16.mxu1 %v9583_v28 }
 0x152   : > { %6887 = vmatpush1.bf16.msra.mxu0 %v9578_v29 }
 0x153   : > { %6928 = vmatpush1.bf16.msra.mxu1 %v9581_v30  ;;  %6888 = vmatprep.subr.bf16.mxu0 %v9586_v31 }
 0x154   : > { %6929 = vmatprep.subr.bf16.mxu1 %v9589_v32 }
 0x156   : > { %6889 = vmatpush1.bf16.msra.mxu0 %v9584_v33 }
 0x157   : > { %6930 = vmatpush1.bf16.msra.mxu1 %v9587_v34  ;;  %6940 = vmatprep.subr.bf16.mxu0 %v9596_v36 }
 0x158   : > { %6981 = vmatprep.subr.bf16.mxu1 %v9599_v43  ;;  %v9641_v43 = vld [vmem:[%s10737_s25 + $0x16e4] ss:$16 sps:$4 sm:$0xff]  }
 0x159   : > { %6891 = vmatmul.mubr.bf16.vlgmr.msra.gmra.mrb[16].mxu0 %v11190_v47 }
 0x15a   : > { %6932 = vmatmul.mubr.bf16.vlgmr.msra.gmra.mrb[16].mxu1 %v11194_v49  ;;  %6941 = vmatpush1.bf16.msra.mxu0 %v9594_v45 }
 0x15b   : > { %6982 = vmatpush1.bf16.msra.mxu1 %v9597_v46  ;;  %6942 = vmatprep.subr.bf16.mxu0 %v9602_v53  ;;  %v9639_v46 = vld [vmem:[%s10737_s25 + $0x16e0] ss:$16 sps:$4 sm:$0xff]   ;;  %v9644_v53 = vld [vmem:[%s10737_s25 + $0x1504] ss:$16 sps:$4 sm:$0xff]  }
 0x15c   : > { %6983 = vmatprep.subr.bf16.mxu1 %v9605_v54  ;;  %6972 = vmatprep.mubr.bf16.mxu0 %v11206_v59  ;;  %v9647_v54 = vld [vmem:[%s10737_s25 + $0x1704] ss:$16 sps:$4 sm:$0xff]  }
 0x15d   : > { %7013 = vmatprep.mubr.bf16.mxu1 %v11210_v62 }
 0x15e   : > { %6943 = vmatpush1.bf16.msra.mxu0 %v9600_v55  ;;  %v9642_v55 = vld [vmem:[%s10737_s25 + $0x1500] ss:$16 sps:$4 sm:$0xff]  }
 0x15f   : > { %6984 = vmatpush1.bf16.msra.mxu1 %v9603_v56  ;;  %6944 = vmatprep.subr.bf16.mxu0 %v9608_v57  ;;  %v9645_v56 = vld [vmem:[%s10737_s25 + $0x1700] ss:$16 sps:$4 sm:$0xff]   ;;  %v9650_v57 = vld [vmem:[%s10737_s25 + $0x1524] ss:$16 sps:$4 sm:$0xff]  }
 0x160   : > { %6985 = vmatprep.subr.bf16.mxu1 %v9611_v58  ;;  %v9653_v58 = vld [vmem:[%s10737_s25 + $0x1724] ss:$16 sps:$4 sm:$0xff]  }
 0x162   : > { %6945 = vmatpush1.bf16.msra.mxu0 %v9606_v63  ;;  %v9648_v63 = vld [vmem:[%s10737_s25 + $0x1520] ss:$16 sps:$4 sm:$0xff]  }
 0x163   : > { %6986 = vmatpush1.bf16.msra.mxu1 %v9609_v0  ;;  %6946 = vmatprep.subr.bf16.mxu0 %v9614_v1  ;;  %v9651_v0 = vld [vmem:[%s10737_s25 + $0x1720] ss:$16 sps:$4 sm:$0xff]   ;;  %v9656_v1 = vld [vmem:[%s10737_s25 + $0x1544] ss:$16 sps:$4 sm:$0xff]  }
 0x164   : > { %6987 = vmatprep.subr.bf16.mxu1 %v9617_v2  ;;  %v9659_v2 = vld [vmem:[%s10737_s25 + $0x1744] ss:$16 sps:$4 sm:$0xff]  }
 0x166   : > { %6947 = vmatpush1.bf16.msra.mxu0 %v9612_v3  ;;  %v9654_v3 = vld [vmem:[%s10737_s25 + $0x1540] ss:$16 sps:$4 sm:$0xff]  }
 0x167   : > { %6988 = vmatpush1.bf16.msra.mxu1 %v9615_v4  ;;  %6948 = vmatprep.subr.bf16.mxu0 %v9620_v5  ;;  %v9657_v4 = vld [vmem:[%s10737_s25 + $0x1740] ss:$16 sps:$4 sm:$0xff]   ;;  %v9662_v5 = vld [vmem:[%s10737_s25 + $0x1564] ss:$16 sps:$4 sm:$0xff]  }
 0x168   : > { %6989 = vmatprep.subr.bf16.mxu1 %v9623_v6  ;;  %v9665_v6 = vld [vmem:[%s10737_s25 + $0x1764] ss:$16 sps:$4 sm:$0xff]  }
 0x16a   : > { %6949 = vmatpush1.bf16.msra.mxu0 %v9618_v9  ;;  %v9660_v9 = vld [vmem:[%s10737_s25 + $0x1560] ss:$16 sps:$4 sm:$0xff]  }
 0x16b   : > { %6990 = vmatpush1.bf16.msra.mxu1 %v9621_v10  ;;  %6950 = vmatprep.subr.bf16.mxu0 %v9626_v11  ;;  %v9663_v10 = vld [vmem:[%s10737_s25 + $0x1760] ss:$16 sps:$4 sm:$0xff]   ;;  %v9668_v11 = vld [vmem:[%s10737_s25 + $0x1584] ss:$16 sps:$4 sm:$0xff]  }
 0x16c   : > { %6991 = vmatprep.subr.bf16.mxu1 %v9629_v12  ;;  %v6646_v19 = vpop.f32.mrb[4].mxu0  ;;  %v9671_v12 = vld [vmem:[%s10737_s25 + $0x1784] ss:$16 sps:$4 sm:$0xff]  }
 0x16d   : > { %v6687_v20 = vpop.f32.mrb[4].mxu1  ;;  %v6647_v27 = vadd.f32 %v6646_v19, %v11144_v35  ;;  %v6648_v28 = vpop.f32.mrb[5].mxu0  ;;  %v9638_v35 = vld [vmem:[%s10737_s25 + $0x14e4] ss:$16 sps:$4 sm:$0xff]   ;;  %v9672_v19 = vld [vmem:[%s10737_s25 + $0x15a0] ss:$16 sps:$4 sm:$0xff]  }
 0x16e   : > { %v6689_v29 = vpop.f32.mrb[5].mxu1  ;;  %v6649_v30 = vadd.f32 %v6648_v28, %v11146_v44  ;;  %v6650_v31 = vpop.f32.mrb[6].mxu0  ;;  %6951 = vmatpush1.bf16.msra.mxu0 %v9624_v13  ;;  %v9636_v44 = vld [vmem:[%s10737_s25 + $0x14e0] ss:$16 sps:$4 sm:$0xff]  }
 0x16f   : > { %v6691_v32 = vpop.f32.mrb[6].mxu1  ;;  %6992 = vmatpush1.bf16.msra.mxu1 %v9627_v14  ;;  %v11240_v33 = vadd.f32 %v6687_v20, %v6647_v27  ;;  %v6651_v34 = vpop.f32.mrb[7].mxu0  ;;  %6952 = vmatprep.subr.bf16.mxu0 %v9632_v15  ;;  %v9666_v13 = vld [vmem:[%s10737_s25 + $0x1580] ss:$16 sps:$4 sm:$0xff]   ;;  %v9674_v15 = vld [vmem:[%s10737_s25 + $0x15a4] ss:$16 sps:$4 sm:$0xff]  }
 0x170   : > { %v6692_v36 = vpop.f32.mrb[7].mxu1  ;;  %6993 = vmatprep.subr.bf16.mxu1 %v9635_v16  ;;  %v11244_v45 = vadd.f32 %v6689_v29, %v6649_v30  ;;  %v9669_v14 = vld [vmem:[%s10737_s25 + $0x1780] ss:$16 sps:$4 sm:$0xff]   ;;  %v9677_v16 = vld [vmem:[%s10737_s25 + $0x17a4] ss:$16 sps:$4 sm:$0xff]  }
 0x171   : > { %v9675_v20 = vld [vmem:[%s10737_s25 + $0x17a0] ss:$16 sps:$4 sm:$0xff]   ;;  %v9686_v29 = vld [vmem:[%s10737_s25 + $0x15e4] ss:$16 sps:$4 sm:$0xff]  }
 0x172   : > { %6953 = vmatpush1.bf16.msra.mxu0 %v9630_v21  ;;  %v9680_v21 = vld [vmem:[%s10737_s25 + $0x15c4] ss:$16 sps:$4 sm:$0xff]   ;;  %v9678_v27 = vld [vmem:[%s10737_s25 + $0x15c0] ss:$16 sps:$4 sm:$0xff]  }
 0x173   : > { %6994 = vmatpush1.bf16.msra.mxu1 %v9633_v22  ;;  %6954 = vmatprep.subr.bf16.mxu0 %v9638_v35  ;;  %v9683_v22 = vld [vmem:[%s10737_s25 + $0x17c4] ss:$16 sps:$4 sm:$0xff]   ;;  %v9681_v28 = vld [vmem:[%s10737_s25 + $0x17c0] ss:$16 sps:$4 sm:$0xff]  }
 0x174   : > { %6995 = vmatprep.subr.bf16.mxu1 %v9641_v43  ;;  %v9689_v30 = vld [vmem:[%s10737_s25 + $0x17e4] ss:$16 sps:$4 sm:$0xff]   ;;  %v9684_v31 = vld [vmem:[%s10737_s25 + $0x15e0] ss:$16 sps:$4 sm:$0xff]  }
 0x175   : > { %v9687_v32 = vld [vmem:[%s10737_s25 + $0x17e0] ss:$16 sps:$4 sm:$0xff]   ;;  %v9696_v34 = vld [vmem:[%s10737_s25 + $0x1804] ss:$16 sps:$4 sm:$0xff]  }
 0x176   : > { %6955 = vmatpush1.bf16.msra.mxu0 %v9636_v44  ;;  %v9699_v36 = vld [vmem:[%s10737_s25 + $0x1a04] ss:$16 sps:$4 sm:$0xff]   ;;  %v9694_v35 = vld [vmem:[%s10737_s25 + $0x1800] ss:$16 sps:$4 sm:$0xff]   ;;  %v11286_v44 = vcombine.low %v11197_v50, %v11197_v50 }
 0x177   : > { %6996 = vmatpush1.bf16.msra.mxu1 %v9639_v46  ;;  %6956 = vmatprep.subr.bf16.mxu0 %v9644_v53  ;;  %v9697_v43 = vld [vmem:[%s10737_s25 + $0x1a00] ss:$16 sps:$4 sm:$0xff]   ;;  %v11290_v46 = vcombine.low %v11200_v51, %v11200_v51 }
 0x178   : > { %6997 = vmatprep.subr.bf16.mxu1 %v9647_v54  ;;  %v11293_v53 = vld [vmem:[%s10732_s21 + $0x60] sm:$0xff]  ;;  %v11296_v54 = vld [vmem:[%s10732_s21 + $0x68] sm:$0xff] }
 0x179   : > { %v11302_v50 = vcombine.high %v11293_v53, %v11293_v53  ;;  %v11306_v51 = vcombine.high %v11296_v54, %v11296_v54 }
 0x17a   : > { %6957 = vmatpush1.bf16.msra.mxu0 %v9642_v55  ;;  %v9702_v55 = vld [vmem:[%s10737_s25 + $0x1824] ss:$16 sps:$4 sm:$0xff]  }
 0x17b   : > { %6998 = vmatpush1.bf16.msra.mxu1 %v9645_v56  ;;  %6958 = vmatprep.subr.bf16.mxu0 %v9650_v57  ;;  %v9705_v56 = vld [vmem:[%s10737_s25 + $0x1a24] ss:$16 sps:$4 sm:$0xff]   ;;  %v9700_v57 = vld [vmem:[%s10737_s25 + $0x1820] ss:$16 sps:$4 sm:$0xff]  }
 0x17c   : > { %6999 = vmatprep.subr.bf16.mxu1 %v9653_v58  ;;  %v9703_v58 = vld [vmem:[%s10737_s25 + $0x1a20] ss:$16 sps:$4 sm:$0xff]  }
 0x17e   : > { %6959 = vmatpush1.bf16.msra.mxu0 %v9648_v63  ;;  %v9708_v63 = vld [vmem:[%s10737_s25 + $0x1844] ss:$16 sps:$4 sm:$0xff]  }
 0x17f   : > { %7000 = vmatpush1.bf16.msra.mxu1 %v9651_v0  ;;  %6960 = vmatprep.subr.bf16.mxu0 %v9656_v1  ;;  %v9711_v0 = vld [vmem:[%s10737_s25 + $0x1a44] ss:$16 sps:$4 sm:$0xff]   ;;  %v9706_v1 = vld [vmem:[%s10737_s25 + $0x1840] ss:$16 sps:$4 sm:$0xff]  }
 0x180   : > { %7001 = vmatprep.subr.bf16.mxu1 %v9659_v2  ;;  %v9709_v2 = vld [vmem:[%s10737_s25 + $0x1a40] ss:$16 sps:$4 sm:$0xff]  }
 0x182   : > { %6961 = vmatpush1.bf16.msra.mxu0 %v9654_v3  ;;  %v9714_v3 = vld [vmem:[%s10737_s25 + $0x1864] ss:$16 sps:$4 sm:$0xff]  }
 0x183   : > { %7002 = vmatpush1.bf16.msra.mxu1 %v9657_v4  ;;  %6962 = vmatprep.subr.bf16.mxu0 %v9662_v5  ;;  %v9717_v4 = vld [vmem:[%s10737_s25 + $0x1a64] ss:$16 sps:$4 sm:$0xff]   ;;  %v9712_v5 = vld [vmem:[%s10737_s25 + $0x1860] ss:$16 sps:$4 sm:$0xff]  }
 0x184   : > { %7003 = vmatprep.subr.bf16.mxu1 %v9665_v6  ;;  %v9715_v6 = vld [vmem:[%s10737_s25 + $0x1a60] ss:$16 sps:$4 sm:$0xff]  }
 0x186   : > { %6963 = vmatpush1.bf16.msra.mxu0 %v9660_v9  ;;  %v9720_v9 = vld [vmem:[%s10737_s25 + $0x1884] ss:$16 sps:$4 sm:$0xff]  }
 0x187   : > { %7004 = vmatpush1.bf16.msra.mxu1 %v9663_v10  ;;  %6964 = vmatprep.subr.bf16.mxu0 %v9668_v11  ;;  %v9723_v10 = vld [vmem:[%s10737_s25 + $0x1a84] ss:$16 sps:$4 sm:$0xff]   ;;  %v9718_v11 = vld [vmem:[%s10737_s25 + $0x1880] ss:$16 sps:$4 sm:$0xff]  }
 0x188   : > { %7005 = vmatprep.subr.bf16.mxu1 %v9671_v12  ;;  %v9721_v12 = vld [vmem:[%s10737_s25 + $0x1a80] ss:$16 sps:$4 sm:$0xff]  }
 0x18a   : > { %6965 = vmatpush1.bf16.msra.mxu0 %v9666_v13  ;;  %v9726_v13 = vld [vmem:[%s10737_s25 + $0x18a4] ss:$16 sps:$4 sm:$0xff]  }
 0x18b   : > { %7006 = vmatpush1.bf16.msra.mxu1 %v9669_v14  ;;  %6966 = vmatprep.subr.bf16.mxu0 %v9674_v15  ;;  %v9729_v14 = vld [vmem:[%s10737_s25 + $0x1aa4] ss:$16 sps:$4 sm:$0xff]   ;;  %v9724_v15 = vld [vmem:[%s10737_s25 + $0x18a0] ss:$16 sps:$4 sm:$0xff]  }
 0x18c   : > { %7007 = vmatprep.subr.bf16.mxu1 %v9677_v16  ;;  %v9727_v16 = vld [vmem:[%s10737_s25 + $0x1aa0] ss:$16 sps:$4 sm:$0xff]  }
 0x18e   : > { %6967 = vmatpush1.bf16.msra.mxu0 %v9672_v19  ;;  %v9732_v19 = vld [vmem:[%s10737_s25 + $0x18c4] ss:$16 sps:$4 sm:$0xff]  }
 0x18f   : > { %7008 = vmatpush1.bf16.msra.mxu1 %v9675_v20  ;;  %6968 = vmatprep.subr.bf16.mxu0 %v9680_v21  ;;  %v9735_v20 = vld [vmem:[%s10737_s25 + $0x1ac4] ss:$16 sps:$4 sm:$0xff]  }
 0x190   : > { %7009 = vmatprep.subr.bf16.mxu1 %v9683_v22 }
 0x192   : > { %6969 = vmatpush1.bf16.msra.mxu0 %v9678_v27  ;;  %v9730_v27 = vld [vmem:[%s10737_s25 + $0x18c0] ss:$16 sps:$4 sm:$0xff]  }
 0x193   : > { %7010 = vmatpush1.bf16.msra.mxu1 %v9681_v28  ;;  %6970 = vmatprep.subr.bf16.mxu0 %v9686_v29  ;;  %v9733_v28 = vld [vmem:[%s10737_s25 + $0x1ac0] ss:$16 sps:$4 sm:$0xff]  }
 0x194   : > { %7011 = vmatprep.subr.bf16.mxu1 %v9689_v30 }
 0x196   : > { %6971 = vmatpush1.bf16.msra.mxu0 %v9684_v31 }
 0x197   : > { %7012 = vmatpush1.bf16.msra.mxu1 %v9687_v32  ;;  %7022 = vmatprep.subr.bf16.mxu0 %v9696_v34 }
 0x198   : > { %7063 = vmatprep.subr.bf16.mxu1 %v9699_v36 }
 0x199   : > { %6973 = vmatmul.mubr.bf16.vlgmr.msra.gmra.mrb[20].mxu0 %v11286_v44 }
 0x19a   : > { %7014 = vmatmul.mubr.bf16.vlgmr.msra.gmra.mrb[20].mxu1 %v11290_v46  ;;  %7023 = vmatpush1.bf16.msra.mxu0 %v9694_v35 }
 0x19b   : > { %7064 = vmatpush1.bf16.msra.mxu1 %v9697_v43  ;;  %7024 = vmatprep.subr.bf16.mxu0 %v9702_v55 }
 0x19c   : > { %7065 = vmatprep.subr.bf16.mxu1 %v9705_v56  ;;  %7054 = vmatprep.mubr.bf16.mxu0 %v11302_v50  ;;  %v9741_v56 = vld [vmem:[%s10737_s25 + $0x1ae4] ss:$16 sps:$4 sm:$0xff]  }
 0x19d   : > { %7095 = vmatprep.mubr.bf16.mxu1 %v11306_v51 }
 0x19e   : > { %7025 = vmatpush1.bf16.msra.mxu0 %v9700_v57 }
 0x19f   : > { %7066 = vmatpush1.bf16.msra.mxu1 %v9703_v58  ;;  %7026 = vmatprep.subr.bf16.mxu0 %v9708_v63  ;;  %v9739_v58 = vld [vmem:[%s10737_s25 + $0x1ae0] ss:$16 sps:$4 sm:$0xff]   ;;  %v9744_v63 = vld [vmem:[%s10737_s25 + $0x1904] ss:$16 sps:$4 sm:$0xff]  }
 0x1a0   : > { %7067 = vmatprep.subr.bf16.mxu1 %v9711_v0  ;;  %v9747_v0 = vld [vmem:[%s10737_s25 + $0x1b04] ss:$16 sps:$4 sm:$0xff]  }
 0x1a2   : > { %7027 = vmatpush1.bf16.msra.mxu0 %v9706_v1  ;;  %v9742_v1 = vld [vmem:[%s10737_s25 + $0x1900] ss:$16 sps:$4 sm:$0xff]  }
 0x1a3   : > { %7068 = vmatpush1.bf16.msra.mxu1 %v9709_v2  ;;  %7028 = vmatprep.subr.bf16.mxu0 %v9714_v3  ;;  %v9745_v2 = vld [vmem:[%s10737_s25 + $0x1b00] ss:$16 sps:$4 sm:$0xff]   ;;  %v9750_v3 = vld [vmem:[%s10737_s25 + $0x1924] ss:$16 sps:$4 sm:$0xff]  }
 0x1a4   : > { %7069 = vmatprep.subr.bf16.mxu1 %v9717_v4  ;;  %v9753_v4 = vld [vmem:[%s10737_s25 + $0x1b24] ss:$16 sps:$4 sm:$0xff]  }
 0x1a6   : > { %7029 = vmatpush1.bf16.msra.mxu0 %v9712_v5  ;;  %v9748_v5 = vld [vmem:[%s10737_s25 + $0x1920] ss:$16 sps:$4 sm:$0xff]  }
 0x1a7   : > { %7070 = vmatpush1.bf16.msra.mxu1 %v9715_v6  ;;  %7030 = vmatprep.subr.bf16.mxu0 %v9720_v9  ;;  %v9751_v6 = vld [vmem:[%s10737_s25 + $0x1b20] ss:$16 sps:$4 sm:$0xff]   ;;  %v9756_v9 = vld [vmem:[%s10737_s25 + $0x1944] ss:$16 sps:$4 sm:$0xff]  }
 0x1a8   : > { %7071 = vmatprep.subr.bf16.mxu1 %v9723_v10  ;;  %v9759_v10 = vld [vmem:[%s10737_s25 + $0x1b44] ss:$16 sps:$4 sm:$0xff]  }
 0x1aa   : > { %7031 = vmatpush1.bf16.msra.mxu0 %v9718_v11  ;;  %v9754_v11 = vld [vmem:[%s10737_s25 + $0x1940] ss:$16 sps:$4 sm:$0xff]  }
 0x1ab   : > { %7072 = vmatpush1.bf16.msra.mxu1 %v9721_v12  ;;  %7032 = vmatprep.subr.bf16.mxu0 %v9726_v13  ;;  %v9757_v12 = vld [vmem:[%s10737_s25 + $0x1b40] ss:$16 sps:$4 sm:$0xff]   ;;  %v9762_v13 = vld [vmem:[%s10737_s25 + $0x1964] ss:$16 sps:$4 sm:$0xff]  }
 0x1ac   : > { %7073 = vmatprep.subr.bf16.mxu1 %v9729_v14  ;;  %v6728_v21 = vpop.f32.mrb[8].mxu0  ;;  %v9765_v14 = vld [vmem:[%s10737_s25 + $0x1b64] ss:$16 sps:$4 sm:$0xff]  }
 0x1ad   : > { %v6769_v22 = vpop.f32.mrb[8].mxu1  ;;  %v6729_v29 = vadd.f32 %v6728_v21, %v11240_v33  ;;  %v6730_v30 = vpop.f32.mrb[9].mxu0  ;;  %v9738_v33 = vld [vmem:[%s10737_s25 + $0x18e4] ss:$16 sps:$4 sm:$0xff]   ;;  %v9766_v21 = vld [vmem:[%s10737_s25 + $0x1980] ss:$16 sps:$4 sm:$0xff]  }
 0x1ae   : > { %v6771_v31 = vpop.f32.mrb[9].mxu1  ;;  %v6731_v32 = vadd.f32 %v6730_v30, %v11244_v45  ;;  %v6732_v34 = vpop.f32.mrb[10].mxu0  ;;  %7033 = vmatpush1.bf16.msra.mxu0 %v9724_v15  ;;  %v9736_v45 = vld [vmem:[%s10737_s25 + $0x18e0] ss:$16 sps:$4 sm:$0xff]  }
 0x1af   : > { %v6773_v36 = vpop.f32.mrb[10].mxu1  ;;  %7074 = vmatpush1.bf16.msra.mxu1 %v9727_v16  ;;  %v11336_v35 = vadd.f32 %v6769_v22, %v6729_v29  ;;  %v6733_v43 = vpop.f32.mrb[11].mxu0  ;;  %7034 = vmatprep.subr.bf16.mxu0 %v9732_v19  ;;  %v9760_v15 = vld [vmem:[%s10737_s25 + $0x1960] ss:$16 sps:$4 sm:$0xff]   ;;  %v9768_v19 = vld [vmem:[%s10737_s25 + $0x1984] ss:$16 sps:$4 sm:$0xff]  }
 0x1b0   : > { %v6774_v55 = vpop.f32.mrb[11].mxu1  ;;  %7075 = vmatprep.subr.bf16.mxu1 %v9735_v20  ;;  %v11340_v57 = vadd.f32 %v6771_v31, %v6731_v32  ;;  %v9763_v16 = vld [vmem:[%s10737_s25 + $0x1b60] ss:$16 sps:$4 sm:$0xff]   ;;  %v9771_v20 = vld [vmem:[%s10737_s25 + $0x1b84] ss:$16 sps:$4 sm:$0xff]  }
 0x1b1   : > { %v9769_v22 = vld [vmem:[%s10737_s25 + $0x1b80] ss:$16 sps:$4 sm:$0xff]   ;;  %v9780_v31 = vld [vmem:[%s10737_s25 + $0x19c4] ss:$16 sps:$4 sm:$0xff]  }
 0x1b2   : > { %7035 = vmatpush1.bf16.msra.mxu0 %v9730_v27  ;;  %v9774_v27 = vld [vmem:[%s10737_s25 + $0x19a4] ss:$16 sps:$4 sm:$0xff]   ;;  %v9772_v29 = vld [vmem:[%s10737_s25 + $0x19a0] ss:$16 sps:$4 sm:$0xff]  }
 0x1b3   : > { %7076 = vmatpush1.bf16.msra.mxu1 %v9733_v28  ;;  %7036 = vmatprep.subr.bf16.mxu0 %v9738_v33  ;;  %v9777_v28 = vld [vmem:[%s10737_s25 + $0x1ba4] ss:$16 sps:$4 sm:$0xff]   ;;  %v9775_v30 = vld [vmem:[%s10737_s25 + $0x1ba0] ss:$16 sps:$4 sm:$0xff]  }
 0x1b4   : > { %7077 = vmatprep.subr.bf16.mxu1 %v9741_v56  ;;  %v9783_v32 = vld [vmem:[%s10737_s25 + $0x1bc4] ss:$16 sps:$4 sm:$0xff]   ;;  %v9778_v34 = vld [vmem:[%s10737_s25 + $0x19c0] ss:$16 sps:$4 sm:$0xff]  }
 0x1b5   : > { %v9781_v36 = vld [vmem:[%s10737_s25 + $0x1bc0] ss:$16 sps:$4 sm:$0xff]   ;;  %v9786_v43 = vld [vmem:[%s10737_s25 + $0x19e4] ss:$16 sps:$4 sm:$0xff]  }
 0x1b6   : > { %7037 = vmatpush1.bf16.msra.mxu0 %v9736_v45  ;;  %v9789_v55 = vld [vmem:[%s10737_s25 + $0x1be4] ss:$16 sps:$4 sm:$0xff]   ;;  %v9784_v33 = vld [vmem:[%s10737_s25 + $0x19e0] ss:$16 sps:$4 sm:$0xff]  }
 0x1b7   : > { %7078 = vmatpush1.bf16.msra.mxu1 %v9739_v58  ;;  %7038 = vmatprep.subr.bf16.mxu0 %v9744_v63  ;;  %v9787_v56 = vld [vmem:[%s10737_s25 + $0x1be0] ss:$16 sps:$4 sm:$0xff]   ;;  %v9796_v45 = vld [vmem:[%s10737_s25 + $0x1c04] ss:$16 sps:$4 sm:$0xff]  }
 0x1b8   : > { %7079 = vmatprep.subr.bf16.mxu1 %v9747_v0  ;;  %v9799_v58 = vld [vmem:[%s10737_s25 + $0x1e04] ss:$16 sps:$4 sm:$0xff]   ;;  %v11382_v0 = vld [vmem:[%s10732_s21 + $0x78] sm:$0xff] }
 0x1b9   : > { %v11379_v63 = vld [vmem:[%s10732_s21 + $0x70] sm:$0xff] }
 0x1ba   : > { %7039 = vmatpush1.bf16.msra.mxu0 %v9742_v1  ;;  %v9794_v1 = vld [vmem:[%s10737_s25 + $0x1c00] ss:$16 sps:$4 sm:$0xff]  }
 0x1bb   : > { %7080 = vmatpush1.bf16.msra.mxu1 %v9745_v2  ;;  %7040 = vmatprep.subr.bf16.mxu0 %v9750_v3  ;;  %v9797_v2 = vld [vmem:[%s10737_s25 + $0x1e00] ss:$16 sps:$4 sm:$0xff]   ;;  %v11388_v3 = vcombine.low %v11293_v53, %v11293_v53  ;;  %v11402_v53 = vcombine.high %v11382_v0, %v11382_v0 }
 0x1bc   : > { %7081 = vmatprep.subr.bf16.mxu1 %v9753_v4  ;;  %v11392_v4 = vcombine.low %v11296_v54, %v11296_v54  ;;  %v9800_v54 = vld [vmem:[%s10737_s25 + $0x1c20] ss:$16 sps:$4 sm:$0xff]  }
 0x1be   : > { %7041 = vmatpush1.bf16.msra.mxu0 %v9748_v5  ;;  %v9802_v5 = vld [vmem:[%s10737_s25 + $0x1c24] ss:$16 sps:$4 sm:$0xff]  }
 0x1bf   : > { %7082 = vmatpush1.bf16.msra.mxu1 %v9751_v6  ;;  %7042 = vmatprep.subr.bf16.mxu0 %v9756_v9  ;;  %v9805_v6 = vld [vmem:[%s10737_s25 + $0x1e24] ss:$16 sps:$4 sm:$0xff]   ;;  %v11398_v9 = vcombine.high %v11379_v63, %v11379_v63 }
 0x1c0   : > { %7083 = vmatprep.subr.bf16.mxu1 %v9759_v10  ;;  %v9803_v10 = vld [vmem:[%s10737_s25 + $0x1e20] ss:$16 sps:$4 sm:$0xff]  }
 0x1c2   : > { %7043 = vmatpush1.bf16.msra.mxu0 %v9754_v11  ;;  %v9808_v11 = vld [vmem:[%s10737_s25 + $0x1c44] ss:$16 sps:$4 sm:$0xff]  }
 0x1c3   : > { %7084 = vmatpush1.bf16.msra.mxu1 %v9757_v12  ;;  %7044 = vmatprep.subr.bf16.mxu0 %v9762_v13  ;;  %v9811_v12 = vld [vmem:[%s10737_s25 + $0x1e44] ss:$16 sps:$4 sm:$0xff]   ;;  %v9806_v13 = vld [vmem:[%s10737_s25 + $0x1c40] ss:$16 sps:$4 sm:$0xff]  }
 0x1c4   : > { %7085 = vmatprep.subr.bf16.mxu1 %v9765_v14  ;;  %v9809_v14 = vld [vmem:[%s10737_s25 + $0x1e40] ss:$16 sps:$4 sm:$0xff]  }
 0x1c6   : > { %7045 = vmatpush1.bf16.msra.mxu0 %v9760_v15  ;;  %v9814_v15 = vld [vmem:[%s10737_s25 + $0x1c64] ss:$16 sps:$4 sm:$0xff]  }
 0x1c7   : > { %7086 = vmatpush1.bf16.msra.mxu1 %v9763_v16  ;;  %7046 = vmatprep.subr.bf16.mxu0 %v9768_v19  ;;  %v9817_v16 = vld [vmem:[%s10737_s25 + $0x1e64] ss:$16 sps:$4 sm:$0xff]   ;;  %v9812_v19 = vld [vmem:[%s10737_s25 + $0x1c60] ss:$16 sps:$4 sm:$0xff]  }
 0x1c8   : > { %7087 = vmatprep.subr.bf16.mxu1 %v9771_v20  ;;  %v9815_v20 = vld [vmem:[%s10737_s25 + $0x1e60] ss:$16 sps:$4 sm:$0xff]  }
 0x1ca   : > { %7047 = vmatpush1.bf16.msra.mxu0 %v9766_v21  ;;  %v9820_v21 = vld [vmem:[%s10737_s25 + $0x1c84] ss:$16 sps:$4 sm:$0xff]  }
 0x1cb   : > { %7088 = vmatpush1.bf16.msra.mxu1 %v9769_v22  ;;  %7048 = vmatprep.subr.bf16.mxu0 %v9774_v27  ;;  %v9823_v22 = vld [vmem:[%s10737_s25 + $0x1e84] ss:$16 sps:$4 sm:$0xff]   ;;  %v9818_v27 = vld [vmem:[%s10737_s25 + $0x1c80] ss:$16 sps:$4 sm:$0xff]  }
 0x1cc   : > { %7089 = vmatprep.subr.bf16.mxu1 %v9777_v28  ;;  %v9821_v28 = vld [vmem:[%s10737_s25 + $0x1e80] ss:$16 sps:$4 sm:$0xff]  }
 0x1ce   : > { %7049 = vmatpush1.bf16.msra.mxu0 %v9772_v29  ;;  %v9826_v29 = vld [vmem:[%s10737_s25 + $0x1ca4] ss:$16 sps:$4 sm:$0xff]  }
 0x1cf   : > { %7090 = vmatpush1.bf16.msra.mxu1 %v9775_v30  ;;  %7050 = vmatprep.subr.bf16.mxu0 %v9780_v31  ;;  %v9829_v30 = vld [vmem:[%s10737_s25 + $0x1ea4] ss:$16 sps:$4 sm:$0xff]   ;;  %v9824_v31 = vld [vmem:[%s10737_s25 + $0x1ca0] ss:$16 sps:$4 sm:$0xff]  }
 0x1d0   : > { %7091 = vmatprep.subr.bf16.mxu1 %v9783_v32  ;;  %v9827_v32 = vld [vmem:[%s10737_s25 + $0x1ea0] ss:$16 sps:$4 sm:$0xff]  }
 0x1d2   : > { %7051 = vmatpush1.bf16.msra.mxu0 %v9778_v34  ;;  %v9832_v34 = vld [vmem:[%s10737_s25 + $0x1cc4] ss:$16 sps:$4 sm:$0xff]  }
 0x1d3   : > { %7092 = vmatpush1.bf16.msra.mxu1 %v9781_v36  ;;  %7052 = vmatprep.subr.bf16.mxu0 %v9786_v43  ;;  %v9835_v36 = vld [vmem:[%s10737_s25 + $0x1ec4] ss:$16 sps:$4 sm:$0xff]  }
 0x1d4   : > { %7093 = vmatprep.subr.bf16.mxu1 %v9789_v55 }
 0x1d6   : > { %7053 = vmatpush1.bf16.msra.mxu0 %v9784_v33  ;;  %v9830_v33 = vld [vmem:[%s10737_s25 + $0x1cc0] ss:$16 sps:$4 sm:$0xff]  }
 0x1d7   : > { %7094 = vmatpush1.bf16.msra.mxu1 %v9787_v56  ;;  %7104 = vmatprep.subr.bf16.mxu0 %v9796_v45  ;;  %v9833_v56 = vld [vmem:[%s10737_s25 + $0x1ec0] ss:$16 sps:$4 sm:$0xff]  }
 0x1d8   : > { %7145 = vmatprep.subr.bf16.mxu1 %v9799_v58 }
 0x1d9   : > { %7055 = vmatmul.mubr.bf16.vlgmr.msra.gmra.mrb[24].mxu0 %v11388_v3 }
 0x1da   : > { %7096 = vmatmul.mubr.bf16.vlgmr.msra.gmra.mrb[24].mxu1 %v11392_v4  ;;  %7105 = vmatpush1.bf16.msra.mxu0 %v9794_v1 }
 0x1db   : > { %7146 = vmatpush1.bf16.msra.mxu1 %v9797_v2  ;;  %7106 = vmatprep.subr.bf16.mxu0 %v9802_v5 }
 0x1dc   : > { %7147 = vmatprep.subr.bf16.mxu1 %v9805_v6  ;;  %7136 = vmatprep.mubr.bf16.mxu0 %v11398_v9 }
 0x1dd   : > { %7177 = vmatprep.mubr.bf16.mxu1 %v11402_v53 }
 0x1de   : > { %7107 = vmatpush1.bf16.msra.mxu0 %v9800_v54 }
 0x1df   : > { %7148 = vmatpush1.bf16.msra.mxu1 %v9803_v10  ;;  %7108 = vmatprep.subr.bf16.mxu0 %v9808_v11 }
 0x1e0   : > { %7149 = vmatprep.subr.bf16.mxu1 %v9811_v12  ;;  %v9841_v12 = vld [vmem:[%s10737_s25 + $0x1ee4] ss:$16 sps:$4 sm:$0xff]  }
 0x1e2   : > { %7109 = vmatpush1.bf16.msra.mxu0 %v9806_v13 }
 0x1e3   : > { %7150 = vmatpush1.bf16.msra.mxu1 %v9809_v14  ;;  %7110 = vmatprep.subr.bf16.mxu0 %v9814_v15  ;;  %v9839_v14 = vld [vmem:[%s10737_s25 + $0x1ee0] ss:$16 sps:$4 sm:$0xff]   ;;  %v9844_v15 = vld [vmem:[%s10737_s25 + $0x1d04] ss:$16 sps:$4 sm:$0xff]  }
 0x1e4   : > { %7151 = vmatprep.subr.bf16.mxu1 %v9817_v16  ;;  %v9847_v16 = vld [vmem:[%s10737_s25 + $0x1f04] ss:$16 sps:$4 sm:$0xff]  }
 0x1e6   : > { %7111 = vmatpush1.bf16.msra.mxu0 %v9812_v19  ;;  %v9842_v19 = vld [vmem:[%s10737_s25 + $0x1d00] ss:$16 sps:$4 sm:$0xff]  }
 0x1e7   : > { %7152 = vmatpush1.bf16.msra.mxu1 %v9815_v20  ;;  %7112 = vmatprep.subr.bf16.mxu0 %v9820_v21  ;;  %v9845_v20 = vld [vmem:[%s10737_s25 + $0x1f00] ss:$16 sps:$4 sm:$0xff]   ;;  %v9850_v21 = vld [vmem:[%s10737_s25 + $0x1d24] ss:$16 sps:$4 sm:$0xff]  }
 0x1e8   : > { %7153 = vmatprep.subr.bf16.mxu1 %v9823_v22  ;;  %v9853_v22 = vld [vmem:[%s10737_s25 + $0x1f24] ss:$16 sps:$4 sm:$0xff]  }
 0x1ea   : > { %7113 = vmatpush1.bf16.msra.mxu0 %v9818_v27  ;;  %v9848_v27 = vld [vmem:[%s10737_s25 + $0x1d20] ss:$16 sps:$4 sm:$0xff]  }
 0x1eb   : > { %7154 = vmatpush1.bf16.msra.mxu1 %v9821_v28  ;;  %7114 = vmatprep.subr.bf16.mxu0 %v9826_v29  ;;  %v9851_v28 = vld [vmem:[%s10737_s25 + $0x1f20] ss:$16 sps:$4 sm:$0xff]   ;;  %v9856_v29 = vld [vmem:[%s10737_s25 + $0x1d44] ss:$16 sps:$4 sm:$0xff]  }
 0x1ec   : > { %7155 = vmatprep.subr.bf16.mxu1 %v9829_v30  ;;  %v6810_v43 = vpop.f32.mrb[12].mxu0  ;;  %v9859_v30 = vld [vmem:[%s10737_s25 + $0x1f44] ss:$16 sps:$4 sm:$0xff]  }
 0x1ed   : > { %v6851_v55 = vpop.f32.mrb[12].mxu1  ;;  %v6811_v45 = vadd.f32 %v6810_v43, %v11336_v35  ;;  %v6812_v58 = vpop.f32.mrb[13].mxu0  ;;  %v9838_v35 = vld [vmem:[%s10737_s25 + $0x1ce4] ss:$16 sps:$4 sm:$0xff]   ;;  %v9860_v43 = vld [vmem:[%s10737_s25 + $0x1d60] ss:$16 sps:$4 sm:$0xff]  }
 0x1ee   : > { %v6853_v1 = vpop.f32.mrb[13].mxu1  ;;  %v6813_v2 = vadd.f32 %v6812_v58, %v11340_v57  ;;  %v6814_v5 = vpop.f32.mrb[14].mxu0  ;;  %7115 = vmatpush1.bf16.msra.mxu0 %v9824_v31  ;;  %v9836_v57 = vld [vmem:[%s10737_s25 + $0x1ce0] ss:$16 sps:$4 sm:$0xff]  }
 0x1ef   : > { %v6855_v6 = vpop.f32.mrb[14].mxu1  ;;  %7156 = vmatpush1.bf16.msra.mxu1 %v9827_v32  ;;  %v11432_v54 = vadd.f32 %v6851_v55, %v6811_v45  ;;  %v6815_v10 = vpop.f32.mrb[15].mxu0  ;;  %7116 = vmatprep.subr.bf16.mxu0 %v9832_v34  ;;  %v9854_v31 = vld [vmem:[%s10737_s25 + $0x1d40] ss:$16 sps:$4 sm:$0xff]   ;;  %v9862_v34 = vld [vmem:[%s10737_s25 + $0x1d64] ss:$16 sps:$4 sm:$0xff]  }
 0x1f0   : > { %v6856_v11 = vpop.f32.mrb[15].mxu1  ;;  %7157 = vmatprep.subr.bf16.mxu1 %v9835_v36  ;;  %v11436_v13 = vadd.f32 %v6853_v1, %v6813_v2  ;;  %v9857_v32 = vld [vmem:[%s10737_s25 + $0x1f40] ss:$16 sps:$4 sm:$0xff]   ;;  %v9865_v36 = vld [vmem:[%s10737_s25 + $0x1f64] ss:$16 sps:$4 sm:$0xff]  }
 0x1f1   : > { %v9863_v55 = vld [vmem:[%s10737_s25 + $0x1f60] ss:$16 sps:$4 sm:$0xff]   ;;  %v9874_v1 = vld [vmem:[%s10737_s25 + $0x1da4] ss:$16 sps:$4 sm:$0xff]  }
 0x1f2   : > { %7117 = vmatpush1.bf16.msra.mxu0 %v9830_v33  ;;  %v9868_v33 = vld [vmem:[%s10737_s25 + $0x1d84] ss:$16 sps:$4 sm:$0xff]   ;;  %v9866_v45 = vld [vmem:[%s10737_s25 + $0x1d80] ss:$16 sps:$4 sm:$0xff]  }
 0x1f3   : > { %7158 = vmatpush1.bf16.msra.mxu1 %v9833_v56  ;;  %7118 = vmatprep.subr.bf16.mxu0 %v9838_v35  ;;  %v9871_v56 = vld [vmem:[%s10737_s25 + $0x1f84] ss:$16 sps:$4 sm:$0xff]   ;;  %v9869_v58 = vld [vmem:[%s10737_s25 + $0x1f80] ss:$16 sps:$4 sm:$0xff]  }
 0x1f4   : > { %7159 = vmatprep.subr.bf16.mxu1 %v9841_v12  ;;  %v9877_v2 = vld [vmem:[%s10737_s25 + $0x1fa4] ss:$16 sps:$4 sm:$0xff]   ;;  %v9872_v5 = vld [vmem:[%s10737_s25 + $0x1da0] ss:$16 sps:$4 sm:$0xff]  }
 0x1f5   : > { %v9875_v6 = vld [vmem:[%s10737_s25 + $0x1fa0] ss:$16 sps:$4 sm:$0xff]   ;;  %v9880_v10 = vld [vmem:[%s10737_s25 + $0x1dc4] ss:$16 sps:$4 sm:$0xff]  }
 0x1f6   : > { %7119 = vmatpush1.bf16.msra.mxu0 %v9836_v57  ;;  %v9883_v11 = vld [vmem:[%s10737_s25 + $0x1fc4] ss:$16 sps:$4 sm:$0xff]   ;;  %v9878_v35 = vld [vmem:[%s10737_s25 + $0x1dc0] ss:$16 sps:$4 sm:$0xff]  }
 0x1f7   : > { %7160 = vmatpush1.bf16.msra.mxu1 %v9839_v14  ;;  %7120 = vmatprep.subr.bf16.mxu0 %v9844_v15  ;;  %v9881_v12 = vld [vmem:[%s10737_s25 + $0x1fc0] ss:$16 sps:$4 sm:$0xff]   ;;  %v9886_v57 = vld [vmem:[%s10737_s25 + $0x1de4] ss:$16 sps:$4 sm:$0xff]  }
 0x1f8   : > { %7161 = vmatprep.subr.bf16.mxu1 %v9847_v16  ;;  %v9889_v14 = vld [vmem:[%s10737_s25 + $0x1fe4] ss:$16 sps:$4 sm:$0xff]   ;;  %v9884_v15 = vld [vmem:[%s10737_s25 + $0x1de0] ss:$16 sps:$4 sm:$0xff]  }
 0x1f9   : > { %v9887_v16 = vld [vmem:[%s10737_s25 + $0x1fe0] ss:$16 sps:$4 sm:$0xff]  }
 0x1fa   : > { %7121 = vmatpush1.bf16.msra.mxu0 %v9842_v19  ;;  %v9896_v19 = vld [vmem:[%s10737_s25 + $0xc] ss:$16 sps:$4 sm:$0xff]  }
 0x1fb   : > { %7162 = vmatpush1.bf16.msra.mxu1 %v9845_v20  ;;  %7122 = vmatprep.subr.bf16.mxu0 %v9850_v21  ;;  %v9899_v20 = vld [vmem:[%s10737_s25 + $0x20c] ss:$16 sps:$4 sm:$0xff]   ;;  %v9894_v21 = vld [vmem:[%s10737_s25 + $0x8] ss:$16 sps:$4 sm:$0xff]  }
 0x1fc   : > { %7163 = vmatprep.subr.bf16.mxu1 %v9853_v22  ;;  %v9897_v22 = vld [vmem:[%s10737_s25 + $0x208] ss:$16 sps:$4 sm:$0xff]  }
 0x1fe   : > { %7123 = vmatpush1.bf16.msra.mxu0 %v9848_v27  ;;  %v11478_v27 = vcombine.low %v11379_v63, %v11379_v63  ;;  %v9900_v63 = vld [vmem:[%s10737_s25 + $0x28] ss:$16 sps:$4 sm:$0xff]  }
 0x1ff   : > { %7164 = vmatpush1.bf16.msra.mxu1 %v9851_v28  ;;  %7124 = vmatprep.subr.bf16.mxu0 %v9856_v29  ;;  %v11482_v28 = vcombine.low %v11382_v0, %v11382_v0  ;;  %v9902_v29 = vld [vmem:[%s10737_s25 + $0x2c] ss:$16 sps:$4 sm:$0xff]   ;;  %v9903_v0 = vld [vmem:[%s10737_s25 + $0x228] ss:$16 sps:$4 sm:$0xff]  }
 0x200   : > { %7165 = vmatprep.subr.bf16.mxu1 %v9859_v30  ;;  %v9905_v30 = vld [vmem:[%s10737_s25 + $0x22c] ss:$16 sps:$4 sm:$0xff]  }
 0x202   : > { %7125 = vmatpush1.bf16.msra.mxu0 %v9854_v31  ;;  %v9908_v31 = vld [vmem:[%s10737_s25 + $0x4c] ss:$16 sps:$4 sm:$0xff]  }
 0x203   : > { %7166 = vmatpush1.bf16.msra.mxu1 %v9857_v32  ;;  %7126 = vmatprep.subr.bf16.mxu0 %v9862_v34  ;;  %v9911_v32 = vld [vmem:[%s10737_s25 + $0x24c] ss:$16 sps:$4 sm:$0xff]   ;;  %v9906_v34 = vld [vmem:[%s10737_s25 + $0x48] ss:$16 sps:$4 sm:$0xff]  }
 0x204   : > { %7167 = vmatprep.subr.bf16.mxu1 %v9865_v36  ;;  %v9909_v36 = vld [vmem:[%s10737_s25 + $0x248] ss:$16 sps:$4 sm:$0xff]  }
 0x206   : > { %7127 = vmatpush1.bf16.msra.mxu0 %v9860_v43  ;;  %v9914_v43 = vld [vmem:[%s10737_s25 + $0x6c] ss:$16 sps:$4 sm:$0xff]  }
 0x207   : > { %7168 = vmatpush1.bf16.msra.mxu1 %v9863_v55  ;;  %7128 = vmatprep.subr.bf16.mxu0 %v9868_v33  ;;  %v9917_v55 = vld [vmem:[%s10737_s25 + $0x26c] ss:$16 sps:$4 sm:$0xff]   ;;  %v9915_v33 = vld [vmem:[%s10737_s25 + $0x268] ss:$16 sps:$4 sm:$0xff]  }
 0x208   : > { %7169 = vmatprep.subr.bf16.mxu1 %v9871_v56  ;;  %v9923_v56 = vld [vmem:[%s10737_s25 + $0x28c] ss:$16 sps:$4 sm:$0xff]  }
 0x20a   : > { %7129 = vmatpush1.bf16.msra.mxu0 %v9866_v45  ;;  %v9918_v45 = vld [vmem:[%s10737_s25 + $0x88] ss:$16 sps:$4 sm:$0xff]  }
 0x20b   : > { %7170 = vmatpush1.bf16.msra.mxu1 %v9869_v58  ;;  %7130 = vmatprep.subr.bf16.mxu0 %v9874_v1  ;;  %v9921_v58 = vld [vmem:[%s10737_s25 + $0x288] ss:$16 sps:$4 sm:$0xff]   ;;  %v9926_v1 = vld [vmem:[%s10737_s25 + $0xac] ss:$16 sps:$4 sm:$0xff]  }
 0x20c   : > { %7171 = vmatprep.subr.bf16.mxu1 %v9877_v2  ;;  %v9929_v2 = vld [vmem:[%s10737_s25 + $0x2ac] ss:$16 sps:$4 sm:$0xff]  }
 0x20e   : > { %7131 = vmatpush1.bf16.msra.mxu0 %v9872_v5  ;;  %v9924_v5 = vld [vmem:[%s10737_s25 + $0xa8] ss:$16 sps:$4 sm:$0xff]  }
 0x20f   : > { %7172 = vmatpush1.bf16.msra.mxu1 %v9875_v6  ;;  %7132 = vmatprep.subr.bf16.mxu0 %v9880_v10  ;;  %v9927_v6 = vld [vmem:[%s10737_s25 + $0x2a8] ss:$16 sps:$4 sm:$0xff]   ;;  %v9932_v10 = vld [vmem:[%s10737_s25 + $0xcc] ss:$16 sps:$4 sm:$0xff]  }
 0x210   : > { %7173 = vmatprep.subr.bf16.mxu1 %v9883_v11  ;;  %v9935_v11 = vld [vmem:[%s10737_s25 + $0x2cc] ss:$16 sps:$4 sm:$0xff]  }
 0x212   : > { %7133 = vmatpush1.bf16.msra.mxu0 %v9878_v35 }
 0x213   : > { %7174 = vmatpush1.bf16.msra.mxu1 %v9881_v12  ;;  %7134 = vmatprep.subr.bf16.mxu0 %v9886_v57  ;;  %v9930_v57 = vld [vmem:[%s10737_s25 + $0xc8] ss:$16 sps:$4 sm:$0xff]  }
 0x214   : > { %7175 = vmatprep.subr.bf16.mxu1 %v9889_v14  ;;  %v9933_v14 = vld [vmem:[%s10737_s25 + $0x2c8] ss:$16 sps:$4 sm:$0xff]  }
 0x216   : > { %7135 = vmatpush1.bf16.msra.mxu0 %v9884_v15 }
 0x217   : > { %7176 = vmatpush1.bf16.msra.mxu1 %v9887_v16  ;;  %7186 = vmatprep.subr.bf16.mxu0 %v9896_v19 }
 0x218   : > { %7227 = vmatprep.subr.bf16.mxu1 %v9899_v20 }
 0x219   : > { %7137 = vmatmul.mubr.bf16.vlgmr.msra.gmra.mrb[28].mxu0 %v11478_v27 }
 0x21a   : > { %7178 = vmatmul.mubr.bf16.vlgmr.msra.gmra.mrb[28].mxu1 %v11482_v28  ;;  %7187 = vmatpush1.bf16.msra.mxu0 %v9894_v21 }
 0x21b   : > { %7228 = vmatpush1.bf16.msra.mxu1 %v9897_v22  ;;  %7188 = vmatprep.subr.bf16.mxu0 %v9902_v29 }
 0x21c   : > { %7229 = vmatprep.subr.bf16.mxu1 %v9905_v30  ;;  %7218 = vmatprep.mubr.bf16.mxu0 %v10799_v48  ;;  %v9912_v48 = vld [vmem:[%s10737_s25 + $0x68] ss:$16 sps:$4 sm:$0xff]  }
 0x21d   : > { %7259 = vmatprep.mubr.bf16.mxu1 %v10804_v52  ;;  %v9920_v52 = vld [vmem:[%s10737_s25 + $0x8c] ss:$16 sps:$4 sm:$0xff]  }
 0x21e   : > { %7189 = vmatpush1.bf16.msra.mxu0 %v9900_v63 }
 0x21f   : > { %7230 = vmatpush1.bf16.msra.mxu1 %v9903_v0  ;;  %7190 = vmatprep.subr.bf16.mxu0 %v9908_v31  ;;  %v9941_v0 = vld [vmem:[%s10737_s25 + $0x2ec] ss:$16 sps:$4 sm:$0xff]  }
 0x220   : > { %7231 = vmatprep.subr.bf16.mxu1 %v9911_v32  ;;  %v9939_v32 = vld [vmem:[%s10737_s25 + $0x2e8] ss:$16 sps:$4 sm:$0xff]  }
 0x222   : > { %7191 = vmatpush1.bf16.msra.mxu0 %v9906_v34  ;;  %v9944_v34 = vld [vmem:[%s10737_s25 + $0x10c] ss:$16 sps:$4 sm:$0xff]  }
 0x223   : > { %7232 = vmatpush1.bf16.msra.mxu1 %v9909_v36  ;;  %7192 = vmatprep.subr.bf16.mxu0 %v9914_v43  ;;  %v9947_v36 = vld [vmem:[%s10737_s25 + $0x30c] ss:$16 sps:$4 sm:$0xff]   ;;  %v9942_v43 = vld [vmem:[%s10737_s25 + $0x108] ss:$16 sps:$4 sm:$0xff]  }
 0x224   : > { %7233 = vmatprep.subr.bf16.mxu1 %v9917_v55  ;;  %v9945_v55 = vld [vmem:[%s10737_s25 + $0x308] ss:$16 sps:$4 sm:$0xff]  }
 0x226   : > { %7193 = vmatpush1.bf16.msra.mxu0 %v9912_v48  ;;  %v9950_v48 = vld [vmem:[%s10737_s25 + $0x12c] ss:$16 sps:$4 sm:$0xff]  }
 0x227   : > { %7234 = vmatpush1.bf16.msra.mxu1 %v9915_v33  ;;  %7194 = vmatprep.subr.bf16.mxu0 %v9920_v52  ;;  %v9953_v33 = vld [vmem:[%s10737_s25 + $0x32c] ss:$16 sps:$4 sm:$0xff]   ;;  %v9948_v52 = vld [vmem:[%s10737_s25 + $0x128] ss:$16 sps:$4 sm:$0xff]  }
 0x228   : > { %7235 = vmatprep.subr.bf16.mxu1 %v9923_v56  ;;  %v9951_v56 = vld [vmem:[%s10737_s25 + $0x328] ss:$16 sps:$4 sm:$0xff]  }
 0x22a   : > { %7195 = vmatpush1.bf16.msra.mxu0 %v9918_v45  ;;  %v9956_v45 = vld [vmem:[%s10737_s25 + $0x14c] ss:$16 sps:$4 sm:$0xff]  }
 0x22b   : > { %7236 = vmatpush1.bf16.msra.mxu1 %v9921_v58  ;;  %7196 = vmatprep.subr.bf16.mxu0 %v9926_v1  ;;  %v9959_v58 = vld [vmem:[%s10737_s25 + $0x34c] ss:$16 sps:$4 sm:$0xff]   ;;  %v9954_v1 = vld [vmem:[%s10737_s25 + $0x148] ss:$16 sps:$4 sm:$0xff]  }
 0x22c   : > { %7237 = vmatprep.subr.bf16.mxu1 %v9929_v2  ;;  %v6892_v35 = vpop.f32.mrb[16].mxu0  ;;  %v9957_v2 = vld [vmem:[%s10737_s25 + $0x348] ss:$16 sps:$4 sm:$0xff]  }
 0x22d   : > { %v6933_v12 = vpop.f32.mrb[16].mxu1  ;;  %v6893_v15 = vadd.f32 %v6892_v35, %v11432_v54  ;;  %v6894_v16 = vpop.f32.mrb[17].mxu0  ;;  %v9938_v54 = vld [vmem:[%s10737_s25 + $0xec] ss:$16 sps:$4 sm:$0xff]  }
 0x22e   : > { %v6935_v19 = vpop.f32.mrb[17].mxu1  ;;  %v6895_v20 = vadd.f32 %v6894_v16, %v11436_v13  ;;  %v6896_v21 = vpop.f32.mrb[18].mxu0  ;;  %7197 = vmatpush1.bf16.msra.mxu0 %v9924_v5  ;;  %v9936_v13 = vld [vmem:[%s10737_s25 + $0xe8] ss:$16 sps:$4 sm:$0xff]   ;;  %v9962_v5 = vld [vmem:[%s10737_s25 + $0x16c] ss:$16 sps:$4 sm:$0xff]  }
 0x22f   : > { %v6937_v22 = vpop.f32.mrb[18].mxu1  ;;  %7238 = vmatpush1.bf16.msra.mxu1 %v9927_v6  ;;  %v11514_v29 = vadd.f32 %v6933_v12, %v6893_v15  ;;  %v6897_v30 = vpop.f32.mrb[19].mxu0  ;;  %7198 = vmatprep.subr.bf16.mxu0 %v9932_v10  ;;  %v9965_v6 = vld [vmem:[%s10737_s25 + $0x36c] ss:$16 sps:$4 sm:$0xff]   ;;  %v9960_v10 = vld [vmem:[%s10737_s25 + $0x168] ss:$16 sps:$4 sm:$0xff]  }
 0x230   : > { %v6938_v63 = vpop.f32.mrb[19].mxu1  ;;  %7239 = vmatprep.subr.bf16.mxu1 %v9935_v11  ;;  %v11518_v31 = vadd.f32 %v6935_v19, %v6895_v20  ;;  %v9963_v11 = vld [vmem:[%s10737_s25 + $0x368] ss:$16 sps:$4 sm:$0xff]   ;;  %v9968_v35 = vld [vmem:[%s10737_s25 + $0x18c] ss:$16 sps:$4 sm:$0xff]  }
 0x231   : > { %v9971_v12 = vld [vmem:[%s10737_s25 + $0x38c] ss:$16 sps:$4 sm:$0xff]   ;;  %v9972_v19 = vld [vmem:[%s10737_s25 + $0x1a8] ss:$16 sps:$4 sm:$0xff]  }
 0x232   : > { %7199 = vmatpush1.bf16.msra.mxu0 %v9930_v57  ;;  %v9966_v57 = vld [vmem:[%s10737_s25 + $0x188] ss:$16 sps:$4 sm:$0xff]   ;;  %v9974_v15 = vld [vmem:[%s10737_s25 + $0x1ac] ss:$16 sps:$4 sm:$0xff]  }
 0x233   : > { %7240 = vmatpush1.bf16.msra.mxu1 %v9933_v14  ;;  %7200 = vmatprep.subr.bf16.mxu0 %v9938_v54  ;;  %v9969_v14 = vld [vmem:[%s10737_s25 + $0x388] ss:$16 sps:$4 sm:$0xff]   ;;  %v9977_v16 = vld [vmem:[%s10737_s25 + $0x3ac] ss:$16 sps:$4 sm:$0xff]  }
 0x234   : > { %7241 = vmatprep.subr.bf16.mxu1 %v9941_v0  ;;  %v9975_v20 = vld [vmem:[%s10737_s25 + $0x3a8] ss:$16 sps:$4 sm:$0xff]   ;;  %v9980_v21 = vld [vmem:[%s10737_s25 + $0x1cc] ss:$16 sps:$4 sm:$0xff]  }
 0x235   : > { %v9983_v22 = vld [vmem:[%s10737_s25 + $0x3cc] ss:$16 sps:$4 sm:$0xff]   ;;  %v9978_v30 = vld [vmem:[%s10737_s25 + $0x1c8] ss:$16 sps:$4 sm:$0xff]  }
 0x236   : > { %7201 = vmatpush1.bf16.msra.mxu0 %v9936_v13  ;;  %v9981_v63 = vld [vmem:[%s10737_s25 + $0x3c8] ss:$16 sps:$4 sm:$0xff]   ;;  %v9986_v54 = vld [vmem:[%s10737_s25 + $0x1ec] ss:$16 sps:$4 sm:$0xff]  }
 0x237   : > { %7242 = vmatpush1.bf16.msra.mxu1 %v9939_v32  ;;  %7202 = vmatprep.subr.bf16.mxu0 %v9944_v34  ;;  %v9989_v0 = vld [vmem:[%s10737_s25 + $0x3ec] ss:$16 sps:$4 sm:$0xff]   ;;  %v9984_v13 = vld [vmem:[%s10737_s25 + $0x1e8] ss:$16 sps:$4 sm:$0xff]  }
 0x238   : > { %7243 = vmatprep.subr.bf16.mxu1 %v9947_v36  ;;  %v9987_v32 = vld [vmem:[%s10737_s25 + $0x3e8] ss:$16 sps:$4 sm:$0xff]   ;;  %v9992_v34 = vld [vmem:[%s10737_s25 + $0x40c] ss:$16 sps:$4 sm:$0xff]  }
 0x239   : > { %v9995_v36 = vld [vmem:[%s10737_s25 + $0x60c] ss:$16 sps:$4 sm:$0xff]  }
 0x23a   : > { %7203 = vmatpush1.bf16.msra.mxu0 %v9942_v43  ;;  %v9990_v43 = vld [vmem:[%s10737_s25 + $0x408] ss:$16 sps:$4 sm:$0xff]  }
 0x23b   : > { %7244 = vmatpush1.bf16.msra.mxu1 %v9945_v55  ;;  %7204 = vmatprep.subr.bf16.mxu0 %v9950_v48  ;;  %v9993_v55 = vld [vmem:[%s10737_s25 + $0x608] ss:$16 sps:$4 sm:$0xff]   ;;  %v9998_v48 = vld [vmem:[%s10737_s25 + $0x42c] ss:$16 sps:$4 sm:$0xff]  }
 0x23c   : > { %7245 = vmatprep.subr.bf16.mxu1 %v9953_v33  ;;  %v10001_v33 = vld [vmem:[%s10737_s25 + $0x62c] ss:$16 sps:$4 sm:$0xff]  }
 0x23e   : > { %7205 = vmatpush1.bf16.msra.mxu0 %v9948_v52  ;;  %v9996_v52 = vld [vmem:[%s10737_s25 + $0x428] ss:$16 sps:$4 sm:$0xff]  }
 0x23f   : > { %7246 = vmatpush1.bf16.msra.mxu1 %v9951_v56  ;;  %7206 = vmatprep.subr.bf16.mxu0 %v9956_v45  ;;  %v9999_v56 = vld [vmem:[%s10737_s25 + $0x628] ss:$16 sps:$4 sm:$0xff]   ;;  %v10004_v45 = vld [vmem:[%s10737_s25 + $0x44c] ss:$16 sps:$4 sm:$0xff]  }
 0x240   : > { %7247 = vmatprep.subr.bf16.mxu1 %v9959_v58  ;;  %v10007_v58 = vld [vmem:[%s10737_s25 + $0x64c] ss:$16 sps:$4 sm:$0xff]  }
 0x242   : > { %7207 = vmatpush1.bf16.msra.mxu0 %v9954_v1  ;;  %v10010_v1 = vld [vmem:[%s10737_s25 + $0x46c] ss:$16 sps:$4 sm:$0xff]  }
 0x243   : > { %7248 = vmatpush1.bf16.msra.mxu1 %v9957_v2  ;;  %7208 = vmatprep.subr.bf16.mxu0 %v9962_v5  ;;  %v10013_v2 = vld [vmem:[%s10737_s25 + $0x66c] ss:$16 sps:$4 sm:$0xff]   ;;  %v10008_v5 = vld [vmem:[%s10737_s25 + $0x468] ss:$16 sps:$4 sm:$0xff]  }
 0x244   : > { %7249 = vmatprep.subr.bf16.mxu1 %v9965_v6  ;;  %v10019_v6 = vld [vmem:[%s10737_s25 + $0x68c] ss:$16 sps:$4 sm:$0xff]  }
 0x246   : > { %7209 = vmatpush1.bf16.msra.mxu0 %v9960_v10  ;;  %v10014_v10 = vld [vmem:[%s10737_s25 + $0x488] ss:$16 sps:$4 sm:$0xff]  }
 0x247   : > { %7250 = vmatpush1.bf16.msra.mxu1 %v9963_v11  ;;  %7210 = vmatprep.subr.bf16.mxu0 %v9968_v35  ;;  %v10017_v11 = vld [vmem:[%s10737_s25 + $0x688] ss:$16 sps:$4 sm:$0xff]   ;;  %v10022_v35 = vld [vmem:[%s10737_s25 + $0x4ac] ss:$16 sps:$4 sm:$0xff]  }
 0x248   : > { %7251 = vmatprep.subr.bf16.mxu1 %v9971_v12  ;;  %v10025_v12 = vld [vmem:[%s10737_s25 + $0x6ac] ss:$16 sps:$4 sm:$0xff]  }
 0x24a   : > { %7211 = vmatpush1.bf16.msra.mxu0 %v9966_v57  ;;  %v10020_v57 = vld [vmem:[%s10737_s25 + $0x4a8] ss:$16 sps:$4 sm:$0xff]  }
 0x24b   : > { %7252 = vmatpush1.bf16.msra.mxu1 %v9969_v14  ;;  %7212 = vmatprep.subr.bf16.mxu0 %v9974_v15  ;;  %v10023_v14 = vld [vmem:[%s10737_s25 + $0x6a8] ss:$16 sps:$4 sm:$0xff]   ;;  %v10028_v15 = vld [vmem:[%s10737_s25 + $0x4cc] ss:$16 sps:$4 sm:$0xff]  }
 0x24c   : > { %7253 = vmatprep.subr.bf16.mxu1 %v9977_v16  ;;  %v10031_v16 = vld [vmem:[%s10737_s25 + $0x6cc] ss:$16 sps:$4 sm:$0xff]  }
 0x24e   : > { %7213 = vmatpush1.bf16.msra.mxu0 %v9972_v19 }
 0x24f   : > { %7254 = vmatpush1.bf16.msra.mxu1 %v9975_v20  ;;  %7214 = vmatprep.subr.bf16.mxu0 %v9980_v21 }
 0x250   : > { %7255 = vmatprep.subr.bf16.mxu1 %v9983_v22 }
 0x252   : > { %7215 = vmatpush1.bf16.msra.mxu0 %v9978_v30 }
 0x253   : > { %7256 = vmatpush1.bf16.msra.mxu1 %v9981_v63  ;;  %7216 = vmatprep.subr.bf16.mxu0 %v9986_v54 }
 0x254   : > { %7257 = vmatprep.subr.bf16.mxu1 %v9989_v0 }
 0x256   : > { %7217 = vmatpush1.bf16.msra.mxu0 %v9984_v13  ;;  %v10026_v13 = vld [vmem:[%s10737_s25 + $0x4c8] ss:$16 sps:$4 sm:$0xff]  }
 0x257   : > { %7258 = vmatpush1.bf16.msra.mxu1 %v9987_v32  ;;  %7268 = vmatprep.subr.bf16.mxu0 %v9992_v34  ;;  %v10029_v32 = vld [vmem:[%s10737_s25 + $0x6c8] ss:$16 sps:$4 sm:$0xff]  }
 0x258   : > { %7309 = vmatprep.subr.bf16.mxu1 %v9995_v36 }
 0x259   : > { %7219 = vmatmul.mubr.bf16.vlgmr.msra.gmra.mrb[32].mxu0 %v10826_v7  ;;  %v10002_v7 = vld [vmem:[%s10737_s25 + $0x448] ss:$16 sps:$4 sm:$0xff]  }
 0x25a   : > { %7260 = vmatmul.mubr.bf16.vlgmr.msra.gmra.mrb[32].mxu1 %v10828_v8  ;;  %7269 = vmatpush1.bf16.msra.mxu0 %v9990_v43  ;;  %v10005_v8 = vld [vmem:[%s10737_s25 + $0x648] ss:$16 sps:$4 sm:$0xff]  }
 0x25b   : > { %7310 = vmatpush1.bf16.msra.mxu1 %v9993_v55  ;;  %7270 = vmatprep.subr.bf16.mxu0 %v9998_v48  ;;  %v10032_v48 = vld [vmem:[%s10737_s25 + $0x4e8] ss:$16 sps:$4 sm:$0xff]  }
 0x25c   : > { %7311 = vmatprep.subr.bf16.mxu1 %v10001_v33  ;;  %7300 = vmatprep.mubr.bf16.mxu0 %v10866_v37  ;;  %v10011_v37 = vld [vmem:[%s10737_s25 + $0x668] ss:$16 sps:$4 sm:$0xff]  }
 0x25d   : > { %7341 = vmatprep.mubr.bf16.mxu1 %v10870_v38  ;;  %v10016_v38 = vld [vmem:[%s10737_s25 + $0x48c] ss:$16 sps:$4 sm:$0xff]   ;;  %v10035_v33 = vld [vmem:[%s10737_s25 + $0x6e8] ss:$16 sps:$4 sm:$0xff]  }
 0x25e   : > { %7271 = vmatpush1.bf16.msra.mxu0 %v9996_v52  ;;  %v10040_v52 = vld [vmem:[%s10737_s25 + $0x50c] ss:$16 sps:$4 sm:$0xff]  }
 0x25f   : > { %7312 = vmatpush1.bf16.msra.mxu1 %v9999_v56  ;;  %7272 = vmatprep.subr.bf16.mxu0 %v10004_v45  ;;  %v10043_v56 = vld [vmem:[%s10737_s25 + $0x70c] ss:$16 sps:$4 sm:$0xff]   ;;  %v10038_v45 = vld [vmem:[%s10737_s25 + $0x508] ss:$16 sps:$4 sm:$0xff]  }
 0x260   : > { %7313 = vmatprep.subr.bf16.mxu1 %v10007_v58  ;;  %v10041_v58 = vld [vmem:[%s10737_s25 + $0x708] ss:$16 sps:$4 sm:$0xff]  }
 0x262   : > { %7273 = vmatpush1.bf16.msra.mxu0 %v10002_v7  ;;  %v10046_v7 = vld [vmem:[%s10737_s25 + $0x52c] ss:$16 sps:$4 sm:$0xff]  }
 0x263   : > { %7314 = vmatpush1.bf16.msra.mxu1 %v10005_v8  ;;  %7274 = vmatprep.subr.bf16.mxu0 %v10010_v1  ;;  %v10049_v8 = vld [vmem:[%s10737_s25 + $0x72c] ss:$16 sps:$4 sm:$0xff]   ;;  %v10044_v1 = vld [vmem:[%s10737_s25 + $0x528] ss:$16 sps:$4 sm:$0xff]  }
 0x264   : > { %7315 = vmatprep.subr.bf16.mxu1 %v10013_v2  ;;  %v10047_v2 = vld [vmem:[%s10737_s25 + $0x728] ss:$16 sps:$4 sm:$0xff]  }
 0x266   : > { %7275 = vmatpush1.bf16.msra.mxu0 %v10008_v5  ;;  %v10052_v5 = vld [vmem:[%s10737_s25 + $0x54c] ss:$16 sps:$4 sm:$0xff]  }
 0x267   : > { %7316 = vmatpush1.bf16.msra.mxu1 %v10011_v37  ;;  %7276 = vmatprep.subr.bf16.mxu0 %v10016_v38  ;;  %v10055_v37 = vld [vmem:[%s10737_s25 + $0x74c] ss:$16 sps:$4 sm:$0xff]   ;;  %v10050_v38 = vld [vmem:[%s10737_s25 + $0x548] ss:$16 sps:$4 sm:$0xff]  }
 0x268   : > { %7317 = vmatprep.subr.bf16.mxu1 %v10019_v6  ;;  %v10053_v6 = vld [vmem:[%s10737_s25 + $0x748] ss:$16 sps:$4 sm:$0xff]  }
 0x26a   : > { %7277 = vmatpush1.bf16.msra.mxu0 %v10014_v10  ;;  %v10058_v10 = vld [vmem:[%s10737_s25 + $0x56c] ss:$16 sps:$4 sm:$0xff]  }
 0x26b   : > { %7318 = vmatpush1.bf16.msra.mxu1 %v10017_v11  ;;  %7278 = vmatprep.subr.bf16.mxu0 %v10022_v35  ;;  %v10061_v11 = vld [vmem:[%s10737_s25 + $0x76c] ss:$16 sps:$4 sm:$0xff]   ;;  %v10056_v35 = vld [vmem:[%s10737_s25 + $0x568] ss:$16 sps:$4 sm:$0xff]  }
 0x26c   : > { %7319 = vmatprep.subr.bf16.mxu1 %v10025_v12  ;;  %v6974_v19 = vpop.f32.mrb[20].mxu0  ;;  %v10059_v12 = vld [vmem:[%s10737_s25 + $0x768] ss:$16 sps:$4 sm:$0xff]  }
 0x26d   : > { %v7015_v20 = vpop.f32.mrb[20].mxu1  ;;  %v6975_v21 = vadd.f32 %v6974_v19, %v11514_v29  ;;  %v6976_v22 = vpop.f32.mrb[21].mxu0  ;;  %v10034_v29 = vld [vmem:[%s10737_s25 + $0x4ec] ss:$16 sps:$4 sm:$0xff]  }
 0x26e   : > { %v7017_v30 = vpop.f32.mrb[21].mxu1  ;;  %v6977_v63 = vadd.f32 %v6976_v22, %v11518_v31  ;;  %v6978_v54 = vpop.f32.mrb[22].mxu0  ;;  %7279 = vmatpush1.bf16.msra.mxu0 %v10020_v57  ;;  %v10037_v31 = vld [vmem:[%s10737_s25 + $0x6ec] ss:$16 sps:$4 sm:$0xff]   ;;  %v10071_v22 = vld [vmem:[%s10737_s25 + $0x7a8] ss:$16 sps:$4 sm:$0xff]  }
 0x26f   : > { %v7019_v0 = vpop.f32.mrb[22].mxu1  ;;  %7320 = vmatpush1.bf16.msra.mxu1 %v10023_v14  ;;  %v11588_v34 = vadd.f32 %v7015_v20, %v6975_v21  ;;  %v6979_v36 = vpop.f32.mrb[23].mxu0  ;;  %7280 = vmatprep.subr.bf16.mxu0 %v10028_v15  ;;  %v10064_v57 = vld [vmem:[%s10737_s25 + $0x58c] ss:$16 sps:$4 sm:$0xff]   ;;  %v10062_v15 = vld [vmem:[%s10737_s25 + $0x588] ss:$16 sps:$4 sm:$0xff]  }
 0x270   : > { %v7020_v43 = vpop.f32.mrb[23].mxu1  ;;  %7321 = vmatprep.subr.bf16.mxu1 %v10031_v16  ;;  %v11592_v55 = vadd.f32 %v7017_v30, %v6977_v63  ;;  %v10067_v14 = vld [vmem:[%s10737_s25 + $0x78c] ss:$16 sps:$4 sm:$0xff]   ;;  %v10065_v16 = vld [vmem:[%s10737_s25 + $0x788] ss:$16 sps:$4 sm:$0xff]  }
 0x271   : > { %v10070_v19 = vld [vmem:[%s10737_s25 + $0x5ac] ss:$16 sps:$4 sm:$0xff]   ;;  %v10068_v21 = vld [vmem:[%s10737_s25 + $0x5a8] ss:$16 sps:$4 sm:$0xff]  }
 0x272   : > { %7281 = vmatpush1.bf16.msra.mxu0 %v10026_v13  ;;  %v10073_v20 = vld [vmem:[%s10737_s25 + $0x7ac] ss:$16 sps:$4 sm:$0xff]   ;;  %v10074_v54 = vld [vmem:[%s10737_s25 + $0x5c8] ss:$16 sps:$4 sm:$0xff]  }
 0x273   : > { %7322 = vmatpush1.bf16.msra.mxu1 %v10029_v32  ;;  %7282 = vmatprep.subr.bf16.mxu0 %v10034_v29  ;;  %v10076_v30 = vld [vmem:[%s10737_s25 + $0x5cc] ss:$16 sps:$4 sm:$0xff]   ;;  %v10077_v0 = vld [vmem:[%s10737_s25 + $0x7c8] ss:$16 sps:$4 sm:$0xff]  }
 0x274   : > { %7323 = vmatprep.subr.bf16.mxu1 %v10037_v31  ;;  %v10079_v63 = vld [vmem:[%s10737_s25 + $0x7cc] ss:$16 sps:$4 sm:$0xff]   ;;  %v10080_v36 = vld [vmem:[%s10737_s25 + $0x5e8] ss:$16 sps:$4 sm:$0xff]  }
 0x275   : > { %v10082_v13 = vld [vmem:[%s10737_s25 + $0x5ec] ss:$16 sps:$4 sm:$0xff]   ;;  %v10083_v43 = vld [vmem:[%s10737_s25 + $0x7e8] ss:$16 sps:$4 sm:$0xff]  }
 0x276   : > { %7283 = vmatpush1.bf16.msra.mxu0 %v10032_v48  ;;  %v10085_v32 = vld [vmem:[%s10737_s25 + $0x7ec] ss:$16 sps:$4 sm:$0xff]   ;;  %v10086_v48 = vld [vmem:[%s10737_s25 + $0x808] ss:$16 sps:$4 sm:$0xff]  }
 0x277   : > { %7324 = vmatpush1.bf16.msra.mxu1 %v10035_v33  ;;  %7284 = vmatprep.subr.bf16.mxu0 %v10040_v52  ;;  %v10088_v29 = vld [vmem:[%s10737_s25 + $0x80c] ss:$16 sps:$4 sm:$0xff]   ;;  %v10089_v33 = vld [vmem:[%s10737_s25 + $0xa08] ss:$16 sps:$4 sm:$0xff]  }
 0x278   : > { %7325 = vmatprep.subr.bf16.mxu1 %v10043_v56  ;;  %v10091_v31 = vld [vmem:[%s10737_s25 + $0xa0c] ss:$16 sps:$4 sm:$0xff]  }
 0x279   : > { %v10094_v52 = vld [vmem:[%s10737_s25 + $0x82c] ss:$16 sps:$4 sm:$0xff]  }
 0x27a   : > { %7285 = vmatpush1.bf16.msra.mxu0 %v10038_v45  ;;  %v10097_v56 = vld [vmem:[%s10737_s25 + $0xa2c] ss:$16 sps:$4 sm:$0xff]   ;;  %v10092_v45 = vld [vmem:[%s10737_s25 + $0x828] ss:$16 sps:$4 sm:$0xff]  }
 0x27b   : > { %7326 = vmatpush1.bf16.msra.mxu1 %v10041_v58  ;;  %7286 = vmatprep.subr.bf16.mxu0 %v10046_v7  ;;  %v10095_v58 = vld [vmem:[%s10737_s25 + $0xa28] ss:$16 sps:$4 sm:$0xff]   ;;  %v10100_v7 = vld [vmem:[%s10737_s25 + $0x84c] ss:$16 sps:$4 sm:$0xff]  }
 0x27c   : > { %7327 = vmatprep.subr.bf16.mxu1 %v10049_v8  ;;  %v10103_v8 = vld [vmem:[%s10737_s25 + $0xa4c] ss:$16 sps:$4 sm:$0xff]  }
 0x27e   : > { %7287 = vmatpush1.bf16.msra.mxu0 %v10044_v1  ;;  %v10106_v1 = vld [vmem:[%s10737_s25 + $0x86c] ss:$16 sps:$4 sm:$0xff]  }
 0x27f   : > { %7328 = vmatpush1.bf16.msra.mxu1 %v10047_v2  ;;  %7288 = vmatprep.subr.bf16.mxu0 %v10052_v5  ;;  %v10109_v2 = vld [vmem:[%s10737_s25 + $0xa6c] ss:$16 sps:$4 sm:$0xff]   ;;  %v10104_v5 = vld [vmem:[%s10737_s25 + $0x868] ss:$16 sps:$4 sm:$0xff]  }
 0x280   : > { %7329 = vmatprep.subr.bf16.mxu1 %v10055_v37  ;;  %v10115_v37 = vld [vmem:[%s10737_s25 + $0xa8c] ss:$16 sps:$4 sm:$0xff]  }
 0x282   : > { %7289 = vmatpush1.bf16.msra.mxu0 %v10050_v38  ;;  %v10110_v38 = vld [vmem:[%s10737_s25 + $0x888] ss:$16 sps:$4 sm:$0xff]  }
 0x283   : > { %7330 = vmatpush1.bf16.msra.mxu1 %v10053_v6  ;;  %7290 = vmatprep.subr.bf16.mxu0 %v10058_v10  ;;  %v10113_v6 = vld [vmem:[%s10737_s25 + $0xa88] ss:$16 sps:$4 sm:$0xff]   ;;  %v10118_v10 = vld [vmem:[%s10737_s25 + $0x8ac] ss:$16 sps:$4 sm:$0xff]  }
 0x284   : > { %7331 = vmatprep.subr.bf16.mxu1 %v10061_v11  ;;  %v10121_v11 = vld [vmem:[%s10737_s25 + $0xaac] ss:$16 sps:$4 sm:$0xff]  }
 0x286   : > { %7291 = vmatpush1.bf16.msra.mxu0 %v10056_v35  ;;  %v10116_v35 = vld [vmem:[%s10737_s25 + $0x8a8] ss:$16 sps:$4 sm:$0xff]  }
 0x287   : > { %7332 = vmatpush1.bf16.msra.mxu1 %v10059_v12  ;;  %7292 = vmatprep.subr.bf16.mxu0 %v10064_v57  ;;  %v10119_v12 = vld [vmem:[%s10737_s25 + $0xaa8] ss:$16 sps:$4 sm:$0xff]   ;;  %v10124_v57 = vld [vmem:[%s10737_s25 + $0x8cc] ss:$16 sps:$4 sm:$0xff]  }
 0x288   : > { %7333 = vmatprep.subr.bf16.mxu1 %v10067_v14  ;;  %v10127_v14 = vld [vmem:[%s10737_s25 + $0xacc] ss:$16 sps:$4 sm:$0xff]  }
 0x28a   : > { %7293 = vmatpush1.bf16.msra.mxu0 %v10062_v15 }
 0x28b   : > { %7334 = vmatpush1.bf16.msra.mxu1 %v10065_v16  ;;  %7294 = vmatprep.subr.bf16.mxu0 %v10070_v19 }
 0x28c   : > { %7335 = vmatprep.subr.bf16.mxu1 %v10073_v20 }
 0x28e   : > { %7295 = vmatpush1.bf16.msra.mxu0 %v10068_v21 }
 0x28f   : > { %7336 = vmatpush1.bf16.msra.mxu1 %v10071_v22  ;;  %7296 = vmatprep.subr.bf16.mxu0 %v10076_v30 }
 0x290   : > { %7337 = vmatprep.subr.bf16.mxu1 %v10079_v63 }
 0x292   : > { %7297 = vmatpush1.bf16.msra.mxu0 %v10074_v54  ;;  %v10122_v54 = vld [vmem:[%s10737_s25 + $0x8c8] ss:$16 sps:$4 sm:$0xff]  }
 0x293   : > { %7338 = vmatpush1.bf16.msra.mxu1 %v10077_v0  ;;  %7298 = vmatprep.subr.bf16.mxu0 %v10082_v13  ;;  %v10125_v0 = vld [vmem:[%s10737_s25 + $0xac8] ss:$16 sps:$4 sm:$0xff]  }
 0x294   : > { %7339 = vmatprep.subr.bf16.mxu1 %v10085_v32 }
 0x296   : > { %7299 = vmatpush1.bf16.msra.mxu0 %v10080_v36 }
 0x297   : > { %7340 = vmatpush1.bf16.msra.mxu1 %v10083_v43  ;;  %7350 = vmatprep.subr.bf16.mxu0 %v10088_v29  ;;  %v10128_v29 = vld [vmem:[%s10737_s25 + $0x8e8] ss:$16 sps:$4 sm:$0xff]  }
 0x298   : > { %7391 = vmatprep.subr.bf16.mxu1 %v10091_v31  ;;  %v10131_v31 = vld [vmem:[%s10737_s25 + $0xae8] ss:$16 sps:$4 sm:$0xff]  }
 0x299   : > { %7301 = vmatmul.mubr.bf16.vlgmr.msra.gmra.mrb[36].mxu0 %v10914_v17  ;;  %v10098_v17 = vld [vmem:[%s10737_s25 + $0x848] ss:$16 sps:$4 sm:$0xff]  }
 0x29a   : > { %7342 = vmatmul.mubr.bf16.vlgmr.msra.gmra.mrb[36].mxu1 %v10918_v18  ;;  %7351 = vmatpush1.bf16.msra.mxu0 %v10086_v48  ;;  %v10101_v18 = vld [vmem:[%s10737_s25 + $0xa48] ss:$16 sps:$4 sm:$0xff]   ;;  %v10136_v48 = vld [vmem:[%s10737_s25 + $0x90c] ss:$16 sps:$4 sm:$0xff]  }
 0x29b   : > { %7392 = vmatpush1.bf16.msra.mxu1 %v10089_v33  ;;  %7352 = vmatprep.subr.bf16.mxu0 %v10094_v52  ;;  %v10139_v33 = vld [vmem:[%s10737_s25 + $0xb0c] ss:$16 sps:$4 sm:$0xff]   ;;  %v10134_v52 = vld [vmem:[%s10737_s25 + $0x908] ss:$16 sps:$4 sm:$0xff]  }
 0x29c   : > { %7393 = vmatprep.subr.bf16.mxu1 %v10097_v56  ;;  %7382 = vmatprep.mubr.bf16.mxu0 %v10932_v25  ;;  %v10107_v25 = vld [vmem:[%s10737_s25 + $0xa68] ss:$16 sps:$4 sm:$0xff]  }
 0x29d   : > { %7423 = vmatprep.mubr.bf16.mxu1 %v10936_v26  ;;  %v10112_v26 = vld [vmem:[%s10737_s25 + $0x88c] ss:$16 sps:$4 sm:$0xff]   ;;  %v10137_v56 = vld [vmem:[%s10737_s25 + $0xb08] ss:$16 sps:$4 sm:$0xff]  }
 0x29e   : > { %7353 = vmatpush1.bf16.msra.mxu0 %v10092_v45  ;;  %v10142_v45 = vld [vmem:[%s10737_s25 + $0x92c] ss:$16 sps:$4 sm:$0xff]  }
 0x29f   : > { %7394 = vmatpush1.bf16.msra.mxu1 %v10095_v58  ;;  %7354 = vmatprep.subr.bf16.mxu0 %v10100_v7  ;;  %v10145_v58 = vld [vmem:[%s10737_s25 + $0xb2c] ss:$16 sps:$4 sm:$0xff]   ;;  %v10140_v7 = vld [vmem:[%s10737_s25 + $0x928] ss:$16 sps:$4 sm:$0xff]  }
 0x2a0   : > { %7395 = vmatprep.subr.bf16.mxu1 %v10103_v8  ;;  %v10143_v8 = vld [vmem:[%s10737_s25 + $0xb28] ss:$16 sps:$4 sm:$0xff]  }
 0x2a2   : > { %7355 = vmatpush1.bf16.msra.mxu0 %v10098_v17  ;;  %v10148_v17 = vld [vmem:[%s10737_s25 + $0x94c] ss:$16 sps:$4 sm:$0xff]  }
 0x2a3   : > { %7396 = vmatpush1.bf16.msra.mxu1 %v10101_v18  ;;  %7356 = vmatprep.subr.bf16.mxu0 %v10106_v1  ;;  %v10151_v18 = vld [vmem:[%s10737_s25 + $0xb4c] ss:$16 sps:$4 sm:$0xff]   ;;  %v10146_v1 = vld [vmem:[%s10737_s25 + $0x948] ss:$16 sps:$4 sm:$0xff]  }
 0x2a4   : > { %7397 = vmatprep.subr.bf16.mxu1 %v10109_v2  ;;  %v10149_v2 = vld [vmem:[%s10737_s25 + $0xb48] ss:$16 sps:$4 sm:$0xff]  }
 0x2a6   : > { %7357 = vmatpush1.bf16.msra.mxu0 %v10104_v5  ;;  %v10154_v5 = vld [vmem:[%s10737_s25 + $0x96c] ss:$16 sps:$4 sm:$0xff]  }
 0x2a7   : > { %7398 = vmatpush1.bf16.msra.mxu1 %v10107_v25  ;;  %7358 = vmatprep.subr.bf16.mxu0 %v10112_v26  ;;  %v10157_v25 = vld [vmem:[%s10737_s25 + $0xb6c] ss:$16 sps:$4 sm:$0xff]   ;;  %v10152_v26 = vld [vmem:[%s10737_s25 + $0x968] ss:$16 sps:$4 sm:$0xff]  }
 0x2a8   : > { %7399 = vmatprep.subr.bf16.mxu1 %v10115_v37  ;;  %v10155_v37 = vld [vmem:[%s10737_s25 + $0xb68] ss:$16 sps:$4 sm:$0xff]  }
 0x2aa   : > { %7359 = vmatpush1.bf16.msra.mxu0 %v10110_v38  ;;  %v10160_v38 = vld [vmem:[%s10737_s25 + $0x98c] ss:$16 sps:$4 sm:$0xff]  }
 0x2ab   : > { %7400 = vmatpush1.bf16.msra.mxu1 %v10113_v6  ;;  %7360 = vmatprep.subr.bf16.mxu0 %v10118_v10  ;;  %v10163_v6 = vld [vmem:[%s10737_s25 + $0xb8c] ss:$16 sps:$4 sm:$0xff]   ;;  %v10158_v10 = vld [vmem:[%s10737_s25 + $0x988] ss:$16 sps:$4 sm:$0xff]  }
 0x2ac   : > { %7401 = vmatprep.subr.bf16.mxu1 %v10121_v11  ;;  %v7056_v15 = vpop.f32.mrb[24].mxu0  ;;  %v10161_v11 = vld [vmem:[%s10737_s25 + $0xb88] ss:$16 sps:$4 sm:$0xff]  }
 0x2ad   : > { %v7097_v16 = vpop.f32.mrb[24].mxu1  ;;  %v7057_v19 = vadd.f32 %v7056_v15, %v11588_v34  ;;  %v7058_v20 = vpop.f32.mrb[25].mxu0  ;;  %v10130_v34 = vld [vmem:[%s10737_s25 + $0x8ec] ss:$16 sps:$4 sm:$0xff]  }
 0x2ae   : > { %v7099_v21 = vpop.f32.mrb[25].mxu1  ;;  %v7059_v22 = vadd.f32 %v7058_v20, %v11592_v55  ;;  %v7060_v30 = vpop.f32.mrb[26].mxu0  ;;  %7361 = vmatpush1.bf16.msra.mxu0 %v10116_v35  ;;  %v10133_v55 = vld [vmem:[%s10737_s25 + $0xaec] ss:$16 sps:$4 sm:$0xff]   ;;  %v10173_v20 = vld [vmem:[%s10737_s25 + $0xbc8] ss:$16 sps:$4 sm:$0xff]  }
 0x2af   : > { %v7101_v63 = vpop.f32.mrb[26].mxu1  ;;  %7402 = vmatpush1.bf16.msra.mxu1 %v10119_v12  ;;  %v11662_v13 = vadd.f32 %v7097_v16, %v7057_v19  ;;  %v7061_v32 = vpop.f32.mrb[27].mxu0  ;;  %7362 = vmatprep.subr.bf16.mxu0 %v10124_v57  ;;  %v10166_v35 = vld [vmem:[%s10737_s25 + $0x9ac] ss:$16 sps:$4 sm:$0xff]   ;;  %v10164_v57 = vld [vmem:[%s10737_s25 + $0x9a8] ss:$16 sps:$4 sm:$0xff]  }
 0x2b0   : > { %v7102_v36 = vpop.f32.mrb[27].mxu1  ;;  %7403 = vmatprep.subr.bf16.mxu1 %v10127_v14  ;;  %v11666_v43 = vadd.f32 %v7099_v21, %v7059_v22  ;;  %v10169_v12 = vld [vmem:[%s10737_s25 + $0xbac] ss:$16 sps:$4 sm:$0xff]   ;;  %v10167_v14 = vld [vmem:[%s10737_s25 + $0xba8] ss:$16 sps:$4 sm:$0xff]  }
 0x2b1   : > { %v10172_v15 = vld [vmem:[%s10737_s25 + $0x9cc] ss:$16 sps:$4 sm:$0xff]   ;;  %v10170_v19 = vld [vmem:[%s10737_s25 + $0x9c8] ss:$16 sps:$4 sm:$0xff]  }
 0x2b2   : > { %7363 = vmatpush1.bf16.msra.mxu0 %v10122_v54  ;;  %v10175_v16 = vld [vmem:[%s10737_s25 + $0xbcc] ss:$16 sps:$4 sm:$0xff]   ;;  %v10176_v30 = vld [vmem:[%s10737_s25 + $0x9e8] ss:$16 sps:$4 sm:$0xff]  }
 0x2b3   : > { %7404 = vmatpush1.bf16.msra.mxu1 %v10125_v0  ;;  %7364 = vmatprep.subr.bf16.mxu0 %v10130_v34  ;;  %v10178_v21 = vld [vmem:[%s10737_s25 + $0x9ec] ss:$16 sps:$4 sm:$0xff]   ;;  %v10179_v63 = vld [vmem:[%s10737_s25 + $0xbe8] ss:$16 sps:$4 sm:$0xff]  }
 0x2b4   : > { %7405 = vmatprep.subr.bf16.mxu1 %v10133_v55  ;;  %v10181_v22 = vld [vmem:[%s10737_s25 + $0xbec] ss:$16 sps:$4 sm:$0xff]   ;;  %v10182_v32 = vld [vmem:[%s10737_s25 + $0xc08] ss:$16 sps:$4 sm:$0xff]  }
 0x2b5   : > { %v10184_v54 = vld [vmem:[%s10737_s25 + $0xc0c] ss:$16 sps:$4 sm:$0xff]   ;;  %v10185_v36 = vld [vmem:[%s10737_s25 + $0xe08] ss:$16 sps:$4 sm:$0xff]  }
 0x2b6   : > { %7365 = vmatpush1.bf16.msra.mxu0 %v10128_v29  ;;  %v10187_v0 = vld [vmem:[%s10737_s25 + $0xe0c] ss:$16 sps:$4 sm:$0xff]   ;;  %v10188_v29 = vld [vmem:[%s10737_s25 + $0xc28] ss:$16 sps:$4 sm:$0xff]  }
 0x2b7   : > { %7406 = vmatpush1.bf16.msra.mxu1 %v10131_v31  ;;  %7366 = vmatprep.subr.bf16.mxu0 %v10136_v48  ;;  %v10190_v34 = vld [vmem:[%s10737_s25 + $0xc2c] ss:$16 sps:$4 sm:$0xff]   ;;  %v10191_v31 = vld [vmem:[%s10737_s25 + $0xe28] ss:$16 sps:$4 sm:$0xff]  }
 0x2b8   : > { %7407 = vmatprep.subr.bf16.mxu1 %v10139_v33  ;;  %v10193_v55 = vld [vmem:[%s10737_s25 + $0xe2c] ss:$16 sps:$4 sm:$0xff]  }
 0x2b9   : > { %v10196_v48 = vld [vmem:[%s10737_s25 + $0xc4c] ss:$16 sps:$4 sm:$0xff]  }
 0x2ba   : > { %7367 = vmatpush1.bf16.msra.mxu0 %v10134_v52  ;;  %v10199_v33 = vld [vmem:[%s10737_s25 + $0xe4c] ss:$16 sps:$4 sm:$0xff]  }
 0x2bb   : > { %7408 = vmatpush1.bf16.msra.mxu1 %v10137_v56  ;;  %7368 = vmatprep.subr.bf16.mxu0 %v10142_v45  ;;  %v10202_v52 = vld [vmem:[%s10737_s25 + $0xc6c] ss:$16 sps:$4 sm:$0xff]   ;;  %v10200_v45 = vld [vmem:[%s10737_s25 + $0xc68] ss:$16 sps:$4 sm:$0xff]  }
 0x2bc   : > { %7409 = vmatprep.subr.bf16.mxu1 %v10145_v58  ;;  %v10205_v56 = vld [vmem:[%s10737_s25 + $0xe6c] ss:$16 sps:$4 sm:$0xff]  }
 0x2bd   : > { %v10211_v58 = vld [vmem:[%s10737_s25 + $0xe8c] ss:$16 sps:$4 sm:$0xff]  }
 0x2be   : > { %7369 = vmatpush1.bf16.msra.mxu0 %v10140_v7  ;;  %v10206_v7 = vld [vmem:[%s10737_s25 + $0xc88] ss:$16 sps:$4 sm:$0xff]  }
 0x2bf   : > { %7410 = vmatpush1.bf16.msra.mxu1 %v10143_v8  ;;  %7370 = vmatprep.subr.bf16.mxu0 %v10148_v17  ;;  %v10209_v8 = vld [vmem:[%s10737_s25 + $0xe88] ss:$16 sps:$4 sm:$0xff]   ;;  %v10214_v17 = vld [vmem:[%s10737_s25 + $0xcac] ss:$16 sps:$4 sm:$0xff]  }
 0x2c0   : > { %7411 = vmatprep.subr.bf16.mxu1 %v10151_v18  ;;  %v10217_v18 = vld [vmem:[%s10737_s25 + $0xeac] ss:$16 sps:$4 sm:$0xff]  }
 0x2c2   : > { %7371 = vmatpush1.bf16.msra.mxu0 %v10146_v1  ;;  %v10212_v1 = vld [vmem:[%s10737_s25 + $0xca8] ss:$16 sps:$4 sm:$0xff]  }
 0x2c3   : > { %7412 = vmatpush1.bf16.msra.mxu1 %v10149_v2  ;;  %7372 = vmatprep.subr.bf16.mxu0 %v10154_v5  ;;  %v10215_v2 = vld [vmem:[%s10737_s25 + $0xea8] ss:$16 sps:$4 sm:$0xff]   ;;  %v10220_v5 = vld [vmem:[%s10737_s25 + $0xccc] ss:$16 sps:$4 sm:$0xff]  }
 0x2c4   : > { %7413 = vmatprep.subr.bf16.mxu1 %v10157_v25  ;;  %v10223_v25 = vld [vmem:[%s10737_s25 + $0xecc] ss:$16 sps:$4 sm:$0xff]  }
 0x2c6   : > { %7373 = vmatpush1.bf16.msra.mxu0 %v10152_v26 }
 0x2c7   : > { %7414 = vmatpush1.bf16.msra.mxu1 %v10155_v37  ;;  %7374 = vmatprep.subr.bf16.mxu0 %v10160_v38 }
 0x2c8   : > { %7415 = vmatprep.subr.bf16.mxu1 %v10163_v6 }
 0x2ca   : > { %7375 = vmatpush1.bf16.msra.mxu0 %v10158_v10 }
 0x2cb   : > { %7416 = vmatpush1.bf16.msra.mxu1 %v10161_v11  ;;  %7376 = vmatprep.subr.bf16.mxu0 %v10166_v35  ;;  %v10218_v11 = vld [vmem:[%s10737_s25 + $0xcc8] ss:$16 sps:$4 sm:$0xff]   ;;  %v254_v35 = vld [vmem:[%s12134_s3] sm:$0xff] }
 0x2cc   : > { %7417 = vmatprep.subr.bf16.mxu1 %v10169_v12 }
 0x2ce   : > { %7377 = vmatpush1.bf16.msra.mxu0 %v10164_v57  ;;  %v255_v57 = vld [vmem:[%s12134_s3 + $0x8] sm:$0xff] }
 0x2cf   : > { %7418 = vmatpush1.bf16.msra.mxu1 %v10167_v14  ;;  %7378 = vmatprep.subr.bf16.mxu0 %v10172_v15 }
 0x2d0   : > { %7419 = vmatprep.subr.bf16.mxu1 %v10175_v16 }
 0x2d2   : > { %7379 = vmatpush1.bf16.msra.mxu0 %v10170_v19 }
 0x2d3   : > { %7420 = vmatpush1.bf16.msra.mxu1 %v10173_v20  ;;  %7380 = vmatprep.subr.bf16.mxu0 %v10178_v21  ;;  %v10226_v21 = vld [vmem:[%s10737_s25 + $0xcec] ss:$16 sps:$4 sm:$0xff]  }
 0x2d4   : > { %7421 = vmatprep.subr.bf16.mxu1 %v10181_v22 }
 0x2d6   : > { %7381 = vmatpush1.bf16.msra.mxu0 %v10176_v30 }
 0x2d7   : > { %7422 = vmatpush1.bf16.msra.mxu1 %v10179_v63  ;;  %7432 = vmatprep.subr.bf16.mxu0 %v10184_v54  ;;  %v10224_v54 = vld [vmem:[%s10737_s25 + $0xce8] ss:$16 sps:$4 sm:$0xff]  }
 0x2d8   : > { %7473 = vmatprep.subr.bf16.mxu1 %v10187_v0  ;;  %v10227_v0 = vld [vmem:[%s10737_s25 + $0xee8] ss:$16 sps:$4 sm:$0xff]  }
 0x2d9   : > { %7383 = vmatmul.mubr.bf16.vlgmr.msra.gmra.mrb[40].mxu0 %v11006_v39  ;;  %v10194_v39 = vld [vmem:[%s10737_s25 + $0xc48] ss:$16 sps:$4 sm:$0xff]  }
 0x2da   : > { %7424 = vmatmul.mubr.bf16.vlgmr.msra.gmra.mrb[40].mxu1 %v11010_v40  ;;  %7433 = vmatpush1.bf16.msra.mxu0 %v10182_v32  ;;  %v10197_v40 = vld [vmem:[%s10737_s25 + $0xe48] ss:$16 sps:$4 sm:$0xff]   ;;  %v10232_v32 = vld [vmem:[%s10737_s25 + $0xd0c] ss:$16 sps:$4 sm:$0xff]  }
 0x2db   : > { %7474 = vmatpush1.bf16.msra.mxu1 %v10185_v36  ;;  %7434 = vmatprep.subr.bf16.mxu0 %v10190_v34  ;;  %v10235_v36 = vld [vmem:[%s10737_s25 + $0xf0c] ss:$16 sps:$4 sm:$0xff]   ;;  %v10230_v34 = vld [vmem:[%s10737_s25 + $0xd08] ss:$16 sps:$4 sm:$0xff]  }
 0x2dc   : > { %7475 = vmatprep.subr.bf16.mxu1 %v10193_v55  ;;  %7464 = vmatprep.mubr.bf16.mxu0 %v11022_v23  ;;  %v10203_v23 = vld [vmem:[%s10737_s25 + $0xe68] ss:$16 sps:$4 sm:$0xff]  }
 0x2dd   : > { %7505 = vmatprep.mubr.bf16.mxu1 %v11026_v24  ;;  %v10208_v24 = vld [vmem:[%s10737_s25 + $0xc8c] ss:$16 sps:$4 sm:$0xff]   ;;  %v10233_v55 = vld [vmem:[%s10737_s25 + $0xf08] ss:$16 sps:$4 sm:$0xff]  }
 0x2de   : > { %7435 = vmatpush1.bf16.msra.mxu0 %v10188_v29  ;;  %v10238_v29 = vld [vmem:[%s10737_s25 + $0xd2c] ss:$16 sps:$4 sm:$0xff]  }
 0x2df   : > { %7476 = vmatpush1.bf16.msra.mxu1 %v10191_v31  ;;  %7436 = vmatprep.subr.bf16.mxu0 %v10196_v48  ;;  %v10241_v31 = vld [vmem:[%s10737_s25 + $0xf2c] ss:$16 sps:$4 sm:$0xff]   ;;  %v10236_v48 = vld [vmem:[%s10737_s25 + $0xd28] ss:$16 sps:$4 sm:$0xff]  }
 0x2e0   : > { %7477 = vmatprep.subr.bf16.mxu1 %v10199_v33  ;;  %v10239_v33 = vld [vmem:[%s10737_s25 + $0xf28] ss:$16 sps:$4 sm:$0xff]  }
 0x2e2   : > { %7437 = vmatpush1.bf16.msra.mxu0 %v10194_v39  ;;  %v10244_v39 = vld [vmem:[%s10737_s25 + $0xd4c] ss:$16 sps:$4 sm:$0xff]  }
 0x2e3   : > { %7478 = vmatpush1.bf16.msra.mxu1 %v10197_v40  ;;  %7438 = vmatprep.subr.bf16.mxu0 %v10202_v52  ;;  %v10247_v40 = vld [vmem:[%s10737_s25 + $0xf4c] ss:$16 sps:$4 sm:$0xff]   ;;  %v10242_v52 = vld [vmem:[%s10737_s25 + $0xd48] ss:$16 sps:$4 sm:$0xff]  }
 0x2e4   : > { %7479 = vmatprep.subr.bf16.mxu1 %v10205_v56  ;;  %v10245_v56 = vld [vmem:[%s10737_s25 + $0xf48] ss:$16 sps:$4 sm:$0xff]  }
 0x2e6   : > { %7439 = vmatpush1.bf16.msra.mxu0 %v10200_v45  ;;  %v10250_v45 = vld [vmem:[%s10737_s25 + $0xd6c] ss:$16 sps:$4 sm:$0xff]  }
 0x2e7   : > { %7480 = vmatpush1.bf16.msra.mxu1 %v10203_v23  ;;  %7440 = vmatprep.subr.bf16.mxu0 %v10208_v24  ;;  %v10253_v23 = vld [vmem:[%s10737_s25 + $0xf6c] ss:$16 sps:$4 sm:$0xff]   ;;  %v10248_v24 = vld [vmem:[%s10737_s25 + $0xd68] ss:$16 sps:$4 sm:$0xff]  }
 0x2e8   : > { %7481 = vmatprep.subr.bf16.mxu1 %v10211_v58  ;;  %v10251_v58 = vld [vmem:[%s10737_s25 + $0xf68] ss:$16 sps:$4 sm:$0xff]  }
 0x2ea   : > { %7441 = vmatpush1.bf16.msra.mxu0 %v10206_v7  ;;  %v10256_v7 = vld [vmem:[%s10737_s25 + $0xd8c] ss:$16 sps:$4 sm:$0xff]  }
 0x2eb   : > { %7482 = vmatpush1.bf16.msra.mxu1 %v10209_v8  ;;  %7442 = vmatprep.subr.bf16.mxu0 %v10214_v17  ;;  %v10259_v8 = vld [vmem:[%s10737_s25 + $0xf8c] ss:$16 sps:$4 sm:$0xff]   ;;  %v10254_v17 = vld [vmem:[%s10737_s25 + $0xd88] ss:$16 sps:$4 sm:$0xff]  }
 0x2ec   : > { %7483 = vmatprep.subr.bf16.mxu1 %v10217_v18  ;;  %v7138_v26 = vpop.f32.mrb[28].mxu0  ;;  %v10257_v18 = vld [vmem:[%s10737_s25 + $0xf88] ss:$16 sps:$4 sm:$0xff]  }
 0x2ed   : > { %v7179_v37 = vpop.f32.mrb[28].mxu1  ;;  %v7139_v38 = vadd.f32 %v7138_v26, %v11662_v13  ;;  %v7140_v6 = vpop.f32.mrb[29].mxu0  ;;  %v10221_v13 = vld [vmem:[%s10737_s25 + $0xec8] ss:$16 sps:$4 sm:$0xff]   ;;  %v10268_v26 = vld [vmem:[%s10737_s25 + $0xdcc] ss:$16 sps:$4 sm:$0xff]  }
 0x2ee   : > { %v7181_v10 = vpop.f32.mrb[29].mxu1  ;;  %v7141_v12 = vadd.f32 %v7140_v6, %v11666_v43  ;;  %v7142_v14 = vpop.f32.mrb[30].mxu0  ;;  %7443 = vmatpush1.bf16.msra.mxu0 %v10212_v1  ;;  %v10229_v43 = vld [vmem:[%s10737_s25 + $0xeec] ss:$16 sps:$4 sm:$0xff]   ;;  %v10269_v6 = vld [vmem:[%s10737_s25 + $0xfc8] ss:$16 sps:$4 sm:$0xff]  }
 0x2ef   : > { %v7183_v15 = vpop.f32.mrb[30].mxu1  ;;  %7484 = vmatpush1.bf16.msra.mxu1 %v10215_v2  ;;  %v7180_v16 = vadd.f32 %v7179_v37, %v7139_v38  ;;  %v7143_v19 = vpop.f32.mrb[31].mxu0  ;;  %7444 = vmatprep.subr.bf16.mxu0 %v10220_v5  ;;  %v10262_v1 = vld [vmem:[%s10737_s25 + $0xdac] ss:$16 sps:$4 sm:$0xff]   ;;  %v10260_v5 = vld [vmem:[%s10737_s25 + $0xda8] ss:$16 sps:$4 sm:$0xff]  }
 0x2f0   : > { %v7184_v20 = vpop.f32.mrb[31].mxu1  ;;  %7485 = vmatprep.subr.bf16.mxu1 %v10223_v25  ;;  %v7182_v22 = vadd.f32 %v7181_v10, %v7141_v12  ;;  %v10265_v2 = vld [vmem:[%s10737_s25 + $0xfac] ss:$16 sps:$4 sm:$0xff]   ;;  %v10263_v25 = vld [vmem:[%s10737_s25 + $0xfa8] ss:$16 sps:$4 sm:$0xff]  }
 0x2f1   : > { %v7842_v30 = vadd.f32 %v7180_v16, %v254_v35  ;;  %v10271_v37 = vld [vmem:[%s10737_s25 + $0xfcc] ss:$16 sps:$4 sm:$0xff]   ;;  %v10266_v38 = vld [vmem:[%s10737_s25 + $0xdc8] ss:$16 sps:$4 sm:$0xff]  }
 0x2f2   : > { %v7843_v63 = vadd.f32 %v7182_v22, %v255_v57  ;;  %7445 = vmatpush1.bf16.msra.mxu0 %v10218_v11  ;;  %v10274_v10 = vld [vmem:[%s10737_s25 + $0xdec] ss:$16 sps:$4 sm:$0xff]   ;;  %v10272_v35 = vld [vmem:[%s10737_s25 + $0xde8] ss:$16 sps:$4 sm:$0xff]  }
 0x2f3   : > { %7486 = vmatpush1.bf16.msra.mxu1 %v10221_v13  ;;  %7846 = vst [vmem:[%s12134_s3] sm:$0xff] %v7842_v30  ;;  %7446 = vmatprep.subr.bf16.mxu0 %v10226_v21  ;;  %v10277_v11 = vld [vmem:[%s10737_s25 + $0xfec] ss:$16 sps:$4 sm:$0xff]   ;;  %v10275_v12 = vld [vmem:[%s10737_s25 + $0xfe8] ss:$16 sps:$4 sm:$0xff]  }
 0x2f4   : > { %7487 = vmatprep.subr.bf16.mxu1 %v10229_v43  ;;  %7847 = vst [vmem:[%s12134_s3 + $0x8] sm:$0xff] %v7843_v63  ;;  %v10280_v57 = vld [vmem:[%s10737_s25 + $0x100c] ss:$16 sps:$4 sm:$0xff]   ;;  %v10278_v15 = vld [vmem:[%s10737_s25 + $0x1008] ss:$16 sps:$4 sm:$0xff]  }
 0x2f5   : > { %v10283_v14 = vld [vmem:[%s10737_s25 + $0x120c] ss:$16 sps:$4 sm:$0xff]   ;;  %v10281_v13 = vld [vmem:[%s10737_s25 + $0x1208] ss:$16 sps:$4 sm:$0xff]  }
 0x2f6   : > { %7447 = vmatpush1.bf16.msra.mxu0 %v10224_v54  ;;  %v10286_v16 = vld [vmem:[%s10737_s25 + $0x102c] ss:$16 sps:$4 sm:$0xff]   ;;  %v10284_v20 = vld [vmem:[%s10737_s25 + $0x1028] ss:$16 sps:$4 sm:$0xff]  }
 0x2f7   : > { %7488 = vmatpush1.bf16.msra.mxu1 %v10227_v0  ;;  %7448 = vmatprep.subr.bf16.mxu0 %v10232_v32  ;;  %v10289_v19 = vld [vmem:[%s10737_s25 + $0x122c] ss:$16 sps:$4 sm:$0xff]   ;;  %v10287_v21 = vld [vmem:[%s10737_s25 + $0x1228] ss:$16 sps:$4 sm:$0xff]  }
 0x2f8   : > { %7489 = vmatprep.subr.bf16.mxu1 %v10235_v36  ;;  %v10292_v43 = vld [vmem:[%s10737_s25 + $0x104c] ss:$16 sps:$4 sm:$0xff]   ;;  %v10296_v54 = vld [vmem:[%s10737_s25 + $0x1068] ss:$16 sps:$4 sm:$0xff]  }
 0x2f9   : > { %v10295_v22 = vld [vmem:[%s10737_s25 + $0x124c] ss:$16 sps:$4 sm:$0xff]   ;;  %v10302_v32 = vld [vmem:[%s10737_s25 + $0x1088] ss:$16 sps:$4 sm:$0xff]  }
 0x2fa   : > { %7449 = vmatpush1.bf16.msra.mxu0 %v10230_v34  ;;  %v10298_v30 = vld [vmem:[%s10737_s25 + $0x106c] ss:$16 sps:$4 sm:$0xff]   ;;  %v10305_v36 = vld [vmem:[%s10737_s25 + $0x1288] ss:$16 sps:$4 sm:$0xff]  }
 0x2fb   : > { %7490 = vmatpush1.bf16.msra.mxu1 %v10233_v55  ;;  %7450 = vmatprep.subr.bf16.mxu0 %v10238_v29  ;;  %v10301_v63 = vld [vmem:[%s10737_s25 + $0x126c] ss:$16 sps:$4 sm:$0xff]   ;;  %v10308_v29 = vld [vmem:[%s10737_s25 + $0x10a8] ss:$16 sps:$4 sm:$0xff]  }
 0x2fc   : > { %7491 = vmatprep.subr.bf16.mxu1 %v10241_v31  ;;  %v10307_v0 = vld [vmem:[%s10737_s25 + $0x128c] ss:$16 sps:$4 sm:$0xff]   ;;  %v10311_v31 = vld [vmem:[%s10737_s25 + $0x12a8] ss:$16 sps:$4 sm:$0xff]  }
 0x2fd   : > { %v10310_v34 = vld [vmem:[%s10737_s25 + $0x10ac] ss:$16 sps:$4 sm:$0xff]  }
 0x2fe   : > { %7451 = vmatpush1.bf16.msra.mxu0 %v10236_v48  ;;  %v10313_v55 = vld [vmem:[%s10737_s25 + $0x12ac] ss:$16 sps:$4 sm:$0xff]  }
 0x2ff   : > { %7492 = vmatpush1.bf16.msra.mxu1 %v10239_v33  ;;  %7452 = vmatprep.subr.bf16.mxu0 %v10244_v39  ;;  %v10316_v48 = vld [vmem:[%s10737_s25 + $0x10cc] ss:$16 sps:$4 sm:$0xff]  }
 0x300   : > { %7493 = vmatprep.subr.bf16.mxu1 %v10247_v40  ;;  %v10319_v33 = vld [vmem:[%s10737_s25 + $0x12cc] ss:$16 sps:$4 sm:$0xff]  }
 0x302   : > { %7453 = vmatpush1.bf16.msra.mxu0 %v10242_v52 }
 0x303   : > { %7494 = vmatpush1.bf16.msra.mxu1 %v10245_v56  ;;  %7454 = vmatprep.subr.bf16.mxu0 %v10250_v45 }
 0x304   : > { %7495 = vmatprep.subr.bf16.mxu1 %v10253_v23 }
 0x306   : > { %7455 = vmatpush1.bf16.msra.mxu0 %v10248_v24 }
 0x307   : > { %7496 = vmatpush1.bf16.msra.mxu1 %v10251_v58  ;;  %7456 = vmatprep.subr.bf16.mxu0 %v10256_v7  ;;  %v10314_v7 = vld [vmem:[%s10737_s25 + $0x10c8] ss:$16 sps:$4 sm:$0xff]  }
 0x308   : > { %7497 = vmatprep.subr.bf16.mxu1 %v10259_v8  ;;  %v10317_v8 = vld [vmem:[%s10737_s25 + $0x12c8] ss:$16 sps:$4 sm:$0xff]  }
 0x30a   : > { %7457 = vmatpush1.bf16.msra.mxu0 %v10254_v17 }
 0x30b   : > { %7498 = vmatpush1.bf16.msra.mxu1 %v10257_v18  ;;  %7458 = vmatprep.subr.bf16.mxu0 %v10262_v1  ;;  %v10322_v1 = vld [vmem:[%s10737_s25 + $0x10ec] ss:$16 sps:$4 sm:$0xff]  }
 0x30c   : > { %7499 = vmatprep.subr.bf16.mxu1 %v10265_v2  ;;  %v10325_v2 = vld [vmem:[%s10737_s25 + $0x12ec] ss:$16 sps:$4 sm:$0xff]  }
 0x30e   : > { %7459 = vmatpush1.bf16.msra.mxu0 %v10260_v5  ;;  %v10320_v5 = vld [vmem:[%s10737_s25 + $0x10e8] ss:$16 sps:$4 sm:$0xff]  }
 0x30f   : > { %7500 = vmatpush1.bf16.msra.mxu1 %v10263_v25  ;;  %7460 = vmatprep.subr.bf16.mxu0 %v10268_v26  ;;  %v10323_v25 = vld [vmem:[%s10737_s25 + $0x12e8] ss:$16 sps:$4 sm:$0xff]   ;;  %v10328_v26 = vld [vmem:[%s10737_s25 + $0x110c] ss:$16 sps:$4 sm:$0xff]  }
 0x310   : > { %7501 = vmatprep.subr.bf16.mxu1 %v10271_v37  ;;  %v10331_v37 = vld [vmem:[%s10737_s25 + $0x130c] ss:$16 sps:$4 sm:$0xff]  }
 0x312   : > { %7461 = vmatpush1.bf16.msra.mxu0 %v10266_v38  ;;  %v10326_v38 = vld [vmem:[%s10737_s25 + $0x1108] ss:$16 sps:$4 sm:$0xff]  }
 0x313   : > { %7502 = vmatpush1.bf16.msra.mxu1 %v10269_v6  ;;  %7462 = vmatprep.subr.bf16.mxu0 %v10274_v10  ;;  %v10329_v6 = vld [vmem:[%s10737_s25 + $0x1308] ss:$16 sps:$4 sm:$0xff]   ;;  %v10334_v10 = vld [vmem:[%s10737_s25 + $0x112c] ss:$16 sps:$4 sm:$0xff]  }
 0x314   : > { %7503 = vmatprep.subr.bf16.mxu1 %v10277_v11  ;;  %v10337_v11 = vld [vmem:[%s10737_s25 + $0x132c] ss:$16 sps:$4 sm:$0xff]  }
 0x316   : > { %7463 = vmatpush1.bf16.msra.mxu0 %v10272_v35  ;;  %v10332_v35 = vld [vmem:[%s10737_s25 + $0x1128] ss:$16 sps:$4 sm:$0xff]  }
 0x317   : > { %7504 = vmatpush1.bf16.msra.mxu1 %v10275_v12  ;;  %7514 = vmatprep.subr.bf16.mxu0 %v10280_v57  ;;  %v10335_v12 = vld [vmem:[%s10737_s25 + $0x1328] ss:$16 sps:$4 sm:$0xff]   ;;  %v10340_v57 = vld [vmem:[%s10737_s25 + $0x114c] ss:$16 sps:$4 sm:$0xff]  }
 0x318   : > { %7555 = vmatprep.subr.bf16.mxu1 %v10283_v14  ;;  %v10343_v14 = vld [vmem:[%s10737_s25 + $0x134c] ss:$16 sps:$4 sm:$0xff]  }
 0x319   : > { %7465 = vmatmul.mubr.bf16.vlgmr.msra.gmra.mrb[44].mxu0 %v11097_v60  ;;  %v10290_v60 = vld [vmem:[%s10737_s25 + $0x1048] ss:$16 sps:$4 sm:$0xff]  }
 0x31a   : > { %7506 = vmatmul.mubr.bf16.vlgmr.msra.gmra.mrb[44].mxu1 %v11101_v61  ;;  %7515 = vmatpush1.bf16.msra.mxu0 %v10278_v15  ;;  %v10293_v61 = vld [vmem:[%s10737_s25 + $0x1248] ss:$16 sps:$4 sm:$0xff]  }
 0x31b   : > { %7556 = vmatpush1.bf16.msra.mxu1 %v10281_v13  ;;  %7516 = vmatprep.subr.bf16.mxu0 %v10286_v16  ;;  %v10338_v15 = vld [vmem:[%s10737_s25 + $0x1148] ss:$16 sps:$4 sm:$0xff]   ;;  %v10346_v16 = vld [vmem:[%s10737_s25 + $0x116c] ss:$16 sps:$4 sm:$0xff]  }
 0x31c   : > { %7557 = vmatprep.subr.bf16.mxu1 %v10289_v19  ;;  %7546 = vmatprep.mubr.bf16.mxu0 %v11112_v41  ;;  %v10299_v41 = vld [vmem:[%s10737_s25 + $0x1268] ss:$16 sps:$4 sm:$0xff]   ;;  %v10349_v19 = vld [vmem:[%s10737_s25 + $0x136c] ss:$16 sps:$4 sm:$0xff]  }
 0x31d   : > { %7587 = vmatprep.mubr.bf16.mxu1 %v11116_v42  ;;  %v10304_v42 = vld [vmem:[%s10737_s25 + $0x108c] ss:$16 sps:$4 sm:$0xff]   ;;  %v10341_v13 = vld [vmem:[%s10737_s25 + $0x1348] ss:$16 sps:$4 sm:$0xff]  }
 0x31e   : > { %7517 = vmatpush1.bf16.msra.mxu0 %v10284_v20  ;;  %v10344_v20 = vld [vmem:[%s10737_s25 + $0x1168] ss:$16 sps:$4 sm:$0xff]  }
 0x31f   : > { %7558 = vmatpush1.bf16.msra.mxu1 %v10287_v21  ;;  %7518 = vmatprep.subr.bf16.mxu0 %v10292_v43  ;;  %v10347_v21 = vld [vmem:[%s10737_s25 + $0x1368] ss:$16 sps:$4 sm:$0xff]   ;;  %v10352_v43 = vld [vmem:[%s10737_s25 + $0x118c] ss:$16 sps:$4 sm:$0xff]  }
 0x320   : > { %7559 = vmatprep.subr.bf16.mxu1 %v10295_v22  ;;  %v10355_v22 = vld [vmem:[%s10737_s25 + $0x138c] ss:$16 sps:$4 sm:$0xff]  }
 0x322   : > { %7519 = vmatpush1.bf16.msra.mxu0 %v10290_v60  ;;  %v10350_v60 = vld [vmem:[%s10737_s25 + $0x1188] ss:$16 sps:$4 sm:$0xff]  }
 0x323   : > { %7560 = vmatpush1.bf16.msra.mxu1 %v10293_v61  ;;  %7520 = vmatprep.subr.bf16.mxu0 %v10298_v30  ;;  %v10353_v61 = vld [vmem:[%s10737_s25 + $0x1388] ss:$16 sps:$4 sm:$0xff]   ;;  %v10358_v30 = vld [vmem:[%s10737_s25 + $0x11ac] ss:$16 sps:$4 sm:$0xff]  }
 0x324   : > { %7561 = vmatprep.subr.bf16.mxu1 %v10301_v63  ;;  %v10361_v63 = vld [vmem:[%s10737_s25 + $0x13ac] ss:$16 sps:$4 sm:$0xff]  }
 0x326   : > { %7521 = vmatpush1.bf16.msra.mxu0 %v10296_v54  ;;  %v10356_v54 = vld [vmem:[%s10737_s25 + $0x11a8] ss:$16 sps:$4 sm:$0xff]  }
 0x327   : > { %7562 = vmatpush1.bf16.msra.mxu1 %v10299_v41  ;;  %7522 = vmatprep.subr.bf16.mxu0 %v10304_v42  ;;  %v10359_v41 = vld [vmem:[%s10737_s25 + $0x13a8] ss:$16 sps:$4 sm:$0xff]   ;;  %v10364_v42 = vld [vmem:[%s10737_s25 + $0x11cc] ss:$16 sps:$4 sm:$0xff]  }
 0x328   : > { %7563 = vmatprep.subr.bf16.mxu1 %v10307_v0  ;;  %v10367_v0 = vld [vmem:[%s10737_s25 + $0x13cc] ss:$16 sps:$4 sm:$0xff]  }
 0x32a   : > { %7523 = vmatpush1.bf16.msra.mxu0 %v10302_v32  ;;  %v10362_v32 = vld [vmem:[%s10737_s25 + $0x11c8] ss:$16 sps:$4 sm:$0xff]  }
 0x32b   : > { %7564 = vmatpush1.bf16.msra.mxu1 %v10305_v36  ;;  %7524 = vmatprep.subr.bf16.mxu0 %v10310_v34  ;;  %v10365_v36 = vld [vmem:[%s10737_s25 + $0x13c8] ss:$16 sps:$4 sm:$0xff]   ;;  %v10370_v34 = vld [vmem:[%s10737_s25 + $0x11ec] ss:$16 sps:$4 sm:$0xff]  }
 0x32c   : > { %7565 = vmatprep.subr.bf16.mxu1 %v10313_v55  ;;  %v7220_v39 = vpop.f32.mrb[32].mxu0  ;;  %v10373_v55 = vld [vmem:[%s10737_s25 + $0x13ec] ss:$16 sps:$4 sm:$0xff]  }
 0x32d   : > { %v7261_v40 = vpop.f32.mrb[32].mxu1  ;;  %v7222_v56 = vpop.f32.mrb[33].mxu0 }
 0x32e   : > { %v11814_v52 = vadd.f32 %v7261_v40, %v7220_v39  ;;  %v7263_v45 = vpop.f32.mrb[33].mxu1  ;;  %v7224_v24 = vpop.f32.mrb[34].mxu0  ;;  %7525 = vmatpush1.bf16.msra.mxu0 %v10308_v29  ;;  %v10368_v29 = vld [vmem:[%s10737_s25 + $0x11e8] ss:$16 sps:$4 sm:$0xff]  }
 0x32f   : > { %v11816_v23 = vadd.f32 %v7263_v45, %v7222_v56  ;;  %v7265_v58 = vpop.f32.mrb[34].mxu1  ;;  %7566 = vmatpush1.bf16.msra.mxu1 %v10311_v31  ;;  %v7225_v17 = vpop.f32.mrb[35].mxu0  ;;  %7526 = vmatprep.subr.bf16.mxu0 %v10316_v48  ;;  %v10371_v31 = vld [vmem:[%s10737_s25 + $0x13e8] ss:$16 sps:$4 sm:$0xff]   ;;  %v10376_v48 = vld [vmem:[%s10737_s25 + $0x140c] ss:$16 sps:$4 sm:$0xff]  }
 0x330   : > { %v7266_v18 = vpop.f32.mrb[35].mxu1  ;;  %7567 = vmatprep.subr.bf16.mxu1 %v10319_v33  ;;  %v10379_v33 = vld [vmem:[%s10737_s25 + $0x160c] ss:$16 sps:$4 sm:$0xff]   ;;  %v10374_v39 = vld [vmem:[%s10737_s25 + $0x1408] ss:$16 sps:$4 sm:$0xff]  }
 0x331   : > { %v10377_v40 = vld [vmem:[%s10737_s25 + $0x1608] ss:$16 sps:$4 sm:$0xff]   ;;  %v10382_v56 = vld [vmem:[%s10737_s25 + $0x142c] ss:$16 sps:$4 sm:$0xff]  }
 0x332   : > { %7527 = vmatpush1.bf16.msra.mxu0 %v10314_v7  ;;  %v10385_v45 = vld [vmem:[%s10737_s25 + $0x162c] ss:$16 sps:$4 sm:$0xff]   ;;  %v10380_v24 = vld [vmem:[%s10737_s25 + $0x1428] ss:$16 sps:$4 sm:$0xff]  }
 0x333   : > { %7568 = vmatpush1.bf16.msra.mxu1 %v10317_v8  ;;  %7528 = vmatprep.subr.bf16.mxu0 %v10322_v1  ;;  %v10383_v58 = vld [vmem:[%s10737_s25 + $0x1628] ss:$16 sps:$4 sm:$0xff]   ;;  %v10388_v7 = vld [vmem:[%s10737_s25 + $0x144c] ss:$16 sps:$4 sm:$0xff]  }
 0x334   : > { %7569 = vmatprep.subr.bf16.mxu1 %v10325_v2  ;;  %v10391_v8 = vld [vmem:[%s10737_s25 + $0x164c] ss:$16 sps:$4 sm:$0xff]   ;;  %v10392_v1 = vld [vmem:[%s10737_s25 + $0x1468] ss:$16 sps:$4 sm:$0xff]  }
 0x335   : > { %v10394_v17 = vld [vmem:[%s10737_s25 + $0x146c] ss:$16 sps:$4 sm:$0xff]  }
 0x336   : > { %7529 = vmatpush1.bf16.msra.mxu0 %v10320_v5  ;;  %v10397_v18 = vld [vmem:[%s10737_s25 + $0x166c] ss:$16 sps:$4 sm:$0xff]   ;;  %v10398_v5 = vld [vmem:[%s10737_s25 + $0x1488] ss:$16 sps:$4 sm:$0xff]  }
 0x337   : > { %7570 = vmatpush1.bf16.msra.mxu1 %v10323_v25  ;;  %7530 = vmatprep.subr.bf16.mxu0 %v10328_v26  ;;  %v10403_v2 = vld [vmem:[%s10737_s25 + $0x168c] ss:$16 sps:$4 sm:$0xff]   ;;  %v10401_v25 = vld [vmem:[%s10737_s25 + $0x1688] ss:$16 sps:$4 sm:$0xff]  }
 0x338   : > { %7571 = vmatprep.subr.bf16.mxu1 %v10331_v37  ;;  %v10406_v26 = vld [vmem:[%s10737_s25 + $0x14ac] ss:$16 sps:$4 sm:$0xff]  }
 0x339   : > { %v10409_v37 = vld [vmem:[%s10737_s25 + $0x16ac] ss:$16 sps:$4 sm:$0xff]  }
 0x33a   : > { %7531 = vmatpush1.bf16.msra.mxu0 %v10326_v38  ;;  %v10404_v38 = vld [vmem:[%s10737_s25 + $0x14a8] ss:$16 sps:$4 sm:$0xff]  }
 0x33b   : > { %7572 = vmatpush1.bf16.msra.mxu1 %v10329_v6  ;;  %7532 = vmatprep.subr.bf16.mxu0 %v10334_v10  ;;  %v10407_v6 = vld [vmem:[%s10737_s25 + $0x16a8] ss:$16 sps:$4 sm:$0xff]   ;;  %v10412_v10 = vld [vmem:[%s10737_s25 + $0x14cc] ss:$16 sps:$4 sm:$0xff]  }
 0x33c   : > { %7573 = vmatprep.subr.bf16.mxu1 %v10337_v11  ;;  %v10415_v11 = vld [vmem:[%s10737_s25 + $0x16cc] ss:$16 sps:$4 sm:$0xff]  }
 0x33e   : > { %7533 = vmatpush1.bf16.msra.mxu0 %v10332_v35 }
 0x33f   : > { %7574 = vmatpush1.bf16.msra.mxu1 %v10335_v12  ;;  %7534 = vmatprep.subr.bf16.mxu0 %v10340_v57 }
 0x340   : > { %7575 = vmatprep.subr.bf16.mxu1 %v10343_v14 }
 0x342   : > { %7535 = vmatpush1.bf16.msra.mxu0 %v10338_v15 }
 0x343   : > { %7576 = vmatpush1.bf16.msra.mxu1 %v10341_v13  ;;  %7536 = vmatprep.subr.bf16.mxu0 %v10346_v16 }
 0x344   : > { %7577 = vmatprep.subr.bf16.mxu1 %v10349_v19 }
 0x346   : > { %7537 = vmatpush1.bf16.msra.mxu0 %v10344_v20  ;;  %v10410_v20 = vld [vmem:[%s10737_s25 + $0x14c8] ss:$16 sps:$4 sm:$0xff]  }
 0x347   : > { %7578 = vmatpush1.bf16.msra.mxu1 %v10347_v21  ;;  %7538 = vmatprep.subr.bf16.mxu0 %v10352_v43  ;;  %v10413_v21 = vld [vmem:[%s10737_s25 + $0x16c8] ss:$16 sps:$4 sm:$0xff]  }
 0x348   : > { %7579 = vmatprep.subr.bf16.mxu1 %v10355_v22 }
 0x34a   : > { %7539 = vmatpush1.bf16.msra.mxu0 %v10350_v60 }
 0x34b   : > { %7580 = vmatpush1.bf16.msra.mxu1 %v10353_v61  ;;  %7540 = vmatprep.subr.bf16.mxu0 %v10358_v30  ;;  %v10416_v30 = vld [vmem:[%s10737_s25 + $0x14e8] ss:$16 sps:$4 sm:$0xff]  }
 0x34c   : > { %7581 = vmatprep.subr.bf16.mxu1 %v10361_v63  ;;  %v10419_v63 = vld [vmem:[%s10737_s25 + $0x16e8] ss:$16 sps:$4 sm:$0xff]  }
 0x34e   : > { %7541 = vmatpush1.bf16.msra.mxu0 %v10356_v54  ;;  %v10424_v54 = vld [vmem:[%s10737_s25 + $0x150c] ss:$16 sps:$4 sm:$0xff]  }
 0x34f   : > { %7582 = vmatpush1.bf16.msra.mxu1 %v10359_v41  ;;  %7542 = vmatprep.subr.bf16.mxu0 %v10364_v42  ;;  %v10427_v41 = vld [vmem:[%s10737_s25 + $0x170c] ss:$16 sps:$4 sm:$0xff]   ;;  %v10422_v42 = vld [vmem:[%s10737_s25 + $0x1508] ss:$16 sps:$4 sm:$0xff]  }
 0x350   : > { %7583 = vmatprep.subr.bf16.mxu1 %v10367_v0  ;;  %v10425_v0 = vld [vmem:[%s10737_s25 + $0x1708] ss:$16 sps:$4 sm:$0xff]  }
 0x352   : > { %7543 = vmatpush1.bf16.msra.mxu0 %v10362_v32  ;;  %v10430_v32 = vld [vmem:[%s10737_s25 + $0x152c] ss:$16 sps:$4 sm:$0xff]  }
 0x353   : > { %7584 = vmatpush1.bf16.msra.mxu1 %v10365_v36  ;;  %7544 = vmatprep.subr.bf16.mxu0 %v10370_v34  ;;  %v10433_v36 = vld [vmem:[%s10737_s25 + $0x172c] ss:$16 sps:$4 sm:$0xff]   ;;  %v10428_v34 = vld [vmem:[%s10737_s25 + $0x1528] ss:$16 sps:$4 sm:$0xff]  }
 0x354   : > { %7585 = vmatprep.subr.bf16.mxu1 %v10373_v55  ;;  %v10431_v55 = vld [vmem:[%s10737_s25 + $0x1728] ss:$16 sps:$4 sm:$0xff]  }
 0x356   : > { %7545 = vmatpush1.bf16.msra.mxu0 %v10368_v29  ;;  %v10436_v29 = vld [vmem:[%s10737_s25 + $0x154c] ss:$16 sps:$4 sm:$0xff]  }
 0x357   : > { %7586 = vmatpush1.bf16.msra.mxu1 %v10371_v31  ;;  %7596 = vmatprep.subr.bf16.mxu0 %v10376_v48  ;;  %v10439_v31 = vld [vmem:[%s10737_s25 + $0x174c] ss:$16 sps:$4 sm:$0xff]   ;;  %v10434_v48 = vld [vmem:[%s10737_s25 + $0x1548] ss:$16 sps:$4 sm:$0xff]  }
 0x358   : > { %7637 = vmatprep.subr.bf16.mxu1 %v10379_v33  ;;  %v10437_v33 = vld [vmem:[%s10737_s25 + $0x1748] ss:$16 sps:$4 sm:$0xff]  }
 0x359   : > { %7547 = vmatmul.mubr.bf16.vlgmr.msra.gmra.mrb[48].mxu0 %v11190_v47  ;;  %v10386_v47 = vld [vmem:[%s10737_s25 + $0x1448] ss:$16 sps:$4 sm:$0xff]  }
 0x35a   : > { %7588 = vmatmul.mubr.bf16.vlgmr.msra.gmra.mrb[48].mxu1 %v11194_v49  ;;  %7597 = vmatpush1.bf16.msra.mxu0 %v10374_v39  ;;  %v10389_v49 = vld [vmem:[%s10737_s25 + $0x1648] ss:$16 sps:$4 sm:$0xff]   ;;  %v10442_v39 = vld [vmem:[%s10737_s25 + $0x156c] ss:$16 sps:$4 sm:$0xff]  }
 0x35b   : > { %7638 = vmatpush1.bf16.msra.mxu1 %v10377_v40  ;;  %7598 = vmatprep.subr.bf16.mxu0 %v10382_v56  ;;  %v10445_v40 = vld [vmem:[%s10737_s25 + $0x176c] ss:$16 sps:$4 sm:$0xff]   ;;  %v10440_v56 = vld [vmem:[%s10737_s25 + $0x1568] ss:$16 sps:$4 sm:$0xff]  }
 0x35c   : > { %7639 = vmatprep.subr.bf16.mxu1 %v10385_v45  ;;  %7628 = vmatprep.mubr.bf16.mxu0 %v11206_v59  ;;  %v10395_v59 = vld [vmem:[%s10737_s25 + $0x1668] ss:$16 sps:$4 sm:$0xff]  }
 0x35d   : > { %7669 = vmatprep.mubr.bf16.mxu1 %v11210_v62  ;;  %v10400_v62 = vld [vmem:[%s10737_s25 + $0x148c] ss:$16 sps:$4 sm:$0xff]   ;;  %v10443_v45 = vld [vmem:[%s10737_s25 + $0x1768] ss:$16 sps:$4 sm:$0xff]  }
 0x35e   : > { %7599 = vmatpush1.bf16.msra.mxu0 %v10380_v24  ;;  %v10448_v24 = vld [vmem:[%s10737_s25 + $0x158c] ss:$16 sps:$4 sm:$0xff]  }
 0x35f   : > { %7640 = vmatpush1.bf16.msra.mxu1 %v10383_v58  ;;  %7600 = vmatprep.subr.bf16.mxu0 %v10388_v7  ;;  %v10451_v58 = vld [vmem:[%s10737_s25 + $0x178c] ss:$16 sps:$4 sm:$0xff]   ;;  %v10446_v7 = vld [vmem:[%s10737_s25 + $0x1588] ss:$16 sps:$4 sm:$0xff]  }
 0x360   : > { %7641 = vmatprep.subr.bf16.mxu1 %v10391_v8  ;;  %v10449_v8 = vld [vmem:[%s10737_s25 + $0x1788] ss:$16 sps:$4 sm:$0xff]  }
 0x362   : > { %7601 = vmatpush1.bf16.msra.mxu0 %v10386_v47  ;;  %v10454_v47 = vld [vmem:[%s10737_s25 + $0x15ac] ss:$16 sps:$4 sm:$0xff]  }
 0x363   : > { %7642 = vmatpush1.bf16.msra.mxu1 %v10389_v49  ;;  %7602 = vmatprep.subr.bf16.mxu0 %v10394_v17  ;;  %v10457_v49 = vld [vmem:[%s10737_s25 + $0x17ac] ss:$16 sps:$4 sm:$0xff]   ;;  %v10452_v17 = vld [vmem:[%s10737_s25 + $0x15a8] ss:$16 sps:$4 sm:$0xff]  }
 0x364   : > { %7643 = vmatprep.subr.bf16.mxu1 %v10397_v18  ;;  %v10455_v18 = vld [vmem:[%s10737_s25 + $0x17a8] ss:$16 sps:$4 sm:$0xff]  }
 0x366   : > { %7603 = vmatpush1.bf16.msra.mxu0 %v10392_v1  ;;  %v10460_v1 = vld [vmem:[%s10737_s25 + $0x15cc] ss:$16 sps:$4 sm:$0xff]  }
 0x367   : > { %7644 = vmatpush1.bf16.msra.mxu1 %v10395_v59  ;;  %7604 = vmatprep.subr.bf16.mxu0 %v10400_v62  ;;  %v10463_v59 = vld [vmem:[%s10737_s25 + $0x17cc] ss:$16 sps:$4 sm:$0xff]   ;;  %v10458_v62 = vld [vmem:[%s10737_s25 + $0x15c8] ss:$16 sps:$4 sm:$0xff]  }
 0x368   : > { %7645 = vmatprep.subr.bf16.mxu1 %v10403_v2  ;;  %v10461_v2 = vld [vmem:[%s10737_s25 + $0x17c8] ss:$16 sps:$4 sm:$0xff]  }
 0x36a   : > { %7605 = vmatpush1.bf16.msra.mxu0 %v10398_v5  ;;  %v10466_v5 = vld [vmem:[%s10737_s25 + $0x15ec] ss:$16 sps:$4 sm:$0xff]  }
 0x36b   : > { %7646 = vmatpush1.bf16.msra.mxu1 %v10401_v25  ;;  %7606 = vmatprep.subr.bf16.mxu0 %v10406_v26  ;;  %v10469_v25 = vld [vmem:[%s10737_s25 + $0x17ec] ss:$16 sps:$4 sm:$0xff]   ;;  %v10464_v26 = vld [vmem:[%s10737_s25 + $0x15e8] ss:$16 sps:$4 sm:$0xff]  }
 0x36c   : > { %7647 = vmatprep.subr.bf16.mxu1 %v10409_v37  ;;  %v7302_v35 = vpop.f32.mrb[36].mxu0  ;;  %v10467_v37 = vld [vmem:[%s10737_s25 + $0x17e8] ss:$16 sps:$4 sm:$0xff]  }
 0x36d   : > { %v7343_v12 = vpop.f32.mrb[36].mxu1  ;;  %v7303_v57 = vadd.f32 %v7302_v35, %v11814_v52  ;;  %v7304_v14 = vpop.f32.mrb[37].mxu0  ;;  %v10418_v52 = vld [vmem:[%s10737_s25 + $0x14ec] ss:$16 sps:$4 sm:$0xff]  }
 0x36e   : > { %v7345_v15 = vpop.f32.mrb[37].mxu1  ;;  %v7305_v13 = vadd.f32 %v7304_v14, %v11816_v23  ;;  %v7306_v16 = vpop.f32.mrb[38].mxu0  ;;  %7607 = vmatpush1.bf16.msra.mxu0 %v10404_v38  ;;  %v10421_v23 = vld [vmem:[%s10737_s25 + $0x16ec] ss:$16 sps:$4 sm:$0xff]   ;;  %v10479_v14 = vld [vmem:[%s10737_s25 + $0x1a28] ss:$16 sps:$4 sm:$0xff]  }
 0x36f   : > { %v7347_v19 = vpop.f32.mrb[38].mxu1  ;;  %7648 = vmatpush1.bf16.msra.mxu1 %v10407_v6  ;;  %v11890_v43 = vadd.f32 %v7343_v12, %v7303_v57  ;;  %v7307_v22 = vpop.f32.mrb[39].mxu0  ;;  %7608 = vmatprep.subr.bf16.mxu0 %v10412_v10  ;;  %v10472_v38 = vld [vmem:[%s10737_s25 + $0x180c] ss:$16 sps:$4 sm:$0xff]   ;;  %v10470_v10 = vld [vmem:[%s10737_s25 + $0x1808] ss:$16 sps:$4 sm:$0xff]  }
 0x370   : > { %v7348_v60 = vpop.f32.mrb[39].mxu1  ;;  %7649 = vmatprep.subr.bf16.mxu1 %v10415_v11  ;;  %v11894_v61 = vadd.f32 %v7345_v15, %v7305_v13  ;;  %v10475_v6 = vld [vmem:[%s10737_s25 + $0x1a0c] ss:$16 sps:$4 sm:$0xff]   ;;  %v10473_v11 = vld [vmem:[%s10737_s25 + $0x1a08] ss:$16 sps:$4 sm:$0xff]  }
 0x371   : > { %v10478_v35 = vld [vmem:[%s10737_s25 + $0x182c] ss:$16 sps:$4 sm:$0xff]   ;;  %v10476_v57 = vld [vmem:[%s10737_s25 + $0x1828] ss:$16 sps:$4 sm:$0xff]  }
 0x372   : > { %7609 = vmatpush1.bf16.msra.mxu0 %v10410_v20  ;;  %v10481_v12 = vld [vmem:[%s10737_s25 + $0x1a2c] ss:$16 sps:$4 sm:$0xff]   ;;  %v10488_v20 = vld [vmem:[%s10737_s25 + $0x1868] ss:$16 sps:$4 sm:$0xff]  }
 0x373   : > { %7650 = vmatpush1.bf16.msra.mxu1 %v10413_v21  ;;  %7610 = vmatprep.subr.bf16.mxu0 %v10418_v52  ;;  %v10484_v15 = vld [vmem:[%s10737_s25 + $0x184c] ss:$16 sps:$4 sm:$0xff]   ;;  %v10494_v22 = vld [vmem:[%s10737_s25 + $0x1888] ss:$16 sps:$4 sm:$0xff]  }
 0x374   : > { %7651 = vmatprep.subr.bf16.mxu1 %v10421_v23  ;;  %v10487_v13 = vld [vmem:[%s10737_s25 + $0x1a4c] ss:$16 sps:$4 sm:$0xff]   ;;  %v10497_v60 = vld [vmem:[%s10737_s25 + $0x1a88] ss:$16 sps:$4 sm:$0xff]  }
 0x375   : > { %v10490_v16 = vld [vmem:[%s10737_s25 + $0x186c] ss:$16 sps:$4 sm:$0xff]  }
 0x376   : > { %7611 = vmatpush1.bf16.msra.mxu0 %v10416_v30  ;;  %v10493_v19 = vld [vmem:[%s10737_s25 + $0x1a6c] ss:$16 sps:$4 sm:$0xff]   ;;  %v10500_v30 = vld [vmem:[%s10737_s25 + $0x18a8] ss:$16 sps:$4 sm:$0xff]  }
 0x377   : > { %7652 = vmatpush1.bf16.msra.mxu1 %v10419_v63  ;;  %7612 = vmatprep.subr.bf16.mxu0 %v10424_v54  ;;  %v10499_v21 = vld [vmem:[%s10737_s25 + $0x1a8c] ss:$16 sps:$4 sm:$0xff]   ;;  %v10503_v63 = vld [vmem:[%s10737_s25 + $0x1aa8] ss:$16 sps:$4 sm:$0xff]  }
 0x378   : > { %7653 = vmatprep.subr.bf16.mxu1 %v10427_v41  ;;  %v10502_v52 = vld [vmem:[%s10737_s25 + $0x18ac] ss:$16 sps:$4 sm:$0xff]  }
 0x379   : > { %v10505_v23 = vld [vmem:[%s10737_s25 + $0x1aac] ss:$16 sps:$4 sm:$0xff]  }
 0x37a   : > { %7613 = vmatpush1.bf16.msra.mxu0 %v10422_v42  ;;  %v10508_v54 = vld [vmem:[%s10737_s25 + $0x18cc] ss:$16 sps:$4 sm:$0xff]  }
 0x37b   : > { %7654 = vmatpush1.bf16.msra.mxu1 %v10425_v0  ;;  %7614 = vmatprep.subr.bf16.mxu0 %v10430_v32  ;;  %v10511_v41 = vld [vmem:[%s10737_s25 + $0x1acc] ss:$16 sps:$4 sm:$0xff]  }
 0x37c   : > { %7655 = vmatprep.subr.bf16.mxu1 %v10433_v36 }
 0x37e   : > { %7615 = vmatpush1.bf16.msra.mxu0 %v10428_v34 }
 0x37f   : > { %7656 = vmatpush1.bf16.msra.mxu1 %v10431_v55  ;;  %7616 = vmatprep.subr.bf16.mxu0 %v10436_v29 }
 0x380   : > { %7657 = vmatprep.subr.bf16.mxu1 %v10439_v31 }
 0x382   : > { %7617 = vmatpush1.bf16.msra.mxu0 %v10434_v48  ;;  %v10506_v48 = vld [vmem:[%s10737_s25 + $0x18c8] ss:$16 sps:$4 sm:$0xff]  }
 0x383   : > { %7658 = vmatpush1.bf16.msra.mxu1 %v10437_v33  ;;  %7618 = vmatprep.subr.bf16.mxu0 %v10442_v39  ;;  %v10509_v33 = vld [vmem:[%s10737_s25 + $0x1ac8] ss:$16 sps:$4 sm:$0xff]  }
 0x384   : > { %7659 = vmatprep.subr.bf16.mxu1 %v10445_v40 }
 0x386   : > { %7619 = vmatpush1.bf16.msra.mxu0 %v10440_v56 }
 0x387   : > { %7660 = vmatpush1.bf16.msra.mxu1 %v10443_v45  ;;  %7620 = vmatprep.subr.bf16.mxu0 %v10448_v24  ;;  %v10512_v24 = vld [vmem:[%s10737_s25 + $0x18e8] ss:$16 sps:$4 sm:$0xff]  }
 0x388   : > { %7661 = vmatprep.subr.bf16.mxu1 %v10451_v58  ;;  %v10515_v58 = vld [vmem:[%s10737_s25 + $0x1ae8] ss:$16 sps:$4 sm:$0xff]  }
 0x38a   : > { %7621 = vmatpush1.bf16.msra.mxu0 %v10446_v7  ;;  %v10520_v7 = vld [vmem:[%s10737_s25 + $0x190c] ss:$16 sps:$4 sm:$0xff]  }
 0x38b   : > { %7662 = vmatpush1.bf16.msra.mxu1 %v10449_v8  ;;  %7622 = vmatprep.subr.bf16.mxu0 %v10454_v47  ;;  %v10523_v8 = vld [vmem:[%s10737_s25 + $0x1b0c] ss:$16 sps:$4 sm:$0xff]   ;;  %v10518_v47 = vld [vmem:[%s10737_s25 + $0x1908] ss:$16 sps:$4 sm:$0xff]  }
 0x38c   : > { %7663 = vmatprep.subr.bf16.mxu1 %v10457_v49  ;;  %v10521_v49 = vld [vmem:[%s10737_s25 + $0x1b08] ss:$16 sps:$4 sm:$0xff]  }
 0x38e   : > { %7623 = vmatpush1.bf16.msra.mxu0 %v10452_v17  ;;  %v10526_v17 = vld [vmem:[%s10737_s25 + $0x192c] ss:$16 sps:$4 sm:$0xff]  }
 0x38f   : > { %7664 = vmatpush1.bf16.msra.mxu1 %v10455_v18  ;;  %7624 = vmatprep.subr.bf16.mxu0 %v10460_v1  ;;  %v10529_v18 = vld [vmem:[%s10737_s25 + $0x1b2c] ss:$16 sps:$4 sm:$0xff]   ;;  %v10524_v1 = vld [vmem:[%s10737_s25 + $0x1928] ss:$16 sps:$4 sm:$0xff]  }
 0x390   : > { %7665 = vmatprep.subr.bf16.mxu1 %v10463_v59  ;;  %v10527_v59 = vld [vmem:[%s10737_s25 + $0x1b28] ss:$16 sps:$4 sm:$0xff]  }
 0x392   : > { %7625 = vmatpush1.bf16.msra.mxu0 %v10458_v62  ;;  %v10532_v62 = vld [vmem:[%s10737_s25 + $0x194c] ss:$16 sps:$4 sm:$0xff]  }
 0x393   : > { %7666 = vmatpush1.bf16.msra.mxu1 %v10461_v2  ;;  %7626 = vmatprep.subr.bf16.mxu0 %v10466_v5  ;;  %v10535_v2 = vld [vmem:[%s10737_s25 + $0x1b4c] ss:$16 sps:$4 sm:$0xff]   ;;  %v10530_v5 = vld [vmem:[%s10737_s25 + $0x1948] ss:$16 sps:$4 sm:$0xff]  }
 0x394   : > { %7667 = vmatprep.subr.bf16.mxu1 %v10469_v25  ;;  %v10533_v25 = vld [vmem:[%s10737_s25 + $0x1b48] ss:$16 sps:$4 sm:$0xff]  }
 0x396   : > { %7627 = vmatpush1.bf16.msra.mxu0 %v10464_v26  ;;  %v10538_v26 = vld [vmem:[%s10737_s25 + $0x196c] ss:$16 sps:$4 sm:$0xff]  }
 0x397   : > { %7668 = vmatpush1.bf16.msra.mxu1 %v10467_v37  ;;  %7678 = vmatprep.subr.bf16.mxu0 %v10472_v38  ;;  %v10541_v37 = vld [vmem:[%s10737_s25 + $0x1b6c] ss:$16 sps:$4 sm:$0xff]   ;;  %v10536_v38 = vld [vmem:[%s10737_s25 + $0x1968] ss:$16 sps:$4 sm:$0xff]  }
 0x398   : > { %7719 = vmatprep.subr.bf16.mxu1 %v10475_v6  ;;  %v10539_v6 = vld [vmem:[%s10737_s25 + $0x1b68] ss:$16 sps:$4 sm:$0xff]  }
 0x399   : > { %7629 = vmatmul.mubr.bf16.vlgmr.msra.gmra.mrb[52].mxu0 %v11286_v44  ;;  %v10482_v44 = vld [vmem:[%s10737_s25 + $0x1848] ss:$16 sps:$4 sm:$0xff]  }
 0x39a   : > { %7670 = vmatmul.mubr.bf16.vlgmr.msra.gmra.mrb[52].mxu1 %v11290_v46  ;;  %7679 = vmatpush1.bf16.msra.mxu0 %v10470_v10  ;;  %v10485_v46 = vld [vmem:[%s10737_s25 + $0x1a48] ss:$16 sps:$4 sm:$0xff]   ;;  %v10544_v10 = vld [vmem:[%s10737_s25 + $0x198c] ss:$16 sps:$4 sm:$0xff]  }
 0x39b   : > { %7720 = vmatpush1.bf16.msra.mxu1 %v10473_v11  ;;  %7680 = vmatprep.subr.bf16.mxu0 %v10478_v35  ;;  %v10547_v11 = vld [vmem:[%s10737_s25 + $0x1b8c] ss:$16 sps:$4 sm:$0xff]   ;;  %v10542_v35 = vld [vmem:[%s10737_s25 + $0x1988] ss:$16 sps:$4 sm:$0xff]  }
 0x39c   : > { %7721 = vmatprep.subr.bf16.mxu1 %v10481_v12  ;;  %7710 = vmatprep.mubr.bf16.mxu0 %v11302_v50  ;;  %v10491_v50 = vld [vmem:[%s10737_s25 + $0x1a68] ss:$16 sps:$4 sm:$0xff]  }
 0x39d   : > { %7751 = vmatprep.mubr.bf16.mxu1 %v11306_v51  ;;  %v10496_v51 = vld [vmem:[%s10737_s25 + $0x188c] ss:$16 sps:$4 sm:$0xff]   ;;  %v10545_v12 = vld [vmem:[%s10737_s25 + $0x1b88] ss:$16 sps:$4 sm:$0xff]  }
 0x39e   : > { %7681 = vmatpush1.bf16.msra.mxu0 %v10476_v57  ;;  %v10550_v57 = vld [vmem:[%s10737_s25 + $0x19ac] ss:$16 sps:$4 sm:$0xff]  }
 0x39f   : > { %7722 = vmatpush1.bf16.msra.mxu1 %v10479_v14  ;;  %7682 = vmatprep.subr.bf16.mxu0 %v10484_v15  ;;  %v10553_v14 = vld [vmem:[%s10737_s25 + $0x1bac] ss:$16 sps:$4 sm:$0xff]   ;;  %v10548_v15 = vld [vmem:[%s10737_s25 + $0x19a8] ss:$16 sps:$4 sm:$0xff]  }
 0x3a0   : > { %7723 = vmatprep.subr.bf16.mxu1 %v10487_v13  ;;  %v10551_v13 = vld [vmem:[%s10737_s25 + $0x1ba8] ss:$16 sps:$4 sm:$0xff]  }
 0x3a2   : > { %7683 = vmatpush1.bf16.msra.mxu0 %v10482_v44  ;;  %v10556_v44 = vld [vmem:[%s10737_s25 + $0x19cc] ss:$16 sps:$4 sm:$0xff]  }
 0x3a3   : > { %7724 = vmatpush1.bf16.msra.mxu1 %v10485_v46  ;;  %7684 = vmatprep.subr.bf16.mxu0 %v10490_v16  ;;  %v10559_v46 = vld [vmem:[%s10737_s25 + $0x1bcc] ss:$16 sps:$4 sm:$0xff]   ;;  %v10554_v16 = vld [vmem:[%s10737_s25 + $0x19c8] ss:$16 sps:$4 sm:$0xff]  }
 0x3a4   : > { %7725 = vmatprep.subr.bf16.mxu1 %v10493_v19  ;;  %v10557_v19 = vld [vmem:[%s10737_s25 + $0x1bc8] ss:$16 sps:$4 sm:$0xff]  }
 0x3a6   : > { %7685 = vmatpush1.bf16.msra.mxu0 %v10488_v20  ;;  %v10562_v20 = vld [vmem:[%s10737_s25 + $0x19ec] ss:$16 sps:$4 sm:$0xff]  }
 0x3a7   : > { %7726 = vmatpush1.bf16.msra.mxu1 %v10491_v50  ;;  %7686 = vmatprep.subr.bf16.mxu0 %v10496_v51  ;;  %v10565_v50 = vld [vmem:[%s10737_s25 + $0x1bec] ss:$16 sps:$4 sm:$0xff]   ;;  %v10560_v51 = vld [vmem:[%s10737_s25 + $0x19e8] ss:$16 sps:$4 sm:$0xff]  }
 0x3a8   : > { %7727 = vmatprep.subr.bf16.mxu1 %v10499_v21  ;;  %v10563_v21 = vld [vmem:[%s10737_s25 + $0x1be8] ss:$16 sps:$4 sm:$0xff]  }
 0x3aa   : > { %7687 = vmatpush1.bf16.msra.mxu0 %v10494_v22  ;;  %v10568_v22 = vld [vmem:[%s10737_s25 + $0x1c0c] ss:$16 sps:$4 sm:$0xff]  }
 0x3ab   : > { %7728 = vmatpush1.bf16.msra.mxu1 %v10497_v60  ;;  %7688 = vmatprep.subr.bf16.mxu0 %v10502_v52  ;;  %v10571_v60 = vld [vmem:[%s10737_s25 + $0x1e0c] ss:$16 sps:$4 sm:$0xff]   ;;  %v10566_v52 = vld [vmem:[%s10737_s25 + $0x1c08] ss:$16 sps:$4 sm:$0xff]  }
 0x3ac   : > { %7729 = vmatprep.subr.bf16.mxu1 %v10505_v23  ;;  %v7384_v42 = vpop.f32.mrb[40].mxu0  ;;  %v10569_v23 = vld [vmem:[%s10737_s25 + $0x1e08] ss:$16 sps:$4 sm:$0xff]  }
 0x3ad   : > { %v7425_v0 = vpop.f32.mrb[40].mxu1  ;;  %v7385_v32 = vadd.f32 %v7384_v42, %v11890_v43  ;;  %v7386_v36 = vpop.f32.mrb[41].mxu0  ;;  %v10514_v43 = vld [vmem:[%s10737_s25 + $0x18ec] ss:$16 sps:$4 sm:$0xff]  }
 0x3ae   : > { %v7427_v34 = vpop.f32.mrb[41].mxu1  ;;  %v7387_v55 = vadd.f32 %v7386_v36, %v11894_v61  ;;  %v7388_v29 = vpop.f32.mrb[42].mxu0  ;;  %7689 = vmatpush1.bf16.msra.mxu0 %v10500_v30  ;;  %v10517_v61 = vld [vmem:[%s10737_s25 + $0x1aec] ss:$16 sps:$4 sm:$0xff]  }
 0x3af   : > { %v7429_v31 = vpop.f32.mrb[42].mxu1  ;;  %7730 = vmatpush1.bf16.msra.mxu1 %v10503_v63  ;;  %v11964_v39 = vadd.f32 %v7425_v0, %v7385_v32  ;;  %v7389_v40 = vpop.f32.mrb[43].mxu0  ;;  %7690 = vmatprep.subr.bf16.mxu0 %v10508_v54  ;;  %v10574_v30 = vld [vmem:[%s10737_s25 + $0x1c2c] ss:$16 sps:$4 sm:$0xff]   ;;  %v10572_v54 = vld [vmem:[%s10737_s25 + $0x1c28] ss:$16 sps:$4 sm:$0xff]  }
 0x3b0   : > { %v7430_v56 = vpop.f32.mrb[43].mxu1  ;;  %7731 = vmatprep.subr.bf16.mxu1 %v10511_v41  ;;  %v11968_v45 = vadd.f32 %v7427_v34, %v7387_v55  ;;  %v10577_v63 = vld [vmem:[%s10737_s25 + $0x1e2c] ss:$16 sps:$4 sm:$0xff]   ;;  %v10575_v41 = vld [vmem:[%s10737_s25 + $0x1e28] ss:$16 sps:$4 sm:$0xff]  }
 0x3b1   : > { %v10580_v42 = vld [vmem:[%s10737_s25 + $0x1c4c] ss:$16 sps:$4 sm:$0xff]   ;;  %v10584_v34 = vld [vmem:[%s10737_s25 + $0x1c68] ss:$16 sps:$4 sm:$0xff]  }
 0x3b2   : > { %7691 = vmatpush1.bf16.msra.mxu0 %v10506_v48  ;;  %v10583_v0 = vld [vmem:[%s10737_s25 + $0x1e4c] ss:$16 sps:$4 sm:$0xff]   ;;  %v10590_v29 = vld [vmem:[%s10737_s25 + $0x1c88] ss:$16 sps:$4 sm:$0xff]  }
 0x3b3   : > { %7732 = vmatpush1.bf16.msra.mxu1 %v10509_v33  ;;  %7692 = vmatprep.subr.bf16.mxu0 %v10514_v43  ;;  %v10586_v32 = vld [vmem:[%s10737_s25 + $0x1c6c] ss:$16 sps:$4 sm:$0xff]   ;;  %v10593_v31 = vld [vmem:[%s10737_s25 + $0x1e88] ss:$16 sps:$4 sm:$0xff]  }
 0x3b4   : > { %7733 = vmatprep.subr.bf16.mxu1 %v10517_v61  ;;  %v10589_v36 = vld [vmem:[%s10737_s25 + $0x1e6c] ss:$16 sps:$4 sm:$0xff]   ;;  %v10596_v40 = vld [vmem:[%s10737_s25 + $0x1ca8] ss:$16 sps:$4 sm:$0xff]  }
 0x3b5   : > { %v10595_v55 = vld [vmem:[%s10737_s25 + $0x1e8c] ss:$16 sps:$4 sm:$0xff]   ;;  %v10599_v56 = vld [vmem:[%s10737_s25 + $0x1ea8] ss:$16 sps:$4 sm:$0xff]  }
 0x3b6   : > { %7693 = vmatpush1.bf16.msra.mxu0 %v10512_v24  ;;  %v10598_v48 = vld [vmem:[%s10737_s25 + $0x1cac] ss:$16 sps:$4 sm:$0xff]  }
 0x3b7   : > { %7734 = vmatpush1.bf16.msra.mxu1 %v10515_v58  ;;  %7694 = vmatprep.subr.bf16.mxu0 %v10520_v7  ;;  %v10601_v33 = vld [vmem:[%s10737_s25 + $0x1eac] ss:$16 sps:$4 sm:$0xff]  }
 0x3b8   : > { %7735 = vmatprep.subr.bf16.mxu1 %v10523_v8  ;;  %v10604_v43 = vld [vmem:[%s10737_s25 + $0x1ccc] ss:$16 sps:$4 sm:$0xff]  }
 0x3b9   : > { %v10607_v61 = vld [vmem:[%s10737_s25 + $0x1ecc] ss:$16 sps:$4 sm:$0xff]  }
 0x3ba   : > { %7695 = vmatpush1.bf16.msra.mxu0 %v10518_v47 }
 0x3bb   : > { %7736 = vmatpush1.bf16.msra.mxu1 %v10521_v49  ;;  %7696 = vmatprep.subr.bf16.mxu0 %v10526_v17 }
 0x3bc   : > { %7737 = vmatprep.subr.bf16.mxu1 %v10529_v18 }
 0x3be   : > { %7697 = vmatpush1.bf16.msra.mxu0 %v10524_v1  ;;  %v10602_v1 = vld [vmem:[%s10737_s25 + $0x1cc8] ss:$16 sps:$4 sm:$0xff]  }
 0x3bf   : > { %7738 = vmatpush1.bf16.msra.mxu1 %v10527_v59  ;;  %7698 = vmatprep.subr.bf16.mxu0 %v10532_v62  ;;  %v10605_v59 = vld [vmem:[%s10737_s25 + $0x1ec8] ss:$16 sps:$4 sm:$0xff]  }
 0x3c0   : > { %7739 = vmatprep.subr.bf16.mxu1 %v10535_v2 }
 0x3c2   : > { %7699 = vmatpush1.bf16.msra.mxu0 %v10530_v5 }
 0x3c3   : > { %7740 = vmatpush1.bf16.msra.mxu1 %v10533_v25  ;;  %7700 = vmatprep.subr.bf16.mxu0 %v10538_v26  ;;  %v10608_v26 = vld [vmem:[%s10737_s25 + $0x1ce8] ss:$16 sps:$4 sm:$0xff]  }
 0x3c4   : > { %7741 = vmatprep.subr.bf16.mxu1 %v10541_v37  ;;  %v10611_v37 = vld [vmem:[%s10737_s25 + $0x1ee8] ss:$16 sps:$4 sm:$0xff]  }
 0x3c6   : > { %7701 = vmatpush1.bf16.msra.mxu0 %v10536_v38  ;;  %v10616_v38 = vld [vmem:[%s10737_s25 + $0x1d0c] ss:$16 sps:$4 sm:$0xff]  }
 0x3c7   : > { %7742 = vmatpush1.bf16.msra.mxu1 %v10539_v6  ;;  %7702 = vmatprep.subr.bf16.mxu0 %v10544_v10  ;;  %v10619_v6 = vld [vmem:[%s10737_s25 + $0x1f0c] ss:$16 sps:$4 sm:$0xff]   ;;  %v10614_v10 = vld [vmem:[%s10737_s25 + $0x1d08] ss:$16 sps:$4 sm:$0xff]  }
 0x3c8   : > { %7743 = vmatprep.subr.bf16.mxu1 %v10547_v11  ;;  %v10617_v11 = vld [vmem:[%s10737_s25 + $0x1f08] ss:$16 sps:$4 sm:$0xff]  }
 0x3ca   : > { %7703 = vmatpush1.bf16.msra.mxu0 %v10542_v35  ;;  %v10622_v35 = vld [vmem:[%s10737_s25 + $0x1d2c] ss:$16 sps:$4 sm:$0xff]  }
 0x3cb   : > { %7744 = vmatpush1.bf16.msra.mxu1 %v10545_v12  ;;  %7704 = vmatprep.subr.bf16.mxu0 %v10550_v57  ;;  %v10625_v12 = vld [vmem:[%s10737_s25 + $0x1f2c] ss:$16 sps:$4 sm:$0xff]   ;;  %v10620_v57 = vld [vmem:[%s10737_s25 + $0x1d28] ss:$16 sps:$4 sm:$0xff]  }
 0x3cc   : > { %7745 = vmatprep.subr.bf16.mxu1 %v10553_v14  ;;  %v10623_v14 = vld [vmem:[%s10737_s25 + $0x1f28] ss:$16 sps:$4 sm:$0xff]  }
 0x3ce   : > { %7705 = vmatpush1.bf16.msra.mxu0 %v10548_v15  ;;  %v10628_v15 = vld [vmem:[%s10737_s25 + $0x1d4c] ss:$16 sps:$4 sm:$0xff]  }
 0x3cf   : > { %7746 = vmatpush1.bf16.msra.mxu1 %v10551_v13  ;;  %7706 = vmatprep.subr.bf16.mxu0 %v10556_v44  ;;  %v10631_v13 = vld [vmem:[%s10737_s25 + $0x1f4c] ss:$16 sps:$4 sm:$0xff]   ;;  %v10626_v44 = vld [vmem:[%s10737_s25 + $0x1d48] ss:$16 sps:$4 sm:$0xff]  }
 0x3d0   : > { %7747 = vmatprep.subr.bf16.mxu1 %v10559_v46  ;;  %v10629_v46 = vld [vmem:[%s10737_s25 + $0x1f48] ss:$16 sps:$4 sm:$0xff]  }
 0x3d2   : > { %7707 = vmatpush1.bf16.msra.mxu0 %v10554_v16  ;;  %v10634_v16 = vld [vmem:[%s10737_s25 + $0x1d6c] ss:$16 sps:$4 sm:$0xff]  }
 0x3d3   : > { %7748 = vmatpush1.bf16.msra.mxu1 %v10557_v19  ;;  %7708 = vmatprep.subr.bf16.mxu0 %v10562_v20  ;;  %v10637_v19 = vld [vmem:[%s10737_s25 + $0x1f6c] ss:$16 sps:$4 sm:$0xff]   ;;  %v10632_v20 = vld [vmem:[%s10737_s25 + $0x1d68] ss:$16 sps:$4 sm:$0xff]  }
 0x3d4   : > { %7749 = vmatprep.subr.bf16.mxu1 %v10565_v50  ;;  %v10635_v50 = vld [vmem:[%s10737_s25 + $0x1f68] ss:$16 sps:$4 sm:$0xff]  }
 0x3d6   : > { %7709 = vmatpush1.bf16.msra.mxu0 %v10560_v51  ;;  %v10640_v51 = vld [vmem:[%s10737_s25 + $0x1d8c] ss:$16 sps:$4 sm:$0xff]  }
 0x3d7   : > { %7750 = vmatpush1.bf16.msra.mxu1 %v10563_v21  ;;  %7760 = vmatprep.subr.bf16.mxu0 %v10568_v22  ;;  %v10643_v21 = vld [vmem:[%s10737_s25 + $0x1f8c] ss:$16 sps:$4 sm:$0xff]   ;;  %v10638_v22 = vld [vmem:[%s10737_s25 + $0x1d88] ss:$16 sps:$4 sm:$0xff]  }
 0x3d8   : > { %7801 = vmatprep.subr.bf16.mxu1 %v10571_v60  ;;  %v10641_v60 = vld [vmem:[%s10737_s25 + $0x1f88] ss:$16 sps:$4 sm:$0xff]  }
 0x3d9   : > { %7711 = vmatmul.mubr.bf16.vlgmr.msra.gmra.mrb[56].mxu0 %v11388_v3  ;;  %v10578_v3 = vld [vmem:[%s10737_s25 + $0x1c48] ss:$16 sps:$4 sm:$0xff]  }
 0x3da   : > { %7752 = vmatmul.mubr.bf16.vlgmr.msra.gmra.mrb[56].mxu1 %v11392_v4  ;;  %7761 = vmatpush1.bf16.msra.mxu0 %v10566_v52  ;;  %v10581_v4 = vld [vmem:[%s10737_s25 + $0x1e48] ss:$16 sps:$4 sm:$0xff]   ;;  %v10646_v52 = vld [vmem:[%s10737_s25 + $0x1dac] ss:$16 sps:$4 sm:$0xff]  }
 0x3db   : > { %7802 = vmatpush1.bf16.msra.mxu1 %v10569_v23  ;;  %7762 = vmatprep.subr.bf16.mxu0 %v10574_v30  ;;  %v10649_v23 = vld [vmem:[%s10737_s25 + $0x1fac] ss:$16 sps:$4 sm:$0xff]   ;;  %v10644_v30 = vld [vmem:[%s10737_s25 + $0x1da8] ss:$16 sps:$4 sm:$0xff]  }
 0x3dc   : > { %7803 = vmatprep.subr.bf16.mxu1 %v10577_v63  ;;  %7792 = vmatprep.mubr.bf16.mxu0 %v11398_v9  ;;  %v10587_v9 = vld [vmem:[%s10737_s25 + $0x1e68] ss:$16 sps:$4 sm:$0xff]  }
 0x3dd   : > { %7833 = vmatprep.mubr.bf16.mxu1 %v11402_v53  ;;  %v10592_v53 = vld [vmem:[%s10737_s25 + $0x1c8c] ss:$16 sps:$4 sm:$0xff]   ;;  %v10647_v63 = vld [vmem:[%s10737_s25 + $0x1fa8] ss:$16 sps:$4 sm:$0xff]  }
 0x3de   : > { %7763 = vmatpush1.bf16.msra.mxu0 %v10572_v54  ;;  %v10652_v54 = vld [vmem:[%s10737_s25 + $0x1dcc] ss:$16 sps:$4 sm:$0xff]  }
 0x3df   : > { %7804 = vmatpush1.bf16.msra.mxu1 %v10575_v41  ;;  %7764 = vmatprep.subr.bf16.mxu0 %v10580_v42  ;;  %v10655_v41 = vld [vmem:[%s10737_s25 + $0x1fcc] ss:$16 sps:$4 sm:$0xff]   ;;  %v10650_v42 = vld [vmem:[%s10737_s25 + $0x1dc8] ss:$16 sps:$4 sm:$0xff]  }
 0x3e0   : > { %7805 = vmatprep.subr.bf16.mxu1 %v10583_v0  ;;  %v10653_v0 = vld [vmem:[%s10737_s25 + $0x1fc8] ss:$16 sps:$4 sm:$0xff]  }
 0x3e2   : > { %7765 = vmatpush1.bf16.msra.mxu0 %v10578_v3  ;;  %v10658_v3 = vld [vmem:[%s10737_s25 + $0x1dec] ss:$16 sps:$4 sm:$0xff]  }
 0x3e3   : > { %7806 = vmatpush1.bf16.msra.mxu1 %v10581_v4  ;;  %7766 = vmatprep.subr.bf16.mxu0 %v10586_v32  ;;  %v10661_v4 = vld [vmem:[%s10737_s25 + $0x1fec] ss:$16 sps:$4 sm:$0xff]   ;;  %v10656_v32 = vld [vmem:[%s10737_s25 + $0x1de8] ss:$16 sps:$4 sm:$0xff]  }
 0x3e4   : > { %7807 = vmatprep.subr.bf16.mxu1 %v10589_v36  ;;  %v10659_v36 = vld [vmem:[%s10737_s25 + $0x1fe8] ss:$16 sps:$4 sm:$0xff]  }
 0x3e6   : > { %7767 = vmatpush1.bf16.msra.mxu0 %v10584_v34 }
 0x3e7   : > { %7808 = vmatpush1.bf16.msra.mxu1 %v10587_v9  ;;  %7768 = vmatprep.subr.bf16.mxu0 %v10592_v53 }
 0x3e8   : > { %7809 = vmatprep.subr.bf16.mxu1 %v10595_v55 }
 0x3ea   : > { %7769 = vmatpush1.bf16.msra.mxu0 %v10590_v29 }
 0x3eb   : > { %7810 = vmatpush1.bf16.msra.mxu1 %v10593_v31  ;;  %7770 = vmatprep.subr.bf16.mxu0 %v10598_v48 }
 0x3ec   : > { %7811 = vmatprep.subr.bf16.mxu1 %v10601_v33  ;;  %v7466_v24 = vpop.f32.mrb[44].mxu0 }
 0x3ed   : > { %v7507_v58 = vpop.f32.mrb[44].mxu1  ;;  %v7467_v7 = vadd.f32 %v7466_v24, %v11964_v39  ;;  %v7468_v8 = vpop.f32.mrb[45].mxu0  ;;  %v10610_v39 = vld [vmem:[%s10737_s25 + $0x1cec] ss:$16 sps:$4 sm:$0xff]  }
 0x3ee   : > { %v7509_v47 = vpop.f32.mrb[45].mxu1  ;;  %v7469_v49 = vadd.f32 %v7468_v8, %v11968_v45  ;;  %v7470_v17 = vpop.f32.mrb[46].mxu0  ;;  %7771 = vmatpush1.bf16.msra.mxu0 %v10596_v40  ;;  %v10613_v45 = vld [vmem:[%s10737_s25 + $0x1eec] ss:$16 sps:$4 sm:$0xff]  }
 0x3ef   : > { %v7511_v18 = vpop.f32.mrb[46].mxu1  ;;  %7812 = vmatpush1.bf16.msra.mxu1 %v10599_v56  ;;  %v12038_v62 = vadd.f32 %v7507_v58, %v7467_v7  ;;  %v7471_v2 = vpop.f32.mrb[47].mxu0  ;;  %7772 = vmatprep.subr.bf16.mxu0 %v10604_v43 }
 0x3f0   : > { %v7512_v5 = vpop.f32.mrb[47].mxu1  ;;  %7813 = vmatprep.subr.bf16.mxu1 %v10607_v61  ;;  %v12042_v25 = vadd.f32 %v7509_v47, %v7469_v49 }
 0x3f2   : > { %7773 = vmatpush1.bf16.msra.mxu0 %v10602_v1 }
 0x3f3   : > { %7814 = vmatpush1.bf16.msra.mxu1 %v10605_v59  ;;  %7774 = vmatprep.subr.bf16.mxu0 %v10610_v39 }
 0x3f4   : > { %7815 = vmatprep.subr.bf16.mxu1 %v10613_v45 }
 0x3f6   : > { %7775 = vmatpush1.bf16.msra.mxu0 %v10608_v26 }
 0x3f7   : > { %7816 = vmatpush1.bf16.msra.mxu1 %v10611_v37  ;;  %7776 = vmatprep.subr.bf16.mxu0 %v10616_v38 }
 0x3f8   : > { %7817 = vmatprep.subr.bf16.mxu1 %v10619_v6 }
 0x3fa   : > { %7777 = vmatpush1.bf16.msra.mxu0 %v10614_v10 }
 0x3fb   : > { %7818 = vmatpush1.bf16.msra.mxu1 %v10617_v11  ;;  %7778 = vmatprep.subr.bf16.mxu0 %v10622_v35 }
 0x3fc   : > { %7819 = vmatprep.subr.bf16.mxu1 %v10625_v12 }
 0x3fe   : > { %7779 = vmatpush1.bf16.msra.mxu0 %v10620_v57 }
 0x3ff   : > { %7820 = vmatpush1.bf16.msra.mxu1 %v10623_v14  ;;  %7780 = vmatprep.subr.bf16.mxu0 %v10628_v15 }
 0x400   : > { %7821 = vmatprep.subr.bf16.mxu1 %v10631_v13  ;;  %v256_v13 = vld [vmem:[%s12134_s3 + $0x10] sm:$0xff] }
 0x402   : > { %7781 = vmatpush1.bf16.msra.mxu0 %v10626_v44 }
 0x403   : > { %7822 = vmatpush1.bf16.msra.mxu1 %v10629_v46  ;;  %7782 = vmatprep.subr.bf16.mxu0 %v10634_v16 }
 0x404   : > { %7823 = vmatprep.subr.bf16.mxu1 %v10637_v19 }
 0x406   : > { %7783 = vmatpush1.bf16.msra.mxu0 %v10632_v20  ;;  %v257_v20 = vld [vmem:[%s12134_s3 + $0x18] sm:$0xff] }
 0x407   : > { %7824 = vmatpush1.bf16.msra.mxu1 %v10635_v50  ;;  %7784 = vmatprep.subr.bf16.mxu0 %v10640_v51 }
 0x408   : > { %7825 = vmatprep.subr.bf16.mxu1 %v10643_v21 }
 0x40a   : > { %7785 = vmatpush1.bf16.msra.mxu0 %v10638_v22 }
 0x40b   : > { %7826 = vmatpush1.bf16.msra.mxu1 %v10641_v60  ;;  %7786 = vmatprep.subr.bf16.mxu0 %v10646_v52  ;;  %v7854_v52 = vld [vmem:[%s12134_s3] sm:$0xff] (!%p9063_p7) }
 0x40c   : > { %7827 = vmatprep.subr.bf16.mxu1 %v10649_v23  ;;  %v7864_v23 = vlaneseq (!%p9063_p7) }
 0x40e   : > { %7787 = vmatpush1.bf16.msra.mxu0 %v10644_v30  ;;  %v7855_v30 = vld [vmem:[%s12134_s3 + $0x8] sm:$0xff] (!%p9063_p7) }
 0x40f   : > { %7828 = vmatpush1.bf16.msra.mxu1 %v10647_v63  ;;  %7788 = vmatprep.subr.bf16.mxu0 %v10652_v54 }
 0x410   : > { %7829 = vmatprep.subr.bf16.mxu1 %v10655_v41  ;;  %v7865_v41 = vshrl.u32 (!%p9063_p7), %v7864_v23, 7 }
 0x412   : > { %7789 = vmatpush1.bf16.msra.mxu0 %v10650_v42  ;;  %v7858_v42 = vmul.f32 (!%p9063_p7), 0.015625, %v7854_v52 }
 0x413   : > { %7830 = vmatpush1.bf16.msra.mxu1 %v10653_v0  ;;  %7790 = vmatprep.subr.bf16.mxu0 %v10658_v3  ;;  %v7862_v0 = vld [vmem:[%s12133_s2] sm:$0xf] (!%p9063_p7)  ;;  %v7859_v3 = vmul.f32 (!%p9063_p7), 0.015625, %v7855_v30 }
 0x414   : > { %7831 = vmatprep.subr.bf16.mxu1 %v10661_v4 }
 0x416   : > { %7791 = vmatpush1.bf16.msra.mxu0 %v10656_v32 }
 0x417   : > { %7832 = vmatpush1.bf16.msra.mxu1 %v10659_v36  ;;  %v7866_v36 = vsub.s32 (!%p9063_p7), 0, %v7865_v41 }
 0x419   : > { %7793 = vmatmul.mubr.bf16.vlgmr.msra.gmra.mrb[60].mxu0 %v11478_v27 }
 0x41a   : > { %7834 = vmatmul.mubr.bf16.vlgmr.msra.gmra.mrb[60].mxu1 %v11482_v28 }
 0x42c   : > { %v7548_v34 = vpop.f32.mrb[48].mxu0 }
 0x42d   : > { %v7589_v9 = vpop.f32.mrb[48].mxu1  ;;  %v7549_v53 = vadd.f32 %v7548_v34, %v12038_v62  ;;  %v7550_v55 = vpop.f32.mrb[49].mxu0  ;;  %v7870_v34 = vsub.s32 (!%p9063_p7), 1, %v7865_v41 }
 0x42e   : > { %v7591_v29 = vpop.f32.mrb[49].mxu1  ;;  %v7551_v31 = vadd.f32 %v7550_v55, %v12042_v25  ;;  %v7552_v48 = vpop.f32.mrb[50].mxu0  ;;  %v7867_v55 = vrot.slane (!%p9063_p7), %v7862_v0, %v7866_v36 }
 0x42f   : > { %v7593_v33 = vpop.f32.mrb[50].mxu1  ;;  %v7590_v40 = vadd.f32 %v7589_v9, %v7549_v53  ;;  %v7553_v56 = vpop.f32.mrb[51].mxu0  ;;  %v7874_v9 = vsub.s32 (!%p9063_p7), 2, %v7865_v41  ;;  %v7878_v53 = vsub.s32 (!%p9063_p7), 3, %v7865_v41 }
 0x430   : > { %v7594_v43 = vpop.f32.mrb[51].mxu1  ;;  %v7592_v61 = vadd.f32 %v7591_v29, %v7551_v31  ;;  %v7871_v29 = vrot.slane (!%p9063_p7), %v7862_v0, %v7870_v34  ;;  %v7884_v33 = vadd.f32 (!%p9063_p7), %v7867_v55, %v7858_v42 }
 0x431   : > { %v7875_v31 = vrot.slane (!%p9063_p7), %v7862_v0, %v7874_v9  ;;  %v7879_v48 = vrot.slane (!%p9063_p7), %v7862_v0, %v7878_v53 }
 0x432   : > { %vm7888_vm0 = vcmp.ge.f32.partialorder (!%p9063_p7), %v7884_v33, 0.0 }
 0x46c   : > { %v7630_v24 = vpop.f32.mrb[52].mxu0 }
 0x46d   : > { %v7671_v58 = vpop.f32.mrb[52].mxu1  ;;  %v7631_v7 = vadd.f32 %v7630_v24, %v7590_v40  ;;  %v7632_v27 = vpop.f32.mrb[53].mxu0  ;;  %v7885_v40 = vadd.f32 (!%p9063_p7), %v7871_v29, %v7859_v3 }
 0x46e   : > { %v7673_v8 = vpop.f32.mrb[53].mxu1  ;;  %v7633_v28 = vadd.f32 %v7632_v27, %v7592_v61  ;;  %v7634_v47 = vpop.f32.mrb[54].mxu0  ;;  %v7892_v61 = vmul.f32 (!%p9063_p7), 0.2, %v7884_v33 }
 0x46f   : > { %v7675_v49 = vpop.f32.mrb[54].mxu1  ;;  %v7672_v17 = vadd.f32 %v7671_v58, %v7631_v7  ;;  %v7635_v18 = vpop.f32.mrb[55].mxu0  ;;  %vm7889_vm1 = vcmp.ge.f32.partialorder (!%p9063_p7), %v7885_v40, 0.0  ;;  %v7893_v24 = vmul.f32 (!%p9063_p7), 0.2, %v7885_v40 }
 0x470   : > { %v7676_v1 = vpop.f32.mrb[55].mxu1  ;;  %v7674_v59 = vadd.f32 %v7673_v8, %v7633_v28  ;;  %v7896_v27 = vsel (!%p9063_p7), %vm7888_vm0, %v7884_v33, %v7892_v61 }
 0x471   : > { %v7897_v8 = vsel (!%p9063_p7), %vm7889_vm1, %v7885_v40, %v7893_v24  ;;  %7900 = vst [vmem:[%s12134_s3] sm:$0xff] (!%p9063_p7), %v7896_v27 }
 0x472   : > { %7901 = vst [vmem:[%s12134_s3 + $0x8] sm:$0xff] (!%p9063_p7), %v7897_v8 }
 0x4ac   : > { %v7712_v62 = vpop.f32.mrb[56].mxu0 }
 0x4ad   : > { %v7753_v2 = vpop.f32.mrb[56].mxu1  ;;  %v7713_v5 = vadd.f32 %v7712_v62, %v7672_v17  ;;  %v7714_v39 = vpop.f32.mrb[57].mxu0 }
 0x4ae   : > { %v7755_v45 = vpop.f32.mrb[57].mxu1  ;;  %v7715_v25 = vadd.f32 %v7714_v39, %v7674_v59  ;;  %v7716_v26 = vpop.f32.mrb[58].mxu0 }
 0x4af   : > { %v7757_v37 = vpop.f32.mrb[58].mxu1  ;;  %v7754_v38 = vadd.f32 %v7753_v2, %v7713_v5  ;;  %v7717_v6 = vpop.f32.mrb[59].mxu0 }
 0x4b0   : > { %v7758_v10 = vpop.f32.mrb[59].mxu1  ;;  %v7756_v11 = vadd.f32 %v7755_v45, %v7715_v25 }
 0x4ec   : > { %v7794_v35 = vpop.f32.mrb[60].mxu0 }
 0x4ed   : > { %v7835_v12 = vpop.f32.mrb[60].mxu1  ;;  %v7795_v57 = vadd.f32 %v7794_v35, %v7754_v38  ;;  %v7796_v14 = vpop.f32.mrb[61].mxu0 }
 0x4ee   : > { %v7837_v15 = vpop.f32.mrb[61].mxu1  ;;  %v7797_v44 = vadd.f32 %v7796_v14, %v7756_v11  ;;  %v7798_v46 = vpop.f32.mrb[62].mxu0  ;;  %7853 = sbr.rel (%p9063_p7) target bundleno = 1284 (0x504), region = 40 }
 0x4ef   : > { %v7839_v16 = vpop.f32.mrb[62].mxu1  ;;  %v7836_v19 = vadd.f32 %v7835_v12, %v7795_v57  ;;  %v7799_v50 = vpop.f32.mrb[63].mxu0 }
 0x4f0   : > { %v7840_v51 = vpop.f32.mrb[63].mxu1  ;;  %v7838_v21 = vadd.f32 %v7837_v15, %v7797_v44 }
 0x4f1   : > { %v7844_v22 = vadd.f32 %v7836_v19, %v256_v13 }
 0x4f2   : > { %v7845_v60 = vadd.f32 %v7838_v21, %v257_v20 }
 0x4f3   : > { %7848 = vst [vmem:[%s12134_s3 + $0x10] sm:$0xff] %v7844_v22 }
 0x4f4   : > { %7849 = vst [vmem:[%s12134_s3 + $0x18] sm:$0xff] %v7845_v60 }
 0x4fa   : > { %v7856_v63 = vld [vmem:[%s12134_s3 + $0x10] sm:$0xff] }
 0x4fb   : > { %v7857_v54 = vld [vmem:[%s12134_s3 + $0x18] sm:$0xff]  ;;  %v7860_v4 = vmul.f32 0.015625, %v7856_v63 }
 0x4fc   : > { %v7861_v32 = vmul.f32 0.015625, %v7857_v54 }
 0x4fd   : > { %v7886_v56 = vadd.f32 %v7875_v31, %v7860_v4 }
 0x4fe   : > { %v7887_v43 = vadd.f32 %v7879_v48, %v7861_v32 }
 0x4ff   : > { %vm7890_vm2 = vcmp.ge.f32.partialorder %v7886_v56, 0.0  ;;  %v7894_v58 = vmul.f32 0.2, %v7886_v56 }
 0x500   : > { %vm7891_vm3 = vcmp.ge.f32.partialorder %v7887_v43, 0.0  ;;  %v7895_v7 = vmul.f32 0.2, %v7887_v43 }
 0x501   : > { %v7898_v28 = vsel %vm7890_vm2, %v7886_v56, %v7894_v58 }
 0x502   : > { %v7899_v47 = vsel %vm7891_vm3, %v7887_v43, %v7895_v7  ;;  %7902 = vst [vmem:[%s12134_s3 + $0x10] sm:$0xff] %v7898_v28 }
 0x503   : > { %7903 = vst [vmem:[%s12134_s3 + $0x18] sm:$0xff] %v7899_v47 }
 0x504 PF: > { %s13_s14 = sadd.s32 1, %s10684_s14   ;;  %s12135_s12 = smov %s10680_s13 }
 0x505   : > { %p10_p8 = scmp.ge.s32.totalorder %s13_s14, 4   ;;  %s12136_s13 = smov %s12138_s15 }
 0x507   :  { %12 = sbr.rel (!%p10_p8) target bundleno = 2 (0x2), region = 76 }

</bundles_post_ra>
